<compile_context>
chip_gen: v7x
topology: tpu7x:2x2x1
jax: 0.10.0
libtpu: 0.0.40
codegen_flags: <defaults>
</compile_context>

<pallas_src>
import functools

import jax
import jax.numpy as jnp
from jax import lax
from jax.experimental import pallas as pl
from jax.experimental.pallas import tpu as pltpu

_NEG_BIG = -1e30                       # f32 additive mask value (stays f32)
_VMEM_LIMIT = 32 * 1024 * 1024         # safe on v5e/v6e/v7x, above v5e default


def _round_up(x, m):
    return (x + m - 1) // m * m


def _pick_tile(n, candidates):
    for c in candidates:
        if n >= c and n % c == 0:
            return c
    return n


def _block_rows(a):
    """[H, D] -> [H, H*D]; row h holds a[h] in cols h*D:(h+1)*D, 0 elsewhere."""
    H, D = a.shape
    return (jnp.eye(H, dtype=a.dtype)[:, :, None] * a[:, None, :]).reshape(H, H * D)


# --------------------------------------------------------------------------
# Kernel 1: layer-1 projection.  One MXU matmul for all heads, then emit the
# head-leading [H, N, D] feature layout plus the per-node attention scalars.
# --------------------------------------------------------------------------
def _gat_project_kernel(x_ref, w_ref, adst_ref, asrc_blk_ref,
                        feat_ref, adst_out_ref, asrc_out_ref,
                        *, heads, d_out, mm_dtype):
    # [Tn, Fin] @ [Fin, H*D] -> [Tn, H*D], f32 accumulation.
    xw = jnp.dot(x_ref[...], w_ref[...], preferred_element_type=jnp.float32)
    xw_b = xw.astype(mm_dtype)
    # Per-head layout conversion (only place with D-wide lane slices: O(N) work,
    # done once per node tile, so the N^2 attention path never lane-slices).
    for h in range(heads):
        f_h = xw[:, h * d_out:(h + 1) * d_out]                  # [Tn, D] f32
        feat_ref[h] = f_h.astype(feat_ref.dtype)                # [Tn, D]
        # dst scalar kept sublane-major [Tn, 1] (broadcasts over src lanes later).
        adst_out_ref[h] = jnp.sum(f_h * adst_ref[h], axis=-1, keepdims=True)
    # src scalars lane-major [H, Tn] via one block-structured MXU matmul.
    asrc_out_ref[...] = lax.dot_general(
        asrc_blk_ref[...], xw_b, (((1,), (1,)), ((), ())),
        preferred_element_type=jnp.float32)


# --------------------------------------------------------------------------
# Shared flash-style masked-softmax attention step over one (dst, src) tile.
# --------------------------------------------------------------------------
def _flash_gat_step(adst_ref, asrc_ref, adj_ref, feat_ref, m_sc, l_sc, acc_sc):
    @pl.when(pl.program_id(1) == 0)
    def _():
        m_sc[...] = jnp.full_like(m_sc, _NEG_BIG)
        l_sc[...] = jnp.zeros_like(l_sc)
        acc_sc[...] = jnp.zeros_like(acc_sc)

    a_dst = adst_ref[...]                                   # [H, Td, 1] f32
    a_src = asrc_ref[...]                                   # [H, Ts]    f32
    s = a_dst + a_src[:, None, :]                           # [H, Td, Ts]
    s = jnp.where(s > 0, s, 0.2 * s)                        # LeakyReLU(0.2)
    adj = adj_ref[...]                                      # [Td, Ts] bf16 0/1
    s = jnp.where(adj[None, :, :] > 0, s, _NEG_BIG)         # mask, no bias tensor

    m_prev = m_sc[...]
    m_new = jnp.maximum(m_prev, jnp.max(s, axis=-1, keepdims=True))
    scale = jnp.exp(m_prev - m_new)                         # [H, Td, 1]
    p = jnp.exp(s - m_new)                                  # masked -> exactly 0
    l_sc[...] = scale * l_sc[...] + jnp.sum(p, axis=-1, keepdims=True)
    acc_sc[...] = scale * acc_sc[...] + jnp.einsum(
        'hqk,hkd->hqd', p.astype(feat_ref.dtype), feat_ref[...],
        preferred_element_type=jnp.float32)
    m_sc[...] = m_new


# --------------------------------------------------------------------------
# Kernel 2: layer-1 attention + bias + ELU, with the layer-2 projection and
# layer-2 attention scalars fused into the finalize (concat never exists).
# --------------------------------------------------------------------------
def _gat_attn_layer1_kernel(adst_ref, asrc_ref, adj_ref, feat_ref,
                            b1_ref, w2_ref, adst2_ref, asrc2_ref,
                            feat2_ref, adst2_out_ref, asrc2_out_ref,
                            m_sc, l_sc, acc_sc, *, heads, mm_dtype):
    _flash_gat_step(adst_ref, asrc_ref, adj_ref, feat_ref, m_sc, l_sc, acc_sc)

    @pl.when(pl.program_id(1) == pl.num_programs(1) - 1)
    def _():
        # x1 = ELU(attn @ feat1 + b1), per head.
        x1 = acc_sc[...] * pl.reciprocal(l_sc[...], approx=True) + b1_ref[...]
        x1 = jnp.where(x1 > 0, x1, jnp.exp(jnp.minimum(x1, 0.0)) - 1.0)  # ELU
        x1_b = x1.astype(mm_dtype)                              # [H, Td, D]
        td = x1.shape[1]
        d2 = w2_ref.shape[-1]
        # Layer-2 projection with concat fused: feat2 = sum_h x1[h] @ W2[h].
        feat2 = jnp.zeros((td, d2), jnp.float32)
        for h in range(heads):                                  # tiny static loop
            feat2 = feat2 + jnp.dot(x1_b[h], w2_ref[h],
                                    preferred_element_type=jnp.float32)
        feat2_ref[...] = feat2[None].astype(feat2_ref.dtype)    # [1, Td, D2]
        # Layer-2 attention scalars for these nodes.
        adst2_out_ref[...] = jnp.sum(
            feat2 * adst2_ref[...], axis=-1, keepdims=True)[None]       # [1, Td, 1]
        asrc2_out_ref[...] = lax.dot_general(                            # [1, Td]
            asrc2_ref[...].astype(mm_dtype), feat2.astype(mm_dtype),
            (((1,), (1,)), ((), ())), preferred_element_type=jnp.float32)


# --------------------------------------------------------------------------
# Kernel 3: layer-2 attention (single head, concat=False) + bias.
# --------------------------------------------------------------------------
def _gat_attn_layer2_kernel(adst_ref, asrc_ref, adj_ref, feat_ref, b2_ref,
                            out_ref, m_sc, l_sc, acc_sc):
    _flash_gat_step(adst_ref, asrc_ref, adj_ref, feat_ref, m_sc, l_sc, acc_sc)

    @pl.when(pl.program_id(1) == pl.num_programs(1) - 1)
    def _():
        out = acc_sc[...] * pl.reciprocal(l_sc[...], approx=True) + b2_ref[...]
        out_ref[...] = out.astype(out_ref.dtype)


# --------------------------------------------------------------------------
# Wrapper: GATNET.forward(x, edge_index) in eval mode (dropout = identity).
# --------------------------------------------------------------------------
def gatnet_forward(params, x, edge_index, *, mm_dtype=jnp.bfloat16):
    N, Fin = x.shape
    H, _, D = params["w1"].shape
    D2 = params["w2"].shape[-1]

    # Dense 0/1 adjacency mask [dst, src] with self-loops (PyG default).
    src, dst = edge_index[0], edge_index[1]
    adj = jnp.zeros((N, N), jnp.float32).at[dst, src].set(1.0)
    adj = jnp.maximum(adj, jnp.eye(N, dtype=jnp.float32))

    # Pad node count to a multiple of 128 (padded rows/cols are all-masked and
    # sliced off at the end; they stay finite and cannot leak into real rows).
    Np = _round_up(max(N, 128), 128)
    adj_p = jnp.pad(adj, ((0, Np - N), (0, Np - N))).astype(jnp.bfloat16)
    x_p = jnp.pad(x, ((0, Np - N), (0, 0))).astype(mm_dtype)

    # Kernel-friendly parameter layouts (tiny reshapes, outside the kernels).
    w1_all = jnp.transpose(params["w1"], (1, 0, 2)).reshape(Fin, H * D)
    w1_all = w1_all.astype(mm_dtype)
    adst1_vec = params["a_dst1"]                                  # [H, 1, D] f32
    asrc1_blk = _block_rows(params["a_src1"][:, 0, :]).astype(mm_dtype)  # [H, H*D]
    b1 = params["b1"].reshape(H, 1, D)                            # f32
    w2_split = params["w2"][0].reshape(H, D, D2).astype(mm_dtype) # [H, D, D2]
    adst2_vec = params["a_dst2"][0]                               # [1, D2] f32
    asrc2_vec = params["a_src2"][0]                               # [1, D2] f32
    b2 = params["b2"].reshape(1, 1, D2)                           # f32

    # Tile sizes (Np is always a multiple of 128).
    tn = _pick_tile(Np, (512, 256, 128))      # projection row tile
    td = _pick_tile(Np, (256, 128))           # dst-row tile (parallel axis)
    ts = _pick_tile(Np, (512, 256, 128))      # src-col tile (reduction axis)

    # ---- layer-1 projection: feat1 [H,Np,D], alpha_dst1, alpha_src1 --------
    feat1, adst1, asrc1 = pl.pallas_call(
        functools.partial(_gat_project_kernel, heads=H, d_out=D,
                          mm_dtype=mm_dtype),
        grid=(Np // tn,),
        in_specs=[
            pl.BlockSpec((tn, Fin), lambda i: (i, 0)),
            pl.BlockSpec((Fin, H * D), lambda i: (0, 0)),
            pl.BlockSpec((H, 1, D), lambda i: (0, 0, 0)),
            pl.BlockSpec((H, H * D), lambda i: (0, 0)),
        ],
        out_specs=[
            pl.BlockSpec((H, tn, D), lambda i: (0, i, 0)),
            pl.BlockSpec((H, tn, 1), lambda i: (0, i, 0)),
            pl.BlockSpec((H, tn), lambda i: (0, i)),
        ],
        out_shape=(
            jax.ShapeDtypeStruct((H, Np, D), mm_dtype),
            jax.ShapeDtypeStruct((H, Np, 1), jnp.float32),
            jax.ShapeDtypeStruct((H, Np), jnp.float32),
        ),
        compiler_params=pltpu.CompilerParams(
            dimension_semantics=("parallel",),
            vmem_limit_bytes=_VMEM_LIMIT),
    )(x_p, w1_all, adst1_vec, asrc1_blk)

    # ---- layer-1 attention (+ ELU + fused layer-2 projection) --------------
    feat2, adst2, asrc2 = pl.pallas_call(
        functools.partial(_gat_attn_layer1_kernel, heads=H, mm_dtype=mm_dtype),
        grid=(Np // td, Np // ts),
        in_specs=[
            pl.BlockSpec((H, td, 1), lambda i, j: (0, i, 0)),    # alpha_dst1
            pl.BlockSpec((H, ts), lambda i, j: (0, j)),          # alpha_src1
            pl.BlockSpec((td, ts), lambda i, j: (i, j)),         # adj tile (streamed)
            pl.BlockSpec((H, ts, D), lambda i, j: (0, j, 0)),    # feat1 (src)
            pl.BlockSpec((H, 1, D), lambda i, j: (0, 0, 0)),     # b1
            pl.BlockSpec((H, D, D2), lambda i, j: (0, 0, 0)),    # W2 per head
            pl.BlockSpec((1, D2), lambda i, j: (0, 0)),          # a_dst2
            pl.BlockSpec((1, D2), lambda i, j: (0, 0)),          # a_src2
        ],
        out_specs=[
            pl.BlockSpec((1, td, D2), lambda i, j: (0, i, 0)),   # feat2
            pl.BlockSpec((1, td, 1), lambda i, j: (0, i, 0)),    # alpha_dst2
            pl.BlockSpec((1, td), lambda i, j: (0, i)),          # alpha_src2
        ],
        out_shape=(
            jax.ShapeDtypeStruct((1, Np, D2), mm_dtype),
            jax.ShapeDtypeStruct((1, Np, 1), jnp.float32),
            jax.ShapeDtypeStruct((1, Np), jnp.float32),
        ),
        scratch_shapes=[
            pltpu.VMEM((H, td, 1), jnp.float32),                 # running max
            pltpu.VMEM((H, td, 1), jnp.float32),                 # running sum
            pltpu.VMEM((H, td, D), jnp.float32),                 # accumulator
        ],
        compiler_params=pltpu.CompilerParams(
            dimension_semantics=("parallel", "arbitrary"),
            vmem_limit_bytes=_VMEM_LIMIT),
    )(adst1, asrc1, adj_p, feat1, b1, w2_split, adst2_vec, asrc2_vec)

    # ---- layer-2 attention --------------------------------------------------
    out_p = pl.pallas_call(
        _gat_attn_layer2_kernel,
        grid=(Np // td, Np // ts),
        in_specs=[
            pl.BlockSpec((1, td, 1), lambda i, j: (0, i, 0)),    # alpha_dst2
            pl.BlockSpec((1, ts), lambda i, j: (0, j)),          # alpha_src2
            pl.BlockSpec((td, ts), lambda i, j: (i, j)),         # adj tile
            pl.BlockSpec((1, ts, D2), lambda i, j: (0, j, 0)),   # feat2 (src)
            pl.BlockSpec((1, 1, D2), lambda i, j: (0, 0, 0)),    # b2
        ],
        out_specs=pl.BlockSpec((1, td, D2), lambda i, j: (0, i, 0)),
        out_shape=jax.ShapeDtypeStruct((1, Np, D2), jnp.float32),
        scratch_shapes=[
            pltpu.VMEM((1, td, 1), jnp.float32),
            pltpu.VMEM((1, td, 1), jnp.float32),
            pltpu.VMEM((1, td, D2), jnp.float32),
        ],
        compiler_params=pltpu.CompilerParams(
            dimension_semantics=("parallel", "arbitrary"),
            vmem_limit_bytes=_VMEM_LIMIT),
    )(adst2, asrc2, adj_p, feat2, b2)

    return out_p[0, :N, :]


# --------------------------------------------------------------------------
# Pure-JAX reference (PyG GATConv semantics, eval mode) for a sanity check.
# --------------------------------------------------------------------------
def _gatnet_reference(params, x, edge_index):
    N = x.shape[0]
    adj = jnp.zeros((N, N), jnp.float32).at[edge_index[1], edge_index[0]].set(1.0)
    adj = jnp.maximum(adj, jnp.eye(N, dtype=jnp.float32))

    def gat_layer(xin, w, a_src, a_dst, bias, concat):
        feat = jnp.einsum('nf,hfd->hnd', xin, w)
        e_dst = jnp.einsum('hnd,hd->hn', feat, a_dst[:, 0, :])
        e_src = jnp.einsum('hnd,hd->hn', feat, a_src[:, 0, :])
        e = e_dst[:, :, None] + e_src[:, None, :]
        e = jnp.where(e > 0, e, 0.2 * e)
        e = jnp.where(adj[None] > 0, e, -jnp.inf)
        attn = jax.nn.softmax(e, axis=-1)
        out = jnp.einsum('hij,hjd->hid', attn, feat)
        if concat:
            H = out.shape[0]
            out = jnp.transpose(out, (1, 0, 2)).reshape(N, -1)
        else:
            out = out[0]
        return out + bias

    x1 = gat_layer(x, params["w1"], params["a_src1"], params["a_dst1"],
                   params["b1"], concat=True)
    x1 = jnp.where(x1 > 0, x1, jnp.exp(jnp.minimum(x1, 0.0)) - 1.0)   # ELU
    return gat_layer(x1, params["w2"], params["a_src2"], params["a_dst2"],
                     params["b2"], concat=False)


def init_gatnet_params(key, in_dim, out_dim, head_num):
    ks = jax.random.split(key, 6)
    glorot = lambda k, shape, fan_in, fan_out: (
        jax.random.normal(k, shape, jnp.float32)
        * jnp.sqrt(2.0 / (fan_in + fan_out)))
    return {
        # layer 1: in_dim -> out_dim, heads=head_num, concat=True
        "w1": glorot(ks[0], (head_num, in_dim, out_dim), in_dim,
                     head_num * out_dim),
        "a_src1": glorot(ks[1], (head_num, 1, out_dim), out_dim, 1),
        "a_dst1": glorot(ks[2], (head_num, 1, out_dim), out_dim, 1),
        "b1": jnp.zeros((head_num * out_dim,), jnp.float32),
        # layer 2: head_num*out_dim -> out_dim, heads=1, concat=False
        "w2": glorot(ks[3], (1, head_num * out_dim, out_dim),
                     head_num * out_dim, out_dim),
        "a_src2": glorot(ks[4], (1, 1, out_dim), out_dim, 1),
        "a_dst2": glorot(ks[5], (1, 1, out_dim), out_dim, 1),
        "b2": jnp.zeros((out_dim,), jnp.float32),
    }


if __name__ == "__main__":
    N, IN_DIM, OUT_DIM, HEADS = 16, 16, 16, 4

    key = jax.random.PRNGKey(0)
    k_x, k_p = jax.random.split(key)

    x = jax.random.normal(k_x, (N, IN_DIM), jnp.float32)

    # Deterministic small graph: ring + skip edges.
    src = jnp.concatenate([jnp.arange(N), jnp.arange(N)])
    dst = jnp.concatenate([(jnp.arange(N) + 1) % N, (jnp.arange(N) + 2) % N])
    edge_index = jnp.stack([src, dst]).astype(jnp.int32)      # [2, E]

    params = init_gatnet_params(k_p, IN_DIM, OUT_DIM, HEADS)

    out = jax.jit(gatnet_forward)(params, x, edge_index)
    jax.block_until_ready(out)

    assert out.shape == (N, OUT_DIM)
    assert bool(jnp.all(jnp.isfinite(out)))

    ref = _gatnet_reference(params, x, edge_index)
    max_err = float(jnp.max(jnp.abs(out - ref)))
    assert max_err < 0.1, f"max abs error vs reference: {max_err}"

    print("KERNEL_OK")
</pallas_src>

<mosaic_0001>
module attributes {stable_mosaic.version = 11 : i64} {
  func.func @_gat_project_kernel(%arg0: i32, %arg1: memref<128x16xbf16, #tpu.memory_space<vmem>>, %arg2: memref<16x64xbf16, #tpu.memory_space<vmem>>, %arg3: memref<4x1x16xf32, #tpu.memory_space<vmem>>, %arg4: memref<4x64xbf16, #tpu.memory_space<vmem>>, %arg5: memref<4x128x16xbf16, #tpu.memory_space<vmem>>, %arg6: memref<4x128x1xf32, #tpu.memory_space<vmem>>, %arg7: memref<4x128xf32, #tpu.memory_space<vmem>>) attributes {dimension_semantics = [#tpu.dimension_semantics<parallel>], iteration_bounds = array<i64: 1>, scalar_prefetch = 0 : i64, scratch_operands = 0 : i64, tpu.core_type = #tpu.core_type<tc>, window_params = [{transform_indices = @transform_0, window_bounds = array<i64: 128, 16>}, {pipeline_mode = #tpu.pipeline_mode<synchronous>, transform_indices = @transform_1, window_bounds = array<i64: 16, 64>}, {pipeline_mode = #tpu.pipeline_mode<synchronous>, transform_indices = @transform_2, window_bounds = array<i64: 4, 1, 16>}, {pipeline_mode = #tpu.pipeline_mode<synchronous>, transform_indices = @transform_3, window_bounds = array<i64: 4, 64>}, {transform_indices = @transform_4, window_bounds = array<i64: 4, 128, 16>}, {transform_indices = @transform_5, window_bounds = array<i64: 4, 128, 1>}, {transform_indices = @transform_6, window_bounds = array<i64: 4, 128>}]} {
    %c0 = arith.constant 0 : index
    %c0_0 = arith.constant 0 : index
    %0 = vector.load %arg1[%c0, %c0_0] : memref<128x16xbf16, #tpu.memory_space<vmem>>, vector<128x16xbf16>
    %c0_1 = arith.constant 0 : index
    %c0_2 = arith.constant 0 : index
    %1 = vector.load %arg2[%c0_1, %c0_2] : memref<16x64xbf16, #tpu.memory_space<vmem>>, vector<16x64xbf16>
    %cst = arith.constant dense<0.000000e+00> : vector<128x64xf32>
    %2 = tpu.matmul %0, %1, %cst {dimension_numbers = #tpu.dot_dimension_numbers<[1], [0], [0], [1], [0, 0, 1, 1], [], []>} : vector<128x16xbf16>, vector<16x64xbf16>, vector<128x64xf32> -> vector<128x64xf32>
    %3 = arith.truncf %2 : vector<128x64xf32> to vector<128x64xbf16>
    %4 = vector.extract_strided_slice %2 {offsets = [0, 0], sizes = [128, 16], strides = [1, 1]} : vector<128x64xf32> to vector<128x16xf32>
    %5 = arith.truncf %4 : vector<128x16xf32> to vector<128x16xbf16>
    %c0_3 = arith.constant 0 : index
    %c0_4 = arith.constant 0 : index
    %c0_5 = arith.constant 0 : index
    %6 = vector.load %arg5[%c0_3, %c0_4, %c0_5] : memref<4x128x16xbf16, #tpu.memory_space<vmem>>, vector<1x128x16xbf16>
    %7 = vector.shape_cast %6 : vector<1x128x16xbf16> to vector<128x16xbf16>
    %8 = vector.shape_cast %5 : vector<128x16xbf16> to vector<1x128x16xbf16>
    tpu.vector_store %arg5[%c0_3, %c0_4, %c0_5], %8 {strides = array<i32>} : memref<4x128x16xbf16, #tpu.memory_space<vmem>>, vector<1x128x16xbf16>,
    %c0_6 = arith.constant 0 : index
    %c0_7 = arith.constant 0 : index
    %c0_8 = arith.constant 0 : index
    %9 = vector.load %arg3[%c0_6, %c0_7, %c0_8] : memref<4x1x16xf32, #tpu.memory_space<vmem>>, vector<1x1x16xf32>
    %10 = vector.shape_cast %9 : vector<1x1x16xf32> to vector<1x16xf32>
    %11 = vector.broadcast %10 : vector<1x16xf32> to vector<128x16xf32>
    %12 = arith.mulf %4, %11 : vector<128x16xf32>
    %cst_9 = arith.constant dense<0.000000e+00> : vector<128xf32>
    %13 = vector.multi_reduction <add>, %12, %cst_9 [1] : vector<128x16xf32> to vector<128xf32>
    %14 = vector.shape_cast %13 : vector<128xf32> to vector<128x1xf32>
    %c0_10 = arith.constant 0 : index
    %c0_11 = arith.constant 0 : index
    %c0_12 = arith.constant 0 : index
    %15 = vector.load %arg6[%c0_10, %c0_11, %c0_12] : memref<4x128x1xf32, #tpu.memory_space<vmem>>, vector<1x128x1xf32>
    %16 = vector.shape_cast %15 : vector<1x128x1xf32> to vector<128x1xf32>
    %17 = vector.shape_cast %14 : vector<128x1xf32> to vector<1x128x1xf32>
    tpu.vector_store %arg6[%c0_10, %c0_11, %c0_12], %17 {strides = array<i32>} : memref<4x128x1xf32, #tpu.memory_space<vmem>>, vector<1x128x1xf32>,
    %18 = vector.extract_strided_slice %2 {offsets = [0, 16], sizes = [128, 16], strides = [1, 1]} : vector<128x64xf32> to vector<128x16xf32>
    %19 = arith.truncf %18 : vector<128x16xf32> to vector<128x16xbf16>
    %c1 = arith.constant 1 : index
    %c0_13 = arith.constant 0 : index
    %c0_14 = arith.constant 0 : index
    %20 = vector.load %arg5[%c1, %c0_13, %c0_14] : memref<4x128x16xbf16, #tpu.memory_space<vmem>>, vector<1x128x16xbf16>
    %21 = vector.shape_cast %20 : vector<1x128x16xbf16> to vector<128x16xbf16>
    %22 = vector.shape_cast %19 : vector<128x16xbf16> to vector<1x128x16xbf16>
    tpu.vector_store %arg5[%c1, %c0_13, %c0_14], %22 {strides = array<i32>} : memref<4x128x16xbf16, #tpu.memory_space<vmem>>, vector<1x128x16xbf16>,
    %c1_15 = arith.constant 1 : index
    %c0_16 = arith.constant 0 : index
    %c0_17 = arith.constant 0 : index
    %23 = vector.load %arg3[%c1_15, %c0_16, %c0_17] : memref<4x1x16xf32, #tpu.memory_space<vmem>>, vector<1x1x16xf32>
    %24 = vector.shape_cast %23 : vector<1x1x16xf32> to vector<1x16xf32>
    %25 = vector.broadcast %24 : vector<1x16xf32> to vector<128x16xf32>
    %26 = arith.mulf %18, %25 : vector<128x16xf32>
    %cst_18 = arith.constant dense<0.000000e+00> : vector<128xf32>
    %27 = vector.multi_reduction <add>, %26, %cst_18 [1] : vector<128x16xf32> to vector<128xf32>
    %28 = vector.shape_cast %27 : vector<128xf32> to vector<128x1xf32>
    %c1_19 = arith.constant 1 : index
    %c0_20 = arith.constant 0 : index
    %c0_21 = arith.constant 0 : index
    %29 = vector.load %arg6[%c1_19, %c0_20, %c0_21] : memref<4x128x1xf32, #tpu.memory_space<vmem>>, vector<1x128x1xf32>
    %30 = vector.shape_cast %29 : vector<1x128x1xf32> to vector<128x1xf32>
    %31 = vector.shape_cast %28 : vector<128x1xf32> to vector<1x128x1xf32>
    tpu.vector_store %arg6[%c1_19, %c0_20, %c0_21], %31 {strides = array<i32>} : memref<4x128x1xf32, #tpu.memory_space<vmem>>, vector<1x128x1xf32>,
    %32 = vector.extract_strided_slice %2 {offsets = [0, 32], sizes = [128, 16], strides = [1, 1]} : vector<128x64xf32> to vector<128x16xf32>
    %33 = arith.truncf %32 : vector<128x16xf32> to vector<128x16xbf16>
    %c2 = arith.constant 2 : index
    %c0_22 = arith.constant 0 : index
    %c0_23 = arith.constant 0 : index
    %34 = vector.load %arg5[%c2, %c0_22, %c0_23] : memref<4x128x16xbf16, #tpu.memory_space<vmem>>, vector<1x128x16xbf16>
    %35 = vector.shape_cast %34 : vector<1x128x16xbf16> to vector<128x16xbf16>
    %36 = vector.shape_cast %33 : vector<128x16xbf16> to vector<1x128x16xbf16>
    tpu.vector_store %arg5[%c2, %c0_22, %c0_23], %36 {strides = array<i32>} : memref<4x128x16xbf16, #tpu.memory_space<vmem>>, vector<1x128x16xbf16>,
    %c2_24 = arith.constant 2 : index
    %c0_25 = arith.constant 0 : index
    %c0_26 = arith.constant 0 : index
    %37 = vector.load %arg3[%c2_24, %c0_25, %c0_26] : memref<4x1x16xf32, #tpu.memory_space<vmem>>, vector<1x1x16xf32>
    %38 = vector.shape_cast %37 : vector<1x1x16xf32> to vector<1x16xf32>
    %39 = vector.broadcast %38 : vector<1x16xf32> to vector<128x16xf32>
    %40 = arith.mulf %32, %39 : vector<128x16xf32>
    %cst_27 = arith.constant dense<0.000000e+00> : vector<128xf32>
    %41 = vector.multi_reduction <add>, %40, %cst_27 [1] : vector<128x16xf32> to vector<128xf32>
    %42 = vector.shape_cast %41 : vector<128xf32> to vector<128x1xf32>
    %c2_28 = arith.constant 2 : index
    %c0_29 = arith.constant 0 : index
    %c0_30 = arith.constant 0 : index
    %43 = vector.load %arg6[%c2_28, %c0_29, %c0_30] : memref<4x128x1xf32, #tpu.memory_space<vmem>>, vector<1x128x1xf32>
    %44 = vector.shape_cast %43 : vector<1x128x1xf32> to vector<128x1xf32>
    %45 = vector.shape_cast %42 : vector<128x1xf32> to vector<1x128x1xf32>
    tpu.vector_store %arg6[%c2_28, %c0_29, %c0_30], %45 {strides = array<i32>} : memref<4x128x1xf32, #tpu.memory_space<vmem>>, vector<1x128x1xf32>,
    %46 = vector.extract_strided_slice %2 {offsets = [0, 48], sizes = [128, 16], strides = [1, 1]} : vector<128x64xf32> to vector<128x16xf32>
    %47 = arith.truncf %46 : vector<128x16xf32> to vector<128x16xbf16>
    %c3 = arith.constant 3 : index
    %c0_31 = arith.constant 0 : index
    %c0_32 = arith.constant 0 : index
    %48 = vector.load %arg5[%c3, %c0_31, %c0_32] : memref<4x128x16xbf16, #tpu.memory_space<vmem>>, vector<1x128x16xbf16>
    %49 = vector.shape_cast %48 : vector<1x128x16xbf16> to vector<128x16xbf16>
    %50 = vector.shape_cast %47 : vector<128x16xbf16> to vector<1x128x16xbf16>
    tpu.vector_store %arg5[%c3, %c0_31, %c0_32], %50 {strides = array<i32>} : memref<4x128x16xbf16, #tpu.memory_space<vmem>>, vector<1x128x16xbf16>,
    %c3_33 = arith.constant 3 : index
    %c0_34 = arith.constant 0 : index
    %c0_35 = arith.constant 0 : index
    %51 = vector.load %arg3[%c3_33, %c0_34, %c0_35] : memref<4x1x16xf32, #tpu.memory_space<vmem>>, vector<1x1x16xf32>
    %52 = vector.shape_cast %51 : vector<1x1x16xf32> to vector<1x16xf32>
    %53 = vector.broadcast %52 : vector<1x16xf32> to vector<128x16xf32>
    %54 = arith.mulf %46, %53 : vector<128x16xf32>
    %cst_36 = arith.constant dense<0.000000e+00> : vector<128xf32>
    %55 = vector.multi_reduction <add>, %54, %cst_36 [1] : vector<128x16xf32> to vector<128xf32>
    %56 = vector.shape_cast %55 : vector<128xf32> to vector<128x1xf32>
    %c3_37 = arith.constant 3 : index
    %c0_38 = arith.constant 0 : index
    %c0_39 = arith.constant 0 : index
    %57 = vector.load %arg6[%c3_37, %c0_38, %c0_39] : memref<4x128x1xf32, #tpu.memory_space<vmem>>, vector<1x128x1xf32>
    %58 = vector.shape_cast %57 : vector<1x128x1xf32> to vector<128x1xf32>
    %59 = vector.shape_cast %56 : vector<128x1xf32> to vector<1x128x1xf32>
    tpu.vector_store %arg6[%c3_37, %c0_38, %c0_39], %59 {strides = array<i32>} : memref<4x128x1xf32, #tpu.memory_space<vmem>>, vector<1x128x1xf32>,
    %c0_40 = arith.constant 0 : index
    %c0_41 = arith.constant 0 : index
    %60 = vector.load %arg4[%c0_40, %c0_41] : memref<4x64xbf16, #tpu.memory_space<vmem>>, vector<4x64xbf16>
    %cst_42 = arith.constant dense<0.000000e+00> : vector<4x128xf32>
    %61 = tpu.matmul %60, %3, %cst_42 {dimension_numbers = #tpu.dot_dimension_numbers<[1], [1], [0], [0], [0, 0, 1, 0], [], []>} : vector<4x64xbf16>, vector<128x64xbf16>, vector<4x128xf32> -> vector<4x128xf32>
    %c0_43 = arith.constant 0 : index
    %c0_44 = arith.constant 0 : index
    %62 = vector.load %arg7[%c0_43, %c0_44] : memref<4x128xf32, #tpu.memory_space<vmem>>, vector<4x128xf32>
    tpu.vector_store %arg7[%c0_43, %c0_44], %61 {strides = array<i32>} : memref<4x128xf32, #tpu.memory_space<vmem>>, vector<4x128xf32>,
    return
  }
  func.func @transform_0(%arg0: i32) -> (i32, i32) {
    %c0_i32 = arith.constant 0 : i32
    %c0_i32_0 = arith.constant 0 : i32
    return %arg0, %c0_i32 : i32, i32
  }
  func.func @transform_1(%arg0: i32) -> (i32, i32) {
    %c0_i32 = arith.constant 0 : i32
    %c0_i32_0 = arith.constant 0 : i32
    %c0_i32_1 = arith.constant 0 : i32
    return %c0_i32, %c0_i32_0 : i32, i32
  }
  func.func @transform_2(%arg0: i32) -> (i32, i32, i32) {
    %c0_i32 = arith.constant 0 : i32
    %c0_i32_0 = arith.constant 0 : i32
    %c0_i32_1 = arith.constant 0 : i32
    %c0_i32_2 = arith.constant 0 : i32
    return %c0_i32, %c0_i32_0, %c0_i32_1 : i32, i32, i32
  }
  func.func @transform_3(%arg0: i32) -> (i32, i32) {
    %c0_i32 = arith.constant 0 : i32
    %c0_i32_0 = arith.constant 0 : i32
    %c0_i32_1 = arith.constant 0 : i32
    return %c0_i32, %c0_i32_0 : i32, i32
  }
  func.func @transform_4(%arg0: i32) -> (i32, i32, i32) {
    %c0_i32 = arith.constant 0 : i32
    %c0_i32_0 = arith.constant 0 : i32
    %c0_i32_1 = arith.constant 0 : i32
    return %c0_i32, %arg0, %c0_i32_0 : i32, i32, i32
  }
  func.func @transform_5(%arg0: i32) -> (i32, i32, i32) {
    %c0_i32 = arith.constant 0 : i32
    %c0_i32_0 = arith.constant 0 : i32
    %c0_i32_1 = arith.constant 0 : i32
    return %c0_i32, %arg0, %c0_i32_0 : i32, i32, i32
  }
  func.func @transform_6(%arg0: i32) -> (i32, i32) {
    %c0_i32 = arith.constant 0 : i32
    %c0_i32_0 = arith.constant 0 : i32
    return %c0_i32, %arg0 : i32, i32
  }
}

module attributes {stable_mosaic.version = 11 : i64} {
  func.func @_gat_attn_layer1_kernel(%arg0: i32, %arg1: i32, %arg2: memref<4x128x1xf32, #tpu.memory_space<vmem>>, %arg3: memref<4x128xf32, #tpu.memory_space<vmem>>, %arg4: memref<128x128xbf16, #tpu.memory_space<vmem>>, %arg5: memref<4x128x16xbf16, #tpu.memory_space<vmem>>, %arg6: memref<4x1x16xf32, #tpu.memory_space<vmem>>, %arg7: memref<4x16x16xbf16, #tpu.memory_space<vmem>>, %arg8: memref<1x16xf32, #tpu.memory_space<vmem>>, %arg9: memref<1x16xf32, #tpu.memory_space<vmem>>, %arg10: memref<1x128x16xbf16, #tpu.memory_space<vmem>>, %arg11: memref<1x128x1xf32, #tpu.memory_space<vmem>>, %arg12: memref<1x128xf32, #tpu.memory_space<vmem>>, %arg13: memref<4x128x1xf32, #tpu.memory_space<vmem>>, %arg14: memref<4x128x1xf32, #tpu.memory_space<vmem>>, %arg15: memref<4x128x16xf32, #tpu.memory_space<vmem>>) attributes {dimension_semantics = [#tpu.dimension_semantics<parallel>, #tpu.dimension_semantics<arbitrary>], iteration_bounds = array<i64: 1, 1>, scalar_prefetch = 0 : i64, scratch_operands = 3 : i64, tpu.core_type = #tpu.core_type<tc>, window_params = [{transform_indices = @transform_0, window_bounds = array<i64: 4, 128, 1>}, {transform_indices = @transform_1, window_bounds = array<i64: 4, 128>}, {transform_indices = @transform_2, window_bounds = array<i64: 128, 128>}, {transform_indices = @transform_3, window_bounds = array<i64: 4, 128, 16>}, {pipeline_mode = #tpu.pipeline_mode<synchronous>, transform_indices = @transform_4, window_bounds = array<i64: 4, 1, 16>}, {pipeline_mode = #tpu.pipeline_mode<synchronous>, transform_indices = @transform_5, window_bounds = array<i64: 4, 16, 16>}, {pipeline_mode = #tpu.pipeline_mode<synchronous>, transform_indices = @transform_6, window_bounds = array<i64: 1, 16>}, {pipeline_mode = #tpu.pipeline_mode<synchronous>, transform_indices = @transform_7, window_bounds = array<i64: 1, 16>}, {transform_indices = @transform_8, window_bounds = array<i64: 1, 128, 16>}, {transform_indices = @transform_9, window_bounds = array<i64: 1, 128, 1>}, {transform_indices = @transform_10, window_bounds = array<i64: 1, 128>}]} {
    %c0_i32 = arith.constant 0 : i32
    %0 = arith.cmpi eq, %arg1, %c0_i32 : i32
    %1 = arith.extui %0 : i1 to i32
    %c0_i32_0 = arith.constant 0 : i32
    %2 = arith.cmpi ne, %1, %c0_i32_0 : i32
    scf.if %2 {
      %cst_36 = arith.constant -1.000000e+30 : f32
      %49 = vector.broadcast %cst_36 : f32 to vector<4x128x1xf32>
      %c0_37 = arith.constant 0 : index
      %c0_38 = arith.constant 0 : index
      %c0_39 = arith.constant 0 : index
      %50 = vector.load %arg13[%c0_37, %c0_38, %c0_39] : memref<4x128x1xf32, #tpu.memory_space<vmem>>, vector<4x128x1xf32>
      tpu.vector_store %arg13[%c0_37, %c0_38, %c0_39], %49 {strides = array<i32>} : memref<4x128x1xf32, #tpu.memory_space<vmem>>, vector<4x128x1xf32>,
      %cst_40 = arith.constant 0.000000e+00 : f32
      %51 = vector.broadcast %cst_40 : f32 to vector<4x128x1xf32>
      %c0_41 = arith.constant 0 : index
      %c0_42 = arith.constant 0 : index
      %c0_43 = arith.constant 0 : index
      %52 = vector.load %arg14[%c0_41, %c0_42, %c0_43] : memref<4x128x1xf32, #tpu.memory_space<vmem>>, vector<4x128x1xf32>
      tpu.vector_store %arg14[%c0_41, %c0_42, %c0_43], %51 {strides = array<i32>} : memref<4x128x1xf32, #tpu.memory_space<vmem>>, vector<4x128x1xf32>,
      %cst_44 = arith.constant 0.000000e+00 : f32
      %53 = vector.broadcast %cst_44 : f32 to vector<4x128x16xf32>
      %c0_45 = arith.constant 0 : index
      %c0_46 = arith.constant 0 : index
      %c0_47 = arith.constant 0 : index
      %54 = vector.load %arg15[%c0_45, %c0_46, %c0_47] : memref<4x128x16xf32, #tpu.memory_space<vmem>>, vector<4x128x16xf32>
      tpu.vector_store %arg15[%c0_45, %c0_46, %c0_47], %53 {strides = array<i32>} : memref<4x128x16xf32, #tpu.memory_space<vmem>>, vector<4x128x16xf32>,
    } else {
    }
    %c0 = arith.constant 0 : index
    %c0_1 = arith.constant 0 : index
    %c0_2 = arith.constant 0 : index
    %3 = vector.load %arg2[%c0, %c0_1, %c0_2] : memref<4x128x1xf32, #tpu.memory_space<vmem>>, vector<4x128x1xf32>
    %c0_3 = arith.constant 0 : index
    %c0_4 = arith.constant 0 : index
    %4 = vector.load %arg3[%c0_3, %c0_4] : memref<4x128xf32, #tpu.memory_space<vmem>>, vector<4x128xf32>
    %5 = vector.shape_cast %4 : vector<4x128xf32> to vector<4x1x128xf32>
    %6 = vector.broadcast %3 : vector<4x128x1xf32> to vector<4x128x128xf32>
    %7 = vector.broadcast %5 : vector<4x1x128xf32> to vector<4x128x128xf32>
    %8 = arith.addf %6, %7 : vector<4x128x128xf32>
    %cst = arith.constant 0.000000e+00 : f32
    %9 = vector.broadcast %cst : f32 to vector<4x128x128xf32>
    %10 = arith.cmpf ogt, %8, %9 : vector<4x128x128xf32>
    %cst_5 = arith.constant 2.000000e-01 : f32
    %11 = vector.broadcast %cst_5 : f32 to vector<4x128x128xf32>
    %12 = arith.mulf %11, %8 : vector<4x128x128xf32>
    %13 = arith.select %10, %8, %12 : vector<4x128x128xi1>, vector<4x128x128xf32>
    %c0_6 = arith.constant 0 : index
    %c0_7 = arith.constant 0 : index
    %14 = vector.load %arg4[%c0_6, %c0_7] : memref<128x128xbf16, #tpu.memory_space<vmem>>, vector<128x128xbf16>
    %15 = vector.shape_cast %14 : vector<128x128xbf16> to vector<1x128x128xbf16>
    %cst_8 = arith.constant 0.000000e+00 : bf16
    %16 = vector.broadcast %cst_8 : bf16 to vector<1x128x128xbf16>
    %17 = arith.cmpf ogt, %15, %16 : vector<1x128x128xbf16>
    %cst_9 = arith.constant -1.000000e+30 : f32
    %18 = vector.shape_cast %17 : vector<1x128x128xi1> to vector<1x128x128xi1>
    %19 = vector.broadcast %18 : vector<1x128x128xi1> to vector<4x128x128xi1>
    %20 = vector.broadcast %cst_9 : f32 to vector<4x128x128xf32>
    %21 = arith.select %19, %13, %20 : vector<4x128x128xi1>, vector<4x128x128xf32>
    %c0_10 = arith.constant 0 : index
    %c0_11 = arith.constant 0 : index
    %c0_12 = arith.constant 0 : index
    %22 = vector.load %arg13[%c0_10, %c0_11, %c0_12] : memref<4x128x1xf32, #tpu.memory_space<vmem>>, vector<4x128x1xf32>
    %cst_13 = arith.constant dense<0xFF800000> : vector<4x128xf32>
    %23 = vector.multi_reduction <maximumf>, %21, %cst_13 [2] : vector<4x128x128xf32> to vector<4x128xf32>
    %24 = vector.shape_cast %23 : vector<4x128xf32> to vector<4x128x1xf32>
    %25 = arith.maximumf %22, %24 : vector<4x128x1xf32>
    %26 = arith.subf %22, %25 : vector<4x128x1xf32>
    %27 = math.exp %26 : vector<4x128x1xf32>
    %28 = vector.broadcast %25 : vector<4x128x1xf32> to vector<4x128x128xf32>
    %29 = arith.subf %21, %28 : vector<4x128x128xf32>
    %30 = math.exp %29 : vector<4x128x128xf32>
    %c0_14 = arith.constant 0 : index
    %c0_15 = arith.constant 0 : index
    %c0_16 = arith.constant 0 : index
    %31 = vector.load %arg14[%c0_14, %c0_15, %c0_16] : memref<4x128x1xf32, #tpu.memory_space<vmem>>, vector<4x128x1xf32>
    %32 = arith.mulf %27, %31 : vector<4x128x1xf32>
    %cst_17 = arith.constant dense<0.000000e+00> : vector<4x128xf32>
    %33 = vector.multi_reduction <add>, %30, %cst_17 [2] : vector<4x128x128xf32> to vector<4x128xf32>
    %34 = vector.shape_cast %33 : vector<4x128xf32> to vector<4x128x1xf32>
    %35 = arith.addf %32, %34 : vector<4x128x1xf32>
    %c0_18 = arith.constant 0 : index
    %c0_19 = arith.constant 0 : index
    %c0_20 = arith.constant 0 : index
    %36 = vector.load %arg14[%c0_18, %c0_19, %c0_20] : memref<4x128x1xf32, #tpu.memory_space<vmem>>, vector<4x128x1xf32>
    tpu.vector_store %arg14[%c0_18, %c0_19, %c0_20], %35 {strides = array<i32>} : memref<4x128x1xf32, #tpu.memory_space<vmem>>, vector<4x128x1xf32>,
    %c0_21 = arith.constant 0 : index
    %c0_22 = arith.constant 0 : index
    %c0_23 = arith.constant 0 : index
    %37 = vector.load %arg15[%c0_21, %c0_22, %c0_23] : memref<4x128x16xf32, #tpu.memory_space<vmem>>, vector<4x128x16xf32>
    %38 = vector.broadcast %27 : vector<4x128x1xf32> to vector<4x128x16xf32>
    %39 = arith.mulf %38, %37 : vector<4x128x16xf32>
    %40 = arith.truncf %30 : vector<4x128x128xf32> to vector<4x128x128xbf16>
    %c0_24 = arith.constant 0 : index
    %c0_25 = arith.constant 0 : index
    %c0_26 = arith.constant 0 : index
    %41 = vector.load %arg5[%c0_24, %c0_25, %c0_26] : memref<4x128x16xbf16, #tpu.memory_space<vmem>>, vector<4x128x16xbf16>
    "tpu.trace_start"() <{level = 10 : i32, message = "hqk,hkd->hqd"}> : () -> ()
    %cst_27 = arith.constant dense<0.000000e+00> : vector<4x128x16xf32>
    %42 = tpu.matmul %40, %41, %cst_27 {dimension_numbers = #tpu.dot_dimension_numbers<[2], [1], [1], [2], [0, 0, 0, 1, 1, 2], [0], [0]>} : vector<4x128x128xbf16>, vector<4x128x16xbf16>, vector<4x128x16xf32> -> vector<4x128x16xf32>
    "tpu.trace_stop"() : () -> ()
    %43 = arith.addf %39, %42 : vector<4x128x16xf32>
    %c0_28 = arith.constant 0 : index
    %c0_29 = arith.constant 0 : index
    %c0_30 = arith.constant 0 : index
    %44 = vector.load %arg15[%c0_28, %c0_29, %c0_30] : memref<4x128x16xf32, #tpu.memory_space<vmem>>, vector<4x128x16xf32>
    tpu.vector_store %arg15[%c0_28, %c0_29, %c0_30], %43 {strides = array<i32>} : memref<4x128x16xf32, #tpu.memory_space<vmem>>, vector<4x128x16xf32>,
    %c0_31 = arith.constant 0 : index
    %c0_32 = arith.constant 0 : index
    %c0_33 = arith.constant 0 : index
    %45 = vector.load %arg13[%c0_31, %c0_32, %c0_33] : memref<4x128x1xf32, #tpu.memory_space<vmem>>, vector<4x128x1xf32>
    tpu.vector_store %arg13[%c0_31, %c0_32, %c0_33], %25 {strides = array<i32>} : memref<4x128x1xf32, #tpu.memory_space<vmem>>, vector<4x128x1xf32>,
    %c0_i32_34 = arith.constant 0 : i32
    %46 = arith.cmpi eq, %arg1, %c0_i32_34 : i32
    %47 = arith.extui %46 : i1 to i32
    %c0_i32_35 = arith.constant 0 : i32
    %48 = arith.cmpi ne, %47, %c0_i32_35 : i32
    scf.if %48 {
      %c0_36 = arith.constant 0 : index
      %c0_37 = arith.constant 0 : index
      %c0_38 = arith.constant 0 : index
      %49 = vector.load %arg15[%c0_36, %c0_37, %c0_38] : memref<4x128x16xf32, #tpu.memory_space<vmem>>, vector<4x128x16xf32>
      %c0_39 = arith.constant 0 : index
      %c0_40 = arith.constant 0 : index
      %c0_41 = arith.constant 0 : index
      %50 = vector.load %arg14[%c0_39, %c0_40, %c0_41] : memref<4x128x1xf32, #tpu.memory_space<vmem>>, vector<4x128x1xf32>
      %51 = tpu.reciprocal %50 {approx = true} : vector<4x128x1xf32> -> vector<4x128x1xf32>
      %52 = vector.broadcast %51 : vector<4x128x1xf32> to vector<4x128x16xf32>
      %53 = arith.mulf %49, %52 : vector<4x128x16xf32>
      %c0_42 = arith.constant 0 : index
      %c0_43 = arith.constant 0 : index
      %c0_44 = arith.constant 0 : index
      %54 = vector.load %arg6[%c0_42, %c0_43, %c0_44] : memref<4x1x16xf32, #tpu.memory_space<vmem>>, vector<4x1x16xf32>
      %55 = vector.broadcast %54 : vector<4x1x16xf32> to vector<4x128x16xf32>
      %56 = arith.addf %53, %55 : vector<4x128x16xf32>
      %cst_45 = arith.constant 0.000000e+00 : f32
      %57 = vector.broadcast %cst_45 : f32 to vector<4x128x16xf32>
      %58 = arith.cmpf ogt, %56, %57 : vector<4x128x16xf32>
      %cst_46 = arith.constant 0.000000e+00 : f32
      %59 = vector.broadcast %cst_46 : f32 to vector<4x128x16xf32>
      %60 = arith.minimumf %56, %59 : vector<4x128x16xf32>
      %61 = math.exp %60 : vector<4x128x16xf32>
      %cst_47 = arith.constant 1.000000e+00 : f32
      %62 = vector.broadcast %cst_47 : f32 to vector<4x128x16xf32>
      %63 = arith.subf %61, %62 : vector<4x128x16xf32>
      %64 = arith.select %58, %56, %63 : vector<4x128x16xi1>, vector<4x128x16xf32>
      %65 = arith.truncf %64 : vector<4x128x16xf32> to vector<4x128x16xbf16>
      %cst_48 = arith.constant 0.000000e+00 : f32
      %66 = vector.broadcast %cst_48 : f32 to vector<128x16xf32>
      %67 = vector.extract_strided_slice %65 {offsets = [0, 0, 0], sizes = [1, 128, 16], strides = [1, 1, 1]} : vector<4x128x16xbf16> to vector<1x128x16xbf16>
      %68 = vector.shape_cast %67 : vector<1x128x16xbf16> to vector<128x16xbf16>
      %c0_49 = arith.constant 0 : index
      %c0_50 = arith.constant 0 : index
      %c0_51 = arith.constant 0 : index
      %69 = vector.load %arg7[%c0_49, %c0_50, %c0_51] : memref<4x16x16xbf16, #tpu.memory_space<vmem>>, vector<1x16x16xbf16>
      %70 = vector.shape_cast %69 : vector<1x16x16xbf16> to vector<16x16xbf16>
      %cst_52 = arith.constant dense<0.000000e+00> : vector<128x16xf32>
      %71 = tpu.matmul %68, %70, %cst_52 {dimension_numbers = #tpu.dot_dimension_numbers<[1], [0], [0], [1], [0, 0, 1, 1], [], []>} : vector<128x16xbf16>, vector<16x16xbf16>, vector<128x16xf32> -> vector<128x16xf32>
      %72 = arith.addf %66, %71 : vector<128x16xf32>
      %73 = vector.extract_strided_slice %65 {offsets = [1, 0, 0], sizes = [1, 128, 16], strides = [1, 1, 1]} : vector<4x128x16xbf16> to vector<1x128x16xbf16>
      %74 = vector.shape_cast %73 : vector<1x128x16xbf16> to vector<128x16xbf16>
      %c1 = arith.constant 1 : index
      %c0_53 = arith.constant 0 : index
      %c0_54 = arith.constant 0 : index
      %75 = vector.load %arg7[%c1, %c0_53, %c0_54] : memref<4x16x16xbf16, #tpu.memory_space<vmem>>, vector<1x16x16xbf16>
      %76 = vector.shape_cast %75 : vector<1x16x16xbf16> to vector<16x16xbf16>
      %cst_55 = arith.constant dense<0.000000e+00> : vector<128x16xf32>
      %77 = tpu.matmul %74, %76, %cst_55 {dimension_numbers = #tpu.dot_dimension_numbers<[1], [0], [0], [1], [0, 0, 1, 1], [], []>} : vector<128x16xbf16>, vector<16x16xbf16>, vector<128x16xf32> -> vector<128x16xf32>
      %78 = arith.addf %72, %77 : vector<128x16xf32>
      %79 = vector.extract_strided_slice %65 {offsets = [2, 0, 0], sizes = [1, 128, 16], strides = [1, 1, 1]} : vector<4x128x16xbf16> to vector<1x128x16xbf16>
      %80 = vector.shape_cast %79 : vector<1x128x16xbf16> to vector<128x16xbf16>
      %c2 = arith.constant 2 : index
      %c0_56 = arith.constant 0 : index
      %c0_57 = arith.constant 0 : index
      %81 = vector.load %arg7[%c2, %c0_56, %c0_57] : memref<4x16x16xbf16, #tpu.memory_space<vmem>>, vector<1x16x16xbf16>
      %82 = vector.shape_cast %81 : vector<1x16x16xbf16> to vector<16x16xbf16>
      %cst_58 = arith.constant dense<0.000000e+00> : vector<128x16xf32>
      %83 = tpu.matmul %80, %82, %cst_58 {dimension_numbers = #tpu.dot_dimension_numbers<[1], [0], [0], [1], [0, 0, 1, 1], [], []>} : vector<128x16xbf16>, vector<16x16xbf16>, vector<128x16xf32> -> vector<128x16xf32>
      %84 = arith.addf %78, %83 : vector<128x16xf32>
      %85 = vector.extract_strided_slice %65 {offsets = [3, 0, 0], sizes = [1, 128, 16], strides = [1, 1, 1]} : vector<4x128x16xbf16> to vector<1x128x16xbf16>
      %86 = vector.shape_cast %85 : vector<1x128x16xbf16> to vector<128x16xbf16>
      %c3 = arith.constant 3 : index
      %c0_59 = arith.constant 0 : index
      %c0_60 = arith.constant 0 : index
      %87 = vector.load %arg7[%c3, %c0_59, %c0_60] : memref<4x16x16xbf16, #tpu.memory_space<vmem>>, vector<1x16x16xbf16>
      %88 = vector.shape_cast %87 : vector<1x16x16xbf16> to vector<16x16xbf16>
      %cst_61 = arith.constant dense<0.000000e+00> : vector<128x16xf32>
      %89 = tpu.matmul %86, %88, %cst_61 {dimension_numbers = #tpu.dot_dimension_numbers<[1], [0], [0], [1], [0, 0, 1, 1], [], []>} : vector<128x16xbf16>, vector<16x16xbf16>, vector<128x16xf32> -> vector<128x16xf32>
      %90 = arith.addf %84, %89 : vector<128x16xf32>
      %91 = vector.shape_cast %90 : vector<128x16xf32> to vector<1x128x16xf32>
      %92 = arith.truncf %91 : vector<1x128x16xf32> to vector<1x128x16xbf16>
      %c0_62 = arith.constant 0 : index
      %c0_63 = arith.constant 0 : index
      %c0_64 = arith.constant 0 : index
      %93 = vector.load %arg10[%c0_62, %c0_63, %c0_64] : memref<1x128x16xbf16, #tpu.memory_space<vmem>>, vector<1x128x16xbf16>
      tpu.vector_store %arg10[%c0_62, %c0_63, %c0_64], %92 {strides = array<i32>} : memref<1x128x16xbf16, #tpu.memory_space<vmem>>, vector<1x128x16xbf16>,
      %c0_65 = arith.constant 0 : index
      %c0_66 = arith.constant 0 : index
      %94 = vector.load %arg8[%c0_65, %c0_66] : memref<1x16xf32, #tpu.memory_space<vmem>>, vector<1x16xf32>
      %95 = vector.broadcast %94 : vector<1x16xf32> to vector<128x16xf32>
      %96 = arith.mulf %90, %95 : vector<128x16xf32>
      %cst_67 = arith.constant dense<0.000000e+00> : vector<128xf32>
      %97 = vector.multi_reduction <add>, %96, %cst_67 [1] : vector<128x16xf32> to vector<128xf32>
      %98 = vector.shape_cast %97 : vector<128xf32> to vector<128x1xf32>
      %99 = vector.shape_cast %98 : vector<128x1xf32> to vector<1x128x1xf32>
      %c0_68 = arith.constant 0 : index
      %c0_69 = arith.constant 0 : index
      %c0_70 = arith.constant 0 : index
      %100 = vector.load %arg11[%c0_68, %c0_69, %c0_70] : memref<1x128x1xf32, #tpu.memory_space<vmem>>, vector<1x128x1xf32>
      tpu.vector_store %arg11[%c0_68, %c0_69, %c0_70], %99 {strides = array<i32>} : memref<1x128x1xf32, #tpu.memory_space<vmem>>, vector<1x128x1xf32>,
      %c0_71 = arith.constant 0 : index
      %c0_72 = arith.constant 0 : index
      %101 = vector.load %arg9[%c0_71, %c0_72] : memref<1x16xf32, #tpu.memory_space<vmem>>, vector<1x16xf32>
      %102 = arith.truncf %101 : vector<1x16xf32> to vector<1x16xbf16>
      %103 = arith.truncf %90 : vector<128x16xf32> to vector<128x16xbf16>
      %cst_73 = arith.constant dense<0.000000e+00> : vector<1x128xf32>
      %104 = tpu.matmul %102, %103, %cst_73 {dimension_numbers = #tpu.dot_dimension_numbers<[1], [1], [0], [0], [0, 0, 1, 0], [], []>} : vector<1x16xbf16>, vector<128x16xbf16>, vector<1x128xf32> -> vector<1x128xf32>
      %c0_74 = arith.constant 0 : index
      %c0_75 = arith.constant 0 : index
      %105 = vector.load %arg12[%c0_74, %c0_75] : memref<1x128xf32, #tpu.memory_space<vmem>>, vector<1x128xf32>
      tpu.vector_store %arg12[%c0_74, %c0_75], %104 {strides = array<i32>} : memref<1x128xf32, #tpu.memory_space<vmem>>, vector<1x128xf32>,
    } else {
    }
    return
  }
  func.func @transform_0(%arg0: i32, %arg1: i32) -> (i32, i32, i32) {
    %c0_i32 = arith.constant 0 : i32
    %c0_i32_0 = arith.constant 0 : i32
    %c0_i32_1 = arith.constant 0 : i32
    return %c0_i32, %arg0, %c0_i32_0 : i32, i32, i32
  }
  func.func @transform_1(%arg0: i32, %arg1: i32) -> (i32, i32) {
    %c0_i32 = arith.constant 0 : i32
    %c0_i32_0 = arith.constant 0 : i32
    return %c0_i32, %arg1 : i32, i32
  }
  func.func @transform_2(%arg0: i32, %arg1: i32) -> (i32, i32) {
    %c0_i32 = arith.constant 0 : i32
    return %arg0, %arg1 : i32, i32
  }
  func.func @transform_3(%arg0: i32, %arg1: i32) -> (i32, i32, i32) {
    %c0_i32 = arith.constant 0 : i32
    %c0_i32_0 = arith.constant 0 : i32
    %c0_i32_1 = arith.constant 0 : i32
    return %c0_i32, %arg1, %c0_i32_0 : i32, i32, i32
  }
  func.func @transform_4(%arg0: i32, %arg1: i32) -> (i32, i32, i32) {
    %c0_i32 = arith.constant 0 : i32
    %c0_i32_0 = arith.constant 0 : i32
    %c0_i32_1 = arith.constant 0 : i32
    %c0_i32_2 = arith.constant 0 : i32
    return %c0_i32, %c0_i32_0, %c0_i32_1 : i32, i32, i32
  }
  func.func @transform_5(%arg0: i32, %arg1: i32) -> (i32, i32, i32) {
    %c0_i32 = arith.constant 0 : i32
    %c0_i32_0 = arith.constant 0 : i32
    %c0_i32_1 = arith.constant 0 : i32
    %c0_i32_2 = arith.constant 0 : i32
    return %c0_i32, %c0_i32_0, %c0_i32_1 : i32, i32, i32
  }
  func.func @transform_6(%arg0: i32, %arg1: i32) -> (i32, i32) {
    %c0_i32 = arith.constant 0 : i32
    %c0_i32_0 = arith.constant 0 : i32
    %c0_i32_1 = arith.constant 0 : i32
    return %c0_i32, %c0_i32_0 : i32, i32
  }
  func.func @transform_7(%arg0: i32, %arg1: i32) -> (i32, i32) {
    %c0_i32 = arith.constant 0 : i32
    %c0_i32_0 = arith.constant 0 : i32
    %c0_i32_1 = arith.constant 0 : i32
    return %c0_i32, %c0_i32_0 : i32, i32
  }
  func.func @transform_8(%arg0: i32, %arg1: i32) -> (i32, i32, i32) {
    %c0_i32 = arith.constant 0 : i32
    %c0_i32_0 = arith.constant 0 : i32
    %c0_i32_1 = arith.constant 0 : i32
    return %c0_i32, %arg0, %c0_i32_0 : i32, i32, i32
  }
  func.func @transform_9(%arg0: i32, %arg1: i32) -> (i32, i32, i32) {
    %c0_i32 = arith.constant 0 : i32
    %c0_i32_0 = arith.constant 0 : i32
    %c0_i32_1 = arith.constant 0 : i32
    return %c0_i32, %arg0, %c0_i32_0 : i32, i32, i32
  }
  func.func @transform_10(%arg0: i32, %arg1: i32) -> (i32, i32) {
    %c0_i32 = arith.constant 0 : i32
    %c0_i32_0 = arith.constant 0 : i32
    return %c0_i32, %arg0 : i32, i32
  }
}

module attributes {stable_mosaic.version = 11 : i64} {
  func.func @_gat_attn_layer2_kernel(%arg0: i32, %arg1: i32, %arg2: memref<1x128x1xf32, #tpu.memory_space<vmem>>, %arg3: memref<1x128xf32, #tpu.memory_space<vmem>>, %arg4: memref<128x128xbf16, #tpu.memory_space<vmem>>, %arg5: memref<1x128x16xbf16, #tpu.memory_space<vmem>>, %arg6: memref<1x1x16xf32, #tpu.memory_space<vmem>>, %arg7: memref<1x128x16xf32, #tpu.memory_space<vmem>>, %arg8: memref<1x128x1xf32, #tpu.memory_space<vmem>>, %arg9: memref<1x128x1xf32, #tpu.memory_space<vmem>>, %arg10: memref<1x128x16xf32, #tpu.memory_space<vmem>>) attributes {dimension_semantics = [#tpu.dimension_semantics<parallel>, #tpu.dimension_semantics<arbitrary>], iteration_bounds = array<i64: 1, 1>, scalar_prefetch = 0 : i64, scratch_operands = 3 : i64, tpu.core_type = #tpu.core_type<tc>, window_params = [{transform_indices = @transform_0, window_bounds = array<i64: 1, 128, 1>}, {transform_indices = @transform_1, window_bounds = array<i64: 1, 128>}, {transform_indices = @transform_2, window_bounds = array<i64: 128, 128>}, {transform_indices = @transform_3, window_bounds = array<i64: 1, 128, 16>}, {pipeline_mode = #tpu.pipeline_mode<synchronous>, transform_indices = @transform_4, window_bounds = array<i64: 1, 1, 16>}, {transform_indices = @transform_5, window_bounds = array<i64: 1, 128, 16>}]} {
    %c0_i32 = arith.constant 0 : i32
    %0 = arith.cmpi eq, %arg1, %c0_i32 : i32
    %1 = arith.extui %0 : i1 to i32
    %c0_i32_0 = arith.constant 0 : i32
    %2 = arith.cmpi ne, %1, %c0_i32_0 : i32
    scf.if %2 {
      %cst_36 = arith.constant -1.000000e+30 : f32
      %47 = vector.broadcast %cst_36 : f32 to vector<1x128x1xf32>
      %c0_37 = arith.constant 0 : index
      %c0_38 = arith.constant 0 : index
      %c0_39 = arith.constant 0 : index
      %48 = vector.load %arg8[%c0_37, %c0_38, %c0_39] : memref<1x128x1xf32, #tpu.memory_space<vmem>>, vector<1x128x1xf32>
      tpu.vector_store %arg8[%c0_37, %c0_38, %c0_39], %47 {strides = array<i32>} : memref<1x128x1xf32, #tpu.memory_space<vmem>>, vector<1x128x1xf32>,
      %cst_40 = arith.constant 0.000000e+00 : f32
      %49 = vector.broadcast %cst_40 : f32 to vector<1x128x1xf32>
      %c0_41 = arith.constant 0 : index
      %c0_42 = arith.constant 0 : index
      %c0_43 = arith.constant 0 : index
      %50 = vector.load %arg9[%c0_41, %c0_42, %c0_43] : memref<1x128x1xf32, #tpu.memory_space<vmem>>, vector<1x128x1xf32>
      tpu.vector_store %arg9[%c0_41, %c0_42, %c0_43], %49 {strides = array<i32>} : memref<1x128x1xf32, #tpu.memory_space<vmem>>, vector<1x128x1xf32>,
      %cst_44 = arith.constant 0.000000e+00 : f32
      %51 = vector.broadcast %cst_44 : f32 to vector<1x128x16xf32>
      %c0_45 = arith.constant 0 : index
      %c0_46 = arith.constant 0 : index
      %c0_47 = arith.constant 0 : index
      %52 = vector.load %arg10[%c0_45, %c0_46, %c0_47] : memref<1x128x16xf32, #tpu.memory_space<vmem>>, vector<1x128x16xf32>
      tpu.vector_store %arg10[%c0_45, %c0_46, %c0_47], %51 {strides = array<i32>} : memref<1x128x16xf32, #tpu.memory_space<vmem>>, vector<1x128x16xf32>,
    } else {
    }
    %c0 = arith.constant 0 : index
    %c0_1 = arith.constant 0 : index
    %c0_2 = arith.constant 0 : index
    %3 = vector.load %arg2[%c0, %c0_1, %c0_2] : memref<1x128x1xf32, #tpu.memory_space<vmem>>, vector<1x128x1xf32>
    %c0_3 = arith.constant 0 : index
    %c0_4 = arith.constant 0 : index
    %4 = vector.load %arg3[%c0_3, %c0_4] : memref<1x128xf32, #tpu.memory_space<vmem>>, vector<1x128xf32>
    %5 = vector.shape_cast %4 : vector<1x128xf32> to vector<1x1x128xf32>
    %6 = vector.broadcast %3 : vector<1x128x1xf32> to vector<1x128x128xf32>
    %7 = vector.broadcast %5 : vector<1x1x128xf32> to vector<1x128x128xf32>
    %8 = arith.addf %6, %7 : vector<1x128x128xf32>
    %cst = arith.constant 0.000000e+00 : f32
    %9 = vector.broadcast %cst : f32 to vector<1x128x128xf32>
    %10 = arith.cmpf ogt, %8, %9 : vector<1x128x128xf32>
    %cst_5 = arith.constant 2.000000e-01 : f32
    %11 = vector.broadcast %cst_5 : f32 to vector<1x128x128xf32>
    %12 = arith.mulf %11, %8 : vector<1x128x128xf32>
    %13 = arith.select %10, %8, %12 : vector<1x128x128xi1>, vector<1x128x128xf32>
    %c0_6 = arith.constant 0 : index
    %c0_7 = arith.constant 0 : index
    %14 = vector.load %arg4[%c0_6, %c0_7] : memref<128x128xbf16, #tpu.memory_space<vmem>>, vector<128x128xbf16>
    %15 = vector.shape_cast %14 : vector<128x128xbf16> to vector<1x128x128xbf16>
    %cst_8 = arith.constant 0.000000e+00 : bf16
    %16 = vector.broadcast %cst_8 : bf16 to vector<1x128x128xbf16>
    %17 = arith.cmpf ogt, %15, %16 : vector<1x128x128xbf16>
    %cst_9 = arith.constant -1.000000e+30 : f32
    %18 = vector.broadcast %cst_9 : f32 to vector<1x128x128xf32>
    %19 = arith.select %17, %13, %18 : vector<1x128x128xi1>, vector<1x128x128xf32>
    %c0_10 = arith.constant 0 : index
    %c0_11 = arith.constant 0 : index
    %c0_12 = arith.constant 0 : index
    %20 = vector.load %arg8[%c0_10, %c0_11, %c0_12] : memref<1x128x1xf32, #tpu.memory_space<vmem>>, vector<1x128x1xf32>
    %cst_13 = arith.constant dense<0xFF800000> : vector<1x128xf32>
    %21 = vector.multi_reduction <maximumf>, %19, %cst_13 [2] : vector<1x128x128xf32> to vector<1x128xf32>
    %22 = vector.shape_cast %21 : vector<1x128xf32> to vector<1x128x1xf32>
    %23 = arith.maximumf %20, %22 : vector<1x128x1xf32>
    %24 = arith.subf %20, %23 : vector<1x128x1xf32>
    %25 = math.exp %24 : vector<1x128x1xf32>
    %26 = vector.broadcast %23 : vector<1x128x1xf32> to vector<1x128x128xf32>
    %27 = arith.subf %19, %26 : vector<1x128x128xf32>
    %28 = math.exp %27 : vector<1x128x128xf32>
    %c0_14 = arith.constant 0 : index
    %c0_15 = arith.constant 0 : index
    %c0_16 = arith.constant 0 : index
    %29 = vector.load %arg9[%c0_14, %c0_15, %c0_16] : memref<1x128x1xf32, #tpu.memory_space<vmem>>, vector<1x128x1xf32>
    %30 = arith.mulf %25, %29 : vector<1x128x1xf32>
    %cst_17 = arith.constant dense<0.000000e+00> : vector<1x128xf32>
    %31 = vector.multi_reduction <add>, %28, %cst_17 [2] : vector<1x128x128xf32> to vector<1x128xf32>
    %32 = vector.shape_cast %31 : vector<1x128xf32> to vector<1x128x1xf32>
    %33 = arith.addf %30, %32 : vector<1x128x1xf32>
    %c0_18 = arith.constant 0 : index
    %c0_19 = arith.constant 0 : index
    %c0_20 = arith.constant 0 : index
    %34 = vector.load %arg9[%c0_18, %c0_19, %c0_20] : memref<1x128x1xf32, #tpu.memory_space<vmem>>, vector<1x128x1xf32>
    tpu.vector_store %arg9[%c0_18, %c0_19, %c0_20], %33 {strides = array<i32>} : memref<1x128x1xf32, #tpu.memory_space<vmem>>, vector<1x128x1xf32>,
    %c0_21 = arith.constant 0 : index
    %c0_22 = arith.constant 0 : index
    %c0_23 = arith.constant 0 : index
    %35 = vector.load %arg10[%c0_21, %c0_22, %c0_23] : memref<1x128x16xf32, #tpu.memory_space<vmem>>, vector<1x128x16xf32>
    %36 = vector.broadcast %25 : vector<1x128x1xf32> to vector<1x128x16xf32>
    %37 = arith.mulf %36, %35 : vector<1x128x16xf32>
    %38 = arith.truncf %28 : vector<1x128x128xf32> to vector<1x128x128xbf16>
    %c0_24 = arith.constant 0 : index
    %c0_25 = arith.constant 0 : index
    %c0_26 = arith.constant 0 : index
    %39 = vector.load %arg5[%c0_24, %c0_25, %c0_26] : memref<1x128x16xbf16, #tpu.memory_space<vmem>>, vector<1x128x16xbf16>
    "tpu.trace_start"() <{level = 10 : i32, message = "hqk,hkd->hqd"}> : () -> ()
    %cst_27 = arith.constant dense<0.000000e+00> : vector<1x128x16xf32>
    %40 = tpu.matmul %38, %39, %cst_27 {dimension_numbers = #tpu.dot_dimension_numbers<[2], [1], [1], [2], [0, 0, 0, 1, 1, 2], [0], [0]>} : vector<1x128x128xbf16>, vector<1x128x16xbf16>, vector<1x128x16xf32> -> vector<1x128x16xf32>
    "tpu.trace_stop"() : () -> ()
    %41 = arith.addf %37, %40 : vector<1x128x16xf32>
    %c0_28 = arith.constant 0 : index
    %c0_29 = arith.constant 0 : index
    %c0_30 = arith.constant 0 : index
    %42 = vector.load %arg10[%c0_28, %c0_29, %c0_30] : memref<1x128x16xf32, #tpu.memory_space<vmem>>, vector<1x128x16xf32>
    tpu.vector_store %arg10[%c0_28, %c0_29, %c0_30], %41 {strides = array<i32>} : memref<1x128x16xf32, #tpu.memory_space<vmem>>, vector<1x128x16xf32>,
    %c0_31 = arith.constant 0 : index
    %c0_32 = arith.constant 0 : index
    %c0_33 = arith.constant 0 : index
    %43 = vector.load %arg8[%c0_31, %c0_32, %c0_33] : memref<1x128x1xf32, #tpu.memory_space<vmem>>, vector<1x128x1xf32>
    tpu.vector_store %arg8[%c0_31, %c0_32, %c0_33], %23 {strides = array<i32>} : memref<1x128x1xf32, #tpu.memory_space<vmem>>, vector<1x128x1xf32>,
    %c0_i32_34 = arith.constant 0 : i32
    %44 = arith.cmpi eq, %arg1, %c0_i32_34 : i32
    %45 = arith.extui %44 : i1 to i32
    %c0_i32_35 = arith.constant 0 : i32
    %46 = arith.cmpi ne, %45, %c0_i32_35 : i32
    scf.if %46 {
      %c0_36 = arith.constant 0 : index
      %c0_37 = arith.constant 0 : index
      %c0_38 = arith.constant 0 : index
      %47 = vector.load %arg10[%c0_36, %c0_37, %c0_38] : memref<1x128x16xf32, #tpu.memory_space<vmem>>, vector<1x128x16xf32>
      %c0_39 = arith.constant 0 : index
      %c0_40 = arith.constant 0 : index
      %c0_41 = arith.constant 0 : index
      %48 = vector.load %arg9[%c0_39, %c0_40, %c0_41] : memref<1x128x1xf32, #tpu.memory_space<vmem>>, vector<1x128x1xf32>
      %49 = tpu.reciprocal %48 {approx = true} : vector<1x128x1xf32> -> vector<1x128x1xf32>
      %50 = vector.broadcast %49 : vector<1x128x1xf32> to vector<1x128x16xf32>
      %51 = arith.mulf %47, %50 : vector<1x128x16xf32>
      %c0_42 = arith.constant 0 : index
      %c0_43 = arith.constant 0 : index
      %c0_44 = arith.constant 0 : index
      %52 = vector.load %arg6[%c0_42, %c0_43, %c0_44] : memref<1x1x16xf32, #tpu.memory_space<vmem>>, vector<1x1x16xf32>
      %53 = vector.broadcast %52 : vector<1x1x16xf32> to vector<1x128x16xf32>
      %54 = arith.addf %51, %53 : vector<1x128x16xf32>
      %c0_45 = arith.constant 0 : index
      %c0_46 = arith.constant 0 : index
      %c0_47 = arith.constant 0 : index
      %55 = vector.load %arg7[%c0_45, %c0_46, %c0_47] : memref<1x128x16xf32, #tpu.memory_space<vmem>>, vector<1x128x16xf32>
      tpu.vector_store %arg7[%c0_45, %c0_46, %c0_47], %54 {strides = array<i32>} : memref<1x128x16xf32, #tpu.memory_space<vmem>>, vector<1x128x16xf32>,
    } else {
    }
    return
  }
  func.func @transform_0(%arg0: i32, %arg1: i32) -> (i32, i32, i32) {
    %c0_i32 = arith.constant 0 : i32
    %c0_i32_0 = arith.constant 0 : i32
    %c0_i32_1 = arith.constant 0 : i32
    return %c0_i32, %arg0, %c0_i32_0 : i32, i32, i32
  }
  func.func @transform_1(%arg0: i32, %arg1: i32) -> (i32, i32) {
    %c0_i32 = arith.constant 0 : i32
    %c0_i32_0 = arith.constant 0 : i32
    return %c0_i32, %arg1 : i32, i32
  }
  func.func @transform_2(%arg0: i32, %arg1: i32) -> (i32, i32) {
    %c0_i32 = arith.constant 0 : i32
    return %arg0, %arg1 : i32, i32
  }
  func.func @transform_3(%arg0: i32, %arg1: i32) -> (i32, i32, i32) {
    %c0_i32 = arith.constant 0 : i32
    %c0_i32_0 = arith.constant 0 : i32
    %c0_i32_1 = arith.constant 0 : i32
    return %c0_i32, %arg1, %c0_i32_0 : i32, i32, i32
  }
  func.func @transform_4(%arg0: i32, %arg1: i32) -> (i32, i32, i32) {
    %c0_i32 = arith.constant 0 : i32
    %c0_i32_0 = arith.constant 0 : i32
    %c0_i32_1 = arith.constant 0 : i32
    %c0_i32_2 = arith.constant 0 : i32
    return %c0_i32, %c0_i32_0, %c0_i32_1 : i32, i32, i32
  }
  func.func @transform_5(%arg0: i32, %arg1: i32) -> (i32, i32, i32) {
    %c0_i32 = arith.constant 0 : i32
    %c0_i32_0 = arith.constant 0 : i32
    %c0_i32_1 = arith.constant 0 : i32
    return %c0_i32, %arg0, %c0_i32_0 : i32, i32, i32
  }
}

</mosaic_0001>

<bundles_post_ra>
// kernel: gatnet_forward.3
= control target key start
LH: loop header
LB: loop body
LE: loop exit
PB: predicated region body
PF: predicated region fallthrough
CT: control target
= control target key end

     0   :  { %vm85_vm0 = vcmask 130048   ;;  %s1344_s10 = smov 16   ;;  %s1345_s11 = smov 32   ;;  %v1347_v12 = vmov 0.0   ;;  %vm271_vm1 = vcmask 125952   ;;  %vm1037_vm2 = vcmask 523264   ;;  %s2556_s1 = inlined_call_operand.vmem [shape: bf16[16,64], index: 1, kind: input, shape index: {}]   ;;  %s2557_s0 = inlined_call_operand.vmem [shape: bf16[128,16], index: 0, kind: input, shape index: {}]   ;;  %s2558_s2 = inlined_call_operand.vmem [shape: f32[4,1,16], index: 2, kind: input, shape index: {}]   ;;  %s2559_s4 = inlined_call_operand.vmem [shape: bf16[4,128,16], index: 4, kind: output, shape index: {0}]   ;;  %s2560_s5 = inlined_call_operand.vmem [shape: f32[4,128,1], index: 5, kind: output, shape index: {1}]   ;;  %s2561_s3 = inlined_call_operand.vmem [shape: bf16[4,64], index: 3, kind: input, shape index: {}]   ;;  %s2562_s6 = inlined_call_operand.vmem [shape: f32[4,128], index: 6, kind: output, shape index: {2}]  }
   0x1   :  { %v1335_v0 = vld [vmem:[%s2556_s1] sm:$0xff]   ;;  %v1337_v2 = vld [vmem:[%s2557_s0 + $0x8] sm:$0xff]   ;;  %v1338_v3 = vld [vmem:[%s2557_s0 + $0x10] sm:$0xff]   ;;  %s1346_s16 = smov 48   ;;  %1307 = vmatprep.subr.bf16.mxu1 %v1347_v12  ;;  %s1349_s23 = smov 112   ;;  %vm359_vm3 = vcmask 7168  }
   0x2   :  { %v1336_v1 = vld [vmem:[%s2557_s0] sm:$0xff]   ;;  %1289 = vmatprep.subr.bf16.mxu0 %v1335_v0  ;;  %v1339_v6 = vld [vmem:[%s2557_s0 + $0x18] sm:$0xff]   ;;  %v1341_v9 = vld [vmem:[%s2557_s0 + $0x28] sm:$0xff]   ;;  %s1350_s13 = smov 80   ;;  %vm1351_vm4 = vmmov 0  }
   0x3   :  { %1290 = vmatpush3.bf16.msra.mxu0 %v1335_v0  ;;  %1291 = vmatprep.mubr.msk.bf16.mxu0 %vm85_vm0, %v1336_v1  ;;  %v1169_v4 = vld [vmem:[%s2558_s2 + $0x1] ss:$0 sm:$0xff]  ;;  %v1203_v5 = vld [vmem:[%s2558_s2 + $0x2] ss:$0 sm:$0xff]  ;;  %v1237_v8 = vld [vmem:[%s2558_s2 + $0x3] ss:$0 sm:$0xff] }
   0x4   :  { %448 = vrot.lane.b32.xlu0 %v1169_v4, %s1344_s10  ;;  %668 = vrot.lane.b32.xlu1 %v1203_v5, %s1345_s11  ;;  %v1340_v7 = vld [vmem:[%s2557_s0 + $0x20] sm:$0xff]   ;;  %v1342_v10 = vld [vmem:[%s2557_s0 + $0x30] sm:$0xff]  }
   0x5   :  { %v1343_v11 = vld [vmem:[%s2557_s0 + $0x38] sm:$0xff]   ;;  %s1348_s0 = smov 96   ;;  %v1579_v52 = vld [vmem:[%s2558_s2] ss:$0 sm:$0xff]  ;;  %1323 = vmatprep.mubr.msk.bf16.mxu1 %vm1351_vm4, %v1347_v12 }
   0x6   :  { %1292 = vmatmul.mubr.msk.bf16.vlgmr.msra.gmra.mrb[0].mxu0 %vm85_vm0, %v1337_v2 }
   0x7   :  { %1295 = vmatprep.mubr.msk.bf16.mxu0 %vm85_vm0, %v1338_v3 }
   0x8   :  { %888 = vrot.lane.b32.xlu0 %v1237_v8, %s1346_s16 }
   0xe   :  { %1296 = vmatmul.mubr.msk.bf16.gmra.mrb[4].mxu0 %vm85_vm0, %v1339_v6 }
   0xf   :  { %1299 = vmatprep.mubr.msk.bf16.mxu0 %vm85_vm0, %v1340_v7 }
  0x16   :  { %1300 = vmatmul.mubr.msk.bf16.gmra.mrb[8].mxu0 %vm85_vm0, %v1341_v9 }
  0x17   :  { %1303 = vmatprep.mubr.msk.bf16.mxu0 %vm85_vm0, %v1342_v10 }
  0x1e   :  { %1304 = vmatmul.mubr.msk.bf16.gmra.mrb[12].mxu0 %vm85_vm0, %v1343_v11 }
  0x76   :  { %v1432_v13 = vpop.permute.xlu1 %668  ;;  %v1462_v22 = vpop.permute.xlu0 %448 }
  0x7a   :  { %v1506_v32 = vpop.permute.xlu0 %888 }
  0xd9   :  { %v1434_v14 = vpop.f32.mrb[0].mxu0 }
  0xda   :  { %v1436_v15 = vpop.f32.mrb[1].mxu0  ;;  %v673_v16 = vmul.f32 %v1434_v14, %v1432_v13  ;;  %v1442_v17 = vpack.c.bf16 %v1434_v14, %v1434_v14  ;;  %v453_v24 = vmul.f32 %v1434_v14, %v1462_v22  ;;  %v893_v39 = vmul.f32 %v1434_v14, %v1506_v32 }
  0xdb   :  { %v1444_v18 = vpop.f32.mrb[2].mxu0  ;;  %v1448_v19 = vpack.c.bf16 %v1436_v15, %v1436_v15  ;;  %v671_v30 = vmul.f32 %v1432_v13, %v1436_v15  ;;  %v295_v53 = vmul.f32 %v1579_v52, %v1436_v15  ;;  %v297_v55 = vmul.f32 %v1434_v14, %v1579_v52 }
  0xdc   :  { %707 = vrot.lane.b32.xlu0 %v673_v16, %s1348_s0  ;;  %380 = vrot.lane.b32.xlu1 %v1442_v17, %s1349_s23  ;;  %274 = vst.msk [vmem:[%s2559_s4 + $0x8] sm:$0xf] %vm271_vm1, %v1442_v17  ;;  %v1458_v20 = vpop.f32.mrb[3].mxu0  ;;  %v208_v21 = vpack.c.bf16 %v1444_v18, %v1434_v14  ;;  %v1480_v27 = vpack.c.bf16 %v1444_v18, %v1444_v18 }
  0xdd   :  { %272 = vst.msk [vmem:[%s2559_s4] sm:$0xf] %vm271_vm1, %v1448_v19  ;;  %v207_v23 = vpack.c.bf16 %v1458_v20, %v1436_v15  ;;  %v1475_v25 = vpack.c.bf16 %v1458_v20, %v1458_v20  ;;  %v311_v54 = vsel %vm85_vm0, %v295_v53, 0.0  ;;  %v317_v56 = vsel %vm85_vm0, %v297_v55, 0.0 }
  0xde   :  { %275 = vst.msk [vmem:[%s2559_s4 + $0xc] sm:$0xf] %vm271_vm1, %v1480_v27  ;;  %v1045_v41 = vsel %vm1037_vm2, %v208_v21, 0  ;;  %v454_v57 = vmul.f32 %v1444_v18, %v1462_v22  ;;  %v451_v58 = vmul.f32 %v1462_v22, %v1436_v15  ;;  %v452_v59 = vmul.f32 %v1462_v22, %v1458_v20 }
  0xdf   :  { %v1042_v26 = vsel %vm1037_vm2, %v207_v23, 0  ;;  %273 = vst.msk [vmem:[%s2559_s4 + $0x4] sm:$0xf] %vm271_vm1, %v1475_v25  ;;  %v891_v60 = vmul.f32 %v1506_v32, %v1436_v15  ;;  %v892_v61 = vmul.f32 %v1506_v32, %v1458_v20  ;;  %v674_v62 = vmul.f32 %v1444_v18, %v1432_v13 }
  0xe0   :  { %487 = vrot.lane.b32.xlu1 %v453_v24, %s1349_s23  ;;  %376 = vrot.lane.b32.xlu0 %v1448_v19, %s1349_s23  ;;  %v894_v63 = vmul.f32 %v1444_v18, %v1506_v32  ;;  %v296_v0 = vmul.f32 %v1579_v52, %v1458_v20  ;;  %v298_v6 = vmul.f32 %v1444_v18, %v1579_v52 }
  0xe1   :  { %1308 = vmatpush3.bf16.xpose.msra.mxu1 %v1042_v26  ;;  %v1490_v28 = vpop.f32.mrb[4].mxu0  ;;  %v672_v23 = vmul.f32 %v1432_v13, %v1458_v20 }
  0xe2   :  { %v1497_v29 = vpop.f32.mrb[5].mxu0  ;;  %1309 = vmatprep.subr.bf16.mxu1 %v1347_v12  ;;  %v1504_v31 = vpack.c.bf16 %v1490_v28, %v1490_v28  ;;  %v314_v1 = vsel %vm85_vm0, %v296_v0, 0.0  ;;  %v320_v8 = vsel %vm85_vm0, %v298_v6, 0.0  ;;  %v457_v24 = vmul.f32 %v1490_v28, %v1462_v22 }
  0xe3   :  { %v1508_v33 = vpop.f32.mrb[6].mxu0  ;;  %v1524_v36 = vpack.c.bf16 %v1497_v29, %v1497_v29  ;;  %v301_v26 = vmul.f32 %v1490_v28, %v1579_v52  ;;  %v897_v20 = vmul.f32 %v1490_v28, %v1506_v32 }
  0xe4   :  { %600 = vrot.lane.b32.xlu1 %v1442_v17, %s1348_s0  ;;  %703 = vrot.lane.b32.xlu0 %v671_v30, %s1348_s0  ;;  %v1513_v34 = vpop.f32.mrb[7].mxu0  ;;  %278 = vst.msk [vmem:[%s2559_s4 + $0x18] sm:$0xf] %vm271_vm1, %v1504_v31  ;;  %v210_v35 = vpack.c.bf16 %v1508_v33, %v1490_v28  ;;  %v1530_v38 = vpack.c.bf16 %v1508_v33, %v1508_v33 }
  0xe5   :  { %v209_v37 = vpack.c.bf16 %v1513_v34, %v1497_v29  ;;  %276 = vst.msk [vmem:[%s2559_s4 + $0x10] sm:$0xf] %vm271_vm1, %v1524_v36  ;;  %v1546_v40 = vpack.c.bf16 %v1513_v34, %v1513_v34  ;;  %v329_v30 = vsel %vm85_vm0, %v301_v26, 0.0  ;;  %v302_v0 = vmul.f32 %v1508_v33, %v1579_v52 }
  0xe6   :  { %279 = vst.msk [vmem:[%s2559_s4 + $0x1c] sm:$0xf] %vm271_vm1, %v1530_v38  ;;  %v1051_v51 = vsel %vm1037_vm2, %v210_v35, 0  ;;  %v677_v35 = vmul.f32 %v1490_v28, %v1432_v13  ;;  %v895_v28 = vmul.f32 %v1506_v32, %v1497_v29  ;;  %v898_v6 = vmul.f32 %v1508_v33, %v1506_v32 }
  0xe7   :  { %277 = vst.msk [vmem:[%s2559_s4 + $0x14] sm:$0xf] %vm271_vm1, %v1546_v40  ;;  %v1048_v46 = vsel %vm1037_vm2, %v209_v37, 0  ;;  %v455_v37 = vmul.f32 %v1462_v22, %v1497_v29 }
  0xe8   :  { %927 = vrot.lane.b32.xlu1 %v893_v39, %s1350_s13  ;;  %v675_v39 = vmul.f32 %v1432_v13, %v1497_v29 }
  0xe9   :  { %1310 = vmatpush3.bf16.xpose.msra.mxu1 %v1045_v41  ;;  %v1550_v42 = vpop.f32.mrb[8].mxu0 }
  0xea   :  { %v1557_v43 = vpop.f32.mrb[9].mxu0  ;;  %1311 = vmatprep.subr.bf16.mxu1 %v1347_v12  ;;  %v1645_v11 = vpack.c.bf16 %v1550_v42, %v1550_v42 }
  0xeb   :  { %v1560_v44 = vpop.f32.mrb[10].mxu0  ;;  %v1658_v16 = vpack.c.bf16 %v1557_v43, %v1557_v43 }
  0xec   :  { %v1562_v45 = vpop.f32.mrb[11].mxu0  ;;  %282 = vst.msk [vmem:[%s2559_s4 + $0x28] sm:$0xf] %vm271_vm1, %v1645_v11  ;;  %v212_v14 = vpack.c.bf16 %v1560_v44, %v1550_v42  ;;  %v1662_v18 = vpack.c.bf16 %v1560_v44, %v1560_v44 }
  0xed   :  { %v211_v9 = vpack.c.bf16 %v1562_v45, %v1557_v43  ;;  %v1666_v21 = vpack.c.bf16 %v1562_v45, %v1562_v45  ;;  %280 = vst.msk [vmem:[%s2559_s4 + $0x20] sm:$0xf] %vm271_vm1, %v1658_v16 }
  0xee   :  { %v1057_v15 = vsel %vm1037_vm2, %v212_v14, 0  ;;  %283 = vst.msk [vmem:[%s2559_s4 + $0x2c] sm:$0xf] %vm271_vm1, %v1662_v18  ;;  %v896_v14 = vmul.f32 %v1506_v32, %v1513_v34 }
  0xef   :  { %v1054_v10 = vsel %vm1037_vm2, %v211_v9, 0  ;;  %281 = vst.msk [vmem:[%s2559_s4 + $0x24] sm:$0xf] %vm271_vm1, %v1666_v21 }
  0xf1   :  { %v1565_v47 = vpop.f32.mrb[12].mxu0  ;;  %1312 = vmatpush3.bf16.xpose.msra.mxu1 %v1048_v46 }
  0xf2   :  { %v1567_v48 = vpop.f32.mrb[13].mxu0  ;;  %1313 = vmatprep.subr.bf16.mxu1 %v1347_v12 }
  0xf3   :  { %v1570_v49 = vpop.f32.mrb[14].mxu0 }
  0xf4   :  { %v1572_v50 = vpop.f32.mrb[15].mxu0 }
  0xf5   :  { %v213_v26 = vpack.c.bf16 %v1572_v50, %v1567_v48 }
  0xf9   :  { %1314 = vmatpush3.bf16.xpose.msra.mxu1 %v1051_v51 }
  0xfa   :  { %1315 = vmatprep.subr.bf16.mxu1 %v1347_v12 }
 0x101   :  { %1316 = vmatpush3.bf16.xpose.msra.mxu1 %v1054_v10 }
 0x102   :  { %1317 = vmatprep.subr.bf16.mxu1 %v1347_v12 }
 0x103   :  { %312 = vadd.xlane.f32.xlu0 %v311_v54 }
 0x109   :  { %1318 = vmatpush3.bf16.xpose.msra.mxu1 %v1057_v15 }
 0x10a   :  { %1319 = vmatprep.subr.bf16.mxu1 %v1347_v12 }
 0x10c   :  { %318 = vadd.xlane.f32.xlu1 %v317_v56 }
 0x119   :  { %489 = vrot.lane.b32.xlu0 %v454_v57, %s1349_s23 }
 0x11d   :  { %483 = vrot.lane.b32.xlu1 %v451_v58, %s1349_s23  ;;  %485 = vrot.lane.b32.xlu0 %v452_v59, %s1349_s23 }
 0x121   :  { %596 = vrot.lane.b32.xlu1 %v1448_v19, %s1348_s0  ;;  %598 = vrot.lane.b32.xlu0 %v1475_v25, %s1348_s0 }
 0x125   :  { %923 = vrot.lane.b32.xlu1 %v891_v60, %s1350_s13  ;;  %925 = vrot.lane.b32.xlu0 %v892_v61, %s1350_s13  ;;  %v299_v61 = vmul.f32 %v1579_v52, %v1497_v29  ;;  %v458_v29 = vmul.f32 %v1508_v33, %v1462_v22 }
 0x129   :  { %382 = vrot.lane.b32.xlu1 %v1480_v27, %s1349_s23 }
 0x12d   :  { %602 = vrot.lane.b32.xlu1 %v1480_v27, %s1348_s0 }
 0x131   :  { %709 = vrot.lane.b32.xlu1 %v674_v62, %s1348_s0 }
 0x135   :  { %929 = vrot.lane.b32.xlu1 %v894_v63, %s1350_s13  ;;  %v323_v63 = vsel %vm85_vm0, %v299_v61, 0.0 }
 0x144   :  { %315 = vadd.xlane.f32.xlu0 %v314_v1  ;;  %v332_v1 = vsel %vm85_vm0, %v302_v0, 0.0  ;;  %v305_v0 = vmul.f32 %v1550_v42, %v1579_v52 }
 0x14e   :  { %v1619_v2 = vpop.permute.xlu0 %707  ;;  %v381_v3 = vpop.permute.xlu1 %380 }
 0x14f   :  { %1154 = vst.msk [vmem:[%s2559_s4 + $0x48] sm:$0xf] %vm271_vm1, %v381_v3  ;;  %v678_v3 = vmul.f32 %v1508_v33, %v1432_v13  ;;  %v676_v33 = vmul.f32 %v1432_v13, %v1513_v34 }
 0x152   :  { %v1625_v4 = vpop.permute.xlu1 %487  ;;  %v377_v5 = vpop.permute.xlu0 %376 }
 0x153   :  { %1152 = vst.msk [vmem:[%s2559_s4 + $0x40] sm:$0xf] %vm271_vm1, %v377_v5 }
 0x156   :  { %v601_v7 = vpop.permute.xlu1 %600  ;;  %v1711_v41 = vpop.permute.xlu0 %703 }
 0x157   :  { %1188 = vst.msk [vmem:[%s2559_s4 + $0x88] sm:$0xf] %vm271_vm1, %v601_v7 }
 0x159   :  { %321 = vadd.xlane.f32.xlu1 %v320_v8  ;;  %v456_v8 = vmul.f32 %v1462_v22, %v1513_v34 }
 0x15a   :  { %388 = vrot.lane.b32.xlu0 %v1504_v31, %s1349_s23  ;;  %v1726_v53 = vpop.permute.xlu1 %927 }
 0x16a   :  { %378 = vrot.lane.b32.xlu1 %v1475_v25, %s1349_s23 }
 0x16e   :  { %705 = vrot.lane.b32.xlu1 %v672_v23, %s1348_s0 }
 0x172   :  { %495 = vrot.lane.b32.xlu1 %v457_v24, %s1349_s23  ;;  %v300_v24 = vmul.f32 %v1579_v52, %v1513_v34 }
 0x176   :  { %608 = vrot.lane.b32.xlu1 %v1504_v31, %s1348_s0 }
 0x179   :  { %330 = vadd.xlane.f32.xlu0 %v329_v30  ;;  %v1060_v30 = vsel %vm1037_vm2, %v213_v26, 0  ;;  %v899_v26 = vmul.f32 %v1506_v32, %v1557_v43 }
 0x17a   :  { %715 = vrot.lane.b32.xlu1 %v677_v35, %s1348_s0  ;;  %1320 = vmatpush3.bf16.xpose.msra.mxu1 %v1060_v30  ;;  %v303_v30 = vmul.f32 %v1579_v52, %v1557_v43 }
 0x17b   :  { %1321 = vmatprep.subr.bf16.mxu1 %v1347_v12  ;;  %v684_v12 = vmul.f32 %v1432_v13, %v1572_v50 }
 0x17e   :  { %935 = vrot.lane.b32.xlu1 %v897_v20, %s1350_s13  ;;  %v326_v20 = vsel %vm85_vm0, %v300_v24, 0.0  ;;  %v679_v24 = vmul.f32 %v1432_v13, %v1557_v43 }
 0x182   :  { %491 = vrot.lane.b32.xlu1 %v455_v37, %s1349_s23  ;;  %v1812_v37 = vpack.c.bf16 %v1565_v47, %v1565_v47 }
 0x184   :  { %286 = vst.msk [vmem:[%s2559_s4 + $0x38] sm:$0xf] %vm271_vm1, %v1812_v37 }
 0x186   :  { %604 = vrot.lane.b32.xlu1 %v1524_v36, %s1348_s0 }
 0x18a   :  { %711 = vrot.lane.b32.xlu1 %v675_v39, %s1348_s0  ;;  %v214_v39 = vpack.c.bf16 %v1570_v49, %v1565_v47 }
 0x18e   :  { %931 = vrot.lane.b32.xlu1 %v895_v28, %s1350_s13  ;;  %v1063_v28 = vsel %vm1037_vm2, %v214_v39, 0  ;;  %v306_v39 = vmul.f32 %v1560_v44, %v1579_v52 }
 0x18f   :  { %384 = vrot.lane.b32.xlu0 %v1524_v36, %s1349_s23  ;;  %1322 = vmatpush3.bf16.xpose.msra.mxu1 %v1063_v28 }
 0x190   :  { %v313_v46 = vpop.xlane.xlu0 %312 }
 0x191   :  { %360 = vst.msk [vmem:[%s2560_s5] sm:$0xff] %vm359_vm3, %v313_v46  ;;  %v1831_v46 = vpack.c.bf16 %v1567_v48, %v1567_v48 }
 0x192   :  { %390 = vrot.lane.b32.xlu1 %v1530_v38, %s1349_s23 }
 0x193   :  { %284 = vst.msk [vmem:[%s2559_s4 + $0x30] sm:$0xf] %vm271_vm1, %v1831_v46 }
 0x194   :  { %v1724_v51 = vpop.permute.xlu0 %489 }
 0x198   :  { %v1728_v54 = vpop.permute.xlu0 %485 }
 0x199   :  { %v319_v55 = vpop.xlane.xlu1 %318 }
 0x19a   :  { %362 = vst.msk [vmem:[%s2560_s5 + $0x10] sm:$0xff] %vm359_vm3, %v319_v55  ;;  %v1835_v55 = vpack.c.bf16 %v1570_v49, %v1570_v49 }
 0x19c   :  { %v599_v56 = vpop.permute.xlu0 %598  ;;  %287 = vst.msk [vmem:[%s2559_s4 + $0x3c] sm:$0xf] %vm271_vm1, %v1835_v55 }
 0x19d   :  { %1187 = vst.msk [vmem:[%s2559_s4 + $0x84] sm:$0xf] %vm271_vm1, %v599_v56  ;;  %v1738_v57 = vpop.permute.xlu1 %483  ;;  %v1839_v56 = vpack.c.bf16 %v1572_v50, %v1572_v50 }
 0x19f   :  { %285 = vst.msk [vmem:[%s2559_s4 + $0x34] sm:$0xf] %vm271_vm1, %v1839_v56 }
 0x1a0   :  { %v1770_v5 = vpop.permute.xlu0 %925 }
 0x1a1   :  { %v597_v58 = vpop.permute.xlu1 %596 }
 0x1a2   :  { %1186 = vst.msk [vmem:[%s2559_s4 + $0x80] sm:$0xf] %vm271_vm1, %v597_v58 }
 0x1a5   :  { %v1744_v59 = vpop.permute.xlu1 %923 }
 0x1a9   :  { %v383_v60 = vpop.permute.xlu1 %382 }
 0x1aa   :  { %1155 = vst.msk [vmem:[%s2559_s4 + $0x4c] sm:$0xf] %vm271_vm1, %v383_v60 }
 0x1ad   :  { %v603_v62 = vpop.permute.xlu1 %602 }
 0x1ae   :  { %1189 = vst.msk [vmem:[%s2559_s4 + $0x8c] sm:$0xf] %vm271_vm1, %v603_v62  ;;  %324 = vadd.xlane.f32.xlu0 %v323_v63  ;;  %v461_v62 = vmul.f32 %v1550_v42, %v1462_v22 }
 0x1b1   :  { %v1790_v10 = vpop.permute.xlu1 %709 }
 0x1b5   :  { %v1796_v15 = vpop.permute.xlu1 %929 }
 0x1b6   :  { %333 = vadd.xlane.f32.xlu1 %v332_v1 }
 0x1c4   :  { %497 = vrot.lane.b32.xlu0 %v458_v29, %s1349_s23  ;;  %v341_v29 = vsel %vm85_vm0, %v305_v0, 0.0 }
 0x1c7   :  { %386 = vrot.lane.b32.xlu1 %v1546_v40, %s1349_s23 }
 0x1c8   :  { %610 = vrot.lane.b32.xlu0 %v1530_v38, %s1348_s0 }
 0x1cc   :  { %717 = vrot.lane.b32.xlu0 %v678_v3, %s1348_s0  ;;  %v681_v3 = vmul.f32 %v1550_v42, %v1432_v13 }
 0x1d0   :  { %937 = vrot.lane.b32.xlu0 %v898_v6, %s1350_s13 }
 0x1d1   :  { %v316_v7 = vpop.xlane.xlu0 %315 }
 0x1d2   :  { %361 = vst.msk [vmem:[%s2560_s5 + $0x8] sm:$0xff] %vm359_vm3, %v316_v7 }
 0x1d4   :  { %493 = vrot.lane.b32.xlu0 %v456_v8, %s1349_s23  ;;  %v901_v8 = vmul.f32 %v1550_v42, %v1506_v32 }
 0x1d5   :  { %v389_v9 = vpop.permute.xlu0 %388 }
 0x1d6   :  { %1158 = vst.msk [vmem:[%s2559_s4 + $0x58] sm:$0xf] %vm271_vm1, %v389_v9 }
 0x1d8   :  { %606 = vrot.lane.b32.xlu0 %v1546_v40, %s1348_s0 }
 0x1dc   :  { %713 = vrot.lane.b32.xlu0 %v676_v33, %s1348_s0 }
 0x1e0   :  { %933 = vrot.lane.b32.xlu0 %v896_v14, %s1350_s13  ;;  %v459_v14 = vmul.f32 %v1462_v22, %v1557_v43 }
 0x1e4   :  { %396 = vrot.lane.b32.xlu0 %v1645_v11, %s1349_s23 }
 0x1e6   :  { %v322_v23 = vpop.xlane.xlu1 %321 }
 0x1e7   :  { %363 = vst.msk [vmem:[%s2560_s5 + $0x18] sm:$0xff] %vm359_vm3, %v322_v23 }
 0x1ea   :  { %v379_v35 = vpop.permute.xlu1 %378 }
 0x1eb   :  { %1153 = vst.msk [vmem:[%s2559_s4 + $0x44] sm:$0xf] %vm271_vm1, %v379_v35  ;;  %327 = vadd.xlane.f32.xlu1 %v326_v20  ;;  %v335_v35 = vsel %vm85_vm0, %v303_v30, 0.0 }
 0x1ee   :  { %v1824_v34 = vpop.permute.xlu1 %705 }
 0x1f2   :  { %v1841_v58 = vpop.permute.xlu1 %495 }
 0x1f6   :  { %v609_v60 = vpop.permute.xlu1 %608 }
 0x1f7   :  { %1192 = vst.msk [vmem:[%s2559_s4 + $0x98] sm:$0xf] %vm271_vm1, %v609_v60  ;;  %v344_v60 = vsel %vm85_vm0, %v306_v39, 0.0 }
 0x1fa   :  { %v1862_v61 = vpop.permute.xlu1 %715 }
 0x1fc   :  { %503 = vrot.lane.b32.xlu1 %v461_v62, %s1349_s23 }
 0x1fe   :  { %v1867_v63 = vpop.permute.xlu1 %935 }
 0x200   :  { %616 = vrot.lane.b32.xlu1 %v1645_v11, %s1348_s0 }
 0x202   :  { %v1873_v1 = vpop.permute.xlu1 %491 }
 0x203   :  { %342 = vadd.xlane.f32.xlu0 %v341_v29 }
 0x204   :  { %723 = vrot.lane.b32.xlu1 %v681_v3, %s1348_s0 }
 0x206   :  { %v331_v6 = vpop.xlane.xlu0 %330  ;;  %v605_v7 = vpop.permute.xlu1 %604 }
 0x207   :  { %366 = vst.msk [vmem:[%s2560_s5 + $0x30] sm:$0xff] %vm359_vm3, %v331_v6  ;;  %v462_v6 = vmul.f32 %v1560_v44, %v1462_v22 }
 0x208   :  { %1190 = vst.msk [vmem:[%s2559_s4 + $0x90] sm:$0xf] %vm271_vm1, %v605_v7  ;;  %943 = vrot.lane.b32.xlu1 %v901_v8, %s1350_s13 }
 0x20a   :  { %v1890_v9 = vpop.permute.xlu1 %711  ;;  %v385_v33 = vpop.permute.xlu0 %384 }
 0x20b   :  { %1156 = vst.msk [vmem:[%s2559_s4 + $0x50] sm:$0xf] %vm271_vm1, %v385_v33  ;;  %v682_v33 = vmul.f32 %v1560_v44, %v1432_v13 }
 0x20c   :  { %499 = vrot.lane.b32.xlu1 %v459_v14, %s1349_s23 }
 0x20e   :  { %v1899_v42 = vpop.permute.xlu1 %931 }
 0x210   :  { %612 = vrot.lane.b32.xlu1 %v1658_v16, %s1348_s0 }
 0x212   :  { %v391_v23 = vpop.permute.xlu1 %390 }
 0x213   :  { %1159 = vst.msk [vmem:[%s2559_s4 + $0x5c] sm:$0xf] %vm271_vm1, %v391_v23  ;;  %v902_v23 = vmul.f32 %v1560_v44, %v1506_v32  ;;  %v680_v44 = vmul.f32 %v1432_v13, %v1562_v45 }
 0x214   :  { %719 = vrot.lane.b32.xlu1 %v679_v24, %s1348_s0 }
 0x218   :  { %939 = vrot.lane.b32.xlu1 %v899_v26, %s1350_s13  ;;  %v460_v26 = vmul.f32 %v1462_v22, %v1562_v45 }
 0x219   :  { %392 = vrot.lane.b32.xlu0 %v1658_v16, %s1349_s23 }
 0x21c   :  { %398 = vrot.lane.b32.xlu1 %v1662_v18, %s1349_s23 }
 0x238   :  { %336 = vadd.xlane.f32.xlu0 %v335_v35  ;;  %v900_v35 = vmul.f32 %v1506_v32, %v1562_v45 }
 0x23b   :  { %v325_v20 = vpop.xlane.xlu0 %324 }
 0x23c   :  { %364 = vst.msk [vmem:[%s2560_s5 + $0x20] sm:$0xff] %vm359_vm3, %v325_v20  ;;  %v304_v20 = vmul.f32 %v1579_v52, %v1562_v45  ;;  %v465_v45 = vmul.f32 %v1565_v47, %v1462_v22 }
 0x23e   :  { %v338_v39 = vsel %vm85_vm0, %v304_v20, 0.0 }
 0x23f   :  { %v1926_v28 = vpop.permute.xlu0 %497 }
 0x240   :  { %345 = vadd.xlane.f32.xlu1 %v344_v60 }
 0x243   :  { %v611_v62 = vpop.permute.xlu0 %610  ;;  %v334_v0 = vpop.xlane.xlu1 %333 }
 0x244   :  { %1193 = vst.msk [vmem:[%s2559_s4 + $0x9c] sm:$0xf] %vm271_vm1, %v611_v62 }
 0x245   :  { %367 = vst.msk [vmem:[%s2560_s5 + $0x38] sm:$0xff] %vm359_vm3, %v334_v0 }
 0x247   :  { %v1937_v43 = vpop.permute.xlu0 %717  ;;  %v387_v29 = vpop.permute.xlu1 %386 }
 0x248   :  { %1157 = vst.msk [vmem:[%s2559_s4 + $0x54] sm:$0xf] %vm271_vm1, %v387_v29 }
 0x24b   :  { %v1943_v3 = vpop.permute.xlu0 %937 }
 0x24e   :  { %505 = vrot.lane.b32.xlu0 %v462_v6, %s1349_s23 }
 0x24f   :  { %v1948_v7 = vpop.permute.xlu0 %493 }
 0x251   :  { %394 = vrot.lane.b32.xlu1 %v1666_v21, %s1349_s23 }
 0x252   :  { %618 = vrot.lane.b32.xlu0 %v1662_v18, %s1348_s0 }
 0x253   :  { %v607_v8 = vpop.permute.xlu0 %606 }
 0x254   :  { %1191 = vst.msk [vmem:[%s2559_s4 + $0x94] sm:$0xf] %vm271_vm1, %v607_v8  ;;  %v309_v8 = vmul.f32 %v1565_v47, %v1579_v52 }
 0x256   :  { %725 = vrot.lane.b32.xlu0 %v682_v33, %s1348_s0 }
 0x257   :  { %v1961_v14 = vpop.permute.xlu0 %713 }
 0x25a   :  { %945 = vrot.lane.b32.xlu0 %v902_v23, %s1350_s13  ;;  %v353_v23 = vsel %vm85_vm0, %v309_v8, 0.0  ;;  %v903_v8 = vmul.f32 %v1506_v32, %v1567_v48 }
 0x25b   :  { %v1966_v24 = vpop.permute.xlu0 %933 }
 0x25e   :  { %501 = vrot.lane.b32.xlu0 %v460_v26, %s1349_s23  ;;  %v685_v26 = vmul.f32 %v1565_v47, %v1432_v13 }
 0x25f   :  { %v397_v30 = vpop.permute.xlu0 %396 }
 0x260   :  { %1162 = vst.msk [vmem:[%s2559_s4 + $0x68] sm:$0xf] %vm271_vm1, %v397_v30 }
 0x262   :  { %614 = vrot.lane.b32.xlu0 %v1666_v21, %s1348_s0 }
 0x266   :  { %721 = vrot.lane.b32.xlu0 %v680_v44, %s1348_s0 }
 0x26a   :  { %941 = vrot.lane.b32.xlu0 %v900_v35, %s1350_s13  ;;  %v905_v35 = vmul.f32 %v1565_v47, %v1506_v32 }
 0x26e   :  { %404 = vrot.lane.b32.xlu0 %v1812_v37, %s1349_s23 }
 0x275   :  { %339 = vadd.xlane.f32.xlu1 %v338_v39 }
 0x278   :  { %v328_v60 = vpop.xlane.xlu1 %327 }
 0x279   :  { %365 = vst.msk [vmem:[%s2560_s5 + $0x28] sm:$0xff] %vm359_vm3, %v328_v60  ;;  %v463_v60 = vmul.f32 %v1462_v22, %v1567_v48 }
 0x27c   :  { %v1992_v62 = vpop.permute.xlu1 %503 }
 0x280   :  { %v617_v0 = vpop.permute.xlu1 %616 }
 0x281   :  { %1196 = vst.msk [vmem:[%s2559_s4 + $0xa8] sm:$0xf] %vm271_vm1, %v617_v0 }
 0x284   :  { %v1998_v29 = vpop.permute.xlu1 %723 }
 0x286   :  { %511 = vrot.lane.b32.xlu1 %v465_v45, %s1349_s23  ;;  %v683_v45 = vmul.f32 %v1432_v13, %v1567_v48 }
 0x288   :  { %v2003_v6 = vpop.permute.xlu1 %943 }
 0x28a   :  { %624 = vrot.lane.b32.xlu1 %v1812_v37, %s1348_s0 }
 0x28c   :  { %v2009_v33 = vpop.permute.xlu1 %499 }
 0x28d   :  { %354 = vadd.xlane.f32.xlu0 %v353_v23  ;;  %v307_v23 = vmul.f32 %v1579_v52, %v1567_v48 }
 0x28e   :  { %731 = vrot.lane.b32.xlu1 %v685_v26, %s1348_s0 }
 0x28f   :  { %v347_v26 = vsel %vm85_vm0, %v307_v23, 0.0  ;;  %v466_v23 = vmul.f32 %v1570_v49, %v1462_v22 }
 0x290   :  { %v343_v30 = vpop.xlane.xlu0 %342  ;;  %v613_v44 = vpop.permute.xlu1 %612 }
 0x291   :  { %370 = vst.msk [vmem:[%s2560_s5 + $0x50] sm:$0xff] %vm359_vm3, %v343_v30 }
 0x292   :  { %1194 = vst.msk [vmem:[%s2559_s4 + $0xa0] sm:$0xf] %vm271_vm1, %v613_v44  ;;  %951 = vrot.lane.b32.xlu1 %v905_v35, %s1350_s13  ;;  %v310_v44 = vmul.f32 %v1570_v49, %v1579_v52 }
 0x294   :  { %v2026_v20 = vpop.permute.xlu1 %719  ;;  %v393_v39 = vpop.permute.xlu0 %392 }
 0x295   :  { %1160 = vst.msk [vmem:[%s2559_s4 + $0x60] sm:$0xf] %vm271_vm1, %v393_v39  ;;  %v356_v39 = vsel %vm85_vm0, %v310_v44, 0.0  ;;  %v686_v44 = vmul.f32 %v1570_v49, %v1432_v13 }
 0x296   :  { %507 = vrot.lane.b32.xlu1 %v463_v60, %s1349_s23 }
 0x298   :  { %v2035_v47 = vpop.permute.xlu1 %939 }
 0x29a   :  { %620 = vrot.lane.b32.xlu1 %v1831_v46, %s1348_s0 }
 0x29c   :  { %v399_v0 = vpop.permute.xlu1 %398 }
 0x29d   :  { %1163 = vst.msk [vmem:[%s2559_s4 + $0x6c] sm:$0xf] %vm271_vm1, %v399_v0 }
 0x29e   :  { %727 = vrot.lane.b32.xlu1 %v683_v45, %s1348_s0 }
 0x2a2   :  { %947 = vrot.lane.b32.xlu1 %v903_v8, %s1350_s13 }
 0x2a3   :  { %400 = vrot.lane.b32.xlu0 %v1831_v46, %s1349_s23 }
 0x2a6   :  { %406 = vrot.lane.b32.xlu1 %v1835_v55, %s1349_s23 }
 0x2c2   :  { %348 = vadd.xlane.f32.xlu0 %v347_v26 }
 0x2c5   :  { %v337_v30 = vpop.xlane.xlu0 %336 }
 0x2c6   :  { %368 = vst.msk [vmem:[%s2560_s5 + $0x40] sm:$0xff] %vm359_vm3, %v337_v30 }
 0x2c9   :  { %v2062_v35 = vpop.permute.xlu0 %505 }
 0x2ca   :  { %357 = vadd.xlane.f32.xlu1 %v356_v39 }
 0x2cd   :  { %v619_v60 = vpop.permute.xlu0 %618  ;;  %v346_v0 = vpop.xlane.xlu1 %345 }
 0x2ce   :  { %1197 = vst.msk [vmem:[%s2559_s4 + $0xac] sm:$0xf] %vm271_vm1, %v619_v60  ;;  %v906_v60 = vmul.f32 %v1570_v49, %v1506_v32  ;;  %v308_v49 = vmul.f32 %v1579_v52, %v1572_v50 }
 0x2cf   :  { %371 = vst.msk [vmem:[%s2560_s5 + $0x58] sm:$0xff] %vm359_vm3, %v346_v0 }
 0x2d1   :  { %v2073_v48 = vpop.permute.xlu0 %725  ;;  %v395_v45 = vpop.permute.xlu1 %394 }
 0x2d2   :  { %1161 = vst.msk [vmem:[%s2559_s4 + $0x64] sm:$0xf] %vm271_vm1, %v395_v45  ;;  %v464_v45 = vmul.f32 %v1462_v22, %v1572_v50  ;;  %v904_v22 = vmul.f32 %v1506_v32, %v1572_v50  ;;  %v751_v32 = vsel %vm85_vm0, %v1711_v41, 0.0  ;;  %v549_v50 = vsel %vm85_vm0, %v1841_v58, 0.0 }
 0x2d3   :  { %v537_v41 = vsel %vm85_vm0, %v1625_v4, 0.0  ;;  %v561_v4 = vsel %vm85_vm0, %v1992_v62, 0.0  ;;  %v775_v62 = vsel %vm85_vm0, %v2026_v20, 0.0 }
 0x2d5   :  { %v2079_v8 = vpop.permute.xlu0 %945 }
 0x2d8   :  { %513 = vrot.lane.b32.xlu0 %v466_v23, %s1349_s23  ;;  %v1036_v23 = vld [vmem:[%s2561_s3] sm:$0x3] }
 0x2d9   :  { %v2084_v26 = vpop.permute.xlu0 %501  ;;  %1324 = vmatmul.mubr.msk.bf16.vlgmr.msra.gmra.mrb[0].mxu1 %vm1037_vm2, %v1036_v23 }
 0x2db   :  { %402 = vrot.lane.b32.xlu1 %v1839_v56, %s1349_s23 }
 0x2dc   :  { %626 = vrot.lane.b32.xlu0 %v1835_v55, %s1348_s0 }
 0x2dd   :  { %v615_v30 = vpop.permute.xlu0 %614 }
 0x2de   :  { %1195 = vst.msk [vmem:[%s2559_s4 + $0xa4] sm:$0xf] %vm271_vm1, %v615_v30 }
 0x2e0   :  { %733 = vrot.lane.b32.xlu0 %v686_v44, %s1348_s0  ;;  %v350_v44 = vsel %vm85_vm0, %v308_v49, 0.0  ;;  %v763_v49 = vsel %vm85_vm0, %v1890_v9, 0.0  ;;  %v555_v9 = vsel %vm85_vm0, %v2009_v33, 0.0  ;;  %v754_v33 = vsel %vm85_vm0, %v1824_v34, 0.0 }
 0x2e1   :  { %v2097_v39 = vpop.permute.xlu0 %721  ;;  %v781_v34 = vsel %vm85_vm0, %v1998_v29, 0.0  ;;  %v977_v29 = vsel %vm85_vm0, %v1726_v53, 0.0  ;;  %v995_v53 = vsel %vm85_vm0, %v2035_v47, 0.0 }
 0x2e4   :  { %953 = vrot.lane.b32.xlu0 %v906_v60, %s1350_s13 }
 0x2e5   :  { %v2102_v0 = vpop.permute.xlu0 %941 }
 0x2e8   :  { %509 = vrot.lane.b32.xlu0 %v464_v45, %s1349_s23  ;;  %v531_v45 = vsel %vm85_vm0, %v1738_v57, 0.0  ;;  %v769_v57 = vsel %vm85_vm0, %v1862_v61, 0.0 }
 0x2e9   :  { %v405_v30 = vpop.permute.xlu0 %404 }
 0x2ea   :  { %1166 = vst.msk [vmem:[%s2559_s4 + $0x78] sm:$0xf] %vm271_vm1, %v405_v30 }
 0x2ec   :  { %622 = vrot.lane.b32.xlu0 %v1839_v56, %s1348_s0 }
 0x2f0   :  { %729 = vrot.lane.b32.xlu0 %v684_v12, %s1348_s0  ;;  %v543_v12 = vsel %vm85_vm0, %v1873_v1, 0.0 }
 0x2f4   :  { %949 = vrot.lane.b32.xlu0 %v904_v22, %s1350_s13  ;;  %v757_v22 = vsel %vm85_vm0, %v1619_v2, 0.0 }
 0x2ff   :  { %351 = vadd.xlane.f32.xlu1 %v350_v44 }
 0x302   :  { %v340_v60 = vpop.xlane.xlu1 %339 }
 0x303   :  { %369 = vst.msk [vmem:[%s2560_s5 + $0x48] sm:$0xff] %vm359_vm3, %v340_v60  ;;  %532 = vadd.xlane.f32.xlu1 %v531_v45  ;;  %v540_v60 = vsel %vm85_vm0, %v1724_v51, 0.0  ;;  %v760_v51 = vsel %vm85_vm0, %v1790_v10, 0.0 }
 0x306   :  { %v512_v13 = vpop.permute.xlu1 %511 }
 0x307   :  { %752 = vadd.xlane.f32.xlu1 %v751_v32  ;;  %v534_v32 = vsel %vm85_vm0, %v1728_v54, 0.0  ;;  %v573_v10 = vsel %vm85_vm0, %v512_v13, 0.0  ;;  %v552_v54 = vsel %vm85_vm0, %v1926_v28, 0.0  ;;  %v772_v13 = vsel %vm85_vm0, %v1937_v43, 0.0 }
 0x308   :  { %v766_v28 = vsel %vm85_vm0, %v1961_v14, 0.0  ;;  %v564_v43 = vsel %vm85_vm0, %v2062_v35, 0.0  ;;  %v989_v14 = vsel %vm85_vm0, %v1867_v63, 0.0  ;;  %v1001_v35 = vsel %vm85_vm0, %v2003_v6, 0.0 }
 0x30a   :  { %v625_v23 = vpop.permute.xlu1 %624 }
 0x30b   :  { %1200 = vst.msk [vmem:[%s2559_s4 + $0xb8] sm:$0xf] %vm271_vm1, %v625_v23  ;;  %550 = vadd.xlane.f32.xlu1 %v549_v50 }
 0x30e   :  { %v732_v52 = vpop.permute.xlu1 %731 }
 0x30f   :  { %770 = vadd.xlane.f32.xlu1 %v769_v57  ;;  %v793_v50 = vsel %vm85_vm0, %v732_v52, 0.0  ;;  %v546_v57 = vsel %vm85_vm0, %v1948_v7, 0.0  ;;  %v558_v7 = vsel %vm85_vm0, %v2084_v26, 0.0  ;;  %v983_v52 = vsel %vm85_vm0, %v1899_v42, 0.0 }
 0x312   :  { %v2143_v30 = vpop.permute.xlu1 %951 }
 0x313   :  { %538 = vadd.xlane.f32.xlu0 %v537_v41  ;;  %544 = vadd.xlane.f32.xlu1 %v543_v12  ;;  %v971_v41 = vsel %vm85_vm0, %v1744_v59, 0.0  ;;  %v778_v59 = vsel %vm85_vm0, %v2097_v39, 0.0  ;;  %v1013_v63 = vsel %vm85_vm0, %v2143_v30, 0.0 }
 0x316   :  { %v508_v58 = vpop.permute.xlu1 %507 }
 0x317   :  { %758 = vadd.xlane.f32.xlu0 %v757_v22  ;;  %764 = vadd.xlane.f32.xlu1 %v763_v49  ;;  %v567_v20 = vsel %vm85_vm0, %v508_v58, 0.0 }
 0x31a   :  { %v355_v61 = vpop.xlane.xlu0 %354  ;;  %v621_v44 = vpop.permute.xlu1 %620 }
 0x31b   :  { %374 = vst.msk [vmem:[%s2560_s5 + $0x70] sm:$0xff] %vm359_vm3, %v355_v61  ;;  %541 = vadd.xlane.f32.xlu0 %v540_v60  ;;  %562 = vadd.xlane.f32.xlu1 %v561_v4  ;;  %v784_v60 = vsel %vm85_vm0, %v2073_v48, 0.0 }
 0x31c   :  { %1198 = vst.msk [vmem:[%s2559_s4 + $0xb0] sm:$0xf] %vm271_vm1, %v621_v44 }
 0x31e   :  { %v2165_v2 = vpop.permute.xlu1 %727  ;;  %v401_v1 = vpop.permute.xlu0 %400 }
 0x31f   :  { %1164 = vst.msk [vmem:[%s2559_s4 + $0x70] sm:$0xf] %vm271_vm1, %v401_v1  ;;  %761 = vadd.xlane.f32.xlu0 %v760_v51  ;;  %556 = vadd.xlane.f32.xlu1 %v555_v9  ;;  %v787_v4 = vsel %vm85_vm0, %v2165_v2, 0.0 }
 0x322   :  { %v948_v45 = vpop.permute.xlu1 %947 }
 0x323   :  { %535 = vadd.xlane.f32.xlu0 %v534_v32  ;;  %776 = vadd.xlane.f32.xlu1 %v775_v62  ;;  %v1007_v42 = vsel %vm85_vm0, %v948_v45, 0.0 }
 0x326   :  { %v407_v23 = vpop.permute.xlu1 %406 }
 0x327   :  { %1167 = vst.msk [vmem:[%s2559_s4 + $0x7c] sm:$0xf] %vm271_vm1, %v407_v23  ;;  %755 = vadd.xlane.f32.xlu0 %v754_v33  ;;  %574 = vadd.xlane.f32.xlu1 %v573_v10 }
 0x32b   :  { %553 = vadd.xlane.f32.xlu0 %v552_v54  ;;  %568 = vadd.xlane.f32.xlu1 %v567_v20 }
 0x32f   :  { %773 = vadd.xlane.f32.xlu0 %v772_v13  ;;  %782 = vadd.xlane.f32.xlu1 %v781_v34 }
 0x333   :  { %547 = vadd.xlane.f32.xlu0 %v546_v57  ;;  %794 = vadd.xlane.f32.xlu1 %v793_v50 }
 0x337   :  { %767 = vadd.xlane.f32.xlu0 %v766_v28  ;;  %972 = vadd.xlane.f32.xlu1 %v971_v41 }
 0x33b   :  { %565 = vadd.xlane.f32.xlu0 %v564_v43  ;;  %978 = vadd.xlane.f32.xlu1 %v977_v29 }
 0x33f   :  { %559 = vadd.xlane.f32.xlu0 %v558_v7  ;;  %984 = vadd.xlane.f32.xlu1 %v983_v52 }
 0x343   :  { %779 = vadd.xlane.f32.xlu0 %v778_v59  ;;  %990 = vadd.xlane.f32.xlu1 %v989_v14 }
 0x347   :  { %996 = vadd.xlane.f32.xlu1 %v995_v53 }
 0x34b   :  { %1002 = vadd.xlane.f32.xlu1 %v1001_v35 }
 0x34f   :  { %v349_v26 = vpop.xlane.xlu0 %348  ;;  %1008 = vadd.xlane.f32.xlu1 %v1007_v42 }
 0x350   :  { %372 = vst.msk [vmem:[%s2560_s5 + $0x60] sm:$0xff] %vm359_vm3, %v349_v26 }
 0x353   :  { %v514_v39 = vpop.permute.xlu0 %513  ;;  %1014 = vadd.xlane.f32.xlu1 %v1013_v63 }
 0x354   :  { %v576_v47 = vsel %vm85_vm0, %v514_v39, 0.0 }
 0x355   :  { %577 = vadd.xlane.f32.xlu0 %v576_v47 }
 0x357   :  { %v627_v12 = vpop.permute.xlu0 %626  ;;  %v358_v6 = vpop.xlane.xlu1 %357 }
 0x358   :  { %1201 = vst.msk [vmem:[%s2559_s4 + $0xbc] sm:$0xf] %vm271_vm1, %v627_v12 }
 0x359   :  { %375 = vst.msk [vmem:[%s2560_s5 + $0x78] sm:$0xff] %vm359_vm3, %v358_v6 }
 0x35b   :  { %v734_v58 = vpop.permute.xlu0 %733  ;;  %v403_v22 = vpop.permute.xlu1 %402 }
 0x35c   :  { %1165 = vst.msk [vmem:[%s2559_s4 + $0x74] sm:$0xf] %vm271_vm1, %v403_v22 }
 0x35f   :  { %v954_v30 = vpop.permute.xlu0 %953 }
 0x363   :  { %v510_v49 = vpop.permute.xlu0 %509 }
 0x364   :  { %v570_v61 = vsel %vm85_vm0, %v510_v49, 0.0  ;;  %816 = vrot.lane.b32.xlu1 %v1448_v19, %s1350_s13 }
 0x365   :  { %571 = vadd.xlane.f32.xlu0 %v570_v61 }
 0x367   :  { %v623_v44 = vpop.permute.xlu0 %622 }
 0x368   :  { %1199 = vst.msk [vmem:[%s2559_s4 + $0xb4] sm:$0xf] %vm271_vm1, %v623_v44  ;;  %820 = vrot.lane.b32.xlu1 %v1442_v17, %s1350_s13  ;;  %v796_v17 = vsel %vm85_vm0, %v734_v58, 0.0 }
 0x369   :  { %785 = vadd.xlane.f32.xlu0 %v784_v60 }
 0x36b   :  { %v730_v19 = vpop.permute.xlu0 %729 }
 0x36c   :  { %822 = vrot.lane.b32.xlu1 %v1480_v27, %s1350_s13  ;;  %v790_v1 = vsel %vm85_vm0, %v730_v19, 0.0  ;;  %v974_v27 = vsel %vm85_vm0, %v1770_v5, 0.0 }
 0x36d   :  { %788 = vadd.xlane.f32.xlu0 %v787_v4 }
 0x370   :  { %824 = vrot.lane.b32.xlu1 %v1524_v36, %s1350_s13  ;;  %v980_v36 = vsel %vm85_vm0, %v1796_v15, 0.0  ;;  %v1004_v15 = vsel %vm85_vm0, %v2079_v8, 0.0 }
 0x371   :  { %791 = vadd.xlane.f32.xlu0 %v790_v1 }
 0x374   :  { %828 = vrot.lane.b32.xlu1 %v1504_v31, %s1350_s13  ;;  %v986_v31 = vsel %vm85_vm0, %v1966_v24, 0.0 }
 0x375   :  { %797 = vadd.xlane.f32.xlu0 %v796_v17 }
 0x378   :  { %832 = vrot.lane.b32.xlu1 %v1658_v16, %s1350_s13  ;;  %v992_v16 = vsel %vm85_vm0, %v1943_v3, 0.0  ;;  %v1016_v3 = vsel %vm85_vm0, %v954_v30, 0.0 }
 0x379   :  { %975 = vadd.xlane.f32.xlu0 %v974_v27 }
 0x37c   :  { %836 = vrot.lane.b32.xlu1 %v1645_v11, %s1350_s13  ;;  %v998_v11 = vsel %vm85_vm0, %v2102_v0, 0.0 }
 0x37d   :  { %981 = vadd.xlane.f32.xlu0 %v980_v36 }
 0x380   :  { %840 = vrot.lane.b32.xlu1 %v1831_v46, %s1350_s13  ;;  %v950_v46 = vpop.permute.xlu0 %949 }
 0x381   :  { %987 = vadd.xlane.f32.xlu0 %v986_v31 }
 0x384   :  { %844 = vrot.lane.b32.xlu1 %v1812_v37, %s1350_s13  ;;  %v1010_v37 = vsel %vm85_vm0, %v950_v46, 0.0 }
 0x385   :  { %993 = vadd.xlane.f32.xlu0 %v992_v16 }
 0x389   :  { %999 = vadd.xlane.f32.xlu0 %v998_v11 }
 0x38c   :  { %v352_v5 = vpop.xlane.xlu1 %351 }
 0x38d   :  { %373 = vst.msk [vmem:[%s2560_s5 + $0x68] sm:$0xff] %vm359_vm3, %v352_v5  ;;  %1005 = vadd.xlane.f32.xlu0 %v1004_v15 }
 0x390   :  { %v533_v24 = vpop.xlane.xlu1 %532 }
 0x391   :  { %1170 = vst.msk [vmem:[%s2560_s5 + $0x80] sm:$0xff] %vm359_vm3, %v533_v24  ;;  %1011 = vadd.xlane.f32.xlu0 %v1010_v37 }
 0x394   :  { %v753_v48 = vpop.xlane.xlu1 %752 }
 0x395   :  { %1204 = vst.msk [vmem:[%s2560_s5 + $0x100] sm:$0xff] %vm359_vm3, %v753_v48  ;;  %1017 = vadd.xlane.f32.xlu0 %v1016_v3 }
 0x398   :  { %v551_v8 = vpop.xlane.xlu1 %550 }
 0x399   :  { %1176 = vst.msk [vmem:[%s2560_s5 + $0xb0] sm:$0xff] %vm359_vm3, %v551_v8 }
 0x39c   :  { %v771_v0 = vpop.xlane.xlu1 %770 }
 0x39d   :  { %1210 = vst.msk [vmem:[%s2560_s5 + $0x130] sm:$0xff] %vm359_vm3, %v771_v0 }
 0x3a0   :  { %v539_v2 = vpop.xlane.xlu0 %538  ;;  %v545_v51 = vpop.xlane.xlu1 %544 }
 0x3a1   :  { %1172 = vst.msk [vmem:[%s2560_s5 + $0x90] sm:$0xff] %vm359_vm3, %v539_v2  ;;  %1174 = vst.msk [vmem:[%s2560_s5 + $0xa0] sm:$0xff] %vm359_vm3, %v545_v51 }
 0x3a4   :  { %v759_v9 = vpop.xlane.xlu0 %758  ;;  %v765_v62 = vpop.xlane.xlu1 %764 }
 0x3a5   :  { %1206 = vst.msk [vmem:[%s2560_s5 + $0x110] sm:$0xff] %vm359_vm3, %v759_v9  ;;  %1208 = vst.msk [vmem:[%s2560_s5 + $0x120] sm:$0xff] %vm359_vm3, %v765_v62 }
 0x3a8   :  { %v542_v45 = vpop.xlane.xlu0 %541  ;;  %v563_v32 = vpop.xlane.xlu1 %562 }
 0x3a9   :  { %1173 = vst.msk [vmem:[%s2560_s5 + $0x98] sm:$0xff] %vm359_vm3, %v542_v45  ;;  %1180 = vst.msk [vmem:[%s2560_s5 + $0xd0] sm:$0xff] %vm359_vm3, %v563_v32 }
 0x3ab   :  { %818 = vrot.lane.b32.xlu0 %v1475_v25, %s1350_s13 }
 0x3ac   :  { %v762_v10 = vpop.xlane.xlu0 %761  ;;  %v557_v23 = vpop.xlane.xlu1 %556 }
 0x3ad   :  { %1207 = vst.msk [vmem:[%s2560_s5 + $0x118] sm:$0xff] %vm359_vm3, %v762_v10  ;;  %1178 = vst.msk [vmem:[%s2560_s5 + $0xc0] sm:$0xff] %vm359_vm3, %v557_v23 }
 0x3af   :  { %826 = vrot.lane.b32.xlu0 %v1546_v40, %s1350_s13 }
 0x3b0   :  { %v536_v33 = vpop.xlane.xlu0 %535  ;;  %v777_v20 = vpop.xlane.xlu1 %776 }
 0x3b1   :  { %1171 = vst.msk [vmem:[%s2560_s5 + $0x88] sm:$0xff] %vm359_vm3, %v536_v33  ;;  %1212 = vst.msk [vmem:[%s2560_s5 + $0x140] sm:$0xff] %vm359_vm3, %v777_v20 }
 0x3b3   :  { %830 = vrot.lane.b32.xlu0 %v1530_v38, %s1350_s13  ;;  %v1099_v38 = vpop.f32.mrb[0].mxu1 }
 0x3b4   :  { %v756_v25 = vpop.xlane.xlu0 %755  ;;  %v575_v54 = vpop.xlane.xlu1 %574  ;;  %1105 = vst [vmem:[%s2562_s6] sm:$0xf] %v1099_v38 }
 0x3b5   :  { %1205 = vst.msk [vmem:[%s2560_s5 + $0x108] sm:$0xff] %vm359_vm3, %v756_v25  ;;  %1184 = vst.msk [vmem:[%s2560_s5 + $0xf0] sm:$0xff] %vm359_vm3, %v575_v54 }
 0x3b7   :  { %834 = vrot.lane.b32.xlu0 %v1666_v21, %s1350_s13  ;;  %v1325_v21 = vpop.f32.mrb[1].mxu1 }
 0x3b8   :  { %v554_v40 = vpop.xlane.xlu0 %553  ;;  %v569_v13 = vpop.xlane.xlu1 %568 }
 0x3b9   :  { %1177 = vst.msk [vmem:[%s2560_s5 + $0xb8] sm:$0xff] %vm359_vm3, %v554_v40  ;;  %1182 = vst.msk [vmem:[%s2560_s5 + $0xe0] sm:$0xff] %vm359_vm3, %v569_v13  ;;  %v1102_v57 = vpop.f32.mrb[2].mxu1 }
 0x3ba   :  { %v1326_v28 = vpop.f32.mrb[3].mxu1 }
 0x3bb   :  { %838 = vrot.lane.b32.xlu0 %v1662_v18, %s1350_s13 }
 0x3bc   :  { %v774_v34 = vpop.xlane.xlu0 %773  ;;  %v783_v50 = vpop.xlane.xlu1 %782 }
 0x3bd   :  { %1211 = vst.msk [vmem:[%s2560_s5 + $0x138] sm:$0xff] %vm359_vm3, %v774_v34  ;;  %1214 = vst.msk [vmem:[%s2560_s5 + $0x150] sm:$0xff] %vm359_vm3, %v783_v50 }
 0x3bf   :  { %842 = vrot.lane.b32.xlu0 %v1839_v56, %s1350_s13 }
 0x3c0   :  { %v548_v18 = vpop.xlane.xlu0 %547  ;;  %v795_v41 = vpop.xlane.xlu1 %794 }
 0x3c1   :  { %1175 = vst.msk [vmem:[%s2560_s5 + $0xa8] sm:$0xff] %vm359_vm3, %v548_v18  ;;  %1218 = vst.msk [vmem:[%s2560_s5 + $0x170] sm:$0xff] %vm359_vm3, %v795_v41 }
 0x3c3   :  { %846 = vrot.lane.b32.xlu0 %v1835_v55, %s1350_s13 }
 0x3c4   :  { %v768_v43 = vpop.xlane.xlu0 %767  ;;  %v973_v29 = vpop.xlane.xlu1 %972 }
 0x3c5   :  { %1209 = vst.msk [vmem:[%s2560_s5 + $0x128] sm:$0xff] %vm359_vm3, %v768_v43  ;;  %1238 = vst.msk [vmem:[%s2560_s5 + $0x180] sm:$0xff] %vm359_vm3, %v973_v29 }
 0x3c8   :  { %v566_v56 = vpop.xlane.xlu0 %565  ;;  %v979_v7 = vpop.xlane.xlu1 %978 }
 0x3c9   :  { %1181 = vst.msk [vmem:[%s2560_s5 + $0xd8] sm:$0xff] %vm359_vm3, %v566_v56  ;;  %1240 = vst.msk [vmem:[%s2560_s5 + $0x190] sm:$0xff] %vm359_vm3, %v979_v7 }
 0x3cc   :  { %v560_v55 = vpop.xlane.xlu0 %559  ;;  %v985_v52 = vpop.xlane.xlu1 %984 }
 0x3cd   :  { %1179 = vst.msk [vmem:[%s2560_s5 + $0xc8] sm:$0xff] %vm359_vm3, %v560_v55  ;;  %1242 = vst.msk [vmem:[%s2560_s5 + $0x1a0] sm:$0xff] %vm359_vm3, %v985_v52 }
 0x3d0   :  { %v780_v59 = vpop.xlane.xlu0 %779  ;;  %v991_v14 = vpop.xlane.xlu1 %990 }
 0x3d1   :  { %1213 = vst.msk [vmem:[%s2560_s5 + $0x148] sm:$0xff] %vm359_vm3, %v780_v59  ;;  %1244 = vst.msk [vmem:[%s2560_s5 + $0x1b0] sm:$0xff] %vm359_vm3, %v991_v14 }
 0x3d4   :  { %v997_v53 = vpop.xlane.xlu1 %996 }
 0x3d5   :  { %1246 = vst.msk [vmem:[%s2560_s5 + $0x1c0] sm:$0xff] %vm359_vm3, %v997_v53 }
 0x3d8   :  { %v1003_v35 = vpop.xlane.xlu1 %1002 }
 0x3d9   :  { %1248 = vst.msk [vmem:[%s2560_s5 + $0x1d0] sm:$0xff] %vm359_vm3, %v1003_v35 }
 0x3dc   :  { %v1009_v42 = vpop.xlane.xlu1 %1008 }
 0x3dd   :  { %1250 = vst.msk [vmem:[%s2560_s5 + $0x1e0] sm:$0xff] %vm359_vm3, %v1009_v42 }
 0x3e0   :  { %v1015_v26 = vpop.xlane.xlu1 %1014 }
 0x3e1   :  { %1252 = vst.msk [vmem:[%s2560_s5 + $0x1f0] sm:$0xff] %vm359_vm3, %v1015_v26 }
 0x3e2   :  { %v578_v63 = vpop.xlane.xlu0 %577 }
 0x3e3   :  { %1185 = vst.msk [vmem:[%s2560_s5 + $0xf8] sm:$0xff] %vm359_vm3, %v578_v63 }
 0x3e4   :  { %v817_v39 = vpop.permute.xlu1 %816 }
 0x3e5   :  { %1220 = vst.msk [vmem:[%s2559_s4 + $0xc0] sm:$0xf] %vm271_vm1, %v817_v39 }
 0x3e8   :  { %v821_v47 = vpop.permute.xlu1 %820 }
 0x3e9   :  { %1222 = vst.msk [vmem:[%s2559_s4 + $0xc8] sm:$0xf] %vm271_vm1, %v821_v47 }
 0x3ec   :  { %v823_v12 = vpop.permute.xlu1 %822 }
 0x3ed   :  { %1223 = vst.msk [vmem:[%s2559_s4 + $0xcc] sm:$0xf] %vm271_vm1, %v823_v12 }
 0x3f0   :  { %v825_v6 = vpop.permute.xlu1 %824 }
 0x3f1   :  { %1224 = vst.msk [vmem:[%s2559_s4 + $0xd0] sm:$0xf] %vm271_vm1, %v825_v6 }
 0x3f2   :  { %v572_v58 = vpop.xlane.xlu0 %571 }
 0x3f3   :  { %1183 = vst.msk [vmem:[%s2560_s5 + $0xe8] sm:$0xff] %vm359_vm3, %v572_v58 }
 0x3f4   :  { %v829_v22 = vpop.permute.xlu1 %828 }
 0x3f5   :  { %1226 = vst.msk [vmem:[%s2559_s4 + $0xd8] sm:$0xf] %vm271_vm1, %v829_v22 }
 0x3f6   :  { %v786_v30 = vpop.xlane.xlu0 %785 }
 0x3f7   :  { %1215 = vst.msk [vmem:[%s2560_s5 + $0x158] sm:$0xff] %vm359_vm3, %v786_v30 }
 0x3f8   :  { %v833_v49 = vpop.permute.xlu1 %832 }
 0x3f9   :  { %1228 = vst.msk [vmem:[%s2559_s4 + $0xe0] sm:$0xf] %vm271_vm1, %v833_v49 }
 0x3fa   :  { %v789_v61 = vpop.xlane.xlu0 %788 }
 0x3fb   :  { %1216 = vst.msk [vmem:[%s2560_s5 + $0x160] sm:$0xff] %vm359_vm3, %v789_v61 }
 0x3fc   :  { %v837_v44 = vpop.permute.xlu1 %836 }
 0x3fd   :  { %1230 = vst.msk [vmem:[%s2559_s4 + $0xe8] sm:$0xf] %vm271_vm1, %v837_v44 }
 0x3fe   :  { %v792_v60 = vpop.xlane.xlu0 %791 }
 0x3ff   :  { %1217 = vst.msk [vmem:[%s2560_s5 + $0x168] sm:$0xff] %vm359_vm3, %v792_v60 }
 0x400   :  { %v841_v4 = vpop.permute.xlu1 %840 }
 0x401   :  { %1232 = vst.msk [vmem:[%s2559_s4 + $0xf0] sm:$0xf] %vm271_vm1, %v841_v4 }
 0x402   :  { %v798_v19 = vpop.xlane.xlu0 %797 }
 0x403   :  { %1219 = vst.msk [vmem:[%s2560_s5 + $0x178] sm:$0xff] %vm359_vm3, %v798_v19 }
 0x404   :  { %v845_v1 = vpop.permute.xlu1 %844 }
 0x405   :  { %1234 = vst.msk [vmem:[%s2559_s4 + $0xf8] sm:$0xf] %vm271_vm1, %v845_v1 }
 0x406   :  { %v976_v17 = vpop.xlane.xlu0 %975 }
 0x407   :  { %1239 = vst.msk [vmem:[%s2560_s5 + $0x188] sm:$0xff] %vm359_vm3, %v976_v17 }
 0x40a   :  { %v982_v27 = vpop.xlane.xlu0 %981 }
 0x40b   :  { %1241 = vst.msk [vmem:[%s2560_s5 + $0x198] sm:$0xff] %vm359_vm3, %v982_v27 }
 0x40e   :  { %v988_v36 = vpop.xlane.xlu0 %987 }
 0x40f   :  { %1243 = vst.msk [vmem:[%s2560_s5 + $0x1a8] sm:$0xff] %vm359_vm3, %v988_v36 }
 0x412   :  { %v994_v31 = vpop.xlane.xlu0 %993 }
 0x413   :  { %1245 = vst.msk [vmem:[%s2560_s5 + $0x1b8] sm:$0xff] %vm359_vm3, %v994_v31 }
 0x416   :  { %v1000_v16 = vpop.xlane.xlu0 %999 }
 0x417   :  { %1247 = vst.msk [vmem:[%s2560_s5 + $0x1c8] sm:$0xff] %vm359_vm3, %v1000_v16 }
 0x41a   :  { %v1006_v11 = vpop.xlane.xlu0 %1005 }
 0x41b   :  { %1249 = vst.msk [vmem:[%s2560_s5 + $0x1d8] sm:$0xff] %vm359_vm3, %v1006_v11 }
 0x41e   :  { %v1012_v5 = vpop.xlane.xlu0 %1011 }
 0x41f   :  { %1251 = vst.msk [vmem:[%s2560_s5 + $0x1e8] sm:$0xff] %vm359_vm3, %v1012_v5 }
 0x422   :  { %v1018_v15 = vpop.xlane.xlu0 %1017 }
 0x423   :  { %1253 = vst.msk [vmem:[%s2560_s5 + $0x1f8] sm:$0xff] %vm359_vm3, %v1018_v15 }
 0x426   :  { %v819_v46 = vpop.permute.xlu0 %818 }
 0x427   :  { %1221 = vst.msk [vmem:[%s2559_s4 + $0xc4] sm:$0xf] %vm271_vm1, %v819_v46 }
 0x42a   :  { %v827_v37 = vpop.permute.xlu0 %826 }
 0x42b   :  { %1225 = vst.msk [vmem:[%s2559_s4 + $0xd4] sm:$0xf] %vm271_vm1, %v827_v37 }
 0x42e   :  { %v831_v24 = vpop.permute.xlu0 %830 }
 0x42f   :  { %1227 = vst.msk [vmem:[%s2559_s4 + $0xdc] sm:$0xf] %vm271_vm1, %v831_v24 }
 0x432   :  { %v835_v3 = vpop.permute.xlu0 %834 }
 0x433   :  { %1229 = vst.msk [vmem:[%s2559_s4 + $0xe4] sm:$0xf] %vm271_vm1, %v835_v3 }
 0x436   :  { %v839_v48 = vpop.permute.xlu0 %838 }
 0x437   :  { %1231 = vst.msk [vmem:[%s2559_s4 + $0xec] sm:$0xf] %vm271_vm1, %v839_v48 }
 0x43a   :  { %v843_v8 = vpop.permute.xlu0 %842 }
 0x43b   :  { %1233 = vst.msk [vmem:[%s2559_s4 + $0xf4] sm:$0xf] %vm271_vm1, %v843_v8 }
 0x43e   :  { %v847_v0 = vpop.permute.xlu0 %846 }
 0x43f   :  { %1235 = vst.msk [vmem:[%s2559_s4 + $0xfc] sm:$0xf] %vm271_vm1, %v847_v0 }

// kernel: gatnet_forward.5
= control target key start
LH: loop header
LB: loop body
LE: loop exit
PB: predicated region body
PF: predicated region fallthrough
CT: control target
= control target key end

     0   :  { %v1380_v0 = vmov 0   ;;  %vm27_vm0 = vcmask 7168   ;;  %v1381_v17 = vmov -1e+30   ;;  %s2183_s0 = inlined_call_operand.vmem [shape: f32[1,128,1], index: 0, kind: input, shape index: {}]   ;;  %s2184_s2 = inlined_call_operand.vmem [shape: bf16[128,128], index: 2, kind: input, shape index: {}]   ;;  %s2185_s1 = inlined_call_operand.vmem [shape: f32[1,128], index: 1, kind: input, shape index: {}]   ;;  %s2186_s3 = inlined_call_operand.vmem [shape: bf16[1,128,16], index: 3, kind: input, shape index: {}]   ;;  %s2187_s4 = inlined_call_operand.vmem [shape: f32[1,1,16], index: 4, kind: input, shape index: {}]   ;;  %s2188_s5 = inlined_call_operand.vmem [shape: f32[1,128,16], index: 5, kind: output, shape index: {}]  }
   0x1   :  { %1275 = vset.pattern.permute.xlu1 %v1380_v0  ;;  %1274 = vset.pattern.permute.xlu0 %v1380_v0  ;;  %v85_v1 = vld [vmem:[%s2183_s0 + $0x40] sm:$0xff]  ;;  %v86_v3 = vld [vmem:[%s2183_s0 + $0x48] sm:$0xff]  ;;  %v80_v5 = vld [vmem:[%s2183_s0 + $0x18] sm:$0xff]  ;;  %28 = vst.msk [vmem:[#allocation2] sm:$0xff] %vm27_vm0, %v1381_v17 }
   0x2   :  { %v77_v2 = vld [vmem:[%s2183_s0] sm:$0xff]  ;;  %136 = vperm.xlu1 %1275, %v85_v1   ;;  %v78_v4 = vld [vmem:[%s2183_s0 + $0x8] sm:$0xff]  ;;  %v79_v6 = vld [vmem:[%s2183_s0 + $0x10] sm:$0xff]  ;;  %29 = vst.msk [vmem:[#allocation2 + $0x8] sm:$0xff] %vm27_vm0, %v1381_v17 }
   0x3   :  { %96 = vperm.xlu0 %1274, %v77_v2   ;;  %v88_v7 = vld [vmem:[%s2183_s0 + $0x58] sm:$0xff]  ;;  %v87_v8 = vld [vmem:[%s2183_s0 + $0x50] sm:$0xff]  ;;  %v82_v9 = vld [vmem:[%s2183_s0 + $0x28] sm:$0xff]  ;;  %30 = vst.msk [vmem:[#allocation2 + $0x10] sm:$0xff] %vm27_vm0, %v1381_v17 }
   0x4   :  { %v81_v10 = vld [vmem:[%s2183_s0 + $0x20] sm:$0xff]  ;;  %v90_v11 = vld [vmem:[%s2183_s0 + $0x68] sm:$0xff]  ;;  %v84_v13 = vld [vmem:[%s2183_s0 + $0x38] sm:$0xff]  ;;  %31 = vst.msk [vmem:[#allocation2 + $0x18] sm:$0xff] %vm27_vm0, %v1381_v17 }
   0x5   :  { %v89_v12 = vld [vmem:[%s2183_s0 + $0x60] sm:$0xff]  ;;  %v83_v14 = vld [vmem:[%s2183_s0 + $0x30] sm:$0xff]  ;;  %v92_v15 = vld [vmem:[%s2183_s0 + $0x78] sm:$0xff]  ;;  %32 = vst.msk [vmem:[#allocation2 + $0x20] sm:$0xff] %vm27_vm0, %v1381_v17 }
   0x6   :  { %141 = vperm.xlu1 %1275, %v86_v3   ;;  %v91_v16 = vld [vmem:[%s2183_s0 + $0x70] sm:$0xff]  ;;  %33 = vst.msk [vmem:[#allocation2 + $0x28] sm:$0xff] %vm27_vm0, %v1381_v17  ;;  %34 = vst.msk [vmem:[#allocation2 + $0x30] sm:$0xff] %vm27_vm0, %v1381_v17  ;;  %v244_v18 = vld [vmem:[%s2184_s2] sm:$0xf] }
   0x7   :  { %101 = vperm.xlu0 %1274, %v78_v4   ;;  %35 = vst.msk [vmem:[#allocation2 + $0x38] sm:$0xff] %vm27_vm0, %v1381_v17  ;;  %36 = vst.msk [vmem:[#allocation2 + $0x40] sm:$0xff] %vm27_vm0, %v1381_v17  ;;  %v252_v19 = vld [vmem:[%s2184_s2 + $0x20] sm:$0xf]  ;;  %v245_v20 = vld [vmem:[%s2184_s2 + $0x4] sm:$0xf] }
   0x8   :  { %37 = vst.msk [vmem:[#allocation2 + $0x48] sm:$0xff] %vm27_vm0, %v1381_v17  ;;  %38 = vst.msk [vmem:[#allocation2 + $0x50] sm:$0xff] %vm27_vm0, %v1381_v17  ;;  %vm260_vm1 = vcmp.gt.bf16.partialorder %v244_v18, 0  ;;  %vm268_vm2 = vcmp.gt.bf16.partialorder %v252_v19, 0  ;;  %v253_v21 = vld [vmem:[%s2184_s2 + $0x24] sm:$0xf] }
   0x9   :  { %39 = vst.msk [vmem:[#allocation2 + $0x58] sm:$0xff] %vm27_vm0, %v1381_v17  ;;  %40 = vst.msk [vmem:[#allocation2 + $0x60] sm:$0xff] %vm27_vm0, %v1381_v17  ;;  %vm261_vm3 = vcmp.gt.bf16.partialorder %v245_v20, 0  ;;  %v276_v22 = vsel %vm260_vm1, 65537, %v1380_v0  ;;  %v284_v23 = vsel %vm268_vm2, 65537, %v1380_v0  ;;  %vm269_vm4 = vcmp.gt.bf16.partialorder %v253_v21, 0 }
   0xa   :  { %111 = vperm.xlu1 %1275, %v80_v5   ;;  %41 = vst.msk [vmem:[#allocation2 + $0x68] sm:$0xff] %vm27_vm0, %v1381_v17  ;;  %42 = vst.msk [vmem:[#allocation2 + $0x70] sm:$0xff] %vm27_vm0, %v1381_v17  ;;  %v246_v24 = vld [vmem:[%s2184_s2 + $0x8] sm:$0xf]  ;;  %v277_v25 = vsel %vm261_vm3, 65537, %v1380_v0  ;;  %v292_v28 = vunpack.c.l.b16 %v276_v22  ;;  %v300_v29 = vunpack.c.l.b16 %v284_v23  ;;  %v285_v31 = vsel %vm269_vm4, 65537, %v1380_v0 }
   0xb   :  { %106 = vperm.xlu0 %1274, %v79_v6   ;;  %43 = vst.msk [vmem:[#allocation2 + $0x78] sm:$0xff] %vm27_vm0, %v1381_v17  ;;  %v247_v26 = vld [vmem:[%s2184_s2 + $0xc] sm:$0xf]  ;;  %v254_v27 = vld [vmem:[%s2184_s2 + $0x28] sm:$0xf]  ;;  %vm262_vm5 = vcmp.gt.bf16.partialorder %v246_v24, 0  ;;  %v293_v33 = vunpack.c.l.b16 %v277_v25  ;;  %v301_v40 = vunpack.c.l.b16 %v285_v31 }
   0xc   :  { %v255_v30 = vld [vmem:[%s2184_s2 + $0x2c] sm:$0xf]  ;;  %v1510_v32 = vld [vmem:[%s2185_s1] ss:$0 sm:$0xff]  ;;  %vm263_vm6 = vcmp.gt.bf16.partialorder %v247_v26, 0  ;;  %vm270_vm7 = vcmp.gt.bf16.partialorder %v254_v27, 0 }
   0xd   :  { %v278_v34 = vsel %vm262_vm5, 65537, %v1380_v0  ;;  %vm271_vm8 = vcmp.gt.bf16.partialorder %v255_v30, 0  ;;  %v248_v35 = vld [vmem:[%s2184_s2 + $0x10] sm:$0xf]  ;;  %vm1516_vm9 = vcmp.ne.s32.totalorder %v292_v28, 0  ;;  %vm1520_vm10 = vcmp.ne.s32.totalorder %v300_v29, 0 }
   0xe   :  { %151 = vperm.xlu1 %1275, %v88_v7   ;;  %v249_v41 = vld [vmem:[%s2184_s2 + $0x14] sm:$0xf]  ;;  %v279_v44 = vsel %vm263_vm6, 65537, %v1380_v0  ;;  %v286_v45 = vsel %vm270_vm7, 65537, %v1380_v0  ;;  %vm1531_vm11 = vcmp.ne.s32.totalorder %v293_v33, 0  ;;  %v294_v47 = vunpack.c.l.b16 %v278_v34 }
   0xf   :  { %146 = vperm.xlu0 %1274, %v87_v8   ;;  %v287_v48 = vsel %vm271_vm8, 65537, %v1380_v0  ;;  %vm264_vm12 = vcmp.gt.bf16.partialorder %v248_v35, 0  ;;  %vm265_vm14 = vcmp.gt.bf16.partialorder %v249_v41, 0  ;;  %vm1536_vm1 = vcmp.ne.s32.totalorder %v301_v40, 0  ;;  %v256_v1 = vld [vmem:[%s2184_s2 + $0x30] sm:$0xf] }
  0x10   :  { %v295_v54 = vunpack.c.l.b16 %v279_v44  ;;  %v302_v55 = vunpack.c.l.b16 %v286_v45  ;;  %v280_v59 = vsel %vm264_vm12, 65537, %v1380_v0  ;;  %vm1547_vm2 = vcmp.ne.s32.totalorder %v294_v47, 0  ;;  %v250_v17 = vld [vmem:[%s2184_s2 + $0x18] sm:$0xf]  ;;  %v251_v29 = vld [vmem:[%s2184_s2 + $0x1c] sm:$0xf] }
  0x11   :  { %v303_v62 = vunpack.c.l.b16 %v287_v48  ;;  %v281_v63 = vsel %vm265_vm14, 65537, %v1380_v0  ;;  %vm272_vm7 = vcmp.gt.bf16.partialorder %v256_v1, 0  ;;  %v258_v33 = vld [vmem:[%s2184_s2 + $0x38] sm:$0xf]  ;;  %v259_v45 = vld [vmem:[%s2184_s2 + $0x3c] sm:$0xf] }
  0x12   :  { %121 = vperm.xlu1 %1275, %v82_v9   ;;  %vm1557_vm5 = vcmp.ne.s32.totalorder %v295_v54, 0  ;;  %vm1561_vm6 = vcmp.ne.s32.totalorder %v302_v55, 0  ;;  %v296_v9 = vunpack.c.l.b16 %v280_v59  ;;  %v288_v25 = vsel %vm272_vm7, 65537, %v1380_v0 }
  0x13   :  { %116 = vperm.xlu0 %1274, %v81_v10   ;;  %v304_v40 = vunpack.c.l.b16 %v288_v25 }
  0x15   :  { %vm1637_vm7 = vcmp.ne.s32.totalorder %v304_v40, 0 }
  0x16   :  { %161 = vperm.xlu1 %1275, %v90_v11  }
  0x17   :  { %156 = vperm.xlu0 %1274, %v89_v12  }
  0x1a   :  { %131 = vperm.xlu1 %1275, %v84_v13   ;;  %v257_v13 = vld [vmem:[%s2184_s2 + $0x34] sm:$0xf] }
  0x1b   :  { %126 = vperm.xlu0 %1274, %v83_v14   ;;  %vm273_vm12 = vcmp.gt.bf16.partialorder %v257_v13, 0 }
  0x1c   :  { %v289_v41 = vsel %vm273_vm12, 65537, %v1380_v0 }
  0x1d   :  { %v305_v55 = vunpack.c.l.b16 %v289_v41 }
  0x1e   :  { %171 = vperm.xlu1 %1275, %v92_v15  }
  0x1f   :  { %166 = vperm.xlu0 %1274, %v91_v16   ;;  %v297_v16 = vunpack.c.l.b16 %v281_v63 }
  0x81   :  { %v137_v36 = vpop.permute.xlu1 %136 }
  0x82   :  { %v97_v37 = vpop.permute.xlu0 %96  ;;  %v188_v42 = vadd.f32 %v1510_v32, %v137_v36 }
  0x83   :  { %v180_v43 = vadd.f32 %v1510_v32, %v97_v37 }
  0x84   :  { %v220_v49 = vmul.f32 0.2, %v188_v42  ;;  %vm204_vm15 = vcmp.gt.f32.partialorder %v188_v42, 0.0 }
  0x85   :  { %v212_v50 = vmul.f32 0.2, %v180_v43  ;;  %vm196_vm13 = vcmp.gt.f32.partialorder %v180_v43, 0.0  ;;  %v142_v51 = vpop.permute.xlu1 %141 }
  0x86   :  { %v102_v52 = vpop.permute.xlu0 %101  ;;  %v189_v56 = vadd.f32 %v1510_v32, %v142_v51  ;;  %v236_v4 = vsel %vm204_vm15, %v188_v42, %v220_v49 }
  0x87   :  { %v181_v57 = vadd.f32 %v1510_v32, %v102_v52  ;;  %v228_v58 = vsel %vm196_vm13, %v180_v43, %v212_v50  ;;  %v1572_v14 = vsel %vm1520_vm10, %v236_v4, -1e+30  ;;  %vm266_vm13 = vcmp.gt.bf16.partialorder %v250_v17, 0 }
  0x88   :  { %v1545_v60 = vsel %vm1516_vm9, %v228_v58, -1e+30  ;;  %v221_v2 = vmul.f32 0.2, %v189_v56  ;;  %vm205_vm4 = vcmp.gt.f32.partialorder %v189_v56, 0.0  ;;  %vm1584_vm9 = vcmp.ne.s32.totalorder %v303_v62, 0 }
  0x89   :  { %v213_v3 = vmul.f32 0.2, %v181_v57  ;;  %356 = vmax.xlane.f32.xlu0 %v1545_v60  ;;  %vm197_vm3 = vcmp.gt.f32.partialorder %v181_v57, 0.0  ;;  %v112_v5 = vpop.permute.xlu1 %111  ;;  %v282_v48 = vsel %vm266_vm13, 65537, %v1380_v0 }
  0x8a   :  { %v107_v6 = vpop.permute.xlu0 %106  ;;  %v183_v10 = vadd.f32 %v1510_v32, %v112_v5  ;;  %v237_v20 = vsel %vm205_vm4, %v189_v56, %v221_v2  ;;  %v298_v61 = vunpack.c.l.b16 %v282_v48  ;;  %v1754_v48 = vld [vmem:[#allocation2 + $0x8] sm:$0xff] }
  0x8b   :  { %v182_v11 = vadd.f32 %v1510_v32, %v107_v6  ;;  %v229_v12 = vsel %vm197_vm3, %v181_v57, %v213_v3  ;;  %v1601_v30 = vsel %vm1536_vm1, %v237_v20, -1e+30  ;;  %vm1613_vm1 = vcmp.ne.s32.totalorder %v297_v16, 0 }
  0x8c   :  { %v1576_v15 = vsel %vm1531_vm11, %v229_v12, -1e+30  ;;  %v215_v18 = vmul.f32 0.2, %v183_v10  ;;  %vm199_vm10 = vcmp.gt.f32.partialorder %v183_v10, 0.0  ;;  %vm1588_vm11 = vcmp.ne.s32.totalorder %v296_v9, 0 }
  0x8d   :  { %v214_v19 = vmul.f32 0.2, %v182_v11  ;;  %372 = vmax.xlane.f32.xlu0 %v1572_v14  ;;  %358 = vmax.xlane.f32.xlu1 %v1576_v15  ;;  %vm198_vm8 = vcmp.gt.f32.partialorder %v182_v11, 0.0  ;;  %v152_v22 = vpop.permute.xlu1 %151  ;;  %vm274_vm3 = vcmp.gt.bf16.partialorder %v258_v33, 0 }
  0x8e   :  { %v147_v23 = vpop.permute.xlu0 %146  ;;  %v191_v26 = vadd.f32 %v1510_v32, %v152_v22  ;;  %v231_v36 = vsel %vm199_vm10, %v183_v10, %v215_v18  ;;  %v290_v1 = vsel %vm274_vm3, 65537, %v1380_v0  ;;  %vm1658_vm10 = vcmp.ne.s32.totalorder %v305_v55, 0 }
  0x8f   :  { %v190_v27 = vadd.f32 %v1510_v32, %v147_v23  ;;  %v230_v28 = vsel %vm198_vm8, %v182_v11, %v214_v19  ;;  %v1626_v46 = vsel %vm1557_vm5, %v231_v36, -1e+30  ;;  %v306_v17 = vunpack.c.l.b16 %v290_v1 }
  0x90   :  { %v1605_v31 = vsel %vm1547_vm2, %v230_v28, -1e+30  ;;  %v223_v34 = vmul.f32 0.2, %v191_v26  ;;  %vm207_vm15 = vcmp.gt.f32.partialorder %v191_v26, 0.0  ;;  %vm267_vm2 = vcmp.gt.bf16.partialorder %v251_v29, 0 }
  0x91   :  { %v222_v35 = vmul.f32 0.2, %v190_v27  ;;  %374 = vmax.xlane.f32.xlu0 %v1601_v30  ;;  %360 = vmax.xlane.f32.xlu1 %v1605_v31  ;;  %vm206_vm14 = vcmp.gt.f32.partialorder %v190_v27, 0.0  ;;  %v122_v37 = vpop.permute.xlu1 %121  ;;  %v283_v56 = vsel %vm267_vm2, 65537, %v1380_v0  ;;  %v2189_v36 = vmov 0.0  }
  0x92   :  { %v117_v38 = vpop.permute.xlu0 %116  ;;  %v185_v42 = vadd.f32 %v1510_v32, %v122_v37  ;;  %v239_v51 = vsel %vm207_vm15, %v191_v26, %v223_v34  ;;  %v299_v8 = vunpack.c.l.b16 %v283_v56  ;;  %vm1694_vm15 = vcmp.ne.s32.totalorder %v306_v17, 0  ;;  %44 = vst.msk [vmem:[#allocation3] sm:$0xff] %vm27_vm0, %v2189_v36  ;;  %45 = vst.msk [vmem:[#allocation3 + $0x8] sm:$0xff] %vm27_vm0, %v2189_v36  ;;  %v1772_v56 = vld [vmem:[#allocation2 + $0x10] sm:$0xff] }
  0x93   :  { %v184_v43 = vadd.f32 %v1510_v32, %v117_v38  ;;  %v238_v44 = vsel %vm206_vm14, %v190_v27, %v222_v35  ;;  %v1647_v62 = vsel %vm1584_vm9, %v239_v51, -1e+30  ;;  %46 = vst.msk [vmem:[#allocation3 + $0x10] sm:$0xff] %vm27_vm0, %v2189_v36  ;;  %47 = vst.msk [vmem:[#allocation3 + $0x18] sm:$0xff] %vm27_vm0, %v2189_v36  ;;  %v1277_v51 = vld [vmem:[%s2186_s3 + $0x8] sm:$0xff]  }
  0x94   :  { %v1630_v47 = vsel %vm1561_vm6, %v238_v44, -1e+30  ;;  %v217_v49 = vmul.f32 0.2, %v185_v42  ;;  %vm201_vm5 = vcmp.gt.f32.partialorder %v185_v42, 0.0  ;;  %vm275_vm6 = vcmp.gt.bf16.partialorder %v259_v45, 0 }
  0x95   :  { %v216_v50 = vmul.f32 0.2, %v184_v43  ;;  %362 = vmax.xlane.f32.xlu0 %v1626_v46  ;;  %376 = vmax.xlane.f32.xlu1 %v1630_v47  ;;  %vm200_vm4 = vcmp.gt.f32.partialorder %v184_v43, 0.0  ;;  %v162_v52 = vpop.permute.xlu1 %161  ;;  %v291_v18 = vsel %vm275_vm6, 65537, %v1380_v0  ;;  %vm1680_vm14 = vcmp.ne.s32.totalorder %v299_v8, 0  ;;  %48 = vst.msk [vmem:[#allocation3 + $0x20] sm:$0xff] %vm27_vm0, %v2189_v36 }
  0x96   :  { %v157_v53 = vpop.permute.xlu0 %156  ;;  %v193_v57 = vadd.f32 %v1510_v32, %v162_v52  ;;  %v233_v4 = vsel %vm201_vm5, %v185_v42, %v217_v49  ;;  %v307_v27 = vunpack.c.l.b16 %v291_v18  ;;  %49 = vst.msk [vmem:[#allocation3 + $0x28] sm:$0xff] %vm27_vm0, %v2189_v36  ;;  %50 = vst.msk [vmem:[#allocation3 + $0x30] sm:$0xff] %vm27_vm0, %v2189_v36  ;;  %v1276_v42 = vld [vmem:[%s2186_s3] sm:$0xff]  }
  0x97   :  { %v192_v58 = vadd.f32 %v1510_v32, %v157_v53  ;;  %v232_v59 = vsel %vm200_vm4, %v184_v43, %v216_v50  ;;  %v1670_v13 = vsel %vm1613_vm1, %v233_v4, -1e+30  ;;  %51 = vst.msk [vmem:[#allocation3 + $0x38] sm:$0xff] %vm27_vm0, %v2189_v36  ;;  %52 = vst.msk [vmem:[#allocation3 + $0x40] sm:$0xff] %vm27_vm0, %v2189_v36  ;;  %1223 = vmatprep.subr.bf16.mxu0 %v1276_v42  ;;  %1255 = vmatprep.subr.bf16.mxu1 %v1276_v42  ;;  %v1749_v43 = vld [vmem:[#allocation2] sm:$0xff]  ;;  %vm60_vm4 = vcmask 130048  }
  0x98   :  { %v1651_v63 = vsel %vm1588_vm11, %v232_v59, -1e+30  ;;  %v225_v2 = vmul.f32 0.2, %v193_v57  ;;  %vm209_vm9 = vcmp.gt.f32.partialorder %v193_v57, 0.0  ;;  %vm1664_vm11 = vcmp.ne.s32.totalorder %v298_v61, 0  ;;  %1224 = vmatpush3.bf16.msra.mxu0 %v1276_v42  ;;  %1263 = vmatpush3.bf16.msra.mxu1 %v1276_v42 }
  0x99   :  { %v224_v3 = vmul.f32 0.2, %v192_v58  ;;  %378 = vmax.xlane.f32.xlu0 %v1647_v62  ;;  %364 = vmax.xlane.f32.xlu1 %v1651_v63  ;;  %vm208_vm8 = vcmp.gt.f32.partialorder %v192_v58, 0.0  ;;  %v132_v5 = vpop.permute.xlu1 %131  ;;  %53 = vst.msk [vmem:[#allocation3 + $0x48] sm:$0xff] %vm27_vm0, %v2189_v36  ;;  %54 = vst.msk [vmem:[#allocation3 + $0x50] sm:$0xff] %vm27_vm0, %v2189_v36  ;;  %vm323_vm3 = vcmp.ne.s32.totalorder %v307_v27, 0 }
  0x9a   :  { %v127_v6 = vpop.permute.xlu0 %126  ;;  %v187_v9 = vadd.f32 %v1510_v32, %v132_v5  ;;  %v241_v21 = vsel %vm209_vm9, %v193_v57, %v225_v2  ;;  %55 = vst.msk [vmem:[#allocation3 + $0x58] sm:$0xff] %vm27_vm0, %v2189_v36  ;;  %56 = vst.msk [vmem:[#allocation3 + $0x60] sm:$0xff] %vm27_vm0, %v2189_v36  ;;  %v1756_v49 = vld [vmem:[#allocation2 + $0x40] sm:$0xff]  ;;  %1225 = vmatprep.subr.bf16.mxu0 %v1277_v51  ;;  %1256 = vmatprep.subr.bf16.mxu1 %v1277_v51  ;;  %v1774_v57 = vld [vmem:[#allocation2 + $0x48] sm:$0xff] }
  0x9b   :  { %v186_v10 = vadd.f32 %v1510_v32, %v127_v6  ;;  %v240_v11 = vsel %vm208_vm8, %v192_v58, %v224_v3  ;;  %v1688_v28 = vsel %vm1658_vm10, %v241_v21, -1e+30  ;;  %57 = vst.msk [vmem:[#allocation3 + $0x68] sm:$0xff] %vm27_vm0, %v2189_v36  ;;  %58 = vst.msk [vmem:[#allocation3 + $0x70] sm:$0xff] %vm27_vm0, %v2189_v36  ;;  %v1278_v61 = vld [vmem:[%s2186_s3 + $0x10] sm:$0xff]   ;;  %v1797_v6 = vld [vmem:[#allocation2 + $0x18] sm:$0xff] }
  0x9c   :  { %v1674_v16 = vsel %vm1637_vm7, %v240_v11, -1e+30  ;;  %v219_v19 = vmul.f32 0.2, %v187_v9  ;;  %vm203_vm13 = vcmp.gt.f32.partialorder %v187_v9, 0.0  ;;  %59 = vst.msk [vmem:[#allocation3 + $0x78] sm:$0xff] %vm27_vm0, %v2189_v36  ;;  %1226 = vmatpush3.bf16.msra.mxu0 %v1277_v51  ;;  %1264 = vmatpush3.bf16.msra.mxu1 %v1277_v51 }
  0x9d   :  { %v218_v20 = vmul.f32 0.2, %v186_v10  ;;  %366 = vmax.xlane.f32.xlu0 %v1670_v13  ;;  %380 = vmax.xlane.f32.xlu1 %v1674_v16  ;;  %vm202_vm12 = vcmp.gt.f32.partialorder %v186_v10, 0.0  ;;  %v172_v22 = vpop.permute.xlu1 %171  ;;  %v1795_v5 = vld [vmem:[#allocation2 + $0x50] sm:$0xff]  ;;  %v1818_v18 = vld [vmem:[#allocation2 + $0x20] sm:$0xff]  ;;  %v1843_v27 = vld [vmem:[#allocation2 + $0x28] sm:$0xff] }
  0x9e   :  { %v167_v23 = vpop.permute.xlu0 %166  ;;  %v195_v25 = vadd.f32 %v1510_v32, %v172_v22  ;;  %1227 = vmatprep.subr.bf16.mxu0 %v1278_v61  ;;  %1257 = vmatprep.subr.bf16.mxu1 %v1278_v61  ;;  %v1280_v22 = vld [vmem:[%s2186_s3 + $0x20] sm:$0xff]   ;;  %v1866_v51 = vld [vmem:[#allocation2 + $0x68] sm:$0xff] }
  0x9f   :  { %v194_v26 = vadd.f32 %v1510_v32, %v167_v23  ;;  %v234_v0 = vsel %vm202_vm12, %v186_v10, %v218_v20  ;;  %v235_v32 = vsel %vm203_vm13, %v187_v9, %v219_v19  ;;  %v1279_v9 = vld [vmem:[%s2186_s3 + $0x18] sm:$0xff]  }
  0xa0   :  { %v1692_v29 = vsel %vm1664_vm11, %v234_v0, -1e+30  ;;  %v227_v34 = vmul.f32 0.2, %v195_v25  ;;  %vm211_vm2 = vcmp.gt.f32.partialorder %v195_v25, 0.0  ;;  %1228 = vmatpush3.bf16.msra.mxu0 %v1278_v61  ;;  %1265 = vmatpush3.bf16.msra.mxu1 %v1278_v61  ;;  %v1820_v19 = vld [vmem:[#allocation2 + $0x58] sm:$0xff] }
  0xa1   :  { %v226_v35 = vmul.f32 0.2, %v194_v26  ;;  %382 = vmax.xlane.f32.xlu0 %v1688_v28  ;;  %368 = vmax.xlane.f32.xlu1 %v1692_v29  ;;  %vm210_vm1 = vcmp.gt.f32.partialorder %v194_v26, 0.0  ;;  %v1735_v38 = vsel %vm1680_vm14, %v235_v32, -1e+30  ;;  %v1841_v0 = vld [vmem:[#allocation2 + $0x60] sm:$0xff] }
  0xa2   :  { %v243_v40 = vsel %vm211_vm2, %v195_v25, %v227_v34  ;;  %1229 = vmatprep.subr.bf16.mxu0 %v1279_v9  ;;  %1258 = vmatprep.subr.bf16.mxu1 %v1279_v9  ;;  %v1282_v61 = vld [vmem:[%s2186_s3 + $0x30] sm:$0xff]  }
  0xa3   :  { %v242_v37 = vsel %vm210_vm1, %v194_v26, %v226_v35  ;;  %v1743_v41 = vsel %vm323_vm3, %v243_v40, -1e+30  ;;  %v1281_v35 = vld [vmem:[%s2186_s3 + $0x28] sm:$0xff]  }
  0xa4   :  { %v1739_v39 = vsel %vm1694_vm15, %v242_v37, -1e+30  ;;  %1230 = vmatpush3.bf16.msra.mxu0 %v1279_v9  ;;  %1266 = vmatpush3.bf16.msra.mxu1 %v1279_v9 }
  0xa5   :  { %370 = vmax.xlane.f32.xlu0 %v1735_v38  ;;  %384 = vmax.xlane.f32.xlu1 %v1739_v39 }
  0xa6   :  { %1231 = vmatprep.subr.bf16.mxu0 %v1280_v22  ;;  %1259 = vmatprep.subr.bf16.mxu1 %v1280_v22 }
  0xa8   :  { %1232 = vmatpush3.bf16.msra.mxu0 %v1280_v22  ;;  %1267 = vmatpush3.bf16.msra.mxu1 %v1280_v22  ;;  %v1889_v22 = vld [vmem:[#allocation2 + $0x38] sm:$0xff] }
  0xa9   :  { %386 = vmax.xlane.f32.xlu0 %v1743_v41  ;;  %1233 = vmatprep.subr.bf16.mxu0 %v1281_v35 }
  0xaa   :  { %1260 = vmatprep.subr.bf16.mxu1 %v1281_v35 }
  0xac   :  { %1234 = vmatpush3.bf16.msra.mxu0 %v1281_v35  ;;  %1268 = vmatpush3.bf16.msra.mxu1 %v1281_v35  ;;  %v1283_v35 = vld [vmem:[%s2186_s3 + $0x38] sm:$0xff]  }
  0xad   :  { %1235 = vmatprep.subr.bf16.mxu0 %v1282_v61  ;;  %1261 = vmatprep.subr.bf16.mxu1 %v1282_v61 }
  0xb0   :  { %1236 = vmatpush3.bf16.msra.mxu0 %v1282_v61  ;;  %1269 = vmatpush3.bf16.msra.mxu1 %v1282_v61 }
  0xb1   :  { %1237 = vmatprep.subr.bf16.mxu0 %v1283_v35  ;;  %1262 = vmatprep.subr.bf16.mxu1 %v1283_v35 }
  0xb4   :  { %1238 = vmatpush3.bf16.msra.mxu0 %v1283_v35  ;;  %1270 = vmatpush3.bf16.msra.mxu1 %v1283_v35 }
 0x116   :  { %v357_v44 = vpop.xlane.xlu0 %356 }
 0x117   :  { %v1752_v45 = vmax.f32 %v1749_v43, %v357_v44  ;;  %v1864_v44 = vld [vmem:[#allocation2 + $0x30] sm:$0xff] }
 0x119   :  { %v404_v50 = vsub.f32 %v1749_v43, %v1752_v45  ;;  %991 = vst.msk [vmem:[#allocation2] sm:$0xff] %vm27_vm0, %v1752_v45  ;;  %454 = vperm.xlu1 %1275, %v1752_v45  }
 0x11a   :  { %v359_v52 = vpop.xlane.xlu1 %358  ;;  %v373_v53 = vpop.xlane.xlu0 %372 }
 0x11b   :  { %v1767_v54 = vmax.f32 %v1754_v48, %v359_v52  ;;  %v1770_v55 = vmax.f32 %v1756_v49, %v373_v53 }
 0x11d   :  { %992 = vst.msk [vmem:[#allocation2 + $0x8] sm:$0xff] %vm27_vm0, %v1767_v54  ;;  %999 = vst.msk [vmem:[#allocation2 + $0x40] sm:$0xff] %vm27_vm0, %v1770_v55  ;;  %459 = vperm.xlu0 %1274, %v1767_v54   ;;  %494 = vperm.xlu1 %1275, %v1770_v55  }
 0x11e   :  { %v361_v1 = vpop.xlane.xlu1 %360  ;;  %v375_v2 = vpop.xlane.xlu0 %374 }
 0x11f   :  { %v1790_v3 = vmax.f32 %v1772_v56, %v361_v1  ;;  %v1793_v4 = vmax.f32 %v1774_v57, %v375_v2 }
 0x121   :  { %993 = vst.msk [vmem:[#allocation2 + $0x10] sm:$0xff] %vm27_vm0, %v1790_v3  ;;  %1000 = vst.msk [vmem:[#allocation2 + $0x48] sm:$0xff] %vm27_vm0, %v1793_v4  ;;  %464 = vperm.xlu0 %1274, %v1790_v3   ;;  %499 = vperm.xlu1 %1275, %v1793_v4  }
 0x122   :  { %v377_v10 = vpop.xlane.xlu1 %376  ;;  %v363_v11 = vpop.xlane.xlu0 %362 }
 0x123   :  { %v1813_v12 = vmax.f32 %v1795_v5, %v377_v10  ;;  %v1816_v17 = vmax.f32 %v1797_v6, %v363_v11  ;;  %v1887_v11 = vld [vmem:[#allocation2 + $0x70] sm:$0xff] }
 0x125   :  { %1001 = vst.msk [vmem:[#allocation2 + $0x50] sm:$0xff] %vm27_vm0, %v1813_v12  ;;  %994 = vst.msk [vmem:[#allocation2 + $0x18] sm:$0xff] %vm27_vm0, %v1816_v17  ;;  %504 = vperm.xlu0 %1274, %v1813_v12   ;;  %469 = vperm.xlu1 %1275, %v1816_v17  }
 0x126   :  { %v365_v23 = vpop.xlane.xlu1 %364  ;;  %v379_v24 = vpop.xlane.xlu0 %378 }
 0x127   :  { %v1836_v25 = vmax.f32 %v1818_v18, %v365_v23  ;;  %v1839_v26 = vmax.f32 %v1820_v19, %v379_v24 }
 0x129   :  { %995 = vst.msk [vmem:[#allocation2 + $0x20] sm:$0xff] %vm27_vm0, %v1836_v25  ;;  %1002 = vst.msk [vmem:[#allocation2 + $0x58] sm:$0xff] %vm27_vm0, %v1839_v26  ;;  %474 = vperm.xlu0 %1274, %v1836_v25   ;;  %509 = vperm.xlu1 %1275, %v1839_v26   ;;  %v2225_v43 = vsub.f32 %v1818_v18, %v1836_v25  ;;  %v2229_v18 = vsub.f32 %v1756_v49, %v1770_v55 }
 0x12a   :  { %v381_v32 = vpop.xlane.xlu1 %380  ;;  %v367_v37 = vpop.xlane.xlu0 %366  ;;  %v2232_v49 = vsub.f32 %v1820_v19, %v1839_v26 }
 0x12b   :  { %v1859_v40 = vmax.f32 %v1841_v0, %v381_v32  ;;  %v1862_v42 = vmax.f32 %v1843_v27, %v367_v37  ;;  %v428_v45 = vmul.f32 1.442695, %v2225_v43  ;;  %v436_v25 = vmul.f32 1.442695, %v2229_v18 }
 0x12c   :  { %v442_v55 = vmul.f32 1.442695, %v2232_v49 }
 0x12d   :  { %1003 = vst.msk [vmem:[#allocation2 + $0x60] sm:$0xff] %vm27_vm0, %v1859_v40  ;;  %996 = vst.msk [vmem:[#allocation2 + $0x28] sm:$0xff] %vm27_vm0, %v1862_v42  ;;  %514 = vperm.xlu0 %1274, %v1859_v40   ;;  %479 = vperm.xlu1 %1275, %v1862_v42  }
 0x12e   :  { %v369_v1 = vpop.xlane.xlu1 %368  ;;  %v383_v2 = vpop.xlane.xlu0 %382 }
 0x12f   :  { %v1882_v9 = vmax.f32 %v1864_v44, %v369_v1  ;;  %v1885_v10 = vmax.f32 %v1866_v51, %v383_v2  ;;  %v1910_v2 = vld [vmem:[#allocation2 + $0x78] sm:$0xff] }
 0x131   :  { %997 = vst.msk [vmem:[#allocation2 + $0x30] sm:$0xff] %vm27_vm0, %v1882_v9  ;;  %1004 = vst.msk [vmem:[#allocation2 + $0x68] sm:$0xff] %vm27_vm0, %v1885_v10  ;;  %484 = vperm.xlu0 %1274, %v1882_v9   ;;  %519 = vperm.xlu1 %1275, %v1885_v10  }
 0x132   :  { %v385_v32 = vpop.xlane.xlu1 %384  ;;  %v371_v37 = vpop.xlane.xlu0 %370 }
 0x133   :  { %v1905_v61 = vmax.f32 %v1887_v11, %v385_v32  ;;  %v1908_v1 = vmax.f32 %v1889_v22, %v371_v37 }
 0x135   :  { %1005 = vst.msk [vmem:[#allocation2 + $0x70] sm:$0xff] %vm27_vm0, %v1905_v61  ;;  %998 = vst.msk [vmem:[#allocation2 + $0x38] sm:$0xff] %vm27_vm0, %v1908_v1  ;;  %524 = vperm.xlu0 %1274, %v1905_v61   ;;  %489 = vperm.xlu1 %1275, %v1908_v1   ;;  %v2235_v19 = vsub.f32 %v1887_v11, %v1905_v61 }
 0x136   :  { %v387_v32 = vpop.xlane.xlu0 %386 }
 0x137   :  { %v1923_v37 = vmax.f32 %v1910_v2, %v387_v32  ;;  %v448_v26 = vmul.f32 1.442695, %v2235_v19 }
 0x139   :  { %1006 = vst.msk [vmem:[#allocation2 + $0x78] sm:$0xff] %vm27_vm0, %v1923_v37  ;;  %529 = vperm.xlu1 %1275, %v1923_v37  }
 0x198   :  { %v455_v24 = vpop.permute.xlu1 %454 }
 0x199   :  { %v532_v34 = vsub.f32 %v1545_v60, %v455_v24 }
 0x19b   :  { %v548_v20 = vmul.f32 1.442695, %v532_v34 }
 0x19c   :  { %v495_v8 = vpop.permute.xlu1 %494  ;;  %v460_v59 = vpop.permute.xlu0 %459 }
 0x19d   :  { %1284 = vpow2.f32 %v548_v20  ;;  %v540_v52 = vsub.f32 %v1572_v14, %v495_v8  ;;  %v533_v32 = vsub.f32 %v1576_v15, %v460_v59 }
 0x19f   :  { %v550_v23 = vmul.f32 1.442695, %v533_v32  ;;  %v564_v53 = vmul.f32 1.442695, %v540_v52 }
 0x1a0   :  { %v500_v33 = vpop.permute.xlu1 %499  ;;  %v465_v35 = vpop.permute.xlu0 %464 }
 0x1a1   :  { %v541_v36 = vsub.f32 %v1601_v30, %v500_v33  ;;  %v534_v21 = vsub.f32 %v1605_v31, %v465_v35  ;;  %1286 = vpow2.f32 %v550_v23 }
 0x1a2   :  { %1288 = vpow2.f32 %v564_v53 }
 0x1a3   :  { %v566_v58 = vmul.f32 1.442695, %v541_v36  ;;  %v552_v7 = vmul.f32 1.442695, %v534_v21 }
 0x1a4   :  { %v470_v60 = vpop.permute.xlu1 %469  ;;  %v505_v34 = vpop.permute.xlu0 %504 }
 0x1a5   :  { %1290 = vpow2.f32 %v566_v58  ;;  %v535_v20 = vsub.f32 %v1626_v46, %v470_v60  ;;  %v542_v14 = vsub.f32 %v1630_v47, %v505_v34 }
 0x1a6   :  { %1292 = vpow2.f32 %v552_v7 }
 0x1a7   :  { %v1285_v15 = vpop.eup %1284  ;;  %v554_v59 = vmul.f32 1.442695, %v535_v20  ;;  %v568_v8 = vmul.f32 1.442695, %v542_v14 }
 0x1a8   :  { %612 = vadd.xlane.f32.xlu0 %v1285_v15  ;;  %v510_v52 = vpop.permute.xlu1 %509  ;;  %v475_v30 = vpop.permute.xlu0 %474 }
 0x1a9   :  { %1294 = vpow2.f32 %v554_v59  ;;  %v543_v31 = vsub.f32 %v1647_v62, %v510_v52  ;;  %v536_v36 = vsub.f32 %v1651_v63, %v475_v30 }
 0x1aa   :  { %1296 = vpow2.f32 %v568_v8 }
 0x1ab   :  { %v570_v21 = vmul.f32 1.442695, %v543_v31  ;;  %v556_v33 = vmul.f32 1.442695, %v536_v36  ;;  %v1287_v53 = vpop.eup %1286 }
 0x1ac   :  { %v480_v58 = vpop.permute.xlu1 %479  ;;  %v515_v46 = vpop.permute.xlu0 %514  ;;  %614 = vadd.xlane.f32.xlu1 %v1287_v53  ;;  %v789_v23 = vpack.c.bf16 %v1287_v53, %v1285_v15 }
 0x1ad   :  { %1298 = vpow2.f32 %v570_v21  ;;  %v537_v47 = vsub.f32 %v1670_v13, %v480_v58  ;;  %v544_v7 = vsub.f32 %v1674_v16, %v515_v46  ;;  %v1289_v24 = vpop.eup %1288 }
 0x1ae   :  { %1300 = vpow2.f32 %v556_v33  ;;  %1239 = vmatprep.mubr.bf16.mxu0 %v789_v23 }
 0x1af   :  { %v1291_v35 = vpop.eup %1290  ;;  %v558_v32 = vmul.f32 1.442695, %v537_v47  ;;  %v572_v63 = vmul.f32 1.442695, %v544_v7 }
 0x1b0   :  { %v1293_v62 = vpop.eup %1292  ;;  %v520_v60 = vpop.permute.xlu1 %519  ;;  %v793_v20 = vpack.c.bf16 %v1291_v35, %v1289_v24 }
 0x1b1   :  { %v485_v34 = vpop.permute.xlu0 %484  ;;  %1302 = vpow2.f32 %v558_v32  ;;  %v545_v14 = vsub.f32 %v1688_v28, %v520_v60  ;;  %616 = vadd.xlane.f32.xlu0 %v1293_v62 }
 0x1b2   :  { %v538_v13 = vsub.f32 %v1692_v29, %v485_v34  ;;  %1247 = vmatprep.mubr.bf16.mxu1 %v793_v20  ;;  %1304 = vpow2.f32 %v572_v63 }
 0x1b3   :  { %v1295_v59 = vpop.eup %1294  ;;  %v574_v16 = vmul.f32 1.442695, %v545_v14 }
 0x1b4   :  { %v560_v15 = vmul.f32 1.442695, %v538_v13  ;;  %v490_v8 = vpop.permute.xlu1 %489  ;;  %v790_v30 = vpack.c.bf16 %v1295_v59, %v1293_v62  ;;  %v1297_v21 = vpop.eup %1296  ;;  %v420_v13 = vmul.f32 1.442695, %v404_v50 }
 0x1b5   :  { %v525_v52 = vpop.permute.xlu0 %524  ;;  %1306 = vpow2.f32 %v574_v16  ;;  %v539_v31 = vsub.f32 %v1735_v38, %v490_v8  ;;  %618 = vadd.xlane.f32.xlu0 %v1295_v59 }
 0x1b6   :  { %v546_v36 = vsub.f32 %v1739_v39, %v525_v52  ;;  %1308 = vpow2.f32 %v560_v15  ;;  %1240 = vmatmul.mubr.bf16.vlgmr.msra.gmra.mrb[0].mxu0 %v790_v30  ;;  %v2223_v15 = vsub.f32 %v1797_v6, %v1816_v17  ;;  %v2224_v52 = vmov 0.0  }
 0x1b7   :  { %v1299_v28 = vpop.eup %1298  ;;  %v562_v33 = vmul.f32 1.442695, %v539_v31  ;;  %61 = vst.msk [vmem:[#allocation4] sm:$0xff] %vm60_vm4, %v2224_v52  ;;  %62 = vst.msk [vmem:[#allocation4 + $0x8] sm:$0xff] %vm60_vm4, %v2224_v52  ;;  %v2228_v6 = vsub.f32 %v1889_v22, %v1908_v1  ;;  %v2231_v31 = vsub.f32 %v1795_v5, %v1813_v12  ;;  %v2234_v5 = vsub.f32 %v1866_v51, %v1885_v10 }
 0x1b8   :  { %v1301_v29 = vpop.eup %1300  ;;  %v576_v53 = vmul.f32 1.442695, %v546_v36  ;;  %v530_v58 = vpop.permute.xlu1 %529  ;;  %v794_v46 = vpack.c.bf16 %v1299_v28, %v1297_v21  ;;  %v426_v8 = vmul.f32 1.442695, %v2223_v15  ;;  %63 = vst.msk [vmem:[#allocation4 + $0x10] sm:$0xff] %vm60_vm4, %v2224_v52  ;;  %64 = vst.msk [vmem:[#allocation4 + $0x18] sm:$0xff] %vm60_vm4, %v2224_v52 }
 0x1b9   :  { %1310 = vpow2.f32 %v562_v33  ;;  %v547_v47 = vsub.f32 %v1743_v41, %v530_v58  ;;  %620 = vadd.xlane.f32.xlu1 %v1301_v29  ;;  %65 = vst.msk [vmem:[#allocation4 + $0x20] sm:$0xff] %vm60_vm4, %v2224_v52  ;;  %66 = vst.msk [vmem:[#allocation4 + $0x28] sm:$0xff] %vm60_vm4, %v2224_v52  ;;  %v434_v17 = vmul.f32 1.442695, %v2228_v6  ;;  %v440_v22 = vmul.f32 1.442695, %v2231_v31 }
 0x1ba   :  { %1248 = vmatmul.mubr.bf16.vlgmr.msra.gmra.mrb[0].mxu1 %v794_v46  ;;  %1312 = vpow2.f32 %v576_v53  ;;  %67 = vst.msk [vmem:[#allocation4 + $0x30] sm:$0xff] %vm60_vm4, %v2224_v52  ;;  %68 = vst.msk [vmem:[#allocation4 + $0x38] sm:$0xff] %vm60_vm4, %v2224_v52  ;;  %v446_v12 = vmul.f32 1.442695, %v2234_v5  ;;  %v580_v53 = vld [vmem:[#allocation3] sm:$0xff]  ;;  %v587_v6 = vld [vmem:[#allocation3 + $0x38] sm:$0xff] }
 0x1bb   :  { %v1303_v7 = vpop.eup %1302  ;;  %v578_v23 = vmul.f32 1.442695, %v547_v47  ;;  %69 = vst.msk [vmem:[#allocation4 + $0x40] sm:$0xff] %vm60_vm4, %v2224_v52  ;;  %70 = vst.msk [vmem:[#allocation4 + $0x48] sm:$0xff] %vm60_vm4, %v2224_v52  ;;  %v589_v31 = vld [vmem:[#allocation3 + $0x48] sm:$0xff] }
 0x1bc   :  { %622 = vadd.xlane.f32.xlu0 %v1303_v7  ;;  %v791_v38 = vpack.c.bf16 %v1303_v7, %v1301_v29  ;;  %v1305_v39 = vpop.eup %1304  ;;  %71 = vst.msk [vmem:[#allocation4 + $0x50] sm:$0xff] %vm60_vm4, %v2224_v52  ;;  %72 = vst.msk [vmem:[#allocation4 + $0x58] sm:$0xff] %vm60_vm4, %v2224_v52  ;;  %v581_v7 = vld [vmem:[#allocation3 + $0x8] sm:$0xff] }
 0x1bd   :  { %1314 = vpow2.f32 %v578_v23  ;;  %73 = vst.msk [vmem:[#allocation4 + $0x60] sm:$0xff] %vm60_vm4, %v2224_v52  ;;  %74 = vst.msk [vmem:[#allocation4 + $0x68] sm:$0xff] %vm60_vm4, %v2224_v52 }
 0x1be   :  { %1243 = vmatprep.mubr.bf16.mxu0 %v791_v38  ;;  %1316 = vpow2.f32 %v420_v13  ;;  %75 = vst.msk [vmem:[#allocation4 + $0x70] sm:$0xff] %vm60_vm4, %v2224_v52  ;;  %76 = vst.msk [vmem:[#allocation4 + $0x78] sm:$0xff] %vm60_vm4, %v2224_v52  ;;  %v584_v13 = vld [vmem:[#allocation3 + $0x20] sm:$0xff] }
 0x1bf   :  { %v1307_v32 = vpop.eup %1306 }
 0x1c0   :  { %v1309_v62 = vpop.eup %1308  ;;  %v795_v63 = vpack.c.bf16 %v1307_v32, %v1305_v39 }
 0x1c1   :  { %624 = vadd.xlane.f32.xlu1 %v1309_v62 }
 0x1c2   :  { %1251 = vmatprep.mubr.bf16.mxu1 %v795_v63 }
 0x1c3   :  { %v1311_v60 = vpop.eup %1310 }
 0x1c4   :  { %626 = vadd.xlane.f32.xlu0 %v1311_v60  ;;  %v792_v34 = vpack.c.bf16 %v1311_v60, %v1309_v62  ;;  %v1313_v41 = vpop.eup %1312  ;;  %v583_v60 = vld [vmem:[#allocation3 + $0x18] sm:$0xff] }
 0x1c5   :  { %628 = vadd.xlane.f32.xlu1 %v1289_v24  ;;  %v2221_v24 = vsub.f32 %v1772_v56, %v1790_v3  ;;  %v2227_v56 = vsub.f32 %v1864_v44, %v1882_v9 }
 0x1c6   :  { %1244 = vmatmul.mubr.bf16.gmra.mrb[4].mxu0 %v792_v34 }
 0x1c7   :  { %v1315_v20 = vpop.eup %1314  ;;  %v424_v59 = vmul.f32 1.442695, %v2221_v24  ;;  %v432_v3 = vmul.f32 1.442695, %v2227_v56 }
 0x1c8   :  { %630 = vadd.xlane.f32.xlu0 %v1291_v35  ;;  %v796_v14 = vpack.c.bf16 %v1315_v20, %v1313_v41  ;;  %v2222_v35 = vsub.f32 %v1754_v48, %v1767_v54  ;;  %v2226_v48 = vsub.f32 %v1843_v27, %v1862_v42  ;;  %v1317_v54 = vpop.eup %1316  ;;  %v2230_v27 = vsub.f32 %v1774_v57, %v1793_v4 }
 0x1c9   :  { %632 = vadd.xlane.f32.xlu1 %v1297_v21  ;;  %1318 = vpow2.f32 %v424_v59  ;;  %v2233_v57 = vsub.f32 %v1841_v0, %v1859_v40  ;;  %v2236_v0 = vsub.f32 %v1910_v2, %v1923_v37  ;;  %v596_v58 = vmul.f32 %v1317_v54, %v580_v53 }
 0x1ca   :  { %1252 = vmatmul.mubr.bf16.gmra.mrb[4].mxu1 %v796_v14  ;;  %v422_v16 = vmul.f32 1.442695, %v2222_v35  ;;  %v430_v50 = vmul.f32 1.442695, %v2226_v48  ;;  %v438_v42 = vmul.f32 1.442695, %v2230_v27 }
 0x1cb   :  { %v444_v4 = vmul.f32 1.442695, %v2233_v57  ;;  %v450_v40 = vmul.f32 1.442695, %v2236_v0 }
 0x1cc   :  { %634 = vadd.xlane.f32.xlu0 %v1299_v28  ;;  %1320 = vpow2.f32 %v422_v16  ;;  %v585_v16 = vld [vmem:[#allocation3 + $0x28] sm:$0xff] }
 0x1cd   :  { %636 = vadd.xlane.f32.xlu1 %v1305_v39  ;;  %1322 = vpow2.f32 %v426_v8  ;;  %v582_v39 = vld [vmem:[#allocation3 + $0x10] sm:$0xff] }
 0x1ce   :  { %1324 = vpow2.f32 %v428_v45 }
 0x1cf   :  { %1326 = vpow2.f32 %v430_v50 }
 0x1d0   :  { %638 = vadd.xlane.f32.xlu0 %v1307_v32  ;;  %1328 = vpow2.f32 %v432_v3 }
 0x1d1   :  { %640 = vadd.xlane.f32.xlu1 %v1313_v41  ;;  %1330 = vpow2.f32 %v434_v17 }
 0x1d2   :  { %1332 = vpow2.f32 %v436_v25 }
 0x1d3   :  { %v1319_v30 = vpop.eup %1318  ;;  %1334 = vpow2.f32 %v438_v42 }
 0x1d4   :  { %642 = vadd.xlane.f32.xlu0 %v1315_v20  ;;  %1336 = vpow2.f32 %v440_v22  ;;  %v598_v62 = vmul.f32 %v1319_v30, %v582_v39 }
 0x1d5   :  { %1338 = vpow2.f32 %v442_v55  ;;  %v590_v55 = vld [vmem:[#allocation3 + $0x50] sm:$0xff] }
 0x1d6   :  { %v1321_v44 = vpop.eup %1320  ;;  %1340 = vpow2.f32 %v444_v4 }
 0x1d7   :  { %v1323_v9 = vpop.eup %1322  ;;  %1342 = vpow2.f32 %v446_v12  ;;  %v597_v23 = vmul.f32 %v1321_v44, %v581_v7  ;;  %v594_v7 = vld [vmem:[#allocation3 + $0x70] sm:$0xff] }
 0x1d8   :  { %v1325_v1 = vpop.eup %1324  ;;  %1344 = vpow2.f32 %v448_v26  ;;  %v599_v20 = vmul.f32 %v1323_v9, %v583_v60  ;;  %v592_v26 = vld [vmem:[#allocation3 + $0x60] sm:$0xff] }
 0x1d9   :  { %v1327_v36 = vpop.eup %1326  ;;  %1346 = vpow2.f32 %v450_v40  ;;  %v600_v35 = vmul.f32 %v1325_v1, %v584_v13 }
 0x1da   :  { %v2020_v21 = vpop.eup %1328  ;;  %v601_v52 = vmul.f32 %v1327_v36, %v585_v16 }
 0x1db   :  { %v2022_v28 = vpop.eup %1330 }
 0x1dc   :  { %v2032_v51 = vpop.eup %1332  ;;  %v603_v27 = vmul.f32 %v2022_v28, %v587_v6 }
 0x1dd   :  { %v2034_v10 = vpop.eup %1334 }
 0x1de   :  { %v2038_v11 = vpop.eup %1336  ;;  %v605_v4 = vmul.f32 %v2034_v10, %v589_v31 }
 0x1df   :  { %v2040_v61 = vpop.eup %1338  ;;  %v606_v5 = vmul.f32 %v2038_v11, %v590_v55  ;;  %v677_v55 = vld [vmem:[#allocation4] sm:$0xff] }
 0x1e0   :  { %v2044_v2 = vpop.eup %1340 }
 0x1e1   :  { %v2046_v37 = vpop.eup %1342 }
 0x1e2   :  { %695 = vperm.xlu1 %1275, %v1317_v54   ;;  %v2050_v33 = vpop.eup %1344  ;;  %v586_v54 = vld [vmem:[#allocation3 + $0x30] sm:$0xff] }
 0x1e3   :  { %v2052_v29 = vpop.eup %1346  ;;  %v602_v3 = vmul.f32 %v2020_v21, %v586_v54 }
 0x1e6   :  { %705 = vperm.xlu1 %1275, %v1319_v30   ;;  %v588_v30 = vld [vmem:[#allocation3 + $0x40] sm:$0xff] }
 0x1ea   :  { %710 = vperm.xlu1 %1275, %v1323_v9   ;;  %700 = vperm.xlu0 %1274, %v1321_v44   ;;  %v604_v44 = vmul.f32 %v2032_v51, %v588_v30 }
 0x1ee   :  { %720 = vperm.xlu1 %1275, %v1327_v36   ;;  %715 = vperm.xlu0 %1274, %v1325_v1  }
 0x1f2   :  { %730 = vperm.xlu1 %1275, %v2022_v28   ;;  %725 = vperm.xlu0 %1274, %v2020_v21   ;;  %v591_v21 = vld [vmem:[#allocation3 + $0x58] sm:$0xff] }
 0x1f6   :  { %740 = vperm.xlu1 %1275, %v2034_v10   ;;  %735 = vperm.xlu0 %1274, %v2032_v51   ;;  %v607_v51 = vmul.f32 %v2040_v61, %v591_v21  ;;  %v608_v10 = vmul.f32 %v2044_v2, %v592_v26 }
 0x1fa   :  { %750 = vperm.xlu1 %1275, %v2040_v61   ;;  %745 = vperm.xlu0 %1274, %v2038_v11  }
 0x1fe   :  { %760 = vperm.xlu1 %1275, %v2046_v37   ;;  %755 = vperm.xlu0 %1274, %v2044_v2   ;;  %v610_v2 = vmul.f32 %v2050_v33, %v594_v7 }
 0x202   :  { %770 = vperm.xlu1 %1275, %v2052_v29   ;;  %765 = vperm.xlu0 %1274, %v2050_v33  }
 0x235   :  { %v613_v46 = vpop.xlane.xlu0 %612 }
 0x236   :  { %v644_v47 = vadd.f32 %v613_v46, %v596_v58  ;;  %v593_v46 = vld [vmem:[#allocation3 + $0x68] sm:$0xff] }
 0x238   :  { %661 = vst.msk [vmem:[#allocation3] sm:$0xff] %vm27_vm0, %v644_v47 }
 0x239   :  { %v615_v38 = vpop.xlane.xlu1 %614 }
 0x23a   :  { %v645_v32 = vadd.f32 %v615_v38, %v597_v23 }
 0x23c   :  { %662 = vst.msk [vmem:[#allocation3 + $0x8] sm:$0xff] %vm27_vm0, %v645_v32  ;;  %v609_v32 = vmul.f32 %v2046_v37, %v593_v46  ;;  %v686_v46 = vld [vmem:[#allocation4 + $0x48] sm:$0xff] }
 0x23e   :  { %v617_v63 = vpop.xlane.xlu0 %616 }
 0x23f   :  { %v646_v34 = vadd.f32 %v617_v63, %v598_v62  ;;  %v1026_v41 = vld [vmem:[#allocation3] sm:$0xff]  ;;  %v595_v63 = vld [vmem:[#allocation3 + $0x78] sm:$0xff] }
 0x240   :  { %1348 = vrcp.f32 %v1026_v41  ;;  %v611_v13 = vmul.f32 %v2052_v29, %v595_v63 }
 0x241   :  { %663 = vst.msk [vmem:[#allocation3 + $0x10] sm:$0xff] %vm27_vm0, %v646_v34 }
 0x242   :  { %v619_v14 = vpop.xlane.xlu0 %618 }
 0x243   :  { %v647_v24 = vadd.f32 %v619_v14, %v599_v20  ;;  %v1027_v59 = vld [vmem:[#allocation3 + $0x8] sm:$0xff] }
 0x244   :  { %1350 = vrcp.f32 %v1027_v59 }
 0x245   :  { %664 = vst.msk [vmem:[#allocation3 + $0x18] sm:$0xff] %vm27_vm0, %v647_v24 }
 0x246   :  { %v621_v15 = vpop.xlane.xlu1 %620 }
 0x247   :  { %v648_v8 = vadd.f32 %v621_v15, %v600_v35 }
 0x248   :  { %v1028_v43 = vld [vmem:[#allocation3 + $0x10] sm:$0xff] }
 0x249   :  { %665 = vst.msk [vmem:[#allocation3 + $0x20] sm:$0xff] %vm27_vm0, %v648_v8  ;;  %v623_v45 = vpop.xlane.xlu0 %622  ;;  %1352 = vrcp.f32 %v1028_v43 }
 0x24a   :  { %v1349_v48 = vpop.eup %1348  ;;  %v649_v50 = vadd.f32 %v623_v45, %v601_v52 }
 0x24b   :  { %1060 = vperm.xlu0 %1274, %v1349_v48  }
 0x24c   :  { %666 = vst.msk [vmem:[#allocation3 + $0x28] sm:$0xff] %vm27_vm0, %v649_v50  ;;  %v1029_v56 = vld [vmem:[#allocation3 + $0x18] sm:$0xff] }
 0x24d   :  { %1354 = vrcp.f32 %v1029_v56 }
 0x24e   :  { %v625_v17 = vpop.xlane.xlu1 %624  ;;  %v1351_v18 = vpop.eup %1350 }
 0x24f   :  { %v650_v25 = vadd.f32 %v625_v17, %v602_v3  ;;  %1065 = vperm.xlu1 %1275, %v1351_v18  }
 0x250   :  { %v1030_v42 = vld [vmem:[#allocation3 + $0x20] sm:$0xff] }
 0x251   :  { %667 = vst.msk [vmem:[#allocation3 + $0x30] sm:$0xff] %vm27_vm0, %v650_v25  ;;  %v627_v9 = vpop.xlane.xlu0 %626  ;;  %1356 = vrcp.f32 %v1030_v42 }
 0x252   :  { %v629_v22 = vpop.xlane.xlu1 %628  ;;  %v651_v49 = vadd.f32 %v627_v9, %v603_v27 }
 0x253   :  { %v1353_v1 = vpop.eup %1352  ;;  %v652_v36 = vadd.f32 %v629_v22, %v604_v44  ;;  %v1031_v57 = vld [vmem:[#allocation3 + $0x28] sm:$0xff]  ;;  %v679_v22 = vld [vmem:[#allocation4 + $0x10] sm:$0xff] }
 0x254   :  { %668 = vst.msk [vmem:[#allocation3 + $0x38] sm:$0xff] %vm27_vm0, %v651_v49  ;;  %1070 = vperm.xlu0 %1274, %v1353_v1   ;;  %1358 = vrcp.f32 %v1031_v57  ;;  %v680_v1 = vld [vmem:[#allocation4 + $0x18] sm:$0xff]  ;;  %v678_v57 = vld [vmem:[#allocation4 + $0x8] sm:$0xff] }
 0x255   :  { %669 = vst.msk [vmem:[#allocation3 + $0x40] sm:$0xff] %vm27_vm0, %v652_v36  ;;  %v631_v12 = vpop.xlane.xlu0 %630 }
 0x256   :  { %v633_v28 = vpop.xlane.xlu1 %632  ;;  %v653_v19 = vadd.f32 %v631_v12, %v605_v4 }
 0x257   :  { %v1355_v0 = vpop.eup %1354  ;;  %v654_v40 = vadd.f32 %v633_v28, %v606_v5  ;;  %v687_v5 = vld [vmem:[#allocation4 + $0x50] sm:$0xff] }
 0x258   :  { %670 = vst.msk [vmem:[#allocation3 + $0x48] sm:$0xff] %vm27_vm0, %v653_v19  ;;  %1075 = vperm.xlu1 %1275, %v1355_v0   ;;  %v1032_v53 = vld [vmem:[#allocation3 + $0x30] sm:$0xff]  ;;  %v685_v19 = vld [vmem:[#allocation4 + $0x40] sm:$0xff] }
 0x259   :  { %671 = vst.msk [vmem:[#allocation3 + $0x50] sm:$0xff] %vm27_vm0, %v654_v40  ;;  %v635_v58 = vpop.xlane.xlu0 %634  ;;  %1360 = vrcp.f32 %v1032_v53 }
 0x25a   :  { %v637_v11 = vpop.xlane.xlu1 %636  ;;  %v655_v47 = vadd.f32 %v635_v58, %v607_v51  ;;  %v688_v51 = vld [vmem:[#allocation4 + $0x58] sm:$0xff] }
 0x25b   :  { %v1357_v23 = vpop.eup %1356  ;;  %v656_v38 = vadd.f32 %v637_v11, %v608_v10  ;;  %v1033_v39 = vld [vmem:[#allocation3 + $0x38] sm:$0xff] }
 0x25c   :  { %672 = vst.msk [vmem:[#allocation3 + $0x58] sm:$0xff] %vm27_vm0, %v655_v47  ;;  %1080 = vperm.xlu0 %1274, %v1357_v23   ;;  %v1034_v61 = vld [vmem:[#allocation3 + $0x40] sm:$0xff]  ;;  %1362 = vrcp.f32 %v1033_v39 }
 0x25d   :  { %673 = vst.msk [vmem:[#allocation3 + $0x60] sm:$0xff] %vm27_vm0, %v656_v38  ;;  %v639_v62 = vpop.xlane.xlu0 %638  ;;  %1364 = vrcp.f32 %v1034_v61 }
 0x25e   :  { %v1359_v60 = vpop.eup %1358  ;;  %v641_v34 = vpop.xlane.xlu1 %640  ;;  %v657_v41 = vadd.f32 %v639_v62, %v609_v32 }
 0x25f   :  { %v658_v20 = vadd.f32 %v641_v34, %v610_v2  ;;  %1085 = vperm.xlu1 %1275, %v1359_v60   ;;  %v1035_v14 = vld [vmem:[#allocation3 + $0x48] sm:$0xff] }
 0x260   :  { %674 = vst.msk [vmem:[#allocation3 + $0x68] sm:$0xff] %vm27_vm0, %v657_v41  ;;  %v1036_v37 = vld [vmem:[#allocation3 + $0x50] sm:$0xff]  ;;  %1366 = vrcp.f32 %v1035_v14 }
 0x261   :  { %675 = vst.msk [vmem:[#allocation3 + $0x70] sm:$0xff] %vm27_vm0, %v658_v20  ;;  %v643_v24 = vpop.xlane.xlu0 %642  ;;  %1368 = vrcp.f32 %v1036_v37 }
 0x262   :  { %v659_v33 = vadd.f32 %v643_v24, %v611_v13  ;;  %v696_v52 = vpop.permute.xlu1 %695  ;;  %v683_v13 = vld [vmem:[#allocation4 + $0x30] sm:$0xff]  ;;  %v681_v24 = vld [vmem:[#allocation4 + $0x20] sm:$0xff] }
 0x263   :  { %v1361_v59 = vpop.eup %1360  ;;  %v1037_v35 = vld [vmem:[#allocation3 + $0x58] sm:$0xff]  ;;  %v773_v4 = vmul.f32 %v696_v52, %v677_v55 }
 0x264   :  { %676 = vst.msk [vmem:[#allocation3 + $0x78] sm:$0xff] %vm27_vm0, %v659_v33  ;;  %1090 = vperm.xlu0 %1274, %v1361_v59   ;;  %v1038_v16 = vld [vmem:[#allocation3 + $0x60] sm:$0xff]  ;;  %1370 = vrcp.f32 %v1037_v35  ;;  %v684_v33 = vld [vmem:[#allocation4 + $0x38] sm:$0xff]  ;;  %v682_v59 = vld [vmem:[#allocation4 + $0x28] sm:$0xff] }
 0x265   :  { %1372 = vrcp.f32 %v1038_v16 }
 0x266   :  { %v1363_v15 = vpop.eup %1362  ;;  %v706_v54 = vpop.permute.xlu1 %705 }
 0x267   :  { %v1365_v8 = vpop.eup %1364  ;;  %1095 = vperm.xlu1 %1275, %v1363_v15   ;;  %v1039_v29 = vld [vmem:[#allocation3 + $0x68] sm:$0xff]  ;;  %v775_v36 = vmul.f32 %v706_v54, %v679_v22  ;;  %v691_v15 = vld [vmem:[#allocation4 + $0x70] sm:$0xff]  ;;  %v692_v54 = vld [vmem:[#allocation4 + $0x78] sm:$0xff] }
 0x268   :  { %1100 = vperm.xlu0 %1274, %v1365_v8   ;;  %v1040_v43 = vld [vmem:[#allocation3 + $0x70] sm:$0xff]  ;;  %1374 = vrcp.f32 %v1039_v29 }
 0x269   :  { %1376 = vrcp.f32 %v1040_v43  ;;  %v701_v6 = vpop.permute.xlu0 %700  ;;  %v689_v43 = vld [vmem:[#allocation4 + $0x60] sm:$0xff] }
 0x26a   :  { %v1367_v45 = vpop.eup %1366  ;;  %v711_v18 = vpop.permute.xlu1 %710  ;;  %v774_v40 = vmul.f32 %v701_v6, %v678_v57 }
 0x26b   :  { %v1369_v48 = vpop.eup %1368  ;;  %1105 = vperm.xlu1 %1275, %v1367_v45   ;;  %v1041_v50 = vld [vmem:[#allocation3 + $0x78] sm:$0xff]  ;;  %v776_v28 = vmul.f32 %v711_v18, %v680_v1 }
 0x26c   :  { %1110 = vperm.xlu0 %1274, %v1369_v48   ;;  %1378 = vrcp.f32 %v1041_v50 }
 0x26d   :  { %v716_v27 = vpop.permute.xlu0 %715 }
 0x26e   :  { %v1371_v56 = vpop.eup %1370  ;;  %v721_v42 = vpop.permute.xlu1 %720  ;;  %v777_v16 = vmul.f32 %v716_v27, %v681_v24 }
 0x26f   :  { %v1373_v3 = vpop.eup %1372  ;;  %1115 = vperm.xlu1 %1275, %v1371_v56   ;;  %v778_v50 = vmul.f32 %v721_v42, %v682_v59 }
 0x270   :  { %1120 = vperm.xlu0 %1274, %v1373_v3  }
 0x271   :  { %v726_v44 = vpop.permute.xlu0 %725 }
 0x272   :  { %v1375_v17 = vpop.eup %1374  ;;  %v731_v9 = vpop.permute.xlu1 %730  ;;  %v779_v35 = vmul.f32 %v726_v44, %v683_v13 }
 0x273   :  { %v1377_v30 = vpop.eup %1376  ;;  %1125 = vperm.xlu1 %1275, %v1375_v17   ;;  %v780_v29 = vmul.f32 %v731_v9, %v684_v33  ;;  %v690_v17 = vld [vmem:[#allocation4 + $0x68] sm:$0xff] }
 0x274   :  { %1130 = vperm.xlu0 %1274, %v1377_v30  }
 0x275   :  { %v736_v31 = vpop.permute.xlu0 %735 }
 0x276   :  { %v1379_v25 = vpop.eup %1378  ;;  %v741_v49 = vpop.permute.xlu1 %740  ;;  %v781_v23 = vmul.f32 %v736_v31, %v685_v19 }
 0x277   :  { %1135 = vperm.xlu1 %1275, %v1379_v25   ;;  %v782_v62 = vmul.f32 %v741_v49, %v686_v46 }
 0x279   :  { %v746_v12 = vpop.permute.xlu0 %745 }
 0x27a   :  { %v751_v53 = vpop.permute.xlu1 %750  ;;  %v783_v11 = vmul.f32 %v746_v12, %v687_v5  ;;  %v2101_v12 = vld [vmem:[%s2187_s4] ss:$0 sm:$0xff] }
 0x27b   :  { %v784_v32 = vmul.f32 %v751_v53, %v688_v51 }
 0x27d   :  { %v756_v14 = vpop.permute.xlu0 %755 }
 0x27e   :  { %v761_v37 = vpop.permute.xlu1 %760  ;;  %v785_v44 = vmul.f32 %v756_v14, %v689_v43 }
 0x27f   :  { %v786_v49 = vmul.f32 %v761_v37, %v690_v17 }
 0x281   :  { %v766_v8 = vpop.permute.xlu0 %765 }
 0x282   :  { %v771_v56 = vpop.permute.xlu1 %770  ;;  %v787_v30 = vmul.f32 %v766_v8, %v691_v15 }
 0x283   :  { %v788_v9 = vmul.f32 %v771_v56, %v692_v54 }
 0x289   :  { %v1241_v21 = vpop.f32.mrb[0].mxu0 }
 0x28a   :  { %v960_v26 = vadd.f32 %v1241_v21, %v775_v36  ;;  %v895_v0 = vpop.f32.mrb[1].mxu0 }
 0x28b   :  { %v958_v10 = vadd.f32 %v895_v0, %v773_v4  ;;  %v1242_v58 = vpop.f32.mrb[2].mxu0 }
 0x28c   :  { %977 = vst.msk [vmem:[#allocation4 + $0x10] sm:$0xff] %vm60_vm4, %v960_v26  ;;  %v961_v47 = vadd.f32 %v1242_v58, %v776_v28  ;;  %v898_v7 = vpop.f32.mrb[3].mxu0 }
 0x28d   :  { %975 = vst.msk [vmem:[#allocation4] sm:$0xff] %vm60_vm4, %v958_v10  ;;  %v959_v38 = vadd.f32 %v898_v7, %v774_v40  ;;  %v1249_v39 = vpop.f32.mrb[0].mxu1 }
 0x28e   :  { %978 = vst.msk [vmem:[#allocation4 + $0x18] sm:$0xff] %vm60_vm4, %v961_v47  ;;  %v968_v61 = vadd.f32 %v1249_v39, %v783_v11  ;;  %v927_v2 = vpop.f32.mrb[1].mxu1 }
 0x28f   :  { %976 = vst.msk [vmem:[#allocation4 + $0x8] sm:$0xff] %vm60_vm4, %v959_v38  ;;  %v966_v63 = vadd.f32 %v927_v2, %v781_v23  ;;  %v1250_v60 = vpop.f32.mrb[2].mxu1 }
 0x290   :  { %985 = vst.msk [vmem:[#allocation4 + $0x50] sm:$0xff] %vm60_vm4, %v968_v61  ;;  %v969_v34 = vadd.f32 %v1250_v60, %v784_v32  ;;  %v930_v41 = vpop.f32.mrb[3].mxu1 }
 0x291   :  { %983 = vst.msk [vmem:[#allocation4 + $0x40] sm:$0xff] %vm60_vm4, %v966_v63  ;;  %v967_v20 = vadd.f32 %v930_v41, %v782_v62 }
 0x292   :  { %986 = vst.msk [vmem:[#allocation4 + $0x58] sm:$0xff] %vm60_vm4, %v969_v34 }
 0x293   :  { %984 = vst.msk [vmem:[#allocation4 + $0x48] sm:$0xff] %vm60_vm4, %v967_v20  ;;  %v1012_v53 = vld [vmem:[#allocation4 + $0x10] sm:$0xff] }
 0x294   :  { %v1010_v5 = vld [vmem:[#allocation4] sm:$0xff] }
 0x295   :  { %v1013_v11 = vld [vmem:[#allocation4 + $0x18] sm:$0xff] }
 0x296   :  { %v1011_v0 = vld [vmem:[#allocation4 + $0x8] sm:$0xff] }
 0x297   :  { %v1020_v43 = vld [vmem:[#allocation4 + $0x50] sm:$0xff] }
 0x298   :  { %v1018_v33 = vld [vmem:[#allocation4 + $0x40] sm:$0xff] }
 0x299   :  { %v1245_v52 = vpop.f32.mrb[4].mxu0  ;;  %v1021_v56 = vld [vmem:[#allocation4 + $0x58] sm:$0xff] }
 0x29a   :  { %v964_v45 = vadd.f32 %v1245_v52, %v779_v35  ;;  %v911_v48 = vpop.f32.mrb[5].mxu0  ;;  %v1019_v8 = vld [vmem:[#allocation4 + $0x48] sm:$0xff] }
 0x29b   :  { %v962_v3 = vadd.f32 %v911_v48, %v777_v16  ;;  %v1246_v6 = vpop.f32.mrb[6].mxu0 }
 0x29c   :  { %981 = vst.msk [vmem:[#allocation4 + $0x30] sm:$0xff] %vm60_vm4, %v964_v45  ;;  %v965_v18 = vadd.f32 %v1246_v6, %v780_v29  ;;  %v914_v25 = vpop.f32.mrb[7].mxu0 }
 0x29d   :  { %979 = vst.msk [vmem:[#allocation4 + $0x20] sm:$0xff] %vm60_vm4, %v962_v3  ;;  %v963_v27 = vadd.f32 %v914_v25, %v778_v50  ;;  %v1253_v31 = vpop.f32.mrb[4].mxu1 }
 0x29e   :  { %982 = vst.msk [vmem:[#allocation4 + $0x38] sm:$0xff] %vm60_vm4, %v965_v18  ;;  %v972_v22 = vadd.f32 %v1253_v31, %v787_v30  ;;  %v943_v42 = vpop.f32.mrb[5].mxu1 }
 0x29f   :  { %980 = vst.msk [vmem:[#allocation4 + $0x28] sm:$0xff] %vm60_vm4, %v963_v27  ;;  %v970_v55 = vadd.f32 %v943_v42, %v785_v44  ;;  %v1254_v1 = vpop.f32.mrb[6].mxu1 }
 0x2a0   :  { %989 = vst.msk [vmem:[#allocation4 + $0x70] sm:$0xff] %vm60_vm4, %v972_v22  ;;  %v973_v36 = vadd.f32 %v1254_v1, %v788_v9  ;;  %v946_v57 = vpop.f32.mrb[7].mxu1 }
 0x2a1   :  { %987 = vst.msk [vmem:[#allocation4 + $0x60] sm:$0xff] %vm60_vm4, %v970_v55  ;;  %v971_v4 = vadd.f32 %v946_v57, %v786_v49 }
 0x2a2   :  { %990 = vst.msk [vmem:[#allocation4 + $0x78] sm:$0xff] %vm60_vm4, %v973_v36 }
 0x2a3   :  { %988 = vst.msk [vmem:[#allocation4 + $0x68] sm:$0xff] %vm60_vm4, %v971_v4  ;;  %v1016_v34 = vld [vmem:[#allocation4 + $0x30] sm:$0xff] }
 0x2a4   :  { %v1014_v38 = vld [vmem:[#allocation4 + $0x20] sm:$0xff] }
 0x2a5   :  { %v1017_v13 = vld [vmem:[#allocation4 + $0x38] sm:$0xff] }
 0x2a6   :  { %v1015_v2 = vld [vmem:[#allocation4 + $0x28] sm:$0xff] }
 0x2a7   :  { %v1024_v22 = vld [vmem:[#allocation4 + $0x70] sm:$0xff] }
 0x2a8   :  { %v1022_v17 = vld [vmem:[#allocation4 + $0x60] sm:$0xff] }
 0x2a9   :  { %v1025_v36 = vld [vmem:[#allocation4 + $0x78] sm:$0xff] }
 0x2aa   :  { %v1023_v27 = vld [vmem:[#allocation4 + $0x68] sm:$0xff] }
 0x2ca   :  { %v1061_v21 = vpop.permute.xlu0 %1060 }
 0x2cb   :  { %v1138_v28 = vmul.f32 %v1061_v21, %v1010_v5 }
 0x2cd   :  { %v1161_v19 = vadd.f32 %v2101_v12, %v1138_v28 }
 0x2ce   :  { %v1066_v26 = vpop.permute.xlu1 %1065 }
 0x2cf   :  { %1177 = vst.msk [vmem:[%s2188_s5] sm:$0xff] %vm60_vm4, %v1161_v19  ;;  %v1139_v40 = vmul.f32 %v1066_v26, %v1011_v0 }
 0x2d1   :  { %v1162_v51 = vadd.f32 %v2101_v12, %v1139_v40 }
 0x2d3   :  { %v1071_v10 = vpop.permute.xlu0 %1070  ;;  %1178 = vst.msk [vmem:[%s2188_s5 + $0x8] sm:$0xff] %vm60_vm4, %v1162_v51 }
 0x2d4   :  { %v1140_v58 = vmul.f32 %v1071_v10, %v1012_v53 }
 0x2d6   :  { %v1163_v46 = vadd.f32 %v2101_v12, %v1140_v58 }
 0x2d7   :  { %v1076_v47 = vpop.permute.xlu1 %1075 }
 0x2d8   :  { %1179 = vst.msk [vmem:[%s2188_s5 + $0x10] sm:$0xff] %vm60_vm4, %v1163_v46  ;;  %v1141_v7 = vmul.f32 %v1076_v47, %v1013_v11 }
 0x2da   :  { %v1164_v23 = vadd.f32 %v2101_v12, %v1141_v7 }
 0x2db   :  { %v1081_v39 = vpop.permute.xlu0 %1080 }
 0x2dc   :  { %1180 = vst.msk [vmem:[%s2188_s5 + $0x18] sm:$0xff] %vm60_vm4, %v1164_v23  ;;  %v1142_v32 = vmul.f32 %v1081_v39, %v1014_v38 }
 0x2de   :  { %v1165_v61 = vadd.f32 %v2101_v12, %v1142_v32  ;;  %v1086_v62 = vpop.permute.xlu1 %1085 }
 0x2df   :  { %v1143_v63 = vmul.f32 %v1086_v62, %v1015_v2 }
 0x2e0   :  { %1181 = vst.msk [vmem:[%s2188_s5 + $0x20] sm:$0xff] %vm60_vm4, %v1165_v61 }
 0x2e1   :  { %v1166_v60 = vadd.f32 %v2101_v12, %v1143_v63 }
 0x2e3   :  { %1182 = vst.msk [vmem:[%s2188_s5 + $0x28] sm:$0xff] %vm60_vm4, %v1166_v60  ;;  %v1091_v41 = vpop.permute.xlu0 %1090 }
 0x2e4   :  { %v1144_v20 = vmul.f32 %v1091_v41, %v1016_v34 }
 0x2e6   :  { %v1167_v14 = vadd.f32 %v2101_v12, %v1144_v20  ;;  %v1096_v37 = vpop.permute.xlu1 %1095 }
 0x2e7   :  { %v1145_v24 = vmul.f32 %v1096_v37, %v1017_v13  ;;  %v1101_v59 = vpop.permute.xlu0 %1100 }
 0x2e8   :  { %1183 = vst.msk [vmem:[%s2188_s5 + $0x30] sm:$0xff] %vm60_vm4, %v1167_v14  ;;  %v1146_v35 = vmul.f32 %v1101_v59, %v1018_v33 }
 0x2e9   :  { %v1168_v16 = vadd.f32 %v2101_v12, %v1145_v24 }
 0x2ea   :  { %v1169_v15 = vadd.f32 %v2101_v12, %v1146_v35  ;;  %v1106_v52 = vpop.permute.xlu1 %1105 }
 0x2eb   :  { %1184 = vst.msk [vmem:[%s2188_s5 + $0x38] sm:$0xff] %vm60_vm4, %v1168_v16  ;;  %v1147_v29 = vmul.f32 %v1106_v52, %v1019_v8  ;;  %v1111_v45 = vpop.permute.xlu0 %1110 }
 0x2ec   :  { %1185 = vst.msk [vmem:[%s2188_s5 + $0x40] sm:$0xff] %vm60_vm4, %v1169_v15  ;;  %v1148_v48 = vmul.f32 %v1111_v45, %v1020_v43 }
 0x2ed   :  { %v1170_v50 = vadd.f32 %v2101_v12, %v1147_v29 }
 0x2ee   :  { %v1171_v54 = vadd.f32 %v2101_v12, %v1148_v48  ;;  %v1116_v3 = vpop.permute.xlu1 %1115 }
 0x2ef   :  { %1186 = vst.msk [vmem:[%s2188_s5 + $0x48] sm:$0xff] %vm60_vm4, %v1170_v50  ;;  %v1149_v6 = vmul.f32 %v1116_v3, %v1021_v56  ;;  %v1121_v30 = vpop.permute.xlu0 %1120 }
 0x2f0   :  { %1187 = vst.msk [vmem:[%s2188_s5 + $0x50] sm:$0xff] %vm60_vm4, %v1171_v54  ;;  %v1150_v18 = vmul.f32 %v1121_v30, %v1022_v17 }
 0x2f1   :  { %v1172_v25 = vadd.f32 %v2101_v12, %v1149_v6 }
 0x2f2   :  { %v1173_v44 = vadd.f32 %v2101_v12, %v1150_v18  ;;  %v1126_v31 = vpop.permute.xlu1 %1125 }
 0x2f3   :  { %1188 = vst.msk [vmem:[%s2188_s5 + $0x58] sm:$0xff] %vm60_vm4, %v1172_v25  ;;  %v1151_v9 = vmul.f32 %v1126_v31, %v1023_v27  ;;  %v1131_v42 = vpop.permute.xlu0 %1130 }
 0x2f4   :  { %1189 = vst.msk [vmem:[%s2188_s5 + $0x60] sm:$0xff] %vm60_vm4, %v1173_v44  ;;  %v1152_v49 = vmul.f32 %v1131_v42, %v1024_v22 }
 0x2f5   :  { %v1174_v55 = vadd.f32 %v2101_v12, %v1151_v9 }
 0x2f6   :  { %v1175_v1 = vadd.f32 %v2101_v12, %v1152_v49  ;;  %v1136_v57 = vpop.permute.xlu1 %1135 }
 0x2f7   :  { %1190 = vst.msk [vmem:[%s2188_s5 + $0x68] sm:$0xff] %vm60_vm4, %v1174_v55  ;;  %v1153_v4 = vmul.f32 %v1136_v57, %v1025_v36 }
 0x2f8   :  { %1191 = vst.msk [vmem:[%s2188_s5 + $0x70] sm:$0xff] %vm60_vm4, %v1175_v1 }
 0x2f9   :  { %v1176_v5 = vadd.f32 %v2101_v12, %v1153_v4 }
 0x2fb   :  { %1192 = vst.msk [vmem:[%s2188_s5 + $0x78] sm:$0xff] %vm60_vm4, %v1176_v5 }

// kernel: gatnet_forward.4
= control target key start
LH: loop header
LB: loop body
LE: loop exit
PB: predicated region body
PF: predicated region fallthrough
CT: control target
= control target key end

     0   :  { %v6754_v0 = vmov 0   ;;  %s10572_s0 = inlined_call_operand.vmem [shape: f32[4,128,1], index: 0, kind: input, shape index: {}]   ;;  %s10573_s1 = inlined_call_operand.vmem [shape: f32[4,128], index: 1, kind: input, shape index: {}]   ;;  %s10574_s2 = inlined_call_operand.vmem [shape: bf16[128,128], index: 2, kind: input, shape index: {}]   ;;  %s10575_s3 = inlined_call_operand.vmem [shape: bf16[4,128,16], index: 3, kind: input, shape index: {}]   ;;  %s10576_s5 = inlined_call_operand.vmem [shape: bf16[4,16,16], index: 5, kind: input, shape index: {}]   ;;  %s10577_s4 = inlined_call_operand.vmem [shape: f32[4,1,16], index: 4, kind: input, shape index: {}]   ;;  %s10578_s6 = inlined_call_operand.vmem [shape: f32[1,16], index: 6, kind: input, shape index: {}]   ;;  %s10579_s8 = inlined_call_operand.vmem [shape: bf16[1,128,16], index: 8, kind: output, shape index: {0}]   ;;  %s10580_s7 = inlined_call_operand.vmem [shape: f32[1,16], index: 7, kind: input, shape index: {}]   ;;  %s10581_s9 = inlined_call_operand.vmem [shape: f32[1,128,1], index: 9, kind: output, shape index: {1}]   ;;  %s10582_s10 = inlined_call_operand.vmem [shape: f32[1,128], index: 10, kind: output, shape index: {2}]  }
   0x1   :  { %6205 = vset.pattern.permute.xlu1 %v6754_v0  ;;  %6204 = vset.pattern.permute.xlu0 %v6754_v0  ;;  %v235_v1 = vld [vmem:[%s10572_s0 + $0x10] sm:$0xff]  ;;  %v233_v2 = vld [vmem:[%s10572_s0] sm:$0xff]  ;;  %v236_v3 = vld [vmem:[%s10572_s0 + $0x18] sm:$0xff] }
   0x2   :  { %335 = vperm.xlu1 %6205, %v235_v1   ;;  %325 = vperm.xlu0 %6204, %v233_v2   ;;  %v234_v4 = vld [vmem:[%s10572_s0 + $0x8] sm:$0xff]  ;;  %v237_v6 = vld [vmem:[%s10572_s0 + $0x20] sm:$0xff]  ;;  %v240_v7 = vld [vmem:[%s10572_s0 + $0x38] sm:$0xff]  ;;  %v6755_v1 = vmov 1966171168  }
   0x3   :  { %v238_v5 = vld [vmem:[%s10572_s0 + $0x28] sm:$0xff]  ;;  %v239_v8 = vld [vmem:[%s10572_s0 + $0x30] sm:$0xff]  ;;  %v241_v10 = vld [vmem:[%s10572_s0 + $0x40] sm:$0xff]  ;;  %v308_v2 = vunpack.c.l.s4 %v6755_v1 }
   0x4   :  { %v242_v9 = vld [vmem:[%s10572_s0 + $0x48] sm:$0xff]  ;;  %v244_v11 = vld [vmem:[%s10572_s0 + $0x58] sm:$0xff]  ;;  %v243_v12 = vld [vmem:[%s10572_s0 + $0x50] sm:$0xff] }
   0x5   :  { %v246_v13 = vld [vmem:[%s10572_s0 + $0x68] sm:$0xff]  ;;  %v245_v14 = vld [vmem:[%s10572_s0 + $0x60] sm:$0xff]  ;;  %v248_v15 = vld [vmem:[%s10572_s0 + $0x78] sm:$0xff] }
   0x6   :  { %340 = vperm.xlu1 %6205, %v236_v3   ;;  %330 = vperm.xlu0 %6204, %v234_v4   ;;  %v247_v16 = vld [vmem:[%s10572_s0 + $0x70] sm:$0xff]  ;;  %v250_v17 = vld [vmem:[%s10572_s0 + $0x88] sm:$0xff]  ;;  %v249_v18 = vld [vmem:[%s10572_s0 + $0x80] sm:$0xff]  ;;  %v310_v3 = vlaneseq }
   0x7   :  { %v252_v19 = vld [vmem:[%s10572_s0 + $0x98] sm:$0xff]  ;;  %v251_v20 = vld [vmem:[%s10572_s0 + $0x90] sm:$0xff]  ;;  %v254_v21 = vld [vmem:[%s10572_s0 + $0xa8] sm:$0xff] }
   0x8   :  { %v253_v22 = vld [vmem:[%s10572_s0 + $0xa0] sm:$0xff]  ;;  %v256_v23 = vld [vmem:[%s10572_s0 + $0xb8] sm:$0xff]  ;;  %v255_v24 = vld [vmem:[%s10572_s0 + $0xb0] sm:$0xff] }
   0x9   :  { %v258_v25 = vld [vmem:[%s10572_s0 + $0xc8] sm:$0xff]  ;;  %v257_v26 = vld [vmem:[%s10572_s0 + $0xc0] sm:$0xff]  ;;  %v260_v27 = vld [vmem:[%s10572_s0 + $0xd8] sm:$0xff] }
   0xa   :  { %350 = vperm.xlu1 %6205, %v238_v5   ;;  %345 = vperm.xlu0 %6204, %v237_v6   ;;  %v259_v28 = vld [vmem:[%s10572_s0 + $0xd0] sm:$0xff]  ;;  %v262_v29 = vld [vmem:[%s10572_s0 + $0xe8] sm:$0xff]  ;;  %v261_v30 = vld [vmem:[%s10572_s0 + $0xe0] sm:$0xff]  ;;  %v309_v6 = vunpack.c.0.s8 %v308_v2 }
   0xb   :  { %v264_v31 = vld [vmem:[%s10572_s0 + $0xf8] sm:$0xff]  ;;  %v263_v32 = vld [vmem:[%s10572_s0 + $0xf0] sm:$0xff]  ;;  %v266_v33 = vld [vmem:[%s10572_s0 + $0x108] sm:$0xff] }
   0xc   :  { %v265_v34 = vld [vmem:[%s10572_s0 + $0x100] sm:$0xff]  ;;  %v268_v35 = vld [vmem:[%s10572_s0 + $0x118] sm:$0xff]  ;;  %v267_v36 = vld [vmem:[%s10572_s0 + $0x110] sm:$0xff] }
   0xd   :  { %v270_v37 = vld [vmem:[%s10572_s0 + $0x128] sm:$0xff]  ;;  %v269_v38 = vld [vmem:[%s10572_s0 + $0x120] sm:$0xff]  ;;  %v272_v39 = vld [vmem:[%s10572_s0 + $0x138] sm:$0xff] }
   0xe   :  { %360 = vperm.xlu1 %6205, %v240_v7   ;;  %355 = vperm.xlu0 %6204, %v239_v8   ;;  %v271_v40 = vld [vmem:[%s10572_s0 + $0x130] sm:$0xff]  ;;  %v274_v41 = vld [vmem:[%s10572_s0 + $0x148] sm:$0xff]  ;;  %v273_v42 = vld [vmem:[%s10572_s0 + $0x140] sm:$0xff]  ;;  %v311_v7 = vshrl.u32 %v310_v3, 7 }
   0xf   :  { %v276_v43 = vld [vmem:[%s10572_s0 + $0x158] sm:$0xff]  ;;  %v275_v44 = vld [vmem:[%s10572_s0 + $0x150] sm:$0xff]  ;;  %v278_v45 = vld [vmem:[%s10572_s0 + $0x168] sm:$0xff] }
  0x10   :  { %v277_v46 = vld [vmem:[%s10572_s0 + $0x160] sm:$0xff]  ;;  %v280_v47 = vld [vmem:[%s10572_s0 + $0x178] sm:$0xff]  ;;  %v279_v48 = vld [vmem:[%s10572_s0 + $0x170] sm:$0xff] }
  0x11   :  { %v282_v49 = vld [vmem:[%s10572_s0 + $0x188] sm:$0xff]  ;;  %v281_v50 = vld [vmem:[%s10572_s0 + $0x180] sm:$0xff]  ;;  %v284_v51 = vld [vmem:[%s10572_s0 + $0x198] sm:$0xff] }
  0x12   :  { %370 = vperm.xlu1 %6205, %v242_v9   ;;  %365 = vperm.xlu0 %6204, %v241_v10   ;;  %v283_v52 = vld [vmem:[%s10572_s0 + $0x190] sm:$0xff]  ;;  %v286_v53 = vld [vmem:[%s10572_s0 + $0x1a8] sm:$0xff]  ;;  %v285_v54 = vld [vmem:[%s10572_s0 + $0x1a0] sm:$0xff]  ;;  %v312_v10 = vsub.s32 %v309_v6, %v311_v7 }
  0x13   :  { %v288_v55 = vld [vmem:[%s10572_s0 + $0x1b8] sm:$0xff]  ;;  %v287_v56 = vld [vmem:[%s10572_s0 + $0x1b0] sm:$0xff]  ;;  %v290_v57 = vld [vmem:[%s10572_s0 + $0x1c8] sm:$0xff] }
  0x14   :  { %v289_v58 = vld [vmem:[%s10572_s0 + $0x1c0] sm:$0xff]  ;;  %v292_v59 = vld [vmem:[%s10572_s0 + $0x1d8] sm:$0xff]  ;;  %v291_v60 = vld [vmem:[%s10572_s0 + $0x1d0] sm:$0xff] }
  0x15   :  { %v294_v61 = vld [vmem:[%s10572_s0 + $0x1e8] sm:$0xff]  ;;  %v293_v62 = vld [vmem:[%s10572_s0 + $0x1e0] sm:$0xff]  ;;  %v295_v63 = vld [vmem:[%s10572_s0 + $0x1f0] sm:$0xff] }
  0x16   :  { %380 = vperm.xlu1 %6205, %v244_v11   ;;  %375 = vperm.xlu0 %6204, %v243_v12   ;;  %v919_v11 = vld [vmem:[%s10574_s2] sm:$0xf]  ;;  %v929_v3 = vld [vmem:[%s10574_s2 + $0x28] sm:$0xf] }
  0x17   :  { %v5645_v12 = vld.sshfl [vmem:[%s10573_s1] sm:$0x33 pattern:$0x75316420]  ;;  %vm935_vm0 = vcmp.gt.bf16.partialorder %v919_v11, 0 }
  0x1a   :  { %390 = vperm.xlu1 %6205, %v246_v13   ;;  %385 = vperm.xlu0 %6204, %v245_v14  }
  0x1e   :  { %400 = vperm.xlu1 %6205, %v248_v15   ;;  %395 = vperm.xlu0 %6204, %v247_v16   ;;  %v920_v15 = vld [vmem:[%s10574_s2 + $0x4] sm:$0xf]  ;;  %v921_v16 = vld [vmem:[%s10574_s2 + $0x8] sm:$0xf] }
  0x1f   :  { %vm936_vm1 = vcmp.gt.bf16.partialorder %v920_v15, 0  ;;  %vm937_vm2 = vcmp.gt.bf16.partialorder %v921_v16, 0  ;;  %v931_v15 = vld [vmem:[%s10574_s2 + $0x30] sm:$0xf] }
  0x22   :  { %410 = vperm.xlu1 %6205, %v250_v17   ;;  %405 = vperm.xlu0 %6204, %v249_v18   ;;  %v7021_v17 = vrot.slane %v5645_v12, %v312_v10  ;;  %v7023_v18 = vsub.s32 0, %v311_v7  ;;  %v928_v7 = vld [vmem:[%s10574_s2 + $0x24] sm:$0xf] }
  0x26   :  { %420 = vperm.xlu1 %6205, %v252_v19   ;;  %415 = vperm.xlu0 %6204, %v251_v20   ;;  %v923_v19 = vld [vmem:[%s10574_s2 + $0x10] sm:$0xf]  ;;  %v922_v20 = vld [vmem:[%s10574_s2 + $0xc] sm:$0xf] }
  0x27   :  { %vm939_vm3 = vcmp.gt.bf16.partialorder %v923_v19, 0  ;;  %vm938_vm4 = vcmp.gt.bf16.partialorder %v922_v20, 0 }
  0x2a   :  { %430 = vperm.xlu1 %6205, %v254_v21   ;;  %425 = vperm.xlu0 %6204, %v253_v22  }
  0x2e   :  { %440 = vperm.xlu1 %6205, %v256_v23   ;;  %435 = vperm.xlu0 %6204, %v255_v24   ;;  %v951_v23 = vsel %vm935_vm0, 65537, %v6754_v0  ;;  %v925_v24 = vld [vmem:[%s10574_s2 + $0x18] sm:$0xf] }
  0x2f   :  { %vm941_vm5 = vcmp.gt.bf16.partialorder %v925_v24, 0 }
  0x32   :  { %450 = vperm.xlu1 %6205, %v258_v25   ;;  %445 = vperm.xlu0 %6204, %v257_v26   ;;  %v7039_v25 = vrot.slane %v7021_v17, %v7023_v18  ;;  %v924_v26 = vld [vmem:[%s10574_s2 + $0x14] sm:$0xf] }
  0x33   :  { %vm940_vm6 = vcmp.gt.bf16.partialorder %v924_v26, 0 }
  0x36   :  { %460 = vperm.xlu1 %6205, %v260_v27   ;;  %455 = vperm.xlu0 %6204, %v259_v28   ;;  %v967_v27 = vunpack.c.l.b16 %v951_v23  ;;  %v952_v28 = vsel %vm936_vm1, 65537, %v6754_v0 }
  0x38   :  { %vm7058_vm7 = vcmp.ne.s32.totalorder %v967_v27, 0  ;;  %v10789_v27 = vmov 0 }
  0x3a   :  { %470 = vperm.xlu1 %6205, %v262_v29   ;;  %465 = vperm.xlu0 %6204, %v261_v30   ;;  %v953_v29 = vsel %vm937_vm2, 65537, %v6754_v0 }
  0x3e   :  { %480 = vperm.xlu1 %6205, %v264_v31   ;;  %475 = vperm.xlu0 %6204, %v263_v32  }
  0x42   :  { %490 = vperm.xlu1 %6205, %v266_v33   ;;  %485 = vperm.xlu0 %6204, %v265_v34   ;;  %v955_v33 = vsel %vm939_vm3, 65537, %v6754_v0  ;;  %v954_v34 = vsel %vm938_vm4, 65537, %v6754_v0  ;;  %vm945_vm3 = vcmp.gt.bf16.partialorder %v929_v3, 0  ;;  %vm944_vm4 = vcmp.gt.bf16.partialorder %v928_v7, 0 }
  0x46   :  { %500 = vperm.xlu1 %6205, %v268_v35   ;;  %495 = vperm.xlu0 %6204, %v267_v36   ;;  %v927_v36 = vld [vmem:[%s10574_s2 + $0x20] sm:$0xf] }
  0x47   :  { %vm943_vm8 = vcmp.gt.bf16.partialorder %v927_v36, 0 }
  0x4a   :  { %510 = vperm.xlu1 %6205, %v270_v37   ;;  %505 = vperm.xlu0 %6204, %v269_v38   ;;  %v968_v37 = vunpack.c.l.b16 %v952_v28  ;;  %v306_v38 = vcombine.high %v5645_v12, %v5645_v12  ;;  %v10791_v28 = vmov 0 }
  0x4c   :  { %vm7070_vm12 = vcmp.ne.s32.totalorder %v968_v37, 0 }
  0x4e   :  { %520 = vperm.xlu1 %6205, %v272_v39   ;;  %515 = vperm.xlu0 %6204, %v271_v40   ;;  %v969_v39 = vunpack.c.l.b16 %v953_v29  ;;  %v926_v40 = vld [vmem:[%s10574_s2 + $0x1c] sm:$0xf]  ;;  %v7144_v29 = vsel %vm945_vm3, 65537, %v6754_v0  ;;  %vm10583_vm3 = vcmask 7168  }
  0x4f   :  { %vm942_vm10 = vcmp.gt.bf16.partialorder %v926_v40, 0  ;;  %v7175_v40 = vld [vmem:[%s10574_s2 + $0x38] sm:$0xf] }
  0x50   :  { %vm7076_vm13 = vcmp.ne.s32.totalorder %v969_v39, 0  ;;  %v958_v2 = vsel %vm942_vm10, 65537, %v6754_v0  ;;  %vm947_vm10 = vcmp.gt.bf16.partialorder %v931_v15, 0 }
  0x52   :  { %530 = vperm.xlu1 %6205, %v274_v41   ;;  %525 = vperm.xlu0 %6204, %v273_v42   ;;  %v971_v42 = vunpack.c.l.b16 %v955_v33 }
  0x54   :  { %vm7080_vm14 = vcmp.ne.s32.totalorder %v971_v42, 0 }
  0x56   :  { %540 = vperm.xlu1 %6205, %v276_v43   ;;  %535 = vperm.xlu0 %6204, %v275_v44   ;;  %v970_v43 = vunpack.c.l.b16 %v954_v34  ;;  %v957_v44 = vsel %vm941_vm5, 65537, %v6754_v0  ;;  %v7156_v34 = vsel %vm944_vm4, 65537, %v6754_v0 }
  0x58   :  { %vm7091_vm15 = vcmp.ne.s32.totalorder %v970_v43, 0 }
  0x5a   :  { %550 = vperm.xlu1 %6205, %v278_v45   ;;  %545 = vperm.xlu0 %6204, %v277_v46  }
  0x5e   :  { %560 = vperm.xlu1 %6205, %v280_v47   ;;  %555 = vperm.xlu0 %6204, %v279_v48  }
  0x62   :  { %570 = vperm.xlu1 %6205, %v282_v49   ;;  %565 = vperm.xlu0 %6204, %v281_v50   ;;  %v956_v49 = vsel %vm940_vm6, 65537, %v6754_v0 }
  0x66   :  { %580 = vperm.xlu1 %6205, %v284_v51   ;;  %575 = vperm.xlu0 %6204, %v283_v52  }
  0x6a   :  { %590 = vperm.xlu1 %6205, %v286_v53   ;;  %585 = vperm.xlu0 %6204, %v285_v54   ;;  %v7074_v53 = vrot.slane %v306_v38, %v312_v10  ;;  %v973_v54 = vunpack.c.l.b16 %v957_v44  ;;  %v10793_v44 = vmov 0 }
  0x6c   :  { %vm7108_vm2 = vcmp.ne.s32.totalorder %v973_v54, 0 }
  0x6e   :  { %600 = vperm.xlu1 %6205, %v288_v55   ;;  %595 = vperm.xlu0 %6204, %v287_v56  }
  0x72   :  { %610 = vperm.xlu1 %6205, %v290_v57   ;;  %605 = vperm.xlu0 %6204, %v289_v58   ;;  %v972_v57 = vunpack.c.l.b16 %v956_v49  ;;  %v959_v58 = vsel %vm943_vm8, 65537, %v6754_v0 }
  0x73   :  { %v975_v10 = vunpack.c.l.b16 %v959_v58 }
  0x74   :  { %vm7134_vm8 = vcmp.ne.s32.totalorder %v972_v57, 0 }
  0x75   :  { %v10790_v27 = vsel %vm7134_vm8, 4294967295, %v10789_v27 }
  0x76   :  { %620 = vperm.xlu1 %6205, %v292_v59   ;;  %615 = vperm.xlu0 %6204, %v291_v60  }
  0x7a   :  { %630 = vperm.xlu1 %6205, %v294_v61   ;;  %625 = vperm.xlu0 %6204, %v293_v62  }
  0x7e   :  { %635 = vperm.xlu0 %6204, %v295_v63  }
  0x81   :  { %v336_v4 = vpop.permute.xlu1 %335  ;;  %v326_v5 = vpop.permute.xlu0 %325 }
  0x82   :  { %v663_v30 = vadd.f32 %v7039_v25, %v326_v5  ;;  %v665_v45 = vadd.f32 %v7039_v25, %v336_v4 }
  0x84   :  { %v791_v48 = vmul.f32 0.2, %v663_v30  ;;  %vm727_vm9 = vcmp.gt.f32.partialorder %v663_v30, 0.0  ;;  %v793_v63 = vmul.f32 0.2, %v665_v45  ;;  %vm729_vm0 = vcmp.gt.f32.partialorder %v665_v45, 0.0 }
  0x85   :  { %v7005_v8 = vpop.permute.xlu1 %340  ;;  %v331_v9 = vpop.permute.xlu0 %330 }
  0x86   :  { %v664_v35 = vadd.f32 %v7039_v25, %v331_v9  ;;  %v666_v59 = vadd.f32 %v7039_v25, %v7005_v8  ;;  %v855_v62 = vsel %vm727_vm9, %v663_v30, %v791_v48  ;;  %v7106_v8 = vrot.slane %v7074_v53, %v7023_v18  ;;  %v7149_v30 = vld [vmem:[%s10574_s2 + $0x2c] sm:$0xf] }
  0x87   :  { %v10787_v9 = vmov 0  ;;  %v7116_v12 = vsel %vm7058_vm7, %v855_v62, -1e+30  ;;  %vm7138_vm9 = vcmp.ne.s32.totalorder %v975_v10, 0  ;;  %v7190_v48 = vsel %vm947_vm10, 65537, %v6754_v0 }
  0x88   :  { %v792_v51 = vmul.f32 0.2, %v664_v35  ;;  %vm728_vm11 = vcmp.gt.f32.partialorder %v664_v35, 0.0  ;;  %v10788_v9 = vsel %vm7108_vm2, 4294967295, %v10787_v9  ;;  %vm730_vm5 = vcmp.gt.f32.partialorder %v666_v59, 0.0 }
  0x89   :  { %v7013_v13 = vpop.permute.xlu1 %350  ;;  %v346_v14 = vpop.permute.xlu0 %345  ;;  %v10792_v28 = vsel %vm7138_vm9, 4294967295, %v10791_v28  ;;  %vm946_vm4 = vcmp.gt.bf16.partialorder %v7149_v30, 0  ;;  %v979_v3 = vunpack.c.l.b16 %v7190_v48  ;;  %v10799_v30 = vmov 0 }
  0x8a   :  { %v667_v50 = vadd.f32 %v7039_v25, %v346_v14  ;;  %v856_v5 = vsel %vm728_vm11, %v664_v35, %v792_v51  ;;  %v668_v11 = vadd.f32 %v7039_v25, %v7013_v13  ;;  %v974_v14 = vunpack.c.l.b16 %v958_v2 }
  0x8b   :  { %v7128_v20 = vsel %vm7070_vm12, %v856_v5, -1e+30  ;;  %v857_v13 = vsel %vm729_vm0, %v665_v45, %v793_v63  ;;  %v977_v45 = vunpack.c.l.b16 %v7144_v29  ;;  %v6756_v2 = vmov -1e+30  }
  0x8c   :  { %v795_v6 = vmul.f32 0.2, %v667_v50  ;;  %vm731_vm1 = vcmp.gt.f32.partialorder %v667_v50, 0.0  ;;  %v796_v33 = vmul.f32 0.2, %v668_v11  ;;  %vm732_vm11 = vcmp.gt.f32.partialorder %v668_v11, 0.0 }
  0x8d   :  { %v7031_v21 = vpop.permute.xlu1 %360  ;;  %v356_v22 = vpop.permute.xlu0 %355  ;;  %vm7183_vm0 = vcmp.ne.s32.totalorder %v974_v14, 0  ;;  %40 = vst.msk [vmem:[#allocation2] sm:$0xff] %vm10583_vm3, %v6756_v2  ;;  %41 = vst.msk [vmem:[#allocation2 + $0x8] sm:$0xff] %vm10583_vm3, %v6756_v2  ;;  %v10795_v5 = vmov 0  ;;  %v10797_v29 = vmov 0 }
  0x8e   :  { %v669_v4 = vadd.f32 %v7039_v25, %v356_v22  ;;  %v794_v22 = vmul.f32 0.2, %v666_v59  ;;  %v859_v24 = vsel %vm731_vm1, %v667_v50, %v795_v6  ;;  %v7160_v35 = vadd.f32 %v7039_v25, %v7031_v21  ;;  %v7203_v50 = vld [vmem:[%s10574_s2 + $0x34] sm:$0xf]  ;;  %42 = vst.msk [vmem:[#allocation2 + $0x10] sm:$0xff] %vm10583_vm3, %v6756_v2  ;;  %43 = vst.msk [vmem:[#allocation2 + $0x18] sm:$0xff] %vm10583_vm3, %v6756_v2 }
  0x8f   :  { %v7169_v38 = vsel %vm7080_vm14, %v859_v24, -1e+30  ;;  %v10794_v44 = vsel %vm7183_vm0, 4294967295, %v10793_v44  ;;  %v7196_v49 = vsel %vm732_vm11, %v668_v11, %v796_v33  ;;  %44 = vst.msk [vmem:[#allocation2 + $0x20] sm:$0xff] %vm10583_vm3, %v6756_v2  ;;  %45 = vst.msk [vmem:[#allocation2 + $0x28] sm:$0xff] %vm10583_vm3, %v6756_v2  ;;  %vm948_vm11 = vcmp.gt.bf16.partialorder %v7203_v50, 0 }
  0x90   :  { %v797_v26 = vmul.f32 0.2, %v669_v4  ;;  %vm733_vm6 = vcmp.gt.f32.partialorder %v669_v4, 0.0  ;;  %v858_v39 = vsel %vm730_vm5, %v666_v59, %v794_v22  ;;  %vm949_vm5 = vcmp.gt.bf16.partialorder %v7175_v40, 0  ;;  %46 = vst.msk [vmem:[#allocation2 + $0x30] sm:$0xff] %vm10583_vm3, %v6756_v2  ;;  %47 = vst.msk [vmem:[#allocation2 + $0x38] sm:$0xff] %vm10583_vm3, %v6756_v2 }
  0x91   :  { %v7047_v31 = vpop.permute.xlu1 %370  ;;  %v366_v32 = vpop.permute.xlu0 %365  ;;  %v7219_v59 = vmul.f32 0.2, %v7160_v35  ;;  %48 = vst.msk [vmem:[#allocation2 + $0x40] sm:$0xff] %vm10583_vm3, %v6756_v2  ;;  %49 = vst.msk [vmem:[#allocation2 + $0x48] sm:$0xff] %vm10583_vm3, %v6756_v2  ;;  %v962_v6 = vsel %vm946_vm4, 65537, %v6754_v0  ;;  %v965_v7 = vsel %vm949_vm5, 65537, %v6754_v0 }
  0x92   :  { %v671_v23 = vadd.f32 %v7039_v25, %v366_v32  ;;  %v7153_v32 = vsel %vm7076_vm13, %v857_v13, -1e+30  ;;  %v861_v42 = vsel %vm733_vm6, %v669_v4, %v797_v26  ;;  %v7207_v51 = vadd.f32 %v7039_v25, %v7047_v31  ;;  %50 = vst.msk [vmem:[#allocation2 + $0x50] sm:$0xff] %vm10583_vm3, %v6756_v2  ;;  %51 = vst.msk [vmem:[#allocation2 + $0x58] sm:$0xff] %vm10583_vm3, %v6756_v2 }
  0x93   :  { %v7216_v58 = vsel %vm7108_vm2, %v861_v42, -1e+30  ;;  %vm734_vm6 = vcmp.gt.f32.partialorder %v7160_v35, 0.0  ;;  %52 = vst.msk [vmem:[#allocation2 + $0x60] sm:$0xff] %vm10583_vm3, %v6756_v2  ;;  %53 = vst.msk [vmem:[#allocation2 + $0x68] sm:$0xff] %vm10583_vm3, %v6756_v2 }
  0x94   :  { %v799_v43 = vmul.f32 0.2, %v671_v23  ;;  %vm735_vm1 = vcmp.gt.f32.partialorder %v671_v23, 0.0  ;;  %54 = vst.msk [vmem:[#allocation2 + $0x70] sm:$0xff] %vm10583_vm3, %v6756_v2  ;;  %55 = vst.msk [vmem:[#allocation2 + $0x78] sm:$0xff] %vm10583_vm3, %v6756_v2  ;;  %v862_v13 = vsel %vm734_vm6, %v7160_v35, %v7219_v59  ;;  %vm736_vm4 = vcmp.gt.f32.partialorder %v7207_v51, 0.0 }
  0x95   :  { %v7064_v46 = vpop.permute.xlu1 %380  ;;  %v7066_v47 = vpop.permute.xlu0 %375  ;;  %56 = vst.msk [vmem:[#allocation2 + $0x80] sm:$0xff] %vm10583_vm3, %v6756_v2  ;;  %57 = vst.msk [vmem:[#allocation2 + $0x88] sm:$0xff] %vm10583_vm3, %v6756_v2  ;;  %v7368_v4 = vsel %vm7134_vm8, %v7196_v49, -1e+30  ;;  %v800_v22 = vmul.f32 0.2, %v7207_v51 }
  0x96   :  { %v7179_v21 = vadd.f32 %v7039_v25, %v7066_v47  ;;  %v7194_v47 = vsel %vm7091_vm15, %v858_v39, -1e+30  ;;  %v7227_v31 = vsel %vm735_vm1, %v671_v23, %v799_v43  ;;  %58 = vst.msk [vmem:[#allocation2 + $0x90] sm:$0xff] %vm10583_vm3, %v6756_v2  ;;  %59 = vst.msk [vmem:[#allocation2 + $0x98] sm:$0xff] %vm10583_vm3, %v6756_v2  ;;  %vm7372_vm1 = vcmp.ne.s32.totalorder %v977_v45, 0 }
  0x97   :  { %60 = vst.msk [vmem:[#allocation2 + $0xa0] sm:$0xff] %vm10583_vm3, %v6756_v2  ;;  %61 = vst.msk [vmem:[#allocation2 + $0xa8] sm:$0xff] %vm10583_vm3, %v6756_v2  ;;  %v10796_v5 = vsel %vm7372_vm1, 4294967295, %v10795_v5  ;;  %v674_v10 = vadd.f32 %v7039_v25, %v7064_v46  ;;  %v7392_v15 = vsel %vm7138_vm9, %v7227_v31, -1e+30  ;;  %v964_v35 = vsel %vm948_vm11, 65537, %v6754_v0 }
  0x98   :  { %v7231_v63 = vmul.f32 0.2, %v7179_v21  ;;  %62 = vst.msk [vmem:[#allocation2 + $0xb0] sm:$0xff] %vm10583_vm3, %v6756_v2  ;;  %63 = vst.msk [vmem:[#allocation2 + $0xb8] sm:$0xff] %vm10583_vm3, %v6756_v2  ;;  %vm737_vm10 = vcmp.gt.f32.partialorder %v7179_v21, 0.0  ;;  %v864_v43 = vsel %vm736_vm4, %v7207_v51, %v800_v22  ;;  %v980_v50 = vunpack.c.l.b16 %v964_v35 }
  0x99   :  { %v7087_v60 = vpop.permute.xlu1 %390  ;;  %v7089_v61 = vpop.permute.xlu0 %385  ;;  %64 = vst.msk [vmem:[#allocation2 + $0xc0] sm:$0xff] %vm10583_vm3, %v6756_v2  ;;  %65 = vst.msk [vmem:[#allocation2 + $0xc8] sm:$0xff] %vm10583_vm3, %v6756_v2  ;;  %v934_v46 = vld [vmem:[%s10574_s2 + $0x3c] sm:$0xf]  ;;  %v7422_v33 = vsel %vm7183_vm0, %v862_v13, -1e+30 }
  0x9a   :  { %v7223_v62 = vadd.f32 %v7039_v25, %v7089_v61  ;;  %66 = vst.msk [vmem:[#allocation2 + $0xd0] sm:$0xff] %vm10583_vm3, %v6756_v2  ;;  %67 = vst.msk [vmem:[#allocation2 + $0xd8] sm:$0xff] %vm10583_vm3, %v6756_v2  ;;  %v976_v61 = vunpack.c.l.b16 %v7156_v34  ;;  %v865_v24 = vsel %vm737_vm10, %v7179_v21, %v7231_v63  ;;  %v981_v34 = vunpack.c.l.b16 %v965_v7 }
  0x9b   :  { %68 = vst.msk [vmem:[#allocation2 + $0xe0] sm:$0xff] %vm10583_vm3, %v6756_v2  ;;  %69 = vst.msk [vmem:[#allocation2 + $0xe8] sm:$0xff] %vm10583_vm3, %v6756_v2  ;;  %v7429_v39 = vadd.f32 %v7039_v25, %v7087_v60  ;;  %v7438_v42 = vsel %vm7372_vm1, %v865_v24, -1e+30  ;;  %v802_v45 = vmul.f32 0.2, %v674_v10 }
  0x9c   :  { %70 = vst.msk [vmem:[#allocation2 + $0xf0] sm:$0xff] %vm10583_vm3, %v6756_v2  ;;  %71 = vst.msk [vmem:[#allocation2 + $0xf8] sm:$0xff] %vm10583_vm3, %v6756_v2  ;;  %v803_v26 = vmul.f32 0.2, %v7223_v62  ;;  %vm7411_vm5 = vcmp.ne.s32.totalorder %v976_v61, 0  ;;  %vm739_vm6 = vcmp.gt.f32.partialorder %v7223_v62, 0.0 }
  0x9d   :  { %v7121_v16 = vpop.permute.xlu1 %400  ;;  %1159 = vmax.xlane.f32.xlu0 %v7116_v12  ;;  %v7124_v19 = vpop.permute.xlu0 %395  ;;  %72 = vst.msk [vmem:[#allocation2 + $0x100] sm:$0xff] %vm10583_vm3, %v6756_v2  ;;  %73 = vst.msk [vmem:[#allocation2 + $0x108] sm:$0xff] %vm10583_vm3, %v6756_v2  ;;  %v10798_v29 = vsel %vm7411_vm5, 4294967295, %v10797_v29  ;;  %vm738_vm11 = vcmp.gt.f32.partialorder %v674_v10, 0.0  ;;  %v7451_v59 = vsel %vm7411_vm5, %v864_v43, -1e+30 }
  0x9e   :  { %1161 = vmax.xlane.f32.xlu1 %v7128_v20  ;;  %74 = vst.msk [vmem:[#allocation2 + $0x110] sm:$0xff] %vm10583_vm3, %v6756_v2  ;;  %75 = vst.msk [vmem:[#allocation2 + $0x118] sm:$0xff] %vm10583_vm3, %v6756_v2  ;;  %v677_v23 = vadd.f32 %v7039_v25, %v7124_v19  ;;  %v978_v19 = vunpack.c.l.b16 %v962_v6  ;;  %v867_v60 = vsel %vm739_vm6, %v7223_v62, %v803_v26  ;;  %v10801_v51 = vmov 0 }
  0x9f   :  { %76 = vst.msk [vmem:[#allocation2 + $0x120] sm:$0xff] %vm10583_vm3, %v6756_v2  ;;  %77 = vst.msk [vmem:[#allocation2 + $0x128] sm:$0xff] %vm10583_vm3, %v6756_v2  ;;  %vm7457_vm1 = vcmp.ne.s32.totalorder %v981_v34, 0  ;;  %vm10805_vm0 = vcmp.gt.bf16.partialorder %v934_v46, 0  ;;  %v7467_v62 = vadd.f32 %v7039_v25, %v7121_v16  ;;  %v7479_v6 = vmul.f32 0.2, %v7429_v39 }
  0xa0   :  { %78 = vst.msk [vmem:[#allocation2 + $0x130] sm:$0xff] %vm10583_vm3, %v6756_v2  ;;  %79 = vst.msk [vmem:[#allocation2 + $0x138] sm:$0xff] %vm10583_vm3, %v6756_v2  ;;  %v805_v49 = vmul.f32 0.2, %v677_v23  ;;  %vm741_vm10 = vcmp.gt.f32.partialorder %v677_v23, 0.0  ;;  %vm7453_vm4 = vcmp.ne.s32.totalorder %v978_v19, 0 }
  0xa1   :  { %v7162_v36 = vpop.permute.xlu1 %410  ;;  %1163 = vmax.xlane.f32.xlu0 %v7153_v32  ;;  %v7165_v37 = vpop.permute.xlu0 %405  ;;  %80 = vst.msk [vmem:[#allocation2 + $0x140] sm:$0xff] %vm10583_vm3, %v6756_v2  ;;  %81 = vst.msk [vmem:[#allocation2 + $0x148] sm:$0xff] %vm10583_vm3, %v6756_v2  ;;  %v10802_v51 = vsel %vm7453_vm4, 4294967295, %v10801_v51  ;;  %v7463_v31 = vsel %vm10805_vm0, 65537, %v6754_v0  ;;  %v10596_v13 = vmov 0.0  }
  0xa2   :  { %1167 = vmax.xlane.f32.xlu1 %v7169_v38  ;;  %82 = vst.msk [vmem:[#allocation2 + $0x150] sm:$0xff] %vm10583_vm3, %v6756_v2  ;;  %83 = vst.msk [vmem:[#allocation2 + $0x158] sm:$0xff] %vm10583_vm3, %v6756_v2  ;;  %v7443_v48 = vadd.f32 %v7106_v8, %v7165_v37  ;;  %v7486_v25 = vsel %vm741_vm10, %v677_v23, %v805_v49  ;;  %vm10808_vm10 = vcmask 7168   ;;  %v680_v22 = vadd.f32 %v7106_v8, %v7162_v36 }
  0xa3   :  { %84 = vst.msk [vmem:[#allocation2 + $0x160] sm:$0xff] %vm10583_vm3, %v6756_v2  ;;  %85 = vst.msk [vmem:[#allocation2 + $0x168] sm:$0xff] %vm10583_vm3, %v6756_v2  ;;  %v7638_v24 = vsel %vm7457_vm1, %v7486_v25, -1e+30  ;;  %v806_v19 = vmul.f32 0.2, %v7467_v62 }
  0xa4   :  { %86 = vst.msk [vmem:[#allocation2 + $0x170] sm:$0xff] %vm10583_vm3, %v6756_v2  ;;  %87 = vst.msk [vmem:[#allocation2 + $0x178] sm:$0xff] %vm10583_vm3, %v6756_v2  ;;  %v7490_v16 = vmul.f32 0.2, %v7443_v48 }
  0xa5   :  { %v7209_v54 = vpop.permute.xlu1 %420  ;;  %1165 = vmax.xlane.f32.xlu0 %v7194_v47  ;;  %v7212_v57 = vpop.permute.xlu0 %415  ;;  %88 = vst.msk [vmem:[#allocation2 + $0x180] sm:$0xff] %vm10583_vm3, %v6756_v2  ;;  %89 = vst.msk [vmem:[#allocation2 + $0x188] sm:$0xff] %vm10583_vm3, %v6756_v2 }
  0xa6   :  { %1171 = vmax.xlane.f32.xlu1 %v7216_v58  ;;  %90 = vst.msk [vmem:[#allocation2 + $0x190] sm:$0xff] %vm10583_vm3, %v6756_v2  ;;  %91 = vst.msk [vmem:[#allocation2 + $0x198] sm:$0xff] %vm10583_vm3, %v6756_v2  ;;  %v7483_v0 = vadd.f32 %v7106_v8, %v7212_v57  ;;  %v982_v57 = vunpack.c.l.b16 %v7463_v31  ;;  %v682_v43 = vadd.f32 %v7106_v8, %v7209_v54 }
  0xa7   :  { %92 = vst.msk [vmem:[#allocation2 + $0x1a0] sm:$0xff] %vm10583_vm3, %v6756_v2  ;;  %93 = vst.msk [vmem:[#allocation2 + $0x1a8] sm:$0xff] %vm10583_vm3, %v6756_v2 }
  0xa8   :  { %94 = vst.msk [vmem:[#allocation2 + $0x1b0] sm:$0xff] %vm10583_vm3, %v6756_v2  ;;  %95 = vst.msk [vmem:[#allocation2 + $0x1b8] sm:$0xff] %vm10583_vm3, %v6756_v2  ;;  %v809_v35 = vmul.f32 0.2, %v7483_v0 }
  0xa9   :  { %96 = vst.msk [vmem:[#allocation2 + $0x1c0] sm:$0xff] %vm10583_vm3, %v6756_v2  ;;  %97 = vst.msk [vmem:[#allocation2 + $0x1c8] sm:$0xff] %vm10583_vm3, %v6756_v2  ;;  %v7384_v11 = vpop.permute.xlu1 %430  ;;  %1169 = vmax.xlane.f32.xlu0 %v7368_v4  ;;  %v7387_v14 = vpop.permute.xlu0 %425 }
  0xaa   :  { %98 = vst.msk [vmem:[#allocation2 + $0x1d0] sm:$0xff] %vm10583_vm3, %v6756_v2  ;;  %99 = vst.msk [vmem:[#allocation2 + $0x1d8] sm:$0xff] %vm10583_vm3, %v6756_v2  ;;  %1175 = vmax.xlane.f32.xlu1 %v7392_v15  ;;  %v683_v36 = vadd.f32 %v7106_v8, %v7387_v14  ;;  %v684_v25 = vadd.f32 %v7106_v8, %v7384_v11  ;;  %v6207_v14 = vld [vmem:[%s10575_s3 + $0x8] sm:$0xff]  }
  0xab   :  { %100 = vst.msk [vmem:[#allocation2 + $0x1e0] sm:$0xff] %vm10583_vm3, %v6756_v2  ;;  %101 = vst.msk [vmem:[#allocation2 + $0x1e8] sm:$0xff] %vm10583_vm3, %v6756_v2 }
  0xac   :  { %102 = vst.msk [vmem:[#allocation2 + $0x1f0] sm:$0xff] %vm10583_vm3, %v6756_v2  ;;  %103 = vst.msk [vmem:[#allocation2 + $0x1f8] sm:$0xff] %vm10583_vm3, %v6756_v2  ;;  %vm7416_vm3 = vcmp.ne.s32.totalorder %v979_v3, 0  ;;  %v866_v3 = vsel %vm738_vm11, %v674_v10, %v802_v45  ;;  %vm7497_vm11 = vcmp.ne.s32.totalorder %v980_v50, 0  ;;  %v808_v50 = vmul.f32 0.2, %v680_v22 }
  0xad   :  { %v10800_v30 = vsel %vm7416_vm3, 4294967295, %v10799_v30  ;;  %v7431_v40 = vpop.permute.xlu1 %440  ;;  %1173 = vmax.xlane.f32.xlu0 %v7422_v33  ;;  %v7434_v21 = vpop.permute.xlu0 %435  ;;  %v7476_v61 = vsel %vm7416_vm3, %v867_v60, -1e+30  ;;  %v7495_v7 = vsel %vm7453_vm4, %v866_v3, -1e+30  ;;  %121 = vst.msk [vmem:[#allocation3 + $0x88] sm:$0xff] %vm10808_vm10, %v10596_v13  ;;  %vm10809_vm0 = vmmov %vm10808_vm10 }
  0xae   :  { %1179 = vmax.xlane.f32.xlu1 %v7438_v42  ;;  %104 = vst.msk [vmem:[#allocation3] sm:$0xff] %vm10809_vm0, %v10596_v13  ;;  %vm10810_vm3 = vmmov %vm10809_vm0  ;;  %v685_v31 = vadd.f32 %v7106_v8, %v7434_v21  ;;  %v811_v54 = vmul.f32 0.2, %v683_v36 }
  0xaf   :  { %105 = vst.msk [vmem:[#allocation3 + $0x8] sm:$0xff] %vm10810_vm3, %v10596_v13  ;;  %vm10811_vm6 = vmmov %vm10809_vm0 }
  0xb0   :  { %106 = vst.msk [vmem:[#allocation3 + $0x10] sm:$0xff] %vm10811_vm6, %v10596_v13  ;;  %vm10812_vm4 = vmmov %vm10809_vm0 }
  0xb1   :  { %v7469_v63 = vpop.permute.xlu1 %450  ;;  %1177 = vmax.xlane.f32.xlu0 %v7451_v59  ;;  %v7472_v2 = vpop.permute.xlu0 %445  ;;  %107 = vst.msk [vmem:[#allocation3 + $0x18] sm:$0xff] %vm10812_vm4, %v10596_v13  ;;  %vm10813_vm5 = vmmov %vm10809_vm0 }
  0xb2   :  { %1183 = vmax.xlane.f32.xlu1 %v7476_v61  ;;  %108 = vst.msk [vmem:[#allocation3 + $0x20] sm:$0xff] %vm10813_vm5, %v10596_v13  ;;  %vm10814_vm9 = vmmov %vm10809_vm0 }
  0xb3   :  { %109 = vst.msk [vmem:[#allocation3 + $0x28] sm:$0xff] %vm10814_vm9, %v10596_v13  ;;  %vm10815_vm10 = vmmov %vm10809_vm0 }
  0xb4   :  { %110 = vst.msk [vmem:[#allocation3 + $0x30] sm:$0xff] %vm10815_vm10, %v10596_v13  ;;  %vm10816_vm3 = vmmov %vm10809_vm0 }
  0xb5   :  { %111 = vst.msk [vmem:[#allocation3 + $0x38] sm:$0xff] %vm10809_vm0, %v10596_v13  ;;  %vm10817_vm6 = vmmov %vm10809_vm0  ;;  %v7632_v46 = vpop.permute.xlu1 %460  ;;  %1181 = vmax.xlane.f32.xlu0 %v7495_v7  ;;  %v456_v23 = vpop.permute.xlu0 %455 }
  0xb6   :  { %112 = vst.msk [vmem:[#allocation3 + $0x40] sm:$0xff] %vm10816_vm3, %v10596_v13  ;;  %vm10818_vm4 = vmmov %vm10809_vm0  ;;  %1187 = vmax.xlane.f32.xlu1 %v7638_v24 }
  0xb7   :  { %113 = vst.msk [vmem:[#allocation3 + $0x48] sm:$0xff] %vm10817_vm6, %v10596_v13  ;;  %vm10819_vm5 = vmmov %vm10809_vm0 }
  0xb8   :  { %114 = vst.msk [vmem:[#allocation3 + $0x50] sm:$0xff] %vm10818_vm4, %v10596_v13  ;;  %vm10820_vm9 = vmmov %vm10809_vm0 }
  0xb9   :  { %115 = vst.msk [vmem:[#allocation3 + $0x58] sm:$0xff] %vm10819_vm5, %v10596_v13  ;;  %vm10821_vm10 = vmmov %vm10809_vm0  ;;  %v7667_v45 = vpop.permute.xlu1 %470 }
  0xba   :  { %116 = vst.msk [vmem:[#allocation3 + $0x60] sm:$0xff] %vm10820_vm9, %v10596_v13  ;;  %vm10822_vm3 = vmmov %vm10809_vm0 }
  0xbb   :  { %117 = vst.msk [vmem:[#allocation3 + $0x68] sm:$0xff] %vm10821_vm10, %v10596_v13  ;;  %vm10823_vm6 = vmmov %vm10809_vm0 }
  0xbc   :  { %118 = vst.msk [vmem:[#allocation3 + $0x70] sm:$0xff] %vm10809_vm0, %v10596_v13  ;;  %vm10824_vm4 = vmmov %vm10809_vm0 }
  0xbd   :  { %119 = vst.msk [vmem:[#allocation3 + $0x78] sm:$0xff] %vm10822_vm3, %v10596_v13  ;;  %vm10825_vm5 = vmmov %vm10809_vm0 }
  0xbe   :  { %120 = vst.msk [vmem:[#allocation3 + $0x80] sm:$0xff] %vm10823_vm6, %v10596_v13  ;;  %vm10826_vm9 = vmmov %vm10809_vm0 }
  0xbf   :  { %122 = vst.msk [vmem:[#allocation3 + $0x90] sm:$0xff] %vm10824_vm4, %v10596_v13  ;;  %vm10827_vm10 = vmmov %vm10809_vm0 }
  0xc0   :  { %123 = vst.msk [vmem:[#allocation3 + $0x98] sm:$0xff] %vm10825_vm5, %v10596_v13  ;;  %vm10828_vm3 = vmmov %vm10809_vm0 }
  0xc1   :  { %124 = vst.msk [vmem:[#allocation3 + $0xa0] sm:$0xff] %vm10826_vm9, %v10596_v13  ;;  %vm10829_vm6 = vmmov %vm10809_vm0 }
  0xc2   :  { %125 = vst.msk [vmem:[#allocation3 + $0xa8] sm:$0xff] %vm10827_vm10, %v10596_v13  ;;  %vm10830_vm4 = vmmov %vm10809_vm0 }
  0xc3   :  { %126 = vst.msk [vmem:[#allocation3 + $0xb0] sm:$0xff] %vm10809_vm0, %v10596_v13  ;;  %vm10831_vm5 = vmmov %vm10809_vm0 }
  0xc4   :  { %127 = vst.msk [vmem:[#allocation3 + $0xb8] sm:$0xff] %vm10828_vm3, %v10596_v13  ;;  %vm10832_vm9 = vmmov %vm10809_vm0 }
  0xc5   :  { %128 = vst.msk [vmem:[#allocation3 + $0xc0] sm:$0xff] %vm10829_vm6, %v10596_v13  ;;  %vm10833_vm10 = vmmov %vm10809_vm0 }
  0xc6   :  { %129 = vst.msk [vmem:[#allocation3 + $0xc8] sm:$0xff] %vm10830_vm4, %v10596_v13  ;;  %vm10834_vm3 = vmmov %vm10809_vm0 }
  0xc7   :  { %130 = vst.msk [vmem:[#allocation3 + $0xd0] sm:$0xff] %vm10831_vm5, %v10596_v13  ;;  %vm10835_vm6 = vmmov %vm10809_vm0 }
  0xc8   :  { %131 = vst.msk [vmem:[#allocation3 + $0xd8] sm:$0xff] %vm10832_vm9, %v10596_v13  ;;  %vm10836_vm4 = vmmov %vm10809_vm0 }
  0xc9   :  { %132 = vst.msk [vmem:[#allocation3 + $0xe0] sm:$0xff] %vm10833_vm10, %v10596_v13  ;;  %vm10837_vm5 = vmmov %vm10809_vm0 }
  0xca   :  { %133 = vst.msk [vmem:[#allocation3 + $0xe8] sm:$0xff] %vm10809_vm0, %v10596_v13  ;;  %vm10838_vm9 = vmmov %vm10809_vm0 }
  0xcb   :  { %134 = vst.msk [vmem:[#allocation3 + $0xf0] sm:$0xff] %vm10834_vm3, %v10596_v13  ;;  %vm10839_vm10 = vmmov %vm10809_vm0 }
  0xcc   :  { %135 = vst.msk [vmem:[#allocation3 + $0xf8] sm:$0xff] %vm10835_vm6, %v10596_v13  ;;  %vm10840_vm3 = vmmov %vm10809_vm0 }
  0xcd   :  { %136 = vst.msk [vmem:[#allocation3 + $0x100] sm:$0xff] %vm10836_vm4, %v10596_v13  ;;  %vm10841_vm6 = vmmov %vm10809_vm0 }
  0xce   :  { %137 = vst.msk [vmem:[#allocation3 + $0x108] sm:$0xff] %vm10837_vm5, %v10596_v13  ;;  %vm10842_vm4 = vmmov %vm10809_vm0 }
  0xcf   :  { %138 = vst.msk [vmem:[#allocation3 + $0x110] sm:$0xff] %vm10838_vm9, %v10596_v13  ;;  %vm10843_vm5 = vmmov %vm10809_vm0 }
  0xd0   :  { %139 = vst.msk [vmem:[#allocation3 + $0x118] sm:$0xff] %vm10839_vm10, %v10596_v13  ;;  %vm10844_vm9 = vmmov %vm10809_vm0 }
  0xd1   :  { %140 = vst.msk [vmem:[#allocation3 + $0x120] sm:$0xff] %vm10809_vm0, %v10596_v13  ;;  %vm10845_vm10 = vmmov %vm10809_vm0 }
  0xd2   :  { %141 = vst.msk [vmem:[#allocation3 + $0x128] sm:$0xff] %vm10840_vm3, %v10596_v13  ;;  %vm10846_vm3 = vmmov %vm10809_vm0 }
  0xd3   :  { %142 = vst.msk [vmem:[#allocation3 + $0x130] sm:$0xff] %vm10841_vm6, %v10596_v13  ;;  %vm10847_vm6 = vmmov %vm10809_vm0 }
  0xd4   :  { %143 = vst.msk [vmem:[#allocation3 + $0x138] sm:$0xff] %vm10842_vm4, %v10596_v13  ;;  %vm10848_vm4 = vmmov %vm10809_vm0 }
  0xd5   :  { %144 = vst.msk [vmem:[#allocation3 + $0x140] sm:$0xff] %vm10843_vm5, %v10596_v13  ;;  %vm10849_vm5 = vmmov %vm10809_vm0 }
  0xd6   :  { %145 = vst.msk [vmem:[#allocation3 + $0x148] sm:$0xff] %vm10844_vm9, %v10596_v13  ;;  %vm10850_vm9 = vmmov %vm10809_vm0 }
  0xd7   :  { %146 = vst.msk [vmem:[#allocation3 + $0x150] sm:$0xff] %vm10845_vm10, %v10596_v13  ;;  %vm10851_vm10 = vmmov %vm10809_vm0 }
  0xd8   :  { %147 = vst.msk [vmem:[#allocation3 + $0x158] sm:$0xff] %vm10809_vm0, %v10596_v13  ;;  %154 = vst.msk [vmem:[#allocation3 + $0x190] sm:$0xff] %vm10809_vm0, %v10596_v13 }
  0xd9   :  { %148 = vst.msk [vmem:[#allocation3 + $0x160] sm:$0xff] %vm10846_vm3, %v10596_v13  ;;  %vm10852_vm3 = vmmov %vm10809_vm0 }
  0xda   :  { %149 = vst.msk [vmem:[#allocation3 + $0x168] sm:$0xff] %vm10847_vm6, %v10596_v13  ;;  %vm10853_vm6 = vmmov %vm10809_vm0 }
  0xdb   :  { %150 = vst.msk [vmem:[#allocation3 + $0x170] sm:$0xff] %vm10848_vm4, %v10596_v13  ;;  %vm10854_vm4 = vmmov %vm10809_vm0 }
  0xdc   :  { %151 = vst.msk [vmem:[#allocation3 + $0x178] sm:$0xff] %vm10849_vm5, %v10596_v13  ;;  %vm10855_vm5 = vmmov %vm10809_vm0 }
  0xdd   :  { %152 = vst.msk [vmem:[#allocation3 + $0x180] sm:$0xff] %vm10850_vm9, %v10596_v13  ;;  %vm10856_vm9 = vmmov %vm10809_vm0 }
  0xde   :  { %153 = vst.msk [vmem:[#allocation3 + $0x188] sm:$0xff] %vm10851_vm10, %v10596_v13  ;;  %vm10857_vm10 = vmmov %vm10809_vm0 }
  0xdf   :  { %155 = vst.msk [vmem:[#allocation3 + $0x198] sm:$0xff] %vm10852_vm3, %v10596_v13  ;;  %vm10858_vm3 = vmmov %vm10809_vm0 }
  0xe0   :  { %156 = vst.msk [vmem:[#allocation3 + $0x1a0] sm:$0xff] %vm10853_vm6, %v10596_v13  ;;  %vm10859_vm6 = vmmov %vm10809_vm0 }
  0xe1   :  { %157 = vst.msk [vmem:[#allocation3 + $0x1a8] sm:$0xff] %vm10854_vm4, %v10596_v13  ;;  %vm10860_vm4 = vmmov %vm10809_vm0 }
  0xe2   :  { %158 = vst.msk [vmem:[#allocation3 + $0x1b0] sm:$0xff] %vm10855_vm5, %v10596_v13  ;;  %vm10861_vm5 = vmmov %vm10809_vm0 }
  0xe3   :  { %159 = vst.msk [vmem:[#allocation3 + $0x1b8] sm:$0xff] %vm10856_vm9, %v10596_v13  ;;  %vm10862_vm9 = vmmov %vm10809_vm0 }
  0xe4   :  { %160 = vst.msk [vmem:[#allocation3 + $0x1c0] sm:$0xff] %vm10857_vm10, %v10596_v13  ;;  %vm10863_vm10 = vmmov %vm10809_vm0 }
  0xe5   :  { %161 = vst.msk [vmem:[#allocation3 + $0x1c8] sm:$0xff] %vm10809_vm0, %v10596_v13  ;;  %vm10864_vm0 = vcmp.gt.f32.partialorder %v7429_v39, 0.0 }
  0xe6   :  { %162 = vst.msk [vmem:[#allocation3 + $0x1d0] sm:$0xff] %vm10858_vm3, %v10596_v13  ;;  %v868_v26 = vsel %vm10864_vm0, %v7429_v39, %v7479_v6  ;;  %vm10865_vm3 = vcmp.gt.f32.partialorder %v7443_v48, 0.0  ;;  %vm746_vm0 = vcmp.gt.f32.partialorder %v682_v43, 0.0 }
  0xe7   :  { %163 = vst.msk [vmem:[#allocation3 + $0x1d8] sm:$0xff] %vm10859_vm6, %v10596_v13  ;;  %v871_v34 = vsel %vm10865_vm3, %v7443_v48, %v7490_v16  ;;  %vm742_vm6 = vcmp.gt.f32.partialorder %v7467_v62, 0.0  ;;  %v7657_v39 = vsel %vm7497_vm11, %v868_v26, -1e+30  ;;  %v466_v48 = vpop.permute.xlu0 %465  ;;  %v7685_v16 = vpop.permute.xlu1 %480  ;;  %v687_v26 = vadd.f32 %v7106_v8, %v7472_v2 }
  0xe8   :  { %164 = vst.msk [vmem:[#allocation3 + $0x1e0] sm:$0xff] %vm10860_vm4, %v10596_v13  ;;  %vm745_vm4 = vcmp.gt.f32.partialorder %v7483_v0, 0.0  ;;  %1185 = vmax.xlane.f32.xlu0 %v7657_v39  ;;  %v7672_v60 = vsel %vm7058_vm7, %v871_v34, -1e+30  ;;  %v870_v49 = vsel %vm742_vm6, %v7467_v62, %v806_v19  ;;  %v813_v34 = vmul.f32 0.2, %v685_v31 }
  0xe9   :  { %165 = vst.msk [vmem:[#allocation3 + $0x1e8] sm:$0xff] %vm10861_vm5, %v10596_v13  ;;  %vm7661_vm5 = vcmp.ne.s32.totalorder %v982_v57, 0  ;;  %10868 = vst [vmem:[#allocation5_spill] sm:$0xff] %v7672_v60  ;;  %1191 = vmax.xlane.f32.xlu1 %v7672_v60  ;;  %v873_v3 = vsel %vm745_vm4, %v7483_v0, %v809_v35  ;;  %v810_v57 = vmul.f32 0.2, %v682_v43  ;;  %vm749_vm3 = vcmp.gt.f32.partialorder %v685_v31, 0.0 }
  0xea   :  { %166 = vst.msk [vmem:[#allocation3 + $0x1f0] sm:$0xff] %vm10862_vm9, %v10596_v13  ;;  %vm744_vm9 = vcmp.gt.f32.partialorder %v680_v22, 0.0  ;;  %v7681_v6 = vsel %vm7661_vm5, %v870_v49, -1e+30  ;;  %v7690_v21 = vsel %vm7076_vm13, %v873_v3, -1e+30  ;;  %v686_v35 = vadd.f32 %v7106_v8, %v7431_v40 }
  0xeb   :  { %167 = vst.msk [vmem:[#allocation3 + $0x1f8] sm:$0xff] %vm10863_vm10, %v10596_v13  ;;  %vm747_vm10 = vcmp.gt.f32.partialorder %v683_v36, 0.0  ;;  %v476_v62 = vpop.permute.xlu0 %475  ;;  %10869 = vst [vmem:[#allocation6_spill] sm:$0xff] %v7690_v21  ;;  %v872_v0 = vsel %vm744_vm9, %v680_v22, %v808_v50  ;;  %v7701_v49 = vpop.permute.xlu1 %490  ;;  %v812_v50 = vmul.f32 0.2, %v684_v25  ;;  %v689_v3 = vadd.f32 %v7106_v8, %v456_v23 }
  0xec   :  { %1189 = vmax.xlane.f32.xlu0 %v7681_v6  ;;  %v875_v19 = vsel %vm747_vm10, %v683_v36, %v811_v54  ;;  %v7697_v11 = vsel %vm7070_vm12, %v872_v0, -1e+30  ;;  %v874_v36 = vsel %vm746_vm0, %v682_v43, %v810_v57  ;;  %v877_v54 = vsel %vm749_vm3, %v685_v31, %v813_v34 }
  0xed   :  { %1195 = vmax.xlane.f32.xlu1 %v7690_v21  ;;  %v7706_v2 = vsel %vm7080_vm14, %v875_v19, -1e+30  ;;  %vm748_vm6 = vcmp.gt.f32.partialorder %v684_v25, 0.0  ;;  %v815_v0 = vmul.f32 0.2, %v687_v26  ;;  %vm751_vm4 = vcmp.gt.f32.partialorder %v687_v26, 0.0 }
  0xee   :  { %10870 = vst [vmem:[#allocation7_spill] sm:$0xff] %v7706_v2  ;;  %v321_v40 = vcombine.high %v7021_v17, %v7021_v17  ;;  %v7714_v13 = vsel %vm7091_vm15, %v874_v36, -1e+30  ;;  %v688_v19 = vadd.f32 %v7106_v8, %v7469_v63  ;;  %v7723_v31 = vsel %vm7108_vm2, %v877_v54, -1e+30 }
  0xef   :  { %v486_v22 = vpop.permute.xlu0 %485  ;;  %v7718_v43 = vpop.permute.xlu1 %500  ;;  %10871 = vst [vmem:[#allocation8_spill] sm:$0xff] %v7723_v31  ;;  %v876_v57 = vsel %vm748_vm6, %v684_v25, %v812_v50  ;;  %v814_v34 = vmul.f32 0.2, %v686_v35  ;;  %v691_v17 = vadd.f32 %v7106_v8, %v466_v48  ;;  %v879_v36 = vsel %vm751_vm4, %v687_v26, %v815_v0 }
  0xf0   :  { %1193 = vmax.xlane.f32.xlu0 %v7697_v11  ;;  %vm750_vm9 = vcmp.gt.f32.partialorder %v686_v35, 0.0  ;;  %vm753_vm10 = vcmp.gt.f32.partialorder %v689_v3, 0.0  ;;  %v7728_v63 = vrot.slane %v321_v40, %v7023_v18  ;;  %v7732_v21 = vsel %vm7134_vm8, %v876_v57, -1e+30 }
  0xf1   :  { %1199 = vmax.xlane.f32.xlu1 %v7706_v2  ;;  %v817_v2 = vmul.f32 0.2, %v689_v3  ;;  %10872 = vst [vmem:[#allocation9_spill] sm:$0xff] %v7732_v21  ;;  %v690_v54 = vadd.f32 %v7106_v8, %v7632_v46  ;;  %vm10873_vm0 = vnez %v10792_v28  ;;  %v878_v50 = vsel %vm750_vm9, %v686_v35, %v814_v34 }
  0xf2   :  { %v7741_v26 = vsel %vm10873_vm0, %v879_v36, -1e+30  ;;  %v816_v0 = vmul.f32 0.2, %v688_v19  ;;  %v693_v40 = vadd.f32 %v7106_v8, %v476_v62  ;;  %vm752_vm3 = vcmp.gt.f32.partialorder %v688_v19, 0.0 }
  0xf3   :  { %v496_v23 = vpop.permute.xlu0 %495  ;;  %v7736_v25 = vpop.permute.xlu1 %510  ;;  %10874 = vst [vmem:[#allocation10_spill] sm:$0xff] %v7741_v26  ;;  %v881_v57 = vsel %vm753_vm10, %v689_v3, %v817_v2  ;;  %vm755_vm6 = vcmp.gt.f32.partialorder %v691_v17, 0.0  ;;  %vm10875_vm4 = vnez %v10794_v44  ;;  %vm10877_vm9 = vnez %v10796_v5 }
  0xf4   :  { %1197 = vmax.xlane.f32.xlu0 %v7714_v13  ;;  %v7747_v46 = vsel %vm10875_vm4, %v878_v50, -1e+30  ;;  %v7756_v62 = vsel %vm10877_vm9, %v881_v57, -1e+30  ;;  %v880_v2 = vsel %vm752_vm3, %v688_v19, %v816_v0  ;;  %v818_v3 = vmul.f32 0.2, %v690_v54 }
  0xf5   :  { %1203 = vmax.xlane.f32.xlu1 %v7723_v31  ;;  %v819_v31 = vmul.f32 0.2, %v691_v17  ;;  %10876 = vst [vmem:[#allocation11_spill] sm:$0xff] %v7747_v46  ;;  %10878 = vst [vmem:[#allocation12_spill] sm:$0xff] %v7756_v62  ;;  %v695_v34 = vadd.f32 %v7728_v63, %v486_v22  ;;  %vm754_vm10 = vcmp.gt.f32.partialorder %v690_v54, 0.0  ;;  %vm757_vm4 = vcmp.gt.f32.partialorder %v693_v40, 0.0 }
  0xf6   :  { %v821_v50 = vmul.f32 0.2, %v693_v40  ;;  %vm10879_vm0 = vnez %v10798_v29  ;;  %vm10880_vm3 = vnez %v10800_v30  ;;  %v697_v0 = vadd.f32 %v7728_v63, %v496_v23 }
  0xf7   :  { %v506_v48 = vpop.permute.xlu0 %505  ;;  %v7751_v60 = vpop.permute.xlu1 %520  ;;  %v883_v36 = vsel %vm755_vm6, %v691_v17, %v819_v31  ;;  %v882_v31 = vsel %vm754_vm10, %v690_v54, %v818_v3  ;;  %vm10882_vm9 = vnez %v10802_v51  ;;  %v296_v51 = vld [vmem:[%s10572_s0 + $0x1f8] sm:$0xff] }
  0xf8   :  { %1201 = vmax.xlane.f32.xlu0 %v7732_v21  ;;  %v692_v21 = vadd.f32 %v7106_v8, %v7667_v45  ;;  %v7762_v45 = vsel %vm10879_vm0, %v880_v2, -1e+30  ;;  %v7771_v22 = vsel %vm10880_vm3, %v883_v36, -1e+30  ;;  %v885_v57 = vsel %vm757_vm4, %v693_v40, %v821_v50 }
  0xf9   :  { %1207 = vmax.xlane.f32.xlu1 %v7741_v26  ;;  %v694_v26 = vadd.f32 %v7106_v8, %v7685_v16  ;;  %10881 = vst [vmem:[#allocation13_spill] sm:$0xff] %v7771_v22  ;;  %v823_v2 = vmul.f32 0.2, %v695_v34  ;;  %vm759_vm0 = vcmp.gt.f32.partialorder %v695_v34, 0.0  ;;  %v7777_v8 = vsel %vm10882_vm9, %v882_v31, -1e+30 }
  0xfa   :  { %v820_v17 = vmul.f32 0.2, %v692_v21  ;;  %vm756_vm6 = vcmp.gt.f32.partialorder %v692_v21, 0.0  ;;  %10883 = vst [vmem:[#allocation14_spill] sm:$0xff] %v7777_v8  ;;  %v696_v16 = vadd.f32 %v7728_v63, %v7701_v49  ;;  %v7786_v23 = vsel %vm7457_vm1, %v885_v57, -1e+30 }
  0xfb   :  { %v516_v35 = vpop.permute.xlu0 %515  ;;  %10884 = vst [vmem:[#allocation15_spill] sm:$0xff] %v7786_v23  ;;  %v822_v3 = vmul.f32 0.2, %v694_v26  ;;  %v699_v36 = vadd.f32 %v7728_v63, %v506_v48  ;;  %v887_v50 = vsel %vm759_vm0, %v695_v34, %v823_v2  ;;  %vm758_vm4 = vcmp.gt.f32.partialorder %v694_v26, 0.0 }
  0xfc   :  { %1205 = vmax.xlane.f32.xlu0 %v7747_v46  ;;  %v7766_v46 = vpop.permute.xlu1 %530  ;;  %v884_v40 = vsel %vm756_vm6, %v692_v21, %v820_v17  ;;  %v825_v31 = vmul.f32 0.2, %v697_v0  ;;  %vm761_vm10 = vcmp.gt.f32.partialorder %v697_v0, 0.0  ;;  %v7799_v48 = vsel %vm7058_vm7, %v887_v50, -1e+30 }
  0xfd   :  { %1211 = vmax.xlane.f32.xlu1 %v7756_v62  ;;  %v7792_v49 = vsel %vm7497_vm11, %v884_v40, -1e+30  ;;  %10886 = vst [vmem:[#allocation17_spill] sm:$0xff] %v7799_v48  ;;  %v886_v17 = vsel %vm758_vm4, %v694_v26, %v822_v3  ;;  %v701_v34 = vadd.f32 %v7728_v63, %v516_v35  ;;  %vm760_vm0 = vcmp.gt.f32.partialorder %v696_v16, 0.0 }
  0xfe   :  { %10885 = vst [vmem:[#allocation16_spill] sm:$0xff] %v7792_v49  ;;  %v889_v2 = vsel %vm761_vm10, %v697_v0, %v825_v31  ;;  %v827_v40 = vmul.f32 0.2, %v699_v36  ;;  %vm763_vm6 = vcmp.gt.f32.partialorder %v699_v36, 0.0  ;;  %v700_v50 = vadd.f32 %v7728_v63, %v7736_v25 }
  0xff   :  { %v526_v19 = vpop.permute.xlu0 %525  ;;  %v7814_v35 = vsel %vm7076_vm13, %v889_v2, -1e+30  ;;  %v829_v0 = vmul.f32 0.2, %v701_v34  ;;  %vm765_vm10 = vcmp.gt.f32.partialorder %v701_v34, 0.0 }
 0x100   :  { %1209 = vmax.xlane.f32.xlu0 %v7762_v45  ;;  %v7781_v62 = vpop.permute.xlu1 %540  ;;  %10888 = vst [vmem:[#allocation19_spill] sm:$0xff] %v7814_v35  ;;  %v703_v31 = vadd.f32 %v7728_v63, %v526_v19 }
 0x101   :  { %1215 = vmax.xlane.f32.xlu1 %v7771_v22  ;;  %v824_v22 = vmul.f32 0.2, %v696_v16 }
 0x103   :  { %v536_v54 = vpop.permute.xlu0 %535  ;;  %v888_v3 = vsel %vm760_vm0, %v696_v16, %v824_v22  ;;  %vm764_vm0 = vcmp.gt.f32.partialorder %v700_v50, 0.0 }
 0x104   :  { %1213 = vmax.xlane.f32.xlu0 %v7777_v8  ;;  %v698_v8 = vadd.f32 %v7728_v63, %v7718_v43  ;;  %v7802_v57 = vpop.permute.xlu1 %550  ;;  %v7807_v43 = vsel %vm7661_vm5, %v886_v17, -1e+30  ;;  %v7820_v25 = vsel %vm7070_vm12, %v888_v3, -1e+30  ;;  %v705_v2 = vadd.f32 %v7728_v63, %v536_v54 }
 0x105   :  { %1219 = vmax.xlane.f32.xlu1 %v7786_v23  ;;  %10887 = vst [vmem:[#allocation18_spill] sm:$0xff] %v7807_v43  ;;  %10889 = vst [vmem:[#allocation20_spill] sm:$0xff] %v7820_v25  ;;  %v322_v3 = vcombine.high %v7074_v53, %v7074_v53 }
 0x106   :  { %v826_v23 = vmul.f32 0.2, %v698_v8  ;;  %vm762_vm4 = vcmp.gt.f32.partialorder %v698_v8, 0.0 }
 0x107   :  { %v546_v21 = vpop.permute.xlu0 %545 }
 0x108   :  { %1217 = vmax.xlane.f32.xlu0 %v7792_v49  ;;  %v561_v17 = vpop.permute.xlu1 %560  ;;  %v702_v49 = vadd.f32 %v7728_v63, %v7751_v60  ;;  %v890_v16 = vsel %vm762_vm4, %v698_v8, %v826_v23 }
 0x109   :  { %1223 = vmax.xlane.f32.xlu1 %v7799_v48  ;;  %v891_v48 = vsel %vm763_vm6, %v699_v36, %v827_v40  ;;  %v831_v36 = vmul.f32 0.2, %v703_v31  ;;  %v893_v40 = vsel %vm765_vm10, %v701_v34, %v829_v0  ;;  %vm767_vm6 = vcmp.gt.f32.partialorder %v703_v31, 0.0 }
 0x10a   :  { %v7827_v19 = vsel %vm7080_vm14, %v891_v48, -1e+30  ;;  %v7835_v60 = vsel %vm7091_vm15, %v890_v16, -1e+30  ;;  %v704_v48 = vadd.f32 %v7728_v63, %v7766_v46  ;;  %v7842_v54 = vsel %vm7108_vm2, %v893_v40, -1e+30 }
 0x10b   :  { %v556_v26 = vpop.permute.xlu0 %555  ;;  %10890 = vst [vmem:[#allocation21_spill] sm:$0xff] %v7827_v19  ;;  %10891 = vst [vmem:[#allocation22_spill] sm:$0xff] %v7835_v60  ;;  %v833_v34 = vmul.f32 0.2, %v705_v2  ;;  %v707_v0 = vadd.f32 %v7728_v63, %v546_v21  ;;  %v895_v16 = vsel %vm767_vm6, %v703_v31, %v831_v36  ;;  %vm766_vm4 = vcmp.gt.f32.partialorder %v702_v49, 0.0 }
 0x10c   :  { %1221 = vmax.xlane.f32.xlu0 %v7807_v43  ;;  %v828_v43 = vmul.f32 0.2, %v700_v50  ;;  %10892 = vst [vmem:[#allocation23_spill] sm:$0xff] %v7842_v54  ;;  %v571_v53 = vpop.permute.xlu1 %570  ;;  %vm769_vm10 = vcmp.gt.f32.partialorder %v705_v2, 0.0  ;;  %vm768_vm6 = vcmp.gt.f32.partialorder %v704_v48, 0.0  ;;  %vm10896_vm2 = vnez %v10794_v44 }
 0x10d   :  { %1227 = vmax.xlane.f32.xlu1 %v7814_v35  ;;  %v830_v35 = vmul.f32 0.2, %v702_v49  ;;  %v835_v36 = vmul.f32 0.2, %v707_v0  ;;  %v897_v40 = vsel %vm769_vm10, %v705_v2, %v833_v34 }
 0x10e   :  { %v892_v23 = vsel %vm764_vm0, %v700_v50, %v828_v43  ;;  %v706_v43 = vadd.f32 %v7728_v63, %v7781_v62  ;;  %vm10894_vm0 = vnez %v10792_v28 }
 0x10f   :  { %v566_v22 = vpop.permute.xlu0 %565  ;;  %v7851_v46 = vsel %vm7134_vm8, %v892_v23, -1e+30  ;;  %v7858_v50 = vsel %vm10894_vm0, %v895_v16, -1e+30  ;;  %v894_v31 = vsel %vm766_vm4, %v702_v49, %v830_v35  ;;  %vm771_vm8 = vcmp.gt.f32.partialorder %v707_v0, 0.0 }
 0x110   :  { %1225 = vmax.xlane.f32.xlu0 %v7820_v25  ;;  %10893 = vst [vmem:[#allocation24_spill] sm:$0xff] %v7851_v46  ;;  %10895 = vst [vmem:[#allocation25_spill] sm:$0xff] %v7858_v50  ;;  %v7864_v62 = vsel %vm10896_vm2, %v894_v31, -1e+30  ;;  %v834_v23 = vmul.f32 0.2, %v706_v43  ;;  %vm10898_vm4 = vnez %v10796_v5  ;;  %v899_v34 = vsel %vm771_vm8, %v707_v0, %v835_v36 }
 0x111   :  { %1231 = vmax.xlane.f32.xlu1 %v7827_v19  ;;  %v7847_v19 = vrot.slane %v322_v3, %v7023_v18  ;;  %v709_v18 = vadd.f32 %v7728_v63, %v556_v26  ;;  %v581_v3 = vpop.permute.xlu1 %580  ;;  %10897 = vst [vmem:[#allocation26_spill] sm:$0xff] %v7864_v62  ;;  %v7871_v49 = vsel %vm10898_vm4, %v897_v40, -1e+30  ;;  %vm770_vm10 = vcmp.gt.f32.partialorder %v706_v43, 0.0 }
 0x112   :  { %10899 = vst [vmem:[#allocation27_spill] sm:$0xff] %v7871_v49  ;;  %vm10900_vm0 = vnez %v10798_v29 }
 0x113   :  { %v576_v8 = vpop.permute.xlu0 %575  ;;  %v837_v35 = vmul.f32 0.2, %v709_v18  ;;  %v711_v2 = vadd.f32 %v7847_v19, %v566_v22  ;;  %vm773_vm2 = vcmp.gt.f32.partialorder %v709_v18, 0.0  ;;  %v898_v22 = vsel %vm770_vm10, %v706_v43, %v834_v23 }
 0x114   :  { %1229 = vmax.xlane.f32.xlu0 %v7835_v60  ;;  %v832_v60 = vmul.f32 0.2, %v704_v48  ;;  %v713_v0 = vadd.f32 %v7847_v19, %v576_v8 }
 0x115   :  { %1235 = vmax.xlane.f32.xlu1 %v7842_v54  ;;  %v708_v54 = vadd.f32 %v7728_v63, %v7802_v57  ;;  %v591_v36 = vpop.permute.xlu1 %590  ;;  %v901_v40 = vsel %vm773_vm2, %v709_v18, %v837_v35 }
 0x116   :  { %v896_v26 = vsel %vm768_vm6, %v704_v48, %v832_v60  ;;  %v7883_v60 = vsel %vm10880_vm3, %v899_v34, -1e+30  ;;  %v839_v48 = vmul.f32 0.2, %v711_v2  ;;  %vm775_vm6 = vcmp.gt.f32.partialorder %v711_v2, 0.0 }
 0x117   :  { %v586_v21 = vpop.permute.xlu0 %585  ;;  %v7877_v31 = vsel %vm10900_vm0, %v896_v26, -1e+30  ;;  %v836_v57 = vmul.f32 0.2, %v708_v54  ;;  %10902 = vst [vmem:[#allocation29_spill] sm:$0xff] %v7883_v60  ;;  %vm772_vm8 = vcmp.gt.f32.partialorder %v708_v54, 0.0 }
 0x118   :  { %1233 = vmax.xlane.f32.xlu0 %v7851_v46  ;;  %10901 = vst [vmem:[#allocation28_spill] sm:$0xff] %v7877_v31  ;;  %v7889_v26 = vsel %vm10882_vm9, %v898_v22, -1e+30  ;;  %v7895_v43 = vsel %vm7457_vm1, %v901_v40, -1e+30  ;;  %v715_v18 = vadd.f32 %v7847_v19, %v586_v21  ;;  %v903_v35 = vsel %vm775_vm6, %v711_v2, %v839_v48  ;;  %v8518_v46 = vld [vmem:[#allocation2 + $0x1e8] sm:$0xff] }
 0x119   :  { %1239 = vmax.xlane.f32.xlu1 %v7858_v50  ;;  %v710_v50 = vadd.f32 %v7728_v63, %v561_v17  ;;  %10903 = vst [vmem:[#allocation30_spill] sm:$0xff] %v7889_v26  ;;  %v712_v17 = vadd.f32 %v7847_v19, %v571_v53  ;;  %10904 = vst [vmem:[#allocation31_spill] sm:$0xff] %v7895_v43  ;;  %v900_v8 = vsel %vm772_vm8, %v708_v54, %v836_v57  ;;  %v601_v34 = vpop.permute.xlu1 %600 }
 0x11a   :  { %v841_v23 = vmul.f32 0.2, %v713_v0  ;;  %vm777_vm10 = vcmp.gt.f32.partialorder %v713_v0, 0.0  ;;  %v7901_v53 = vsel %vm7497_vm11, %v900_v8, -1e+30  ;;  %vm779_vm6 = vcmp.gt.f32.partialorder %v715_v18, 0.0 }
 0x11b   :  { %v596_v16 = vpop.permute.xlu0 %595  ;;  %v838_v63 = vmul.f32 0.2, %v710_v50  ;;  %vm774_vm2 = vcmp.gt.f32.partialorder %v710_v50, 0.0  ;;  %10905 = vst [vmem:[#allocation32_spill] sm:$0xff] %v7901_v53  ;;  %v840_v22 = vmul.f32 0.2, %v712_v17 }
 0x11c   :  { %1237 = vmax.xlane.f32.xlu0 %v7864_v62  ;;  %v7907_v54 = vsel %vm7058_vm7, %v903_v35, -1e+30  ;;  %v843_v57 = vmul.f32 0.2, %v715_v18  ;;  %v717_v2 = vadd.f32 %v7847_v19, %v596_v16  ;;  %v905_v48 = vsel %vm777_vm10, %v713_v0, %v841_v23  ;;  %v8501_v62 = vld [vmem:[#allocation2 + $0x1d8] sm:$0xff]  ;;  %11098 = vst [vmem:[#allocation164_spill] sm:$0xff] %v8518_v46 }
 0x11d   :  { %1243 = vmax.xlane.f32.xlu1 %v7871_v49  ;;  %10906 = vst [vmem:[#allocation33_spill] sm:$0xff] %v7907_v54  ;;  %v902_v21 = vsel %vm774_vm2, %v710_v50, %v838_v63  ;;  %vm776_vm8 = vcmp.gt.f32.partialorder %v712_v17, 0.0  ;;  %v7919_v41 = vsel %vm7076_vm13, %v905_v48, -1e+30  ;;  %v611_v63 = vpop.permute.xlu1 %610  ;;  %11092 = vst [vmem:[#allocation160_spill] sm:$0xff] %v8501_v62 }
 0x11e   :  { %v7913_v8 = vsel %vm7661_vm5, %v902_v21, -1e+30  ;;  %10908 = vst [vmem:[#allocation35_spill] sm:$0xff] %v7919_v41  ;;  %v904_v50 = vsel %vm776_vm8, %v712_v17, %v840_v22  ;;  %v845_v16 = vmul.f32 0.2, %v717_v2  ;;  %v907_v23 = vsel %vm779_vm6, %v715_v18, %v843_v57 }
 0x11f   :  { %v606_v49 = vpop.permute.xlu0 %605  ;;  %10907 = vst [vmem:[#allocation34_spill] sm:$0xff] %v7913_v8  ;;  %vm781_vm2 = vcmp.gt.f32.partialorder %v717_v2, 0.0  ;;  %v7925_v35 = vsel %vm7070_vm12, %v904_v50, -1e+30  ;;  %v718_v21 = vadd.f32 %v7847_v19, %v601_v34  ;;  %v7931_v17 = vsel %vm7080_vm14, %v907_v23, -1e+30 }
 0x120   :  { %1241 = vmax.xlane.f32.xlu0 %v7877_v31  ;;  %v719_v0 = vadd.f32 %v7847_v19, %v606_v49  ;;  %10909 = vst [vmem:[#allocation36_spill] sm:$0xff] %v7925_v35  ;;  %10910 = vst [vmem:[#allocation37_spill] sm:$0xff] %v7931_v17  ;;  %v909_v57 = vsel %vm781_vm2, %v717_v2, %v845_v16  ;;  %v720_v50 = vadd.f32 %v7847_v19, %v611_v63  ;;  %v8484_v31 = vld [vmem:[#allocation2 + $0x1c8] sm:$0xff] }
 0x121   :  { %1247 = vmax.xlane.f32.xlu1 %v7883_v60  ;;  %v714_v60 = vadd.f32 %v7847_v19, %v581_v3  ;;  %v621_v52 = vpop.permute.xlu1 %620  ;;  %v846_v48 = vmul.f32 0.2, %v718_v21  ;;  %vm10912_vm14 = vnez %v10788_v9  ;;  %vm782_vm10 = vcmp.gt.f32.partialorder %v718_v21, 0.0  ;;  %11086 = vst [vmem:[#allocation156_spill] sm:$0xff] %v8484_v31 }
 0x122   :  { %v847_v22 = vmul.f32 0.2, %v719_v0  ;;  %vm783_vm12 = vcmp.gt.f32.partialorder %v719_v0, 0.0  ;;  %v7943_v56 = vsel %vm10912_vm14, %v909_v57, -1e+30  ;;  %vm10914_vm8 = vnez %v10790_v27 }
 0x123   :  { %v616_v40 = vpop.permute.xlu0 %615  ;;  %v842_v3 = vmul.f32 0.2, %v714_v60  ;;  %vm778_vm7 = vcmp.gt.f32.partialorder %v714_v60, 0.0  ;;  %10913 = vst [vmem:[#allocation39_spill] sm:$0xff] %v7943_v56  ;;  %v848_v63 = vmul.f32 0.2, %v720_v50  ;;  %v722_v23 = vadd.f32 %v7847_v19, %v621_v52 }
 0x124   :  { %1245 = vmax.xlane.f32.xlu0 %v7889_v26  ;;  %v721_v18 = vadd.f32 %v7847_v19, %v616_v40  ;;  %vm10916_vm6 = vnez %v10792_v28  ;;  %v8467_v26 = vld [vmem:[#allocation2 + $0x1b8] sm:$0xff] }
 0x125   :  { %1251 = vmax.xlane.f32.xlu1 %v7895_v43  ;;  %v716_v43 = vadd.f32 %v7847_v19, %v591_v36  ;;  %v906_v49 = vsel %vm778_vm7, %v714_v60, %v842_v3  ;;  %v911_v3 = vsel %vm783_vm12, %v719_v0, %v847_v22  ;;  %vm784_vm7 = vcmp.gt.f32.partialorder %v720_v50, 0.0  ;;  %11080 = vst [vmem:[#allocation152_spill] sm:$0xff] %v8467_v26 }
 0x126   :  { %v7937_v34 = vsel %vm7091_vm15, %v906_v49, -1e+30  ;;  %v849_v40 = vmul.f32 0.2, %v721_v18  ;;  %vm785_vm15 = vcmp.gt.f32.partialorder %v721_v18, 0.0  ;;  %vm786_vm12 = vcmp.gt.f32.partialorder %v722_v23, 0.0 }
 0x127   :  { %v844_v36 = vmul.f32 0.2, %v716_v43  ;;  %v626_v55 = vpop.permute.xlu0 %625  ;;  %vm780_vm13 = vcmp.gt.f32.partialorder %v716_v43, 0.0  ;;  %10911 = vst [vmem:[#allocation38_spill] sm:$0xff] %v7937_v34  ;;  %v7955_v9 = vsel %vm10916_vm6, %v911_v3, -1e+30 }
 0x128   :  { %1249 = vmax.xlane.f32.xlu0 %v7901_v53  ;;  %v723_v2 = vadd.f32 %v7847_v19, %v626_v55  ;;  %10917 = vst [vmem:[#allocation41_spill] sm:$0xff] %v7955_v9  ;;  %v913_v49 = vsel %vm785_vm15, %v721_v18, %v849_v40  ;;  %v850_v22 = vmul.f32 0.2, %v722_v23  ;;  %v7998_v3 = vld [vmem:[#allocation2] sm:$0xff]  ;;  %v8450_v53 = vld [vmem:[#allocation2 + $0x1a8] sm:$0xff] }
 0x129   :  { %1255 = vmax.xlane.f32.xlu1 %v7907_v54  ;;  %v908_v60 = vsel %vm780_vm13, %v716_v43, %v844_v36  ;;  %v910_v43 = vsel %vm782_vm10, %v718_v21, %v846_v48  ;;  %v631_v36 = vpop.permute.xlu1 %630  ;;  %vm10918_vm13 = vnez %v10794_v44  ;;  %v7967_v28 = vsel %vm10898_vm4, %v913_v49, -1e+30  ;;  %10926 = vst [vmem:[#allocation49_spill] sm:$0xff] %v7998_v3  ;;  %v8382_v54 = vld [vmem:[#allocation2 + $0x168] sm:$0xff]  ;;  %11074 = vst [vmem:[#allocation148_spill] sm:$0xff] %v8450_v53 }
 0x12a   :  { %v7949_v16 = vsel %vm10914_vm8, %v908_v60, -1e+30  ;;  %v851_v55 = vmul.f32 0.2, %v723_v2  ;;  %vm787_vm2 = vcmp.gt.f32.partialorder %v723_v2, 0.0  ;;  %v724_v57 = vadd.f32 %v7847_v19, %v631_v36  ;;  %10920 = vst [vmem:[#allocation43_spill] sm:$0xff] %v7967_v28 }
 0x12b   :  { %v636_v1 = vpop.permute.xlu0 %635  ;;  %10915 = vst [vmem:[#allocation40_spill] sm:$0xff] %v7949_v16  ;;  %v7961_v27 = vsel %vm10918_vm13, %v910_v43, -1e+30  ;;  %v912_v21 = vsel %vm784_vm7, %v720_v50, %v848_v63  ;;  %v914_v5 = vsel %vm786_vm12, %v722_v23, %v850_v22  ;;  %v8008_v43 = vld [vmem:[#allocation2 + $0x10] sm:$0xff]  ;;  %11051 = vst [vmem:[#allocation132_spill] sm:$0xff] %v8382_v54 }
 0x12c   :  { %1253 = vmax.xlane.f32.xlu0 %v7913_v8  ;;  %v725_v0 = vadd.f32 %v7847_v19, %v636_v1  ;;  %10919 = vst [vmem:[#allocation42_spill] sm:$0xff] %v7961_v27  ;;  %v915_v18 = vsel %vm787_vm2, %v723_v2, %v851_v55  ;;  %v7972_v44 = vsel %vm10900_vm0, %v912_v21, -1e+30  ;;  %v852_v48 = vmul.f32 0.2, %v724_v57  ;;  %v8000_v1 = vld [vmem:[#allocation2 + $0x8] sm:$0xff] }
 0x12d   :  { %1259 = vmax.xlane.f32.xlu1 %v7919_v41  ;;  %10921 = vst [vmem:[#allocation44_spill] sm:$0xff] %v7972_v44  ;;  %v7977_v60 = vsel %vm10880_vm3, %v915_v18, -1e+30  ;;  %vm788_vm4 = vcmp.gt.f32.partialorder %v724_v57, 0.0  ;;  %v7982_v40 = vsel %vm10882_vm9, %v914_v5, -1e+30  ;;  %v1162_v23 = vpop.xlane.xlu1 %1161 }
 0x12e   :  { %v853_v52 = vmul.f32 0.2, %v725_v0  ;;  %vm789_vm14 = vcmp.gt.f32.partialorder %v725_v0, 0.0  ;;  %10922 = vst [vmem:[#allocation45_spill] sm:$0xff] %v7977_v60  ;;  %10923 = vst [vmem:[#allocation46_spill] sm:$0xff] %v7982_v40  ;;  %v916_v2 = vsel %vm788_vm4, %v724_v57, %v852_v48  ;;  %v8006_v10 = vmax.f32 %v8000_v1, %v1162_v23  ;;  %v8015_v55 = vld [vmem:[#allocation2 + $0x20] sm:$0xff] }
 0x12f   :  { %v7992_v30 = vsel %vm7497_vm11, %v916_v2, -1e+30  ;;  %10927 = vst [vmem:[#allocation50_spill] sm:$0xff] %v8000_v1  ;;  %v1160_v37 = vpop.xlane.xlu0 %1159  ;;  %10930 = vst [vmem:[#allocation53_spill] sm:$0xff] %v8008_v43  ;;  %v8025_v21 = vld [vmem:[#allocation2 + $0x18] sm:$0xff]  ;;  %v8032_v18 = vld [vmem:[#allocation2 + $0x30] sm:$0xff] }
 0x130   :  { %1257 = vmax.xlane.f32.xlu0 %v7925_v35  ;;  %v917_v50 = vsel %vm789_vm14, %v725_v0, %v853_v52  ;;  %10925 = vst [vmem:[#allocation48_spill] sm:$0xff] %v7992_v30  ;;  %v8003_v63 = vmax.f32 %v7998_v3, %v1160_v37  ;;  %10929 = vst [vmem:[#allocation52_spill] sm:$0xff] %v8006_v10  ;;  %v8049_v23 = vld [vmem:[#allocation2 + $0x40] sm:$0xff]  ;;  %v8059_v52 = vld [vmem:[#allocation2 + $0x38] sm:$0xff] }
 0x131   :  { %1263 = vmax.xlane.f32.xlu1 %v7931_v17  ;;  %v7987_v29 = vsel %vm7457_vm1, %v917_v50, -1e+30  ;;  %vm10931_vm1 = vcmask 7168   ;;  %10932 = vst [vmem:[#allocation54_spill] sm:$0xff] %v8015_v55  ;;  %v1168_v22 = vpop.xlane.xlu1 %1167  ;;  %10936 = vst [vmem:[#allocation57_spill] sm:$0xff] %v8025_v21  ;;  %v8066_v36 = vld [vmem:[#allocation2 + $0x50] sm:$0xff] }
 0x132   :  { %10924 = vst [vmem:[#allocation47_spill] sm:$0xff] %v7987_v29  ;;  %10928 = vst [vmem:[#allocation51_spill] sm:$0xff] %v8003_v63  ;;  %v8023_v57 = vmax.f32 %v8015_v55, %v1168_v22  ;;  %v8110_v55 = vld [vmem:[#allocation2 + $0x68] sm:$0xff]  ;;  %v8161_v1 = vld [vmem:[#allocation2 + $0x98] sm:$0xff] }
 0x133   :  { %3693 = vst.msk [vmem:[#allocation2] sm:$0xff] %vm10931_vm1, %v8003_v63  ;;  %vm10933_vm11 = vmmov %vm10931_vm1  ;;  %v1164_v0 = vpop.xlane.xlu0 %1163  ;;  %v8314_v17 = vld [vmem:[#allocation2 + $0x128] sm:$0xff]  ;;  %v8433_v8 = vld [vmem:[#allocation2 + $0x198] sm:$0xff] }
 0x134   :  { %1261 = vmax.xlane.f32.xlu0 %v7937_v34  ;;  %3694 = vst.msk [vmem:[#allocation2 + $0x8] sm:$0xff] %vm10933_vm11, %v8006_v10  ;;  %v8020_v49 = vmax.f32 %v8008_v43, %v1164_v0  ;;  %10935 = vst [vmem:[#allocation56_spill] sm:$0xff] %v8023_v57  ;;  %v8348_v41 = vld [vmem:[#allocation2 + $0x148] sm:$0xff]  ;;  %v8399_v34 = vld [vmem:[#allocation2 + $0x178] sm:$0xff] }
 0x135   :  { %1267 = vmax.xlane.f32.xlu1 %v7943_v56  ;;  %vm10937_vm9 = vmmov %vm10931_vm1  ;;  %10938 = vst [vmem:[#allocation58_spill] sm:$0xff] %v8032_v18  ;;  %v1172_v50 = vpop.xlane.xlu1 %1171  ;;  %v8280_v56 = vld [vmem:[#allocation2 + $0x108] sm:$0xff] }
 0x136   :  { %10934 = vst [vmem:[#allocation55_spill] sm:$0xff] %v8020_v49  ;;  %3695 = vst.msk [vmem:[#allocation2 + $0x10] sm:$0xff] %vm10937_vm9, %v8020_v49  ;;  %v8040_v2 = vmax.f32 %v8032_v18, %v1172_v50  ;;  %v8416_v35 = vld [vmem:[#allocation2 + $0x188] sm:$0xff] }
 0x137   :  { %vm10939_vm3 = vmmov %vm10931_vm1  ;;  %v1166_v48 = vpop.xlane.xlu0 %1165  ;;  %10944 = vst [vmem:[#allocation62_spill] sm:$0xff] %v8049_v23 }
 0x138   :  { %1265 = vmax.xlane.f32.xlu0 %v7949_v16  ;;  %3697 = vst.msk [vmem:[#allocation2 + $0x20] sm:$0xff] %vm10939_vm3, %v8023_v57  ;;  %v8037_v5 = vmax.f32 %v8025_v21, %v1166_v48  ;;  %10941 = vst [vmem:[#allocation60_spill] sm:$0xff] %v8040_v2  ;;  %v8093_v21 = vld [vmem:[#allocation2 + $0x58] sm:$0xff] }
 0x139   :  { %1271 = vmax.xlane.f32.xlu1 %v7955_v9  ;;  %vm10943_vm0 = vmmov %vm10931_vm1  ;;  %v1176_v48 = vpop.xlane.xlu1 %1175  ;;  %10948 = vst [vmem:[#allocation65_spill] sm:$0xff] %v8059_v52  ;;  %v8246_v9 = vld [vmem:[#allocation2 + $0xe8] sm:$0xff]  ;;  %v8365_v16 = vld [vmem:[#allocation2 + $0x158] sm:$0xff] }
 0x13a   :  { %10940 = vst [vmem:[#allocation59_spill] sm:$0xff] %v8037_v5  ;;  %3696 = vst.msk [vmem:[#allocation2 + $0x18] sm:$0xff] %vm10943_vm0, %v8037_v5  ;;  %v8057_v50 = vmax.f32 %v8049_v23, %v1176_v48 }
 0x13b   :  { %vm10945_vm10 = vmmov %vm10943_vm0  ;;  %v1170_v0 = vpop.xlane.xlu0 %1169  ;;  %10950 = vst [vmem:[#allocation66_spill] sm:$0xff] %v8066_v36 }
 0x13c   :  { %1269 = vmax.xlane.f32.xlu0 %v7961_v27  ;;  %3699 = vst.msk [vmem:[#allocation2 + $0x30] sm:$0xff] %vm10945_vm10, %v8040_v2  ;;  %10947 = vst [vmem:[#allocation64_spill] sm:$0xff] %v8057_v50  ;;  %v8331_v27 = vld [vmem:[#allocation2 + $0x138] sm:$0xff] }
 0x13d   :  { %1275 = vmax.xlane.f32.xlu1 %v7967_v28  ;;  %vm10949_vm15 = vmmov %vm10943_vm0  ;;  %v1180_v48 = vpop.xlane.xlu1 %1179  ;;  %10960 = vst [vmem:[#allocation73_spill] sm:$0xff] %v8093_v21  ;;  %v8212_v28 = vld [vmem:[#allocation2 + $0xc8] sm:$0xff] }
 0x13e   :  { %vm10951_vm8 = vmmov %vm10943_vm0  ;;  %v8074_v23 = vmax.f32 %v8066_v36, %v1180_v48  ;;  %10966 = vst [vmem:[#allocation77_spill] sm:$0xff] %v8110_v55 }
 0x13f   :  { %3701 = vst.msk [vmem:[#allocation2 + $0x40] sm:$0xff] %vm10951_vm8, %v8057_v50  ;;  %vm10955_vm6 = vmmov %vm10943_vm0 }
 0x140   :  { %1273 = vmax.xlane.f32.xlu0 %v7972_v44  ;;  %10953 = vst [vmem:[#allocation68_spill] sm:$0xff] %v8074_v23  ;;  %vm10957_vm7 = vmmov %vm10943_vm0  ;;  %v8297_v44 = vld [vmem:[#allocation2 + $0x118] sm:$0xff] }
 0x141   :  { %1279 = vmax.xlane.f32.xlu1 %v7977_v60  ;;  %3703 = vst.msk [vmem:[#allocation2 + $0x50] sm:$0xff] %vm10957_vm7, %v8074_v23  ;;  %v1184_v48 = vpop.xlane.xlu1 %1183  ;;  %vm10961_vm2 = vmmov %vm10943_vm0  ;;  %v8195_v60 = vld [vmem:[#allocation2 + $0xb8] sm:$0xff] }
 0x142   :  { %vm10963_vm13 = vmmov %vm10943_vm0  ;;  %10979 = vst [vmem:[#allocation84_spill] sm:$0xff] %v8161_v1 }
 0x143   :  { %vm10967_vm12 = vmmov %vm10943_vm0  ;;  %10988 = vst [vmem:[#allocation90_spill] sm:$0xff] %v8195_v60 }
 0x144   :  { %1277 = vmax.xlane.f32.xlu0 %v7982_v40  ;;  %vm10969_vm14 = vmmov %vm10943_vm0  ;;  %10993 = vst [vmem:[#allocation93_spill] sm:$0xff] %v8212_v28  ;;  %v8263_v40 = vld [vmem:[#allocation2 + $0xf8] sm:$0xff] }
 0x145   :  { %1283 = vmax.xlane.f32.xlu1 %v7987_v29  ;;  %vm10972_vm4 = vmmov %vm10943_vm0  ;;  %11004 = vst [vmem:[#allocation100_spill] sm:$0xff] %v8246_v9 }
 0x146   :  { %vm10974_vm1 = vmmov %vm10943_vm0  ;;  %11010 = vst [vmem:[#allocation104_spill] sm:$0xff] %v8263_v40 }
 0x147   :  { %vm10976_vm11 = vmmov %vm10943_vm0  ;;  %11016 = vst [vmem:[#allocation108_spill] sm:$0xff] %v8280_v56 }
 0x148   :  { %1281 = vmax.xlane.f32.xlu0 %v7992_v30  ;;  %vm10978_vm9 = vmmov %vm10943_vm0  ;;  %v8229_v30 = vld [vmem:[#allocation2 + $0xd8] sm:$0xff]  ;;  %11022 = vst [vmem:[#allocation112_spill] sm:$0xff] %v8297_v44 }
 0x149   :  { %vm10980_vm3 = vmmov %vm10943_vm0  ;;  %10998 = vst [vmem:[#allocation96_spill] sm:$0xff] %v8229_v30 }
 0x14a   :  { %vm10984_vm10 = vmmov %vm10943_vm0  ;;  %11027 = vst [vmem:[#allocation116_spill] sm:$0xff] %v8314_v17 }
 0x14b   :  { %vm10989_vm8 = vmmov %vm10943_vm0  ;;  %11033 = vst [vmem:[#allocation120_spill] sm:$0xff] %v8331_v27 }
 0x14c   :  { %vm10994_vm7 = vmmov %vm10943_vm0  ;;  %11039 = vst [vmem:[#allocation124_spill] sm:$0xff] %v8348_v41 }
 0x14d   :  { %11045 = vst [vmem:[#allocation128_spill] sm:$0xff] %v8365_v16  ;;  %11057 = vst [vmem:[#allocation136_spill] sm:$0xff] %v8399_v34 }
 0x14e   :  { %11063 = vst [vmem:[#allocation140_spill] sm:$0xff] %v8416_v35  ;;  %11068 = vst [vmem:[#allocation144_spill] sm:$0xff] %v8433_v8 }
 0x156   :  { %640 = vperm.xlu1 %6205, %v296_v51   ;;  %v8042_v51 = vld [vmem:[#allocation2 + $0x28] sm:$0xff] }
 0x157   :  { %10942 = vst [vmem:[#allocation61_spill] sm:$0xff] %v8042_v51  ;;  %v8054_v22 = vmax.f32 %v8042_v51, %v1170_v0  ;;  %v1174_v0 = vpop.xlane.xlu0 %1173 }
 0x158   :  { %v8071_v18 = vmax.f32 %v8059_v52, %v1174_v0 }
 0x159   :  { %10946 = vst [vmem:[#allocation63_spill] sm:$0xff] %v8054_v22  ;;  %3698 = vst.msk [vmem:[#allocation2 + $0x28] sm:$0xff] %vm10949_vm15, %v8054_v22 }
 0x15a   :  { %1545 = vperm.xlu1 %6205, %v8003_v63   ;;  %10952 = vst [vmem:[#allocation67_spill] sm:$0xff] %v8071_v18  ;;  %3700 = vst.msk [vmem:[#allocation2 + $0x38] sm:$0xff] %vm10955_vm6, %v8071_v18  ;;  %v8144_v63 = vld [vmem:[#allocation2 + $0x88] sm:$0xff] }
 0x15b   :  { %v1178_v0 = vpop.xlane.xlu0 %1177  ;;  %vm10986_vm15 = vmmov %vm10943_vm0 }
 0x15c   :  { %vm10991_vm6 = vmmov %vm10943_vm0 }
 0x15e   :  { %1555 = vperm.xlu1 %6205, %v8020_v49   ;;  %v8127_v49 = vld [vmem:[#allocation2 + $0x78] sm:$0xff] }
 0x15f   :  { %10971 = vst [vmem:[#allocation80_spill] sm:$0xff] %v8127_v49 }
 0x162   :  { %1560 = vperm.xlu1 %6205, %v8037_v5   ;;  %v8076_v5 = vld [vmem:[#allocation2 + $0x48] sm:$0xff] }
 0x163   :  { %10954 = vst [vmem:[#allocation69_spill] sm:$0xff] %v8076_v5  ;;  %v8088_v51 = vmax.f32 %v8076_v5, %v1178_v0  ;;  %v1182_v0 = vpop.xlane.xlu0 %1181 }
 0x164   :  { %v8105_v52 = vmax.f32 %v8093_v21, %v1182_v0 }
 0x165   :  { %10958 = vst [vmem:[#allocation71_spill] sm:$0xff] %v8088_v51  ;;  %3702 = vst.msk [vmem:[#allocation2 + $0x48] sm:$0xff] %vm10961_vm2, %v8088_v51 }
 0x166   :  { %1570 = vperm.xlu1 %6205, %v8054_v22   ;;  %v8083_v22 = vld [vmem:[#allocation2 + $0x60] sm:$0xff]  ;;  %10964 = vst [vmem:[#allocation75_spill] sm:$0xff] %v8105_v52  ;;  %3704 = vst.msk [vmem:[#allocation2 + $0x58] sm:$0xff] %vm10967_vm12, %v8105_v52 }
 0x167   :  { %10956 = vst [vmem:[#allocation70_spill] sm:$0xff] %v8083_v22  ;;  %v8091_v36 = vmax.f32 %v8083_v22, %v1184_v48  ;;  %v1188_v48 = vpop.xlane.xlu1 %1187  ;;  %vm10996_vm2 = vmmov %vm10943_vm0 }
 0x168   :  { %vm11001_vm12 = vmmov %vm10943_vm0 }
 0x169   :  { %10959 = vst [vmem:[#allocation72_spill] sm:$0xff] %v8091_v36  ;;  %3705 = vst.msk [vmem:[#allocation2 + $0x60] sm:$0xff] %vm10963_vm13, %v8091_v36 }
 0x16a   :  { %1580 = vperm.xlu1 %6205, %v8071_v18   ;;  %v8100_v18 = vld [vmem:[#allocation2 + $0x70] sm:$0xff]  ;;  %vm10999_vm13 = vmmov %vm10943_vm0 }
 0x16b   :  { %10962 = vst [vmem:[#allocation74_spill] sm:$0xff] %v8100_v18  ;;  %v8108_v22 = vmax.f32 %v8100_v18, %v1188_v48 }
 0x16d   :  { %10965 = vst [vmem:[#allocation76_spill] sm:$0xff] %v8108_v22  ;;  %3707 = vst.msk [vmem:[#allocation2 + $0x70] sm:$0xff] %vm10969_vm14, %v8108_v22 }
 0x16e   :  { %1590 = vperm.xlu1 %6205, %v8088_v51   ;;  %v8117_v51 = vld [vmem:[#allocation2 + $0x80] sm:$0xff]  ;;  %vm11005_vm14 = vmmov %vm10943_vm0 }
 0x16f   :  { %10968 = vst [vmem:[#allocation78_spill] sm:$0xff] %v8117_v51 }
 0x172   :  { %1600 = vperm.xlu1 %6205, %v8105_v52   ;;  %v8134_v52 = vld [vmem:[#allocation2 + $0x90] sm:$0xff] }
 0x173   :  { %10973 = vst [vmem:[#allocation81_spill] sm:$0xff] %v8134_v52 }
 0x175   :  { %v1186_v0 = vpop.xlane.xlu0 %1185 }
 0x176   :  { %v8122_v5 = vmax.f32 %v8110_v55, %v1186_v0  ;;  %v1192_v48 = vpop.xlane.xlu1 %1191 }
 0x177   :  { %v8125_v18 = vmax.f32 %v8117_v51, %v1192_v48 }
 0x178   :  { %10970 = vst [vmem:[#allocation79_spill] sm:$0xff] %v8122_v5  ;;  %3706 = vst.msk [vmem:[#allocation2 + $0x68] sm:$0xff] %vm10972_vm4, %v8122_v5  ;;  %1610 = vperm.xlu1 %6205, %v8122_v5   ;;  %v8151_v5 = vld [vmem:[#allocation2 + $0xa0] sm:$0xff] }
 0x179   :  { %3709 = vst.msk [vmem:[#allocation2 + $0x80] sm:$0xff] %vm10974_vm1, %v8125_v18  ;;  %v1190_v0 = vpop.xlane.xlu0 %1189  ;;  %10977 = vst [vmem:[#allocation83_spill] sm:$0xff] %v8151_v5 }
 0x17a   :  { %v8139_v21 = vmax.f32 %v8127_v49, %v1190_v0  ;;  %v1196_v48 = vpop.xlane.xlu1 %1195  ;;  %vm11007_vm4 = vmmov %vm10943_vm0 }
 0x17b   :  { %v8142_v43 = vmax.f32 %v8134_v52, %v1196_v48  ;;  %v8185_v52 = vld [vmem:[#allocation2 + $0xc0] sm:$0xff]  ;;  %vm11011_vm1 = vmmov %vm10943_vm0 }
 0x17c   :  { %10975 = vst [vmem:[#allocation82_spill] sm:$0xff] %v8139_v21  ;;  %3708 = vst.msk [vmem:[#allocation2 + $0x78] sm:$0xff] %vm10976_vm11, %v8139_v21  ;;  %1620 = vperm.xlu1 %6205, %v8139_v21   ;;  %v8168_v21 = vld [vmem:[#allocation2 + $0xb0] sm:$0xff] }
 0x17d   :  { %3711 = vst.msk [vmem:[#allocation2 + $0x90] sm:$0xff] %vm10978_vm9, %v8142_v43  ;;  %v1194_v0 = vpop.xlane.xlu0 %1193  ;;  %10981 = vst [vmem:[#allocation85_spill] sm:$0xff] %v8168_v21 }
 0x17e   :  { %v8156_v55 = vmax.f32 %v8144_v63, %v1194_v0  ;;  %v1200_v48 = vpop.xlane.xlu1 %1199  ;;  %10985 = vst [vmem:[#allocation88_spill] sm:$0xff] %v8185_v52  ;;  %vm11013_vm11 = vmmov %vm10943_vm0 }
 0x17f   :  { %v8159_v3 = vmax.f32 %v8151_v5, %v1200_v48  ;;  %v8178_v5 = vld [vmem:[#allocation2 + $0xa8] sm:$0xff]  ;;  %vm11017_vm9 = vmmov %vm10943_vm0 }
 0x180   :  { %3710 = vst.msk [vmem:[#allocation2 + $0x88] sm:$0xff] %vm10980_vm3, %v8156_v55  ;;  %1630 = vperm.xlu1 %6205, %v8156_v55   ;;  %10983 = vst [vmem:[#allocation87_spill] sm:$0xff] %v8178_v5 }
 0x181   :  { %3713 = vst.msk [vmem:[#allocation2 + $0xa0] sm:$0xff] %vm10943_vm0, %v8159_v3  ;;  %v1198_v0 = vpop.xlane.xlu0 %1197  ;;  %vm11019_vm3 = vmmov %vm10943_vm0 }
 0x182   :  { %v8173_v49 = vmax.f32 %v8161_v1, %v1198_v0  ;;  %v1204_v48 = vpop.xlane.xlu1 %1203 }
 0x183   :  { %v8176_v29 = vmax.f32 %v8168_v21, %v1204_v48 }
 0x184   :  { %10982 = vst [vmem:[#allocation86_spill] sm:$0xff] %v8173_v49  ;;  %3712 = vst.msk [vmem:[#allocation2 + $0x98] sm:$0xff] %vm10984_vm10, %v8173_v49  ;;  %1640 = vperm.xlu1 %6205, %v8173_v49   ;;  %v8202_v49 = vld [vmem:[#allocation2 + $0xd0] sm:$0xff] }
 0x185   :  { %3715 = vst.msk [vmem:[#allocation2 + $0xb0] sm:$0xff] %vm10986_vm15, %v8176_v29  ;;  %v1202_v0 = vpop.xlane.xlu0 %1201  ;;  %10990 = vst [vmem:[#allocation91_spill] sm:$0xff] %v8202_v49 }
 0x186   :  { %v8190_v51 = vmax.f32 %v8178_v5, %v1202_v0  ;;  %v1208_v48 = vpop.xlane.xlu1 %1207  ;;  %vm11024_vm10 = vmmov %vm10943_vm0 }
 0x187   :  { %v8193_v21 = vmax.f32 %v8185_v52, %v1208_v48  ;;  %vm11028_vm15 = vmmov %vm10943_vm0 }
 0x188   :  { %10987 = vst [vmem:[#allocation89_spill] sm:$0xff] %v8190_v51  ;;  %3714 = vst.msk [vmem:[#allocation2 + $0xa8] sm:$0xff] %vm10989_vm8, %v8190_v51  ;;  %1650 = vperm.xlu1 %6205, %v8190_v51   ;;  %v8219_v51 = vld [vmem:[#allocation2 + $0xe0] sm:$0xff] }
 0x189   :  { %3717 = vst.msk [vmem:[#allocation2 + $0xc0] sm:$0xff] %vm10991_vm6, %v8193_v21  ;;  %v1206_v0 = vpop.xlane.xlu0 %1205  ;;  %10995 = vst [vmem:[#allocation94_spill] sm:$0xff] %v8219_v51 }
 0x18a   :  { %v8207_v1 = vmax.f32 %v8195_v60, %v1206_v0  ;;  %v1212_v48 = vpop.xlane.xlu1 %1211  ;;  %vm11030_vm8 = vmmov %vm10943_vm0 }
 0x18b   :  { %v8210_v52 = vmax.f32 %v8202_v49, %v1212_v48  ;;  %vm11034_vm6 = vmmov %vm10943_vm0 }
 0x18c   :  { %10992 = vst [vmem:[#allocation92_spill] sm:$0xff] %v8207_v1  ;;  %3716 = vst.msk [vmem:[#allocation2 + $0xb8] sm:$0xff] %vm10994_vm7, %v8207_v1  ;;  %1660 = vperm.xlu1 %6205, %v8207_v1   ;;  %v8236_v1 = vld [vmem:[#allocation2 + $0xf0] sm:$0xff] }
 0x18d   :  { %3719 = vst.msk [vmem:[#allocation2 + $0xd0] sm:$0xff] %vm10996_vm2, %v8210_v52  ;;  %v1210_v0 = vpop.xlane.xlu0 %1209  ;;  %11000 = vst [vmem:[#allocation97_spill] sm:$0xff] %v8236_v1 }
 0x18e   :  { %v8224_v5 = vmax.f32 %v8212_v28, %v1210_v0  ;;  %v1216_v48 = vpop.xlane.xlu1 %1215  ;;  %vm11036_vm7 = vmmov %vm10943_vm0 }
 0x18f   :  { %v8227_v49 = vmax.f32 %v8219_v51, %v1216_v48  ;;  %vm11040_vm2 = vmmov %vm10943_vm0 }
 0x190   :  { %10997 = vst [vmem:[#allocation95_spill] sm:$0xff] %v8224_v5  ;;  %3718 = vst.msk [vmem:[#allocation2 + $0xc8] sm:$0xff] %vm10999_vm13, %v8224_v5  ;;  %1670 = vperm.xlu1 %6205, %v8224_v5   ;;  %v8253_v5 = vld [vmem:[#allocation2 + $0x100] sm:$0xff] }
 0x191   :  { %3721 = vst.msk [vmem:[#allocation2 + $0xe0] sm:$0xff] %vm11001_vm12, %v8227_v49  ;;  %v1214_v0 = vpop.xlane.xlu0 %1213  ;;  %11006 = vst [vmem:[#allocation101_spill] sm:$0xff] %v8253_v5 }
 0x192   :  { %v8241_v60 = vmax.f32 %v8229_v30, %v1214_v0  ;;  %v1220_v48 = vpop.xlane.xlu1 %1219  ;;  %vm11042_vm13 = vmmov %vm10943_vm0 }
 0x193   :  { %v8244_v51 = vmax.f32 %v8236_v1, %v1220_v48  ;;  %vm11046_vm12 = vmmov %vm10943_vm0 }
 0x194   :  { %11002 = vst [vmem:[#allocation98_spill] sm:$0xff] %v8241_v60  ;;  %3720 = vst.msk [vmem:[#allocation2 + $0xd8] sm:$0xff] %vm11005_vm14, %v8241_v60  ;;  %1680 = vperm.xlu1 %6205, %v8241_v60   ;;  %v8270_v60 = vld [vmem:[#allocation2 + $0x110] sm:$0xff] }
 0x195   :  { %11003 = vst [vmem:[#allocation99_spill] sm:$0xff] %v8244_v51  ;;  %3723 = vst.msk [vmem:[#allocation2 + $0xf0] sm:$0xff] %vm11007_vm4, %v8244_v51  ;;  %v1218_v0 = vpop.xlane.xlu0 %1217 }
 0x196   :  { %v8258_v28 = vmax.f32 %v8246_v9, %v1218_v0  ;;  %v1224_v48 = vpop.xlane.xlu1 %1223  ;;  %11012 = vst [vmem:[#allocation105_spill] sm:$0xff] %v8270_v60  ;;  %vm11048_vm14 = vmmov %vm10943_vm0 }
 0x197   :  { %v8261_v1 = vmax.f32 %v8253_v5, %v1224_v48  ;;  %vm11052_vm4 = vmmov %vm10943_vm0 }
 0x198   :  { %11008 = vst [vmem:[#allocation102_spill] sm:$0xff] %v8258_v28  ;;  %3722 = vst.msk [vmem:[#allocation2 + $0xe8] sm:$0xff] %vm11011_vm1, %v8258_v28  ;;  %1690 = vperm.xlu1 %6205, %v8258_v28   ;;  %v8287_v28 = vld [vmem:[#allocation2 + $0x120] sm:$0xff] }
 0x199   :  { %11009 = vst [vmem:[#allocation103_spill] sm:$0xff] %v8261_v1  ;;  %3725 = vst.msk [vmem:[#allocation2 + $0x100] sm:$0xff] %vm11013_vm11, %v8261_v1  ;;  %v1222_v0 = vpop.xlane.xlu0 %1221 }
 0x19a   :  { %v8275_v30 = vmax.f32 %v8263_v40, %v1222_v0  ;;  %v1228_v48 = vpop.xlane.xlu1 %1227  ;;  %11018 = vst [vmem:[#allocation109_spill] sm:$0xff] %v8287_v28  ;;  %vm11054_vm1 = vmmov %vm10943_vm0 }
 0x19b   :  { %v8278_v5 = vmax.f32 %v8270_v60, %v1228_v48  ;;  %vm11058_vm11 = vmmov %vm10943_vm0 }
 0x19c   :  { %11014 = vst [vmem:[#allocation106_spill] sm:$0xff] %v8275_v30  ;;  %3724 = vst.msk [vmem:[#allocation2 + $0xf8] sm:$0xff] %vm11017_vm9, %v8275_v30  ;;  %1700 = vperm.xlu1 %6205, %v8275_v30   ;;  %v8304_v30 = vld [vmem:[#allocation2 + $0x130] sm:$0xff] }
 0x19d   :  { %11015 = vst [vmem:[#allocation107_spill] sm:$0xff] %v8278_v5  ;;  %3727 = vst.msk [vmem:[#allocation2 + $0x110] sm:$0xff] %vm11019_vm3, %v8278_v5  ;;  %v1226_v0 = vpop.xlane.xlu0 %1225 }
 0x19e   :  { %v8292_v9 = vmax.f32 %v8280_v56, %v1226_v0  ;;  %v1232_v48 = vpop.xlane.xlu1 %1231  ;;  %11023 = vst [vmem:[#allocation113_spill] sm:$0xff] %v8304_v30  ;;  %vm11060_vm9 = vmmov %vm10943_vm0 }
 0x19f   :  { %v8295_v60 = vmax.f32 %v8287_v28, %v1232_v48  ;;  %vm11064_vm3 = vmmov %vm10943_vm0 }
 0x1a0   :  { %11020 = vst [vmem:[#allocation110_spill] sm:$0xff] %v8292_v9  ;;  %3726 = vst.msk [vmem:[#allocation2 + $0x108] sm:$0xff] %vm10943_vm0, %v8292_v9  ;;  %1710 = vperm.xlu1 %6205, %v8292_v9   ;;  %v8321_v9 = vld [vmem:[#allocation2 + $0x140] sm:$0xff] }
 0x1a1   :  { %11021 = vst [vmem:[#allocation111_spill] sm:$0xff] %v8295_v60  ;;  %3729 = vst.msk [vmem:[#allocation2 + $0x120] sm:$0xff] %vm11024_vm10, %v8295_v60  ;;  %v1230_v0 = vpop.xlane.xlu0 %1229 }
 0x1a2   :  { %v8309_v40 = vmax.f32 %v8297_v44, %v1230_v0  ;;  %v1236_v48 = vpop.xlane.xlu1 %1235  ;;  %11029 = vst [vmem:[#allocation117_spill] sm:$0xff] %v8321_v9  ;;  %vm11069_vm10 = vmmov %vm10943_vm0 }
 0x1a3   :  { %v8312_v28 = vmax.f32 %v8304_v30, %v1236_v48 }
 0x1a4   :  { %11025 = vst [vmem:[#allocation114_spill] sm:$0xff] %v8309_v40  ;;  %3728 = vst.msk [vmem:[#allocation2 + $0x118] sm:$0xff] %vm11028_vm15, %v8309_v40  ;;  %1720 = vperm.xlu1 %6205, %v8309_v40   ;;  %v8338_v40 = vld [vmem:[#allocation2 + $0x150] sm:$0xff] }
 0x1a5   :  { %11026 = vst [vmem:[#allocation115_spill] sm:$0xff] %v8312_v28  ;;  %3731 = vst.msk [vmem:[#allocation2 + $0x130] sm:$0xff] %vm11030_vm8, %v8312_v28  ;;  %v1234_v0 = vpop.xlane.xlu0 %1233 }
 0x1a6   :  { %v8326_v56 = vmax.f32 %v8314_v17, %v1234_v0  ;;  %v1240_v48 = vpop.xlane.xlu1 %1239  ;;  %11035 = vst [vmem:[#allocation121_spill] sm:$0xff] %v8338_v40  ;;  %vm11071_vm15 = vmmov %vm10943_vm0 }
 0x1a7   :  { %v8329_v30 = vmax.f32 %v8321_v9, %v1240_v48  ;;  %vm11075_vm8 = vmmov %vm10943_vm0 }
 0x1a8   :  { %11031 = vst [vmem:[#allocation118_spill] sm:$0xff] %v8326_v56  ;;  %3730 = vst.msk [vmem:[#allocation2 + $0x128] sm:$0xff] %vm11034_vm6, %v8326_v56  ;;  %1730 = vperm.xlu1 %6205, %v8326_v56   ;;  %v8355_v56 = vld [vmem:[#allocation2 + $0x160] sm:$0xff] }
 0x1a9   :  { %11032 = vst [vmem:[#allocation119_spill] sm:$0xff] %v8329_v30  ;;  %3733 = vst.msk [vmem:[#allocation2 + $0x140] sm:$0xff] %vm11036_vm7, %v8329_v30  ;;  %v1238_v0 = vpop.xlane.xlu0 %1237 }
 0x1aa   :  { %v8343_v44 = vmax.f32 %v8331_v27, %v1238_v0  ;;  %v1244_v48 = vpop.xlane.xlu1 %1243  ;;  %11041 = vst [vmem:[#allocation125_spill] sm:$0xff] %v8355_v56  ;;  %vm11077_vm6 = vmmov %vm10943_vm0 }
 0x1ab   :  { %v8346_v9 = vmax.f32 %v8338_v40, %v1244_v48  ;;  %vm11081_vm7 = vmmov %vm10943_vm0 }
 0x1ac   :  { %11037 = vst [vmem:[#allocation122_spill] sm:$0xff] %v8343_v44  ;;  %3732 = vst.msk [vmem:[#allocation2 + $0x138] sm:$0xff] %vm11040_vm2, %v8343_v44  ;;  %1740 = vperm.xlu1 %6205, %v8343_v44   ;;  %v8372_v44 = vld [vmem:[#allocation2 + $0x170] sm:$0xff] }
 0x1ad   :  { %11038 = vst [vmem:[#allocation123_spill] sm:$0xff] %v8346_v9  ;;  %3735 = vst.msk [vmem:[#allocation2 + $0x150] sm:$0xff] %vm11042_vm13, %v8346_v9  ;;  %v1242_v0 = vpop.xlane.xlu0 %1241 }
 0x1ae   :  { %v8360_v17 = vmax.f32 %v8348_v41, %v1242_v0  ;;  %v1248_v48 = vpop.xlane.xlu1 %1247  ;;  %11047 = vst [vmem:[#allocation129_spill] sm:$0xff] %v8372_v44  ;;  %vm11083_vm2 = vmmov %vm10943_vm0 }
 0x1af   :  { %v8363_v40 = vmax.f32 %v8355_v56, %v1248_v48  ;;  %vm11087_vm13 = vmmov %vm10943_vm0 }
 0x1b0   :  { %11043 = vst [vmem:[#allocation126_spill] sm:$0xff] %v8360_v17  ;;  %3734 = vst.msk [vmem:[#allocation2 + $0x148] sm:$0xff] %vm11046_vm12, %v8360_v17  ;;  %1750 = vperm.xlu1 %6205, %v8360_v17   ;;  %v8389_v17 = vld [vmem:[#allocation2 + $0x180] sm:$0xff] }
 0x1b1   :  { %11044 = vst [vmem:[#allocation127_spill] sm:$0xff] %v8363_v40  ;;  %3737 = vst.msk [vmem:[#allocation2 + $0x160] sm:$0xff] %vm11048_vm14, %v8363_v40  ;;  %v1246_v0 = vpop.xlane.xlu0 %1245 }
 0x1b2   :  { %v8377_v27 = vmax.f32 %v8365_v16, %v1246_v0  ;;  %v1252_v48 = vpop.xlane.xlu1 %1251  ;;  %11053 = vst [vmem:[#allocation133_spill] sm:$0xff] %v8389_v17  ;;  %vm11089_vm12 = vmmov %vm10943_vm0 }
 0x1b3   :  { %v8380_v56 = vmax.f32 %v8372_v44, %v1252_v48  ;;  %vm11093_vm14 = vmmov %vm10943_vm0 }
 0x1b4   :  { %11049 = vst [vmem:[#allocation130_spill] sm:$0xff] %v8377_v27  ;;  %3736 = vst.msk [vmem:[#allocation2 + $0x158] sm:$0xff] %vm11052_vm4, %v8377_v27  ;;  %1760 = vperm.xlu1 %6205, %v8377_v27   ;;  %v8406_v27 = vld [vmem:[#allocation2 + $0x190] sm:$0xff] }
 0x1b5   :  { %11050 = vst [vmem:[#allocation131_spill] sm:$0xff] %v8380_v56  ;;  %3739 = vst.msk [vmem:[#allocation2 + $0x170] sm:$0xff] %vm11054_vm1, %v8380_v56  ;;  %v1250_v0 = vpop.xlane.xlu0 %1249 }
 0x1b6   :  { %v8394_v41 = vmax.f32 %v8382_v54, %v1250_v0  ;;  %v1256_v48 = vpop.xlane.xlu1 %1255  ;;  %11059 = vst [vmem:[#allocation137_spill] sm:$0xff] %v8406_v27  ;;  %vm11095_vm4 = vmmov %vm10943_vm0 }
 0x1b7   :  { %v8397_v44 = vmax.f32 %v8389_v17, %v1256_v48  ;;  %vm11099_vm1 = vmmov %vm10943_vm0 }
 0x1b8   :  { %11055 = vst [vmem:[#allocation134_spill] sm:$0xff] %v8394_v41  ;;  %3738 = vst.msk [vmem:[#allocation2 + $0x168] sm:$0xff] %vm11058_vm11, %v8394_v41  ;;  %1770 = vperm.xlu1 %6205, %v8394_v41   ;;  %v8423_v41 = vld [vmem:[#allocation2 + $0x1a0] sm:$0xff] }
 0x1b9   :  { %11056 = vst [vmem:[#allocation135_spill] sm:$0xff] %v8397_v44  ;;  %3741 = vst.msk [vmem:[#allocation2 + $0x180] sm:$0xff] %vm11060_vm9, %v8397_v44  ;;  %v1254_v0 = vpop.xlane.xlu0 %1253 }
 0x1ba   :  { %v8411_v16 = vmax.f32 %v8399_v34, %v1254_v0  ;;  %v1260_v48 = vpop.xlane.xlu1 %1259  ;;  %11065 = vst [vmem:[#allocation141_spill] sm:$0xff] %v8423_v41  ;;  %vm11100_vm11 = vmmov %vm10943_vm0 }
 0x1bb   :  { %v8414_v17 = vmax.f32 %v8406_v27, %v1260_v48  ;;  %vm11102_vm9 = vmmov %vm10943_vm0 }
 0x1bc   :  { %11061 = vst [vmem:[#allocation138_spill] sm:$0xff] %v8411_v16  ;;  %3740 = vst.msk [vmem:[#allocation2 + $0x178] sm:$0xff] %vm11064_vm3, %v8411_v16  ;;  %1780 = vperm.xlu1 %6205, %v8411_v16   ;;  %v8440_v16 = vld [vmem:[#allocation2 + $0x1b0] sm:$0xff] }
 0x1bd   :  { %11062 = vst [vmem:[#allocation139_spill] sm:$0xff] %v8414_v17  ;;  %3743 = vst.msk [vmem:[#allocation2 + $0x190] sm:$0xff] %vm10943_vm0, %v8414_v17  ;;  %v1258_v0 = vpop.xlane.xlu0 %1257 }
 0x1be   :  { %v8428_v54 = vmax.f32 %v8416_v35, %v1258_v0  ;;  %v1264_v48 = vpop.xlane.xlu1 %1263  ;;  %11070 = vst [vmem:[#allocation145_spill] sm:$0xff] %v8440_v16 }
 0x1bf   :  { %v8431_v27 = vmax.f32 %v8423_v41, %v1264_v48 }
 0x1c0   :  { %11066 = vst [vmem:[#allocation142_spill] sm:$0xff] %v8428_v54  ;;  %3742 = vst.msk [vmem:[#allocation2 + $0x188] sm:$0xff] %vm11069_vm10, %v8428_v54  ;;  %1790 = vperm.xlu1 %6205, %v8428_v54   ;;  %v8457_v54 = vld [vmem:[#allocation2 + $0x1c0] sm:$0xff]  ;;  %vm168_vm10 = vcmask 130048  }
 0x1c1   :  { %11067 = vst [vmem:[#allocation143_spill] sm:$0xff] %v8431_v27  ;;  %3745 = vst.msk [vmem:[#allocation2 + $0x1a0] sm:$0xff] %vm11071_vm15, %v8431_v27  ;;  %v1262_v0 = vpop.xlane.xlu0 %1261 }
 0x1c2   :  { %v8445_v34 = vmax.f32 %v8433_v8, %v1262_v0  ;;  %v1268_v48 = vpop.xlane.xlu1 %1267  ;;  %11076 = vst [vmem:[#allocation149_spill] sm:$0xff] %v8457_v54  ;;  %vm11172_vm15 = vmmov %vm10943_vm0 }
 0x1c3   :  { %v8448_v41 = vmax.f32 %v8440_v16, %v1268_v48 }
 0x1c4   :  { %11072 = vst [vmem:[#allocation146_spill] sm:$0xff] %v8445_v34  ;;  %3744 = vst.msk [vmem:[#allocation2 + $0x198] sm:$0xff] %vm11075_vm8, %v8445_v34  ;;  %1800 = vperm.xlu1 %6205, %v8445_v34   ;;  %v8474_v34 = vld [vmem:[#allocation2 + $0x1d0] sm:$0xff] }
 0x1c5   :  { %11073 = vst [vmem:[#allocation147_spill] sm:$0xff] %v8448_v41  ;;  %3747 = vst.msk [vmem:[#allocation2 + $0x1b0] sm:$0xff] %vm11077_vm6, %v8448_v41  ;;  %v1266_v0 = vpop.xlane.xlu0 %1265 }
 0x1c6   :  { %v8462_v35 = vmax.f32 %v8450_v53, %v1266_v0  ;;  %v1272_v48 = vpop.xlane.xlu1 %1271  ;;  %11082 = vst [vmem:[#allocation153_spill] sm:$0xff] %v8474_v34  ;;  %vm11178_vm8 = vmmov %vm10943_vm0 }
 0x1c7   :  { %v8465_v16 = vmax.f32 %v8457_v54, %v1272_v48  ;;  %vm11182_vm6 = vmmov %vm10943_vm0 }
 0x1c8   :  { %11078 = vst [vmem:[#allocation150_spill] sm:$0xff] %v8462_v35  ;;  %3746 = vst.msk [vmem:[#allocation2 + $0x1a8] sm:$0xff] %vm11081_vm7, %v8462_v35  ;;  %1810 = vperm.xlu1 %6205, %v8462_v35   ;;  %v8491_v35 = vld [vmem:[#allocation2 + $0x1e0] sm:$0xff] }
 0x1c9   :  { %11079 = vst [vmem:[#allocation151_spill] sm:$0xff] %v8465_v16  ;;  %3749 = vst.msk [vmem:[#allocation2 + $0x1c0] sm:$0xff] %vm11083_vm2, %v8465_v16  ;;  %v1270_v0 = vpop.xlane.xlu0 %1269 }
 0x1ca   :  { %v8479_v8 = vmax.f32 %v8467_v26, %v1270_v0  ;;  %v1276_v48 = vpop.xlane.xlu1 %1275  ;;  %11088 = vst [vmem:[#allocation157_spill] sm:$0xff] %v8491_v35  ;;  %vm11183_vm7 = vmmov %vm10943_vm0 }
 0x1cb   :  { %v8482_v54 = vmax.f32 %v8474_v34, %v1276_v48  ;;  %vm11192_vm2 = vmmov %vm10943_vm0 }
 0x1cc   :  { %11084 = vst [vmem:[#allocation154_spill] sm:$0xff] %v8479_v8  ;;  %3748 = vst.msk [vmem:[#allocation2 + $0x1b8] sm:$0xff] %vm11087_vm13, %v8479_v8  ;;  %1820 = vperm.xlu1 %6205, %v8479_v8   ;;  %v8508_v8 = vld [vmem:[#allocation2 + $0x1f0] sm:$0xff] }
 0x1cd   :  { %11085 = vst [vmem:[#allocation155_spill] sm:$0xff] %v8482_v54  ;;  %3751 = vst.msk [vmem:[#allocation2 + $0x1d0] sm:$0xff] %vm11089_vm12, %v8482_v54  ;;  %v1274_v0 = vpop.xlane.xlu0 %1273 }
 0x1ce   :  { %v8496_v53 = vmax.f32 %v8484_v31, %v1274_v0  ;;  %v1280_v48 = vpop.xlane.xlu1 %1279  ;;  %11094 = vst [vmem:[#allocation161_spill] sm:$0xff] %v8508_v8  ;;  %vm11193_vm13 = vmmov %vm10943_vm0 }
 0x1cf   :  { %v8499_v34 = vmax.f32 %v8491_v35, %v1280_v48  ;;  %vm11199_vm12 = vmmov %vm10943_vm0 }
 0x1d0   :  { %11090 = vst [vmem:[#allocation158_spill] sm:$0xff] %v8496_v53  ;;  %3750 = vst.msk [vmem:[#allocation2 + $0x1c8] sm:$0xff] %vm11093_vm14, %v8496_v53  ;;  %1830 = vperm.xlu1 %6205, %v8496_v53  }
 0x1d1   :  { %11091 = vst [vmem:[#allocation159_spill] sm:$0xff] %v8499_v34  ;;  %3753 = vst.msk [vmem:[#allocation2 + $0x1e0] sm:$0xff] %vm11095_vm4, %v8499_v34  ;;  %v1278_v0 = vpop.xlane.xlu0 %1277 }
 0x1d2   :  { %v8513_v26 = vmax.f32 %v8501_v62, %v1278_v0  ;;  %v1284_v48 = vpop.xlane.xlu1 %1283  ;;  %vm11200_vm14 = vmmov %vm10943_vm0 }
 0x1d3   :  { %v8516_v35 = vmax.f32 %v8508_v8, %v1284_v48  ;;  %v6206_v8 = vld [vmem:[%s10575_s3] sm:$0xff]   ;;  %vm11206_vm4 = vmmov %vm10943_vm0 }
 0x1d4   :  { %11096 = vst [vmem:[#allocation162_spill] sm:$0xff] %v8513_v26  ;;  %3752 = vst.msk [vmem:[#allocation2 + $0x1d8] sm:$0xff] %vm11099_vm1, %v8513_v26  ;;  %1840 = vperm.xlu1 %6205, %v8513_v26   ;;  %5931 = vmatprep.subr.bf16.mxu1 %v6206_v8 }
 0x1d5   :  { %11097 = vst [vmem:[#allocation163_spill] sm:$0xff] %v8516_v35  ;;  %3755 = vst.msk [vmem:[#allocation2 + $0x1f0] sm:$0xff] %vm11100_vm11, %v8516_v35  ;;  %v1282_v53 = vpop.xlane.xlu0 %1281  ;;  %5932 = vmatpush3.bf16.msra.mxu1 %v6206_v8  ;;  %v6209_v8 = vld [vmem:[%s10575_s3 + $0x18] sm:$0xff]  }
 0x1d6   :  { %v8528_v0 = vmax.f32 %v8518_v46, %v1282_v53  ;;  %v641_v31 = vpop.permute.xlu1 %640  ;;  %5933 = vmatprep.subr.bf16.mxu1 %v6207_v14  ;;  %v6211_v46 = vld [vmem:[%s10575_s3 + $0x28] sm:$0xff]   ;;  %vm11207_vm1 = vmmov %vm10943_vm0 }
 0x1d7   :  { %v726_v48 = vadd.f32 %v7847_v19, %v641_v31  ;;  %vm11213_vm11 = vmmov %vm10943_vm0 }
 0x1d8   :  { %11101 = vst [vmem:[#allocation165_spill] sm:$0xff] %v8528_v0  ;;  %3754 = vst.msk [vmem:[#allocation2 + $0x1e8] sm:$0xff] %vm11102_vm9, %v8528_v0  ;;  %1850 = vperm.xlu1 %6205, %v8528_v0  }
 0x1d9   :  { %v854_v37 = vmul.f32 0.2, %v726_v48  ;;  %vm790_vm3 = vcmp.gt.f32.partialorder %v726_v48, 0.0  ;;  %5934 = vmatpush3.bf16.msra.mxu1 %v6207_v14  ;;  %v6210_v14 = vld [vmem:[%s10575_s3 + $0x20] sm:$0xff]   ;;  %vm11214_vm9 = vmmov %vm10943_vm0 }
 0x1da   :  { %v8536_v26 = vpop.permute.xlu1 %1545 }
 0x1db   :  { %v918_v62 = vsel %vm790_vm3, %v726_v48, %v854_v37  ;;  %v6208_v37 = vld [vmem:[%s10575_s3 + $0x10] sm:$0xff]   ;;  %vm11220_vm3 = vmmov %vm10943_vm0 }
 0x1dc   :  { %v8540_v53 = vsel %vm7661_vm5, %v918_v62, -1e+30  ;;  %5935 = vmatprep.subr.bf16.mxu1 %v6208_v37  ;;  %vm11106_vm5 = vmmov %vm10943_vm0 }
 0x1dd   :  { %11103 = vst [vmem:[#allocation166_spill] sm:$0xff] %v8540_v53  ;;  %1285 = vmax.xlane.f32.xlu0 %v8540_v53  ;;  %5936 = vmatpush3.bf16.msra.mxu1 %v6208_v37 }
 0x1de   :  { %v8543_v19 = vpop.permute.xlu1 %1555  ;;  %5937 = vmatprep.subr.bf16.mxu1 %v6209_v8 }
 0x1e1   :  { %5938 = vmatpush3.bf16.msra.mxu1 %v6209_v8 }
 0x1e2   :  { %v8545_v31 = vpop.permute.xlu1 %1560  ;;  %5939 = vmatprep.subr.bf16.mxu1 %v6210_v14 }
 0x1e5   :  { %5940 = vmatpush3.bf16.msra.mxu1 %v6210_v14 }
 0x1e6   :  { %v8550_v0 = vpop.permute.xlu1 %1570  ;;  %5941 = vmatprep.subr.bf16.mxu1 %v6211_v46 }
 0x1e9   :  { %5942 = vmatpush3.bf16.msra.mxu1 %v6211_v46 }
 0x1ea   :  { %v8555_v62 = vpop.permute.xlu1 %1580 }
 0x1ee   :  { %v8560_v48 = vpop.permute.xlu1 %1590 }
 0x1f2   :  { %v8566_v53 = vpop.permute.xlu1 %1600 }
 0x1f3   :  { %1550 = vperm.xlu0 %6204, %v8006_v10   ;;  %v6212_v10 = vld [vmem:[%s10575_s3 + $0x30] sm:$0xff]  }
 0x1f4   :  { %5943 = vmatprep.subr.bf16.mxu1 %v6212_v10 }
 0x1f5   :  { %5944 = vmatpush3.bf16.msra.mxu1 %v6212_v10 }
 0x1f7   :  { %1565 = vperm.xlu0 %6204, %v8023_v57   ;;  %v8572_v37 = vpop.permute.xlu1 %1610  ;;  %v6213_v57 = vld [vmem:[%s10575_s3 + $0x38] sm:$0xff]  }
 0x1f8   :  { %5945 = vmatprep.subr.bf16.mxu1 %v6213_v57 }
 0x1f9   :  { %5946 = vmatpush3.bf16.msra.mxu1 %v6213_v57  ;;  %v6222_v57 = vld [vmem:[%s10575_s3 + $0x80] sm:$0xff]  }
 0x1fa   :  { %5995 = vmatprep.subr.bf16.mxu0 %v6222_v57 }
 0x1fb   :  { %1575 = vperm.xlu0 %6204, %v8040_v2   ;;  %v8578_v8 = vpop.permute.xlu1 %1620  ;;  %v8592_v2 = vld [vmem:[%s10575_s3 + $0x40] sm:$0xff]   ;;  %5996 = vmatpush3.bf16.msra.mxu0 %v6222_v57  ;;  %v6225_v57 = vld [vmem:[%s10575_s3 + $0x98] sm:$0xff]  }
 0x1fc   :  { %5963 = vmatprep.subr.bf16.mxu1 %v8592_v2 }
 0x1ff   :  { %1585 = vperm.xlu0 %6204, %v8057_v50   ;;  %v1631_v14 = vpop.permute.xlu1 %1630 }
 0x200   :  { %v1880_v25 = vsub.f32 %v7697_v11, %v1631_v14 }
 0x202   :  { %v1961_v46 = vmul.f32 1.442695, %v1880_v25 }
 0x203   :  { %1595 = vperm.xlu0 %6204, %v8074_v23   ;;  %v8603_v11 = vpop.permute.xlu1 %1640 }
 0x204   :  { %6242 = vpow2.f32 %v1961_v46  ;;  %v6223_v46 = vld [vmem:[%s10575_s3 + $0x88] sm:$0xff]  }
 0x205   :  { %5997 = vmatprep.subr.bf16.mxu0 %v6223_v46 }
 0x206   :  { %5998 = vmatpush3.bf16.msra.mxu0 %v6223_v46  ;;  %v6226_v46 = vld [vmem:[%s10575_s3 + $0xa0] sm:$0xff]  }
 0x207   :  { %1605 = vperm.xlu0 %6204, %v8091_v36   ;;  %v8607_v25 = vpop.permute.xlu1 %1650 }
 0x20b   :  { %1615 = vperm.xlu0 %6204, %v8108_v22   ;;  %v8613_v14 = vpop.permute.xlu1 %1660  ;;  %v6224_v22 = vld [vmem:[%s10575_s3 + $0x90] sm:$0xff]  }
 0x20c   :  { %5999 = vmatprep.subr.bf16.mxu0 %v6224_v22 }
 0x20d   :  { %6000 = vmatpush3.bf16.msra.mxu0 %v6224_v22  ;;  %v6227_v22 = vld [vmem:[%s10575_s3 + $0xa8] sm:$0xff]  }
 0x20e   :  { %v8597_v10 = vpop.eup %6242  ;;  %6001 = vmatprep.subr.bf16.mxu0 %v6225_v57 }
 0x20f   :  { %1625 = vperm.xlu0 %6204, %v8125_v18   ;;  %2217 = vadd.xlane.f32.xlu1 %v8597_v10  ;;  %v8623_v36 = vpop.permute.xlu1 %1670 }
 0x211   :  { %6002 = vmatpush3.bf16.msra.mxu0 %v6225_v57  ;;  %v6228_v57 = vld [vmem:[%s10575_s3 + $0xb0] sm:$0xff]  }
 0x212   :  { %6003 = vmatprep.subr.bf16.mxu0 %v6226_v46 }
 0x213   :  { %1635 = vperm.xlu0 %6204, %v8142_v43   ;;  %v8629_v23 = vpop.permute.xlu1 %1680 }
 0x215   :  { %6004 = vmatpush3.bf16.msra.mxu0 %v6226_v46  ;;  %v6229_v46 = vld [vmem:[%s10575_s3 + $0xb8] sm:$0xff]  }
 0x216   :  { %6005 = vmatprep.subr.bf16.mxu0 %v6227_v22 }
 0x217   :  { %1645 = vperm.xlu0 %6204, %v8159_v3  }
 0x219   :  { %6006 = vmatpush3.bf16.msra.mxu0 %v6227_v22 }
 0x21a   :  { %6007 = vmatprep.subr.bf16.mxu0 %v6228_v57 }
 0x21b   :  { %1655 = vperm.xlu0 %6204, %v8176_v29  }
 0x21d   :  { %6008 = vmatpush3.bf16.msra.mxu0 %v6228_v57 }
 0x21e   :  { %6009 = vmatprep.subr.bf16.mxu0 %v6229_v46 }
 0x21f   :  { %1665 = vperm.xlu0 %6204, %v8193_v21  }
 0x221   :  { %6010 = vmatpush3.bf16.msra.mxu0 %v6229_v46 }
 0x223   :  { %1675 = vperm.xlu0 %6204, %v8210_v52  }
 0x227   :  { %1685 = vperm.xlu0 %6204, %v8227_v49  }
 0x22b   :  { %1695 = vperm.xlu0 %6204, %v8244_v51  }
 0x22f   :  { %1705 = vperm.xlu0 %6204, %v8261_v1   ;;  %v8639_v1 = vpop.permute.xlu1 %1690 }
 0x233   :  { %1715 = vperm.xlu0 %6204, %v8278_v5   ;;  %v8645_v5 = vpop.permute.xlu1 %1700 }
 0x237   :  { %1725 = vperm.xlu0 %6204, %v8295_v60   ;;  %v8652_v22 = vpop.permute.xlu1 %1710 }
 0x23b   :  { %1735 = vperm.xlu0 %6204, %v8312_v28   ;;  %v8655_v28 = vpop.permute.xlu1 %1720 }
 0x23f   :  { %1745 = vperm.xlu0 %6204, %v8329_v30   ;;  %v8659_v57 = vpop.permute.xlu1 %1730 }
 0x243   :  { %1755 = vperm.xlu0 %6204, %v8346_v9   ;;  %v8662_v30 = vpop.permute.xlu1 %1740 }
 0x247   :  { %1765 = vperm.xlu0 %6204, %v8363_v40   ;;  %v8666_v46 = vpop.permute.xlu1 %1750 }
 0x24b   :  { %1775 = vperm.xlu0 %6204, %v8380_v56   ;;  %v8669_v40 = vpop.permute.xlu1 %1760  ;;  %v8675_v56 = vld [vmem:[#allocation2 + $0x1f8] sm:$0xff] }
 0x24c   :  { %11104 = vst [vmem:[#allocation167_spill] sm:$0xff] %v8675_v56 }
 0x24f   :  { %1785 = vperm.xlu0 %6204, %v8397_v44   ;;  %v8673_v44 = vpop.permute.xlu1 %1770 }
 0x253   :  { %1795 = vperm.xlu0 %6204, %v8414_v17  }
 0x257   :  { %1805 = vperm.xlu0 %6204, %v8431_v27  }
 0x25b   :  { %1815 = vperm.xlu0 %6204, %v8448_v41   ;;  %v1863_v41 = vsub.f32 %v7116_v12, %v8536_v26 }
 0x25d   :  { %v1927_v27 = vmul.f32 1.442695, %v1863_v41 }
 0x25f   :  { %1825 = vperm.xlu0 %6204, %v8465_v16   ;;  %v1865_v16 = vsub.f32 %v7153_v32, %v8543_v19  ;;  %6244 = vpow2.f32 %v1927_v27  ;;  %v1874_v27 = vsub.f32 %v7495_v7, %v8566_v53  ;;  %v1876_v7 = vsub.f32 %v7657_v39, %v8572_v37 }
 0x261   :  { %v1931_v12 = vmul.f32 1.442695, %v1865_v16  ;;  %v1953_v37 = vmul.f32 1.442695, %v1876_v7  ;;  %v1882_v7 = vsub.f32 %v7714_v13, %v8603_v11  ;;  %v11109_v11 = vld [vmem:[#allocation9_spill] sm:$0xff] }
 0x263   :  { %1835 = vperm.xlu0 %6204, %v8482_v54   ;;  %v1866_v54 = vsub.f32 %v7194_v47, %v8545_v31  ;;  %v1870_v31 = vsub.f32 %v7422_v33, %v8555_v62  ;;  %v1949_v62 = vmul.f32 1.442695, %v1874_v27  ;;  %v1965_v13 = vmul.f32 1.442695, %v1882_v7 }
 0x265   :  { %v1933_v60 = vmul.f32 1.442695, %v1866_v54 }
 0x267   :  { %1845 = vperm.xlu0 %6204, %v8499_v34   ;;  %v8687_v34 = vpop.permute.xlu1 %1780  ;;  %6246 = vpow2.f32 %v1933_v60 }
 0x269   :  { %v8706_v60 = vpop.eup %6244 }
 0x26a   :  { %v1286_v17 = vpop.xlane.xlu0 %1285 }
 0x26b   :  { %v8678_v9 = vmax.f32 %v8675_v56, %v1286_v17  ;;  %1855 = vperm.xlu0 %6204, %v8516_v35   ;;  %v1868_v17 = vsub.f32 %v7368_v4, %v8550_v0  ;;  %v8694_v26 = vpop.permute.xlu1 %1790  ;;  %v1941_v4 = vmul.f32 1.442695, %v1870_v31 }
 0x26d   :  { %11105 = vst [vmem:[#allocation168_spill] sm:$0xff] %v8678_v9  ;;  %3756 = vst.msk [vmem:[#allocation2 + $0x1f8] sm:$0xff] %vm11106_vm5, %v8678_v9  ;;  %v1937_v47 = vmul.f32 1.442695, %v1868_v17 }
 0x26e   :  { %vm11221_vm5 = vmmov %vm10943_vm0 }
 0x26f   :  { %v8701_v41 = vpop.permute.xlu1 %1800 }
 0x272   :  { %v1551_v56 = vpop.permute.xlu0 %1550 }
 0x273   :  { %v1864_v35 = vsub.f32 %v7128_v20, %v1551_v56  ;;  %v1872_v20 = vsub.f32 %v7451_v59, %v8560_v48  ;;  %v8711_v59 = vpop.permute.xlu1 %1810 }
 0x275   :  { %v1929_v50 = vmul.f32 1.442695, %v1864_v35  ;;  %v1945_v33 = vmul.f32 1.442695, %v1872_v20 }
 0x276   :  { %v1566_v51 = vpop.permute.xlu0 %1565 }
 0x277   :  { %6248 = vpow2.f32 %v1929_v50  ;;  %v1867_v32 = vsub.f32 %v7169_v38, %v1566_v51  ;;  %v8709_v50 = vpop.eup %6246 }
 0x278   :  { %6250 = vpow2.f32 %v1931_v12  ;;  %v6215_v12 = vld [vmem:[%s10575_s3 + $0x48] sm:$0xff]  }
 0x279   :  { %v1935_v54 = vmul.f32 1.442695, %v1867_v32  ;;  %6252 = vpow2.f32 %v1937_v47  ;;  %v1878_v32 = vsub.f32 %v7681_v6, %v8578_v8 }
 0x27a   :  { %v1576_v56 = vpop.permute.xlu0 %1575 }
 0x27b   :  { %6254 = vpow2.f32 %v1935_v54  ;;  %v1869_v35 = vsub.f32 %v7216_v58, %v1576_v56  ;;  %v6216_v56 = vld [vmem:[%s10575_s3 + $0x50] sm:$0xff]  }
 0x27c   :  { %6256 = vpow2.f32 %v1941_v4 }
 0x27d   :  { %v1939_v16 = vmul.f32 1.442695, %v1869_v35 }
 0x27e   :  { %v1586_v38 = vpop.permute.xlu0 %1585 }
 0x27f   :  { %6258 = vpow2.f32 %v1939_v16  ;;  %v1871_v51 = vsub.f32 %v7392_v15, %v1586_v38 }
 0x280   :  { %6260 = vpow2.f32 %v1945_v33  ;;  %v1957_v33 = vmul.f32 1.442695, %v1878_v32  ;;  %v1884_v32 = vsub.f32 %v11109_v11, %v8607_v25 }
 0x281   :  { %v8713_v0 = vpop.eup %6248  ;;  %v1943_v19 = vmul.f32 1.442695, %v1871_v51  ;;  %v6217_v51 = vld [vmem:[%s10575_s3 + $0x58] sm:$0xff]  }
 0x282   :  { %v8715_v58 = vpop.eup %6250  ;;  %v1596_v53 = vpop.permute.xlu0 %1595  ;;  %v2888_v48 = vpack.c.bf16 %v8713_v0, %v8706_v60 }
 0x283   :  { %6262 = vpow2.f32 %v1943_v19  ;;  %v1873_v15 = vsub.f32 %v7438_v42, %v1596_v53  ;;  %v2889_v17 = vpack.c.bf16 %v8709_v50, %v8715_v58  ;;  %v8727_v47 = vpop.eup %6252  ;;  %v8733_v42 = vpop.permute.xlu1 %1820 }
 0x284   :  { %5947 = vmatprep.mubr.bf16.mxu1 %v2888_v48  ;;  %6264 = vpow2.f32 %v1949_v62  ;;  %v11108_v48 = vld [vmem:[#allocation5_spill] sm:$0xff] }
 0x285   :  { %v8729_v31 = vpop.eup %6254  ;;  %v1947_v39 = vmul.f32 1.442695, %v1873_v15  ;;  %5948 = vmatmul.mubr.bf16.vlgmr.msra.gmra.mrb[0].mxu1 %v2889_v17  ;;  %v6218_v17 = vld [vmem:[%s10575_s3 + $0x60] sm:$0xff]  }
 0x286   :  { %5964 = vmatpush3.bf16.msra.mxu1 %v8592_v2  ;;  %v1606_v54 = vpop.permute.xlu0 %1605  ;;  %v2890_v4 = vpack.c.bf16 %v8727_v47, %v8729_v31  ;;  %v8742_v35 = vpop.eup %6256  ;;  %v11107_v2 = vsub.f32 %v8144_v63, %v8156_v55 }
 0x287   :  { %6266 = vpow2.f32 %v1947_v39  ;;  %v1875_v20 = vsub.f32 %v7476_v61, %v1606_v54  ;;  %5965 = vmatprep.subr.bf16.mxu1 %v6215_v12  ;;  %v8757_v63 = vpop.permute.xlu1 %1830 }
 0x288   :  { %5951 = vmatprep.mubr.bf16.mxu1 %v2890_v4  ;;  %v1449_v8 = vmul.f32 1.442695, %v11107_v2  ;;  %6268 = vpow2.f32 %v1953_v37 }
 0x289   :  { %v8744_v6 = vpop.eup %6258  ;;  %v1951_v16 = vmul.f32 1.442695, %v1875_v20 }
 0x28a   :  { %5966 = vmatpush3.bf16.msra.mxu1 %v6215_v12  ;;  %v1616_v27 = vpop.permute.xlu0 %1615  ;;  %v2891_v61 = vpack.c.bf16 %v8742_v35, %v8744_v6  ;;  %v8755_v19 = vpop.eup %6260 }
 0x28b   :  { %6270 = vpow2.f32 %v1951_v16  ;;  %v1877_v38 = vsub.f32 %v7638_v24, %v1616_v27  ;;  %5967 = vmatprep.subr.bf16.mxu1 %v6216_v56  ;;  %v8775_v54 = vpop.permute.xlu1 %1840  ;;  %v1969_v27 = vmul.f32 1.442695, %v1884_v32  ;;  %v1888_v32 = vsub.f32 %v7762_v45, %v8623_v36 }
 0x28c   :  { %6272 = vpow2.f32 %v1449_v8  ;;  %v6219_v8 = vld [vmem:[%s10575_s3 + $0x68] sm:$0xff]  }
 0x28d   :  { %v8759_v55 = vpop.eup %6262  ;;  %v1955_v62 = vmul.f32 1.442695, %v1877_v38  ;;  %5952 = vmatmul.mubr.bf16.gmra.mrb[4].mxu1 %v2891_v61  ;;  %6274 = vpow2.f32 %v1957_v33  ;;  %v11111_v61 = vld [vmem:[#allocation11_spill] sm:$0xff]  ;;  %v1977_v45 = vmul.f32 1.442695, %v1888_v32 }
 0x28e   :  { %5968 = vmatpush3.bf16.msra.mxu1 %v6216_v56  ;;  %v1626_v24 = vpop.permute.xlu0 %1625  ;;  %v2892_v53 = vpack.c.bf16 %v8755_v19, %v8759_v55  ;;  %v8769_v12 = vpop.eup %6264  ;;  %v11110_v56 = vld [vmem:[#allocation6_spill] sm:$0xff]  ;;  %v1886_v38 = vsub.f32 %v11111_v61, %v8613_v14  ;;  %v6221_v61 = vld [vmem:[%s10575_s3 + $0x78] sm:$0xff]  }
 0x28f   :  { %6276 = vpow2.f32 %v1955_v62  ;;  %v1879_v15 = vsub.f32 %v11108_v48, %v1626_v24  ;;  %5969 = vmatprep.subr.bf16.mxu1 %v6217_v51  ;;  %v11112_v24 = vld [vmem:[#allocation7_spill] sm:$0xff]  ;;  %v2072_v14 = vld [vmem:[#allocation3 + $0x88] sm:$0xff] }
 0x290   :  { %5955 = vmatprep.mubr.bf16.mxu1 %v2892_v53  ;;  %v6220_v48 = vld [vmem:[%s10575_s3 + $0x70] sm:$0xff]   ;;  %v1973_v11 = vmul.f32 1.442695, %v1886_v38 }
 0x291   :  { %v8771_v39 = vpop.eup %6266  ;;  %v1959_v37 = vmul.f32 1.442695, %v1879_v15 }
 0x292   :  { %5970 = vmatpush3.bf16.msra.mxu1 %v6217_v51  ;;  %v1636_v4 = vpop.permute.xlu0 %1635  ;;  %v2893_v20 = vpack.c.bf16 %v8769_v12, %v8771_v39  ;;  %v8783_v16 = vpop.eup %6268 }
 0x293   :  { %6278 = vpow2.f32 %v1959_v37  ;;  %v1881_v2 = vsub.f32 %v11110_v56, %v1636_v4  ;;  %5971 = vmatprep.subr.bf16.mxu1 %v6218_v17  ;;  %v8799_v37 = vpop.permute.xlu1 %1850  ;;  %v11113_v56 = vld [vmem:[#allocation8_spill] sm:$0xff] }
 0x294   :  { %6280 = vpow2.f32 %v1965_v13 }
 0x295   :  { %v8785_v33 = vpop.eup %6270  ;;  %v1963_v25 = vmul.f32 1.442695, %v1881_v2  ;;  %5956 = vmatmul.mubr.bf16.gmra.mrb[8].mxu1 %v2893_v20 }
 0x296   :  { %5972 = vmatpush3.bf16.msra.mxu1 %v6218_v17  ;;  %v1646_v51 = vpop.permute.xlu0 %1645  ;;  %v2894_v62 = vpack.c.bf16 %v8783_v16, %v8785_v33  ;;  %v8791_v7 = vpop.eup %6272 }
 0x297   :  { %6282 = vpow2.f32 %v1963_v25  ;;  %v1883_v53 = vsub.f32 %v11112_v24, %v1646_v51  ;;  %5973 = vmatprep.subr.bf16.mxu1 %v6219_v8  ;;  %v8797_v15 = vpop.eup %6274  ;;  %v2136_v25 = vmul.f32 %v8791_v7, %v2072_v14  ;;  %v11114_v24 = vld [vmem:[#allocation14_spill] sm:$0xff] }
 0x298   :  { %5959 = vmatprep.mubr.bf16.mxu1 %v2894_v62  ;;  %6284 = vpow2.f32 %v1969_v27  ;;  %v11115_v14 = vld [vmem:[#allocation10_spill] sm:$0xff] }
 0x299   :  { %v8801_v17 = vpop.eup %6276  ;;  %v1967_v13 = vmul.f32 1.442695, %v1883_v53  ;;  %v1890_v53 = vsub.f32 %v11114_v24, %v8629_v23 }
 0x29a   :  { %5974 = vmatpush3.bf16.msra.mxu1 %v6219_v8  ;;  %v1656_v4 = vpop.permute.xlu0 %1655  ;;  %v2895_v20 = vpack.c.bf16 %v8797_v15, %v8801_v17 }
 0x29b   :  { %6286 = vpow2.f32 %v1967_v13  ;;  %v1885_v2 = vsub.f32 %v11113_v56, %v1656_v4  ;;  %5975 = vmatprep.subr.bf16.mxu1 %v6220_v48  ;;  %v6230_v4 = vld [vmem:[%s10575_s3 + $0xc0] sm:$0xff]  }
 0x29c   :  { %v2218_v27 = vpop.xlane.xlu1 %2217  ;;  %6288 = vpow2.f32 %v1973_v11 }
 0x29d   :  { %v6279_v38 = vpop.eup %6278  ;;  %v1971_v51 = vmul.f32 1.442695, %v1885_v2  ;;  %v2328_v62 = vadd.f32 %v2218_v27, %v2136_v25  ;;  %5960 = vmatmul.mubr.bf16.gmra.mrb[12].mxu1 %v2895_v20  ;;  %v1981_v2 = vmul.f32 1.442695, %v1890_v53  ;;  %v11117_v25 = vld [vmem:[#allocation12_spill] sm:$0xff]  ;;  %v11119_v53 = vld [vmem:[#allocation13_spill] sm:$0xff] }
 0x29e   :  { %5976 = vmatpush3.bf16.msra.mxu1 %v6220_v48  ;;  %2215 = vadd.xlane.f32.xlu0 %v6279_v38  ;;  %v1666_v36 = vpop.permute.xlu0 %1665  ;;  %v2896_v8 = vpack.c.bf16 %v8597_v10, %v6279_v38  ;;  %v6281_v11 = vpop.eup %6280  ;;  %v11116_v10 = vld [vmem:[#allocation16_spill] sm:$0xff] }
 0x29f   :  { %6290 = vpow2.f32 %v1971_v51  ;;  %2393 = vst.msk [vmem:[#allocation3 + $0x88] sm:$0xff] %vm10943_vm0, %v2328_v62  ;;  %v1887_v13 = vsub.f32 %v11115_v14, %v1666_v36  ;;  %5977 = vmatprep.subr.bf16.mxu1 %v6221_v61  ;;  %v1892_v20 = vsub.f32 %v11116_v10, %v8639_v1  ;;  %v6231_v51 = vld [vmem:[%s10575_s3 + $0xc8] sm:$0xff]  }
 0x2a0   :  { %5979 = vmatprep.mubr.bf16.mxu1 %v2896_v8  ;;  %6292 = vpow2.f32 %v1977_v45  ;;  %v11118_v1 = vld [vmem:[#allocation18_spill] sm:$0xff] }
 0x2a1   :  { %v6283_v48 = vpop.eup %6282  ;;  %v1975_v32 = vmul.f32 1.442695, %v1887_v13  ;;  %v1985_v45 = vmul.f32 1.442695, %v1892_v20 }
 0x2a2   :  { %5978 = vmatpush3.bf16.msra.mxu1 %v6221_v61  ;;  %2219 = vadd.xlane.f32.xlu0 %v6283_v48  ;;  %v1676_v23 = vpop.permute.xlu0 %1675  ;;  %v2897_v56 = vpack.c.bf16 %v6281_v11, %v6283_v48  ;;  %v6285_v38 = vpop.eup %6284  ;;  %v1894_v61 = vsub.f32 %v11118_v1, %v8645_v5  ;;  %v6232_v48 = vld [vmem:[%s10575_s3 + $0xd0] sm:$0xff]  }
 0x2a3   :  { %6294 = vpow2.f32 %v1975_v32  ;;  %v1889_v27 = vsub.f32 %v11117_v25, %v1676_v23  ;;  %6027 = vmatprep.subr.bf16.mxu1 %v6230_v4 }
 0x2a4   :  { %6296 = vpow2.f32 %v1981_v2  ;;  %v1989_v5 = vmul.f32 1.442695, %v1894_v61 }
 0x2a5   :  { %v6287_v62 = vpop.eup %6286  ;;  %v1979_v36 = vmul.f32 1.442695, %v1889_v27  ;;  %5980 = vmatmul.mubr.bf16.vlgmr.msra.gmra.mrb[16].mxu1 %v2897_v56  ;;  %v6233_v27 = vld [vmem:[%s10575_s3 + $0xd8] sm:$0xff]  }
 0x2a6   :  { %2221 = vadd.xlane.f32.xlu0 %v6281_v11  ;;  %2223 = vadd.xlane.f32.xlu1 %v6287_v62  ;;  %v1686_v8 = vpop.permute.xlu0 %1685  ;;  %v2898_v24 = vpack.c.bf16 %v6285_v38, %v6287_v62  ;;  %v6289_v13 = vpop.eup %6288  ;;  %v11120_v11 = vld [vmem:[#allocation20_spill] sm:$0xff] }
 0x2a7   :  { %v1891_v14 = vsub.f32 %v11119_v53, %v1686_v8  ;;  %6028 = vmatpush3.bf16.msra.mxu1 %v6230_v4  ;;  %6298 = vpow2.f32 %v1979_v36  ;;  %v1896_v20 = vsub.f32 %v11120_v11, %v8652_v22  ;;  %v11121_v4 = vld [vmem:[#allocation15_spill] sm:$0xff]  ;;  %v11122_v22 = vld [vmem:[#allocation22_spill] sm:$0xff] }
 0x2a8   :  { %5983 = vmatprep.mubr.bf16.mxu1 %v2898_v24  ;;  %6029 = vmatprep.subr.bf16.mxu1 %v6231_v51  ;;  %6300 = vpow2.f32 %v1985_v45  ;;  %v6234_v24 = vld [vmem:[%s10575_s3 + $0xe0] sm:$0xff]   ;;  %v11125_v11 = vld [vmem:[#allocation19_spill] sm:$0xff] }
 0x2a9   :  { %v6291_v32 = vpop.eup %6290  ;;  %v1983_v10 = vmul.f32 1.442695, %v1891_v14  ;;  %v1993_v45 = vmul.f32 1.442695, %v1896_v20 }
 0x2aa   :  { %2225 = vadd.xlane.f32.xlu0 %v6285_v38  ;;  %2227 = vadd.xlane.f32.xlu1 %v6291_v32  ;;  %v1696_v23 = vpop.permute.xlu0 %1695  ;;  %v2899_v56 = vpack.c.bf16 %v6289_v13, %v6291_v32  ;;  %v6293_v25 = vpop.eup %6292  ;;  %v1898_v38 = vsub.f32 %v11122_v22, %v8655_v28  ;;  %v11124_v28 = vld [vmem:[#allocation24_spill] sm:$0xff] }
 0x2ab   :  { %6302 = vpow2.f32 %v1983_v10  ;;  %v1893_v2 = vsub.f32 %v11121_v4, %v1696_v23  ;;  %6030 = vmatpush3.bf16.msra.mxu1 %v6231_v51  ;;  %v11123_v51 = vld [vmem:[#allocation17_spill] sm:$0xff] }
 0x2ac   :  { %6031 = vmatprep.subr.bf16.mxu1 %v6232_v48  ;;  %6304 = vpow2.f32 %v1989_v5  ;;  %v1997_v10 = vmul.f32 1.442695, %v1898_v38 }
 0x2ad   :  { %v6295_v62 = vpop.eup %6294  ;;  %v1987_v36 = vmul.f32 1.442695, %v1893_v2  ;;  %5984 = vmatmul.mubr.bf16.gmra.mrb[20].mxu1 %v2899_v56  ;;  %v6235_v56 = vld [vmem:[%s10575_s3 + $0xe8] sm:$0xff]  }
 0x2ae   :  { %2229 = vadd.xlane.f32.xlu0 %v6289_v13  ;;  %2231 = vadd.xlane.f32.xlu1 %v6295_v62  ;;  %v1706_v1 = vpop.permute.xlu0 %1705  ;;  %v2900_v61 = vpack.c.bf16 %v6293_v25, %v6295_v62  ;;  %v6297_v53 = vpop.eup %6296  ;;  %v1900_v13 = vsub.f32 %v11124_v28, %v8659_v57  ;;  %v11126_v57 = vld [vmem:[#allocation26_spill] sm:$0xff] }
 0x2af   :  { %6306 = vpow2.f32 %v1987_v36  ;;  %v1895_v8 = vsub.f32 %v11123_v51, %v1706_v1  ;;  %6032 = vmatpush3.bf16.msra.mxu1 %v6232_v48  ;;  %v6236_v1 = vld [vmem:[%s10575_s3 + $0xf0] sm:$0xff]  }
 0x2b0   :  { %5987 = vmatprep.mubr.bf16.mxu1 %v2900_v61  ;;  %6033 = vmatprep.subr.bf16.mxu1 %v6233_v27  ;;  %6308 = vpow2.f32 %v1993_v45  ;;  %v2001_v62 = vmul.f32 1.442695, %v1900_v13  ;;  %v6237_v13 = vld [vmem:[%s10575_s3 + $0xf8] sm:$0xff]  }
 0x2b1   :  { %v1991_v14 = vmul.f32 1.442695, %v1895_v8  ;;  %v6299_v32 = vpop.eup %6298 }
 0x2b2   :  { %2233 = vadd.xlane.f32.xlu0 %v6293_v25  ;;  %v1716_v5 = vpop.permute.xlu0 %1715  ;;  %2235 = vadd.xlane.f32.xlu1 %v6299_v32  ;;  %v2901_v20 = vpack.c.bf16 %v6297_v53, %v6299_v32  ;;  %v6301_v23 = vpop.eup %6300  ;;  %v1902_v25 = vsub.f32 %v11126_v57, %v8662_v30  ;;  %v11128_v30 = vld [vmem:[#allocation28_spill] sm:$0xff] }
 0x2b3   :  { %6310 = vpow2.f32 %v1991_v14  ;;  %v1897_v48 = vsub.f32 %v11125_v11, %v1716_v5  ;;  %6034 = vmatpush3.bf16.msra.mxu1 %v6233_v27  ;;  %v11127_v27 = vld [vmem:[#allocation21_spill] sm:$0xff] }
 0x2b4   :  { %6035 = vmatprep.subr.bf16.mxu1 %v6234_v24  ;;  %6312 = vpow2.f32 %v1997_v10  ;;  %v2005_v8 = vmul.f32 1.442695, %v1902_v25 }
 0x2b5   :  { %v6303_v4 = vpop.eup %6302  ;;  %v1995_v2 = vmul.f32 1.442695, %v1897_v48  ;;  %5988 = vmatmul.mubr.bf16.gmra.mrb[24].mxu1 %v2901_v20  ;;  %v11130_v48 = vld [vmem:[#allocation30_spill] sm:$0xff] }
 0x2b6   :  { %2237 = vadd.xlane.f32.xlu0 %v6297_v53  ;;  %v1726_v36 = vpop.permute.xlu0 %1725  ;;  %v2902_v45 = vpack.c.bf16 %v6301_v23, %v6303_v4  ;;  %2239 = vadd.xlane.f32.xlu1 %v6303_v4  ;;  %v6305_v38 = vpop.eup %6304  ;;  %v1904_v53 = vsub.f32 %v11128_v30, %v8666_v46  ;;  %v1906_v20 = vsub.f32 %v11130_v48, %v8669_v40  ;;  %v11131_v4 = vld [vmem:[#allocation25_spill] sm:$0xff] }
 0x2b7   :  { %6314 = vpow2.f32 %v1995_v2  ;;  %v1899_v22 = vsub.f32 %v11127_v27, %v1726_v36  ;;  %6036 = vmatpush3.bf16.msra.mxu1 %v6234_v24  ;;  %v11129_v24 = vld [vmem:[#allocation23_spill] sm:$0xff]  ;;  %v11132_v36 = vld [vmem:[#allocation32_spill] sm:$0xff] }
 0x2b8   :  { %5991 = vmatprep.mubr.bf16.mxu1 %v2902_v45  ;;  %6037 = vmatprep.subr.bf16.mxu1 %v6235_v56  ;;  %6316 = vpow2.f32 %v2001_v62  ;;  %v2009_v46 = vmul.f32 1.442695, %v1904_v53  ;;  %v2013_v40 = vmul.f32 1.442695, %v1906_v20  ;;  %v1908_v45 = vsub.f32 %v11132_v36, %v8673_v44 }
 0x2b9   :  { %v6307_v61 = vpop.eup %6306  ;;  %v1999_v51 = vmul.f32 1.442695, %v1899_v22  ;;  %v11133_v22 = vld [vmem:[#allocation27_spill] sm:$0xff] }
 0x2ba   :  { %2241 = vadd.xlane.f32.xlu0 %v6301_v23  ;;  %v1736_v14 = vpop.permute.xlu0 %1735  ;;  %v2903_v32 = vpack.c.bf16 %v6305_v38, %v6307_v61  ;;  %2243 = vadd.xlane.f32.xlu1 %v6307_v61  ;;  %v8859_v28 = vpop.eup %6308  ;;  %v11134_v61 = vmov 0.0  }
 0x2bb   :  { %6318 = vpow2.f32 %v1999_v51  ;;  %v1901_v10 = vsub.f32 %v11129_v24, %v1736_v14  ;;  %6038 = vmatpush3.bf16.msra.mxu1 %v6235_v56  ;;  %v11136_v14 = vld [vmem:[#allocation29_spill] sm:$0xff]  ;;  %185 = vst.msk [vmem:[#allocation4 + $0x80] sm:$0xff] %vm168_vm10, %v11134_v61  ;;  %169 = vst.msk [vmem:[#allocation4] sm:$0xff] %vm168_vm10, %v11134_v61 }
 0x2bc   :  { %6039 = vmatprep.subr.bf16.mxu1 %v6236_v1  ;;  %6320 = vpow2.f32 %v2005_v8  ;;  %v11135_v8 = vld [vmem:[#allocation34_spill] sm:$0xff]  ;;  %170 = vst.msk [vmem:[#allocation4 + $0x8] sm:$0xff] %vm168_vm10, %v11134_v61  ;;  %171 = vst.msk [vmem:[#allocation4 + $0x10] sm:$0xff] %vm168_vm10, %v11134_v61 }
 0x2bd   :  { %v8864_v5 = vpop.eup %6310  ;;  %v2003_v11 = vmul.f32 1.442695, %v1901_v10  ;;  %5992 = vmatmul.mubr.bf16.gmra.mrb[28].mxu1 %v2903_v32  ;;  %v1910_v30 = vsub.f32 %v11135_v8, %v8687_v34  ;;  %v11137_v34 = vld [vmem:[#allocation36_spill] sm:$0xff]  ;;  %172 = vst.msk [vmem:[#allocation4 + $0x18] sm:$0xff] %vm168_vm10, %v11134_v61  ;;  %173 = vst.msk [vmem:[#allocation4 + $0x20] sm:$0xff] %vm168_vm10, %v11134_v61 }
 0x2be   :  { %2245 = vadd.xlane.f32.xlu0 %v6305_v38  ;;  %v1746_v23 = vpop.permute.xlu0 %1745  ;;  %v2904_v56 = vpack.c.bf16 %v8859_v28, %v8864_v5  ;;  %2183 = vadd.xlane.f32.xlu1 %v8706_v60  ;;  %v8872_v62 = vpop.eup %6312  ;;  %174 = vst.msk [vmem:[#allocation4 + $0x28] sm:$0xff] %vm168_vm10, %v11134_v61  ;;  %175 = vst.msk [vmem:[#allocation4 + $0x30] sm:$0xff] %vm168_vm10, %v11134_v61 }
 0x2bf   :  { %6322 = vpow2.f32 %v2003_v11  ;;  %v1903_v2 = vsub.f32 %v11131_v4, %v1746_v23  ;;  %6040 = vmatpush3.bf16.msra.mxu1 %v6236_v1  ;;  %v2021_v11 = vmul.f32 1.442695, %v1910_v30  ;;  %176 = vst.msk [vmem:[#allocation4 + $0x38] sm:$0xff] %vm168_vm10, %v11134_v61  ;;  %177 = vst.msk [vmem:[#allocation4 + $0x40] sm:$0xff] %vm168_vm10, %v11134_v61 }
 0x2c0   :  { %6011 = vmatprep.mubr.bf16.mxu0 %v2904_v56  ;;  %6041 = vmatprep.subr.bf16.mxu1 %v6237_v13  ;;  %6324 = vpow2.f32 %v2009_v46  ;;  %178 = vst.msk [vmem:[#allocation4 + $0x48] sm:$0xff] %vm168_vm10, %v11134_v61  ;;  %179 = vst.msk [vmem:[#allocation4 + $0x50] sm:$0xff] %vm168_vm10, %v11134_v61 }
 0x2c1   :  { %v8874_v57 = vpop.eup %6314  ;;  %v2007_v25 = vmul.f32 1.442695, %v1903_v2  ;;  %180 = vst.msk [vmem:[#allocation4 + $0x58] sm:$0xff] %vm168_vm10, %v11134_v61  ;;  %181 = vst.msk [vmem:[#allocation4 + $0x60] sm:$0xff] %vm168_vm10, %v11134_v61 }
 0x2c2   :  { %2185 = vadd.xlane.f32.xlu0 %v8713_v0  ;;  %v1756_v27 = vpop.permute.xlu0 %1755  ;;  %v2905_v60 = vpack.c.bf16 %v8872_v62, %v8874_v57  ;;  %2187 = vadd.xlane.f32.xlu1 %v8715_v58  ;;  %v8883_v1 = vpop.eup %6316  ;;  %v2017_v0 = vmul.f32 1.442695, %v1908_v45  ;;  %182 = vst.msk [vmem:[#allocation4 + $0x68] sm:$0xff] %vm168_vm10, %v11134_v61  ;;  %183 = vst.msk [vmem:[#allocation4 + $0x70] sm:$0xff] %vm168_vm10, %v11134_v61 }
 0x2c3   :  { %6326 = vpow2.f32 %v2007_v25  ;;  %v1905_v38 = vsub.f32 %v11133_v22, %v1756_v27  ;;  %6042 = vmatpush3.bf16.msra.mxu1 %v6237_v13  ;;  %184 = vst.msk [vmem:[#allocation4 + $0x78] sm:$0xff] %vm168_vm10, %v11134_v61  ;;  %186 = vst.msk [vmem:[#allocation4 + $0x88] sm:$0xff] %vm168_vm10, %v11134_v61 }
 0x2c4   :  { %6012 = vmatmul.mubr.bf16.vlgmr.msra.gmra.mrb[0].mxu0 %v2905_v60  ;;  %6131 = vmatprep.subr.bf16.mxu1 %v11134_v61  ;;  %6328 = vpow2.f32 %v2013_v40  ;;  %187 = vst.msk [vmem:[#allocation4 + $0x90] sm:$0xff] %vm168_vm10, %v11134_v61  ;;  %188 = vst.msk [vmem:[#allocation4 + $0x98] sm:$0xff] %vm168_vm10, %v11134_v61 }
 0x2c5   :  { %v8886_v51 = vpop.eup %6318  ;;  %v2011_v44 = vmul.f32 1.442695, %v1905_v38  ;;  %189 = vst.msk [vmem:[#allocation4 + $0xa0] sm:$0xff] %vm168_vm10, %v11134_v61  ;;  %190 = vst.msk [vmem:[#allocation4 + $0xa8] sm:$0xff] %vm168_vm10, %v11134_v61 }
 0x2c6   :  { %2189 = vadd.xlane.f32.xlu0 %v8709_v50  ;;  %v1766_v53 = vpop.permute.xlu0 %1765  ;;  %v2906_v58 = vpack.c.bf16 %v8883_v1, %v8886_v51  ;;  %2191 = vadd.xlane.f32.xlu1 %v8729_v31  ;;  %v8895_v24 = vpop.eup %6320  ;;  %v1912_v50 = vsub.f32 %v11137_v34, %v8694_v26  ;;  %v11138_v31 = vld [vmem:[#allocation31_spill] sm:$0xff]  ;;  %v11139_v26 = vld [vmem:[#allocation38_spill] sm:$0xff]  ;;  %191 = vst.msk [vmem:[#allocation4 + $0xb0] sm:$0xff] %vm168_vm10, %v11134_v61  ;;  %192 = vst.msk [vmem:[#allocation4 + $0xb8] sm:$0xff] %vm168_vm10, %v11134_v61 }
 0x2c7   :  { %6330 = vpow2.f32 %v2011_v44  ;;  %v1907_v32 = vsub.f32 %v11136_v14, %v1766_v53  ;;  %193 = vst.msk [vmem:[#allocation4 + $0xc0] sm:$0xff] %vm168_vm10, %v11134_v61  ;;  %194 = vst.msk [vmem:[#allocation4 + $0xc8] sm:$0xff] %vm168_vm10, %v11134_v61 }
 0x2c8   :  { %6015 = vmatprep.mubr.bf16.mxu0 %v2906_v58  ;;  %6332 = vpow2.f32 %v2017_v0  ;;  %v2025_v2 = vmul.f32 1.442695, %v1912_v50  ;;  %195 = vst.msk [vmem:[#allocation4 + $0xd0] sm:$0xff] %vm168_vm10, %v11134_v61  ;;  %196 = vst.msk [vmem:[#allocation4 + $0xd8] sm:$0xff] %vm168_vm10, %v11134_v61 }
 0x2c9   :  { %v8897_v10 = vpop.eup %6322  ;;  %v2015_v13 = vmul.f32 1.442695, %v1907_v32  ;;  %197 = vst.msk [vmem:[#allocation4 + $0xe0] sm:$0xff] %vm168_vm10, %v11134_v61  ;;  %198 = vst.msk [vmem:[#allocation4 + $0xe8] sm:$0xff] %vm168_vm10, %v11134_v61 }
 0x2ca   :  { %2193 = vadd.xlane.f32.xlu0 %v8727_v47  ;;  %v1776_v46 = vpop.permute.xlu0 %1775  ;;  %v2907_v48 = vpack.c.bf16 %v8895_v24, %v8897_v10  ;;  %2195 = vadd.xlane.f32.xlu1 %v8744_v6  ;;  %v8906_v23 = vpop.eup %6324  ;;  %v1914_v47 = vsub.f32 %v11139_v26, %v8701_v41  ;;  %v11140_v6 = vld [vmem:[#allocation33_spill] sm:$0xff]  ;;  %v11141_v41 = vld [vmem:[#allocation40_spill] sm:$0xff]  ;;  %199 = vst.msk [vmem:[#allocation4 + $0xf0] sm:$0xff] %vm168_vm10, %v11134_v61  ;;  %200 = vst.msk [vmem:[#allocation4 + $0xf8] sm:$0xff] %vm168_vm10, %v11134_v61 }
 0x2cb   :  { %6334 = vpow2.f32 %v2015_v13  ;;  %v1909_v20 = vsub.f32 %v11138_v31, %v1776_v46  ;;  %201 = vst.msk [vmem:[#allocation4 + $0x100] sm:$0xff] %vm168_vm10, %v11134_v61  ;;  %202 = vst.msk [vmem:[#allocation4 + $0x108] sm:$0xff] %vm168_vm10, %v11134_v61 }
 0x2cc   :  { %6016 = vmatmul.mubr.bf16.gmra.mrb[4].mxu0 %v2907_v48  ;;  %6336 = vpow2.f32 %v2021_v11  ;;  %v2029_v22 = vmul.f32 1.442695, %v1914_v47  ;;  %203 = vst.msk [vmem:[#allocation4 + $0x110] sm:$0xff] %vm168_vm10, %v11134_v61  ;;  %204 = vst.msk [vmem:[#allocation4 + $0x118] sm:$0xff] %vm168_vm10, %v11134_v61 }
 0x2cd   :  { %v8908_v56 = vpop.eup %6326  ;;  %v2019_v4 = vmul.f32 1.442695, %v1909_v20  ;;  %205 = vst.msk [vmem:[#allocation4 + $0x120] sm:$0xff] %vm168_vm10, %v11134_v61  ;;  %206 = vst.msk [vmem:[#allocation4 + $0x128] sm:$0xff] %vm168_vm10, %v11134_v61 }
 0x2ce   :  { %2197 = vadd.xlane.f32.xlu0 %v8742_v35  ;;  %v1786_v25 = vpop.permute.xlu0 %1785  ;;  %v2908_v40 = vpack.c.bf16 %v8906_v23, %v8908_v56  ;;  %2199 = vadd.xlane.f32.xlu1 %v8759_v55  ;;  %v8917_v45 = vpop.eup %6328  ;;  %v1916_v35 = vsub.f32 %v11141_v41, %v8711_v59  ;;  %v11142_v55 = vld [vmem:[#allocation35_spill] sm:$0xff]  ;;  %v11143_v59 = vld [vmem:[#allocation42_spill] sm:$0xff]  ;;  %207 = vst.msk [vmem:[#allocation4 + $0x130] sm:$0xff] %vm168_vm10, %v11134_v61  ;;  %208 = vst.msk [vmem:[#allocation4 + $0x138] sm:$0xff] %vm168_vm10, %v11134_v61 }
 0x2cf   :  { %6338 = vpow2.f32 %v2019_v4  ;;  %v1911_v36 = vsub.f32 %v11140_v6, %v1786_v25  ;;  %209 = vst.msk [vmem:[#allocation4 + $0x140] sm:$0xff] %vm168_vm10, %v11134_v61  ;;  %210 = vst.msk [vmem:[#allocation4 + $0x148] sm:$0xff] %vm168_vm10, %v11134_v61 }
 0x2d0   :  { %6019 = vmatprep.mubr.bf16.mxu0 %v2908_v40  ;;  %6340 = vpow2.f32 %v2025_v2  ;;  %v2033_v58 = vmul.f32 1.442695, %v1916_v35  ;;  %211 = vst.msk [vmem:[#allocation4 + $0x150] sm:$0xff] %vm168_vm10, %v11134_v61  ;;  %212 = vst.msk [vmem:[#allocation4 + $0x158] sm:$0xff] %vm168_vm10, %v11134_v61 }
 0x2d1   :  { %v8919_v27 = vpop.eup %6330  ;;  %v2023_v60 = vmul.f32 1.442695, %v1911_v36  ;;  %213 = vst.msk [vmem:[#allocation4 + $0x160] sm:$0xff] %vm168_vm10, %v11134_v61  ;;  %214 = vst.msk [vmem:[#allocation4 + $0x168] sm:$0xff] %vm168_vm10, %v11134_v61 }
 0x2d2   :  { %2201 = vadd.xlane.f32.xlu0 %v8755_v19  ;;  %v1796_v38 = vpop.permute.xlu0 %1795  ;;  %v2909_v44 = vpack.c.bf16 %v8917_v45, %v8919_v27  ;;  %2203 = vadd.xlane.f32.xlu1 %v8771_v39  ;;  %v8928_v8 = vpop.eup %6332  ;;  %v1918_v19 = vsub.f32 %v11143_v59, %v8733_v42  ;;  %v11144_v39 = vld [vmem:[#allocation37_spill] sm:$0xff]  ;;  %v11145_v42 = vld [vmem:[#allocation44_spill] sm:$0xff]  ;;  %215 = vst.msk [vmem:[#allocation4 + $0x170] sm:$0xff] %vm168_vm10, %v11134_v61  ;;  %216 = vst.msk [vmem:[#allocation4 + $0x178] sm:$0xff] %vm168_vm10, %v11134_v61 }
 0x2d3   :  { %6342 = vpow2.f32 %v2023_v60  ;;  %v1913_v0 = vsub.f32 %v11142_v55, %v1796_v38  ;;  %217 = vst.msk [vmem:[#allocation4 + $0x180] sm:$0xff] %vm168_vm10, %v11134_v61  ;;  %218 = vst.msk [vmem:[#allocation4 + $0x188] sm:$0xff] %vm168_vm10, %v11134_v61 }
 0x2d4   :  { %6020 = vmatmul.mubr.bf16.gmra.mrb[8].mxu0 %v2909_v44  ;;  %6344 = vpow2.f32 %v2029_v22  ;;  %v2037_v46 = vmul.f32 1.442695, %v1918_v19  ;;  %219 = vst.msk [vmem:[#allocation4 + $0x190] sm:$0xff] %vm168_vm10, %v11134_v61  ;;  %220 = vst.msk [vmem:[#allocation4 + $0x198] sm:$0xff] %vm168_vm10, %v11134_v61 }
 0x2d5   :  { %v8930_v30 = vpop.eup %6334  ;;  %v2027_v53 = vmul.f32 1.442695, %v1913_v0  ;;  %221 = vst.msk [vmem:[#allocation4 + $0x1a0] sm:$0xff] %vm168_vm10, %v11134_v61  ;;  %222 = vst.msk [vmem:[#allocation4 + $0x1a8] sm:$0xff] %vm168_vm10, %v11134_v61 }
 0x2d6   :  { %2205 = vadd.xlane.f32.xlu0 %v8769_v12  ;;  %v1806_v14 = vpop.permute.xlu0 %1805  ;;  %v2910_v32 = vpack.c.bf16 %v8928_v8, %v8930_v30  ;;  %2207 = vadd.xlane.f32.xlu1 %v8785_v33  ;;  %v8939_v11 = vpop.eup %6336  ;;  %v1920_v12 = vsub.f32 %v11145_v42, %v8757_v63  ;;  %v11146_v33 = vld [vmem:[#allocation39_spill] sm:$0xff]  ;;  %v11147_v63 = vld [vmem:[#allocation46_spill] sm:$0xff]  ;;  %223 = vst.msk [vmem:[#allocation4 + $0x1b0] sm:$0xff] %vm168_vm10, %v11134_v61  ;;  %224 = vst.msk [vmem:[#allocation4 + $0x1b8] sm:$0xff] %vm168_vm10, %v11134_v61 }
 0x2d7   :  { %6346 = vpow2.f32 %v2027_v53  ;;  %v1915_v13 = vsub.f32 %v11144_v39, %v1806_v14  ;;  %225 = vst.msk [vmem:[#allocation4 + $0x1c0] sm:$0xff] %vm168_vm10, %v11134_v61  ;;  %226 = vst.msk [vmem:[#allocation4 + $0x1c8] sm:$0xff] %vm168_vm10, %v11134_v61 }
 0x2d8   :  { %6023 = vmatprep.mubr.bf16.mxu0 %v2910_v32  ;;  %6348 = vpow2.f32 %v2033_v58  ;;  %v2041_v47 = vmul.f32 1.442695, %v1920_v12  ;;  %v11155_v12 = vld [vmem:[#allocation84_spill] sm:$0xff]  ;;  %227 = vst.msk [vmem:[#allocation4 + $0x1d0] sm:$0xff] %vm168_vm10, %v11134_v61  ;;  %228 = vst.msk [vmem:[#allocation4 + $0x1d8] sm:$0xff] %vm168_vm10, %v11134_v61 }
 0x2d9   :  { %v8941_v34 = vpop.eup %6338  ;;  %v2031_v50 = vmul.f32 1.442695, %v1915_v13  ;;  %229 = vst.msk [vmem:[#allocation4 + $0x1e0] sm:$0xff] %vm168_vm10, %v11134_v61  ;;  %230 = vst.msk [vmem:[#allocation4 + $0x1e8] sm:$0xff] %vm168_vm10, %v11134_v61 }
 0x2da   :  { %2209 = vadd.xlane.f32.xlu0 %v8783_v16  ;;  %v1816_v48 = vpop.permute.xlu0 %1815  ;;  %v2911_v31 = vpack.c.bf16 %v8939_v11, %v8941_v34  ;;  %2211 = vadd.xlane.f32.xlu1 %v8801_v17  ;;  %v8950_v4 = vpop.eup %6340  ;;  %v1922_v16 = vsub.f32 %v11147_v63, %v8775_v54  ;;  %v11148_v17 = vld [vmem:[#allocation41_spill] sm:$0xff]  ;;  %v11149_v54 = vld [vmem:[#allocation48_spill] sm:$0xff]  ;;  %231 = vst.msk [vmem:[#allocation4 + $0x1f0] sm:$0xff] %vm168_vm10, %v11134_v61  ;;  %232 = vst.msk [vmem:[#allocation4 + $0x1f8] sm:$0xff] %vm168_vm10, %v11134_v61 }
 0x2db   :  { %6350 = vpow2.f32 %v2031_v50  ;;  %v1917_v20 = vsub.f32 %v11146_v33, %v1816_v48  ;;  %v1924_v35 = vsub.f32 %v11149_v54, %v8799_v37  ;;  %v11156_v48 = vld [vmem:[#allocation86_spill] sm:$0xff]  ;;  %v11166_v54 = vld [vmem:[#allocation88_spill] sm:$0xff] }
 0x2dc   :  { %6024 = vmatmul.mubr.bf16.gmra.mrb[12].mxu0 %v2911_v31  ;;  %6352 = vpow2.f32 %v2037_v46  ;;  %v2045_v41 = vmul.f32 1.442695, %v1922_v16  ;;  %v11157_v31 = vsub.f32 %v11155_v12, %v11156_v48 }
 0x2dd   :  { %v8952_v2 = vpop.eup %6342  ;;  %v2035_v26 = vmul.f32 1.442695, %v1917_v20  ;;  %v2049_v58 = vmul.f32 1.442695, %v1924_v35  ;;  %v11158_v20 = vld [vmem:[#allocation85_spill] sm:$0xff]  ;;  %v1375_v35 = vsub.f32 %v11166_v54, %v8193_v21 }
 0x2de   :  { %2213 = vadd.xlane.f32.xlu0 %v8797_v15  ;;  %v1826_v25 = vpop.permute.xlu0 %1825  ;;  %v2912_v40 = vpack.c.bf16 %v8950_v4, %v8952_v2  ;;  %2247 = vadd.xlane.f32.xlu1 %v8864_v5  ;;  %v8961_v36 = vpop.eup %6344  ;;  %v11150_v5 = vld [vmem:[#allocation43_spill] sm:$0xff]  ;;  %v9013_v33 = vmul.f32 1.442695, %v11157_v31 }
 0x2df   :  { %6354 = vpow2.f32 %v2035_v26  ;;  %v1919_v6 = vsub.f32 %v11148_v17, %v1826_v25  ;;  %v11159_v26 = vld [vmem:[#allocation47_spill] sm:$0xff] }
 0x2e0   :  { %6043 = vmatprep.mubr.bf16.mxu1 %v2912_v40  ;;  %6356 = vpow2.f32 %v2041_v47  ;;  %v11161_v40 = vld [vmem:[#allocation92_spill] sm:$0xff] }
 0x2e1   :  { %v6347_v60 = vpop.eup %6346  ;;  %v2039_v22 = vmul.f32 1.442695, %v1919_v6 }
 0x2e2   :  { %2249 = vadd.xlane.f32.xlu0 %v8859_v28  ;;  %v1836_v15 = vpop.permute.xlu0 %1835  ;;  %v2913_v38 = vpack.c.bf16 %v8961_v36, %v6347_v60  ;;  %2251 = vadd.xlane.f32.xlu1 %v8874_v57  ;;  %v6349_v55 = vpop.eup %6348  ;;  %v11151_v28 = vld [vmem:[#allocation45_spill] sm:$0xff] }
 0x2e3   :  { %6358 = vpow2.f32 %v2039_v22  ;;  %v1921_v44 = vsub.f32 %v11150_v5, %v1836_v15  ;;  %v3841_v15 = vld [vmem:[#allocation3 + $0x88] sm:$0xff]  ;;  %v2071_v5 = vld [vmem:[#allocation3 + $0x80] sm:$0xff] }
 0x2e4   :  { %6044 = vmatmul.mubr.bf16.vlgmr.msra.gmra.mrb[32].mxu1 %v2913_v38  ;;  %6360 = vpow2.f32 %v2045_v41 }
 0x2e5   :  { %v6351_v0 = vpop.eup %6350  ;;  %v2043_v53 = vmul.f32 1.442695, %v1921_v44  ;;  %v1463_v44 = vmul.f32 1.442695, %v1375_v35  ;;  %v11186_v35 = vld [vmem:[#allocation104_spill] sm:$0xff] }
 0x2e6   :  { %2253 = vadd.xlane.f32.xlu0 %v8872_v62  ;;  %v1846_v59 = vpop.permute.xlu0 %1845  ;;  %v2914_v37 = vpack.c.bf16 %v6349_v55, %v6351_v0  ;;  %2255 = vadd.xlane.f32.xlu1 %v8886_v51  ;;  %v8972_v14 = vpop.eup %6352 }
 0x2e7   :  { %6362 = vpow2.f32 %v2043_v53  ;;  %v1923_v19 = vsub.f32 %v11151_v28, %v1846_v59 }
 0x2e8   :  { %6047 = vmatprep.mubr.bf16.mxu1 %v2914_v37  ;;  %6364 = vpow2.f32 %v2049_v58  ;;  %v2073_v37 = vld [vmem:[#allocation3 + $0x90] sm:$0xff] }
 0x2e9   :  { %v8974_v57 = vpop.eup %6354  ;;  %v2047_v32 = vmul.f32 1.442695, %v1923_v19  ;;  %v11168_v19 = vld [vmem:[#allocation93_spill] sm:$0xff] }
 0x2ea   :  { %2257 = vadd.xlane.f32.xlu0 %v8883_v1  ;;  %v2915_v39 = vpack.c.bf16 %v8972_v14, %v8974_v57  ;;  %2259 = vadd.xlane.f32.xlu1 %v8897_v10  ;;  %v6357_v62 = vpop.eup %6356 }
 0x2eb   :  { %6366 = vpow2.f32 %v2047_v32 }
 0x2ec   :  { %6048 = vmatmul.mubr.bf16.gmra.mrb[36].mxu1 %v2915_v39 }
 0x2ed   :  { %v8980_v51 = vpop.eup %6358 }
 0x2ee   :  { %2261 = vadd.xlane.f32.xlu0 %v8895_v24  ;;  %v2916_v13 = vpack.c.bf16 %v6357_v62, %v8980_v51  ;;  %2263 = vadd.xlane.f32.xlu1 %v8908_v56  ;;  %v8985_v50 = vpop.eup %6360 }
 0x2f0   :  { %6051 = vmatprep.mubr.bf16.mxu1 %v2916_v13  ;;  %v2075_v13 = vld [vmem:[#allocation3 + $0xa0] sm:$0xff] }
 0x2f1   :  { %v8987_v1 = vpop.eup %6362 }
 0x2f2   :  { %2265 = vadd.xlane.f32.xlu0 %v8906_v23  ;;  %v2917_v10 = vpack.c.bf16 %v8985_v50, %v8987_v1  ;;  %2267 = vadd.xlane.f32.xlu1 %v8919_v27  ;;  %v6365_v46 = vpop.eup %6364  ;;  %v11152_v23 = vld [vmem:[#allocation78_spill] sm:$0xff]  ;;  %v11153_v27 = vld [vmem:[#allocation81_spill] sm:$0xff] }
 0x2f3   :  { %v1367_v56 = vsub.f32 %v11152_v23, %v8125_v18 }
 0x2f4   :  { %6052 = vmatmul.mubr.bf16.gmra.mrb[40].mxu1 %v2917_v10  ;;  %v2074_v10 = vld [vmem:[#allocation3 + $0x98] sm:$0xff] }
 0x2f5   :  { %v8993_v42 = vpop.eup %6366 }
 0x2f6   :  { %2269 = vadd.xlane.f32.xlu0 %v8917_v45  ;;  %v2918_v24 = vpack.c.bf16 %v6365_v46, %v8993_v42  ;;  %2273 = vadd.xlane.f32.xlu1 %v8928_v8  ;;  %v1447_v45 = vmul.f32 1.442695, %v1367_v56  ;;  %v1369_v8 = vsub.f32 %v11153_v27, %v8142_v43  ;;  %v1856_v43 = vpop.permute.xlu0 %1855 }
 0x2f7   :  { %v1925_v47 = vsub.f32 %v11159_v26, %v1856_v43  ;;  %v2076_v43 = vld [vmem:[#allocation3 + $0xa8] sm:$0xff] }
 0x2f8   :  { %6055 = vmatprep.mubr.bf16.mxu1 %v2918_v24  ;;  %6368 = vpow2.f32 %v1447_v45  ;;  %v11174_v24 = vld [vmem:[#allocation98_spill] sm:$0xff] }
 0x2f9   :  { %v2051_v25 = vmul.f32 1.442695, %v1925_v47 }
 0x2fa   :  { %2271 = vadd.xlane.f32.xlu0 %v8930_v30  ;;  %2281 = vadd.xlane.f32.xlu1 %v8950_v4  ;;  %v1451_v30 = vmul.f32 1.442695, %v1369_v8  ;;  %v1373_v4 = vsub.f32 %v11158_v20, %v8176_v29  ;;  %v11176_v8 = vld [vmem:[#allocation99_spill] sm:$0xff] }
 0x2fc   :  { %6370 = vpow2.f32 %v1451_v30  ;;  %v1459_v63 = vmul.f32 1.442695, %v1373_v4  ;;  %v11177_v30 = vld [vmem:[#allocation97_spill] sm:$0xff]  ;;  %v11179_v4 = vld [vmem:[#allocation100_spill] sm:$0xff] }
 0x2fd   :  { %6372 = vpow2.f32 %v9013_v33  ;;  %v2077_v33 = vld [vmem:[#allocation3 + $0xb0] sm:$0xff] }
 0x2fe   :  { %2275 = vadd.xlane.f32.xlu0 %v8941_v34  ;;  %2289 = vadd.xlane.f32.xlu1 %v6349_v55  ;;  %v11167_v55 = vld [vmem:[#allocation91_spill] sm:$0xff] }
 0x302   :  { %2277 = vadd.xlane.f32.xlu0 %v8939_v11  ;;  %2297 = vadd.xlane.f32.xlu1 %v6357_v62  ;;  %v11154_v11 = vld [vmem:[#allocation83_spill] sm:$0xff]  ;;  %v11171_v62 = vld [vmem:[#allocation94_spill] sm:$0xff] }
 0x303   :  { %v1371_v34 = vsub.f32 %v11154_v11, %v8159_v3  ;;  %v11160_v3 = vld [vmem:[#allocation90_spill] sm:$0xff]  ;;  %v1381_v11 = vsub.f32 %v11177_v30, %v11176_v8  ;;  %v2082_v8 = vld [vmem:[#allocation3 + $0xd8] sm:$0xff] }
 0x304   :  { %v11162_v17 = vsub.f32 %v11160_v3, %v11161_v40 }
 0x305   :  { %v1455_v18 = vmul.f32 1.442695, %v1371_v34 }
 0x306   :  { %2279 = vadd.xlane.f32.xlu0 %v8952_v2  ;;  %2305 = vadd.xlane.f32.xlu1 %v6365_v46  ;;  %v6369_v2 = vpop.eup %6368  ;;  %v1461_v6 = vmul.f32 1.442695, %v11162_v17 }
 0x307   :  { %6374 = vpow2.f32 %v1455_v18  ;;  %v6371_v16 = vpop.eup %6370  ;;  %v2135_v53 = vmul.f32 %v6369_v2, %v2071_v5 }
 0x308   :  { %6376 = vpow2.f32 %v1459_v63  ;;  %v6373_v29 = vpop.eup %6372  ;;  %v1475_v63 = vmul.f32 1.442695, %v1381_v11 }
 0x309   :  { %6378 = vpow2.f32 %v2051_v25  ;;  %v2138_v34 = vmul.f32 %v6373_v29, %v2074_v10 }
 0x30a   :  { %2283 = vadd.xlane.f32.xlu0 %v6347_v60  ;;  %v11164_v60 = vld [vmem:[#allocation89_spill] sm:$0xff]  ;;  %6380 = vpow2.f32 %v1461_v6 }
 0x30b   :  { %v2079_v6 = vld [vmem:[#allocation3 + $0xc0] sm:$0xff] }
 0x30e   :  { %2285 = vadd.xlane.f32.xlu0 %v8961_v36  ;;  %v11163_v36 = vld [vmem:[#allocation87_spill] sm:$0xff] }
 0x30f   :  { %v11165_v22 = vsub.f32 %v11163_v36, %v11164_v60 }
 0x311   :  { %v1457_v41 = vmul.f32 1.442695, %v11165_v22  ;;  %v6375_v38 = vpop.eup %6374  ;;  %v11184_v22 = vld [vmem:[#allocation52_spill] sm:$0xff] }
 0x312   :  { %2287 = vadd.xlane.f32.xlu0 %v6351_v0  ;;  %v1377_v0 = vsub.f32 %v11167_v55, %v8210_v52  ;;  %v6377_v58 = vpop.eup %6376  ;;  %v2137_v52 = vmul.f32 %v6371_v16, %v2073_v37  ;;  %v2139_v45 = vmul.f32 %v6375_v38, %v2075_v13  ;;  %v11190_v55 = vld [vmem:[#allocation51_spill] sm:$0xff]  ;;  %v11194_v13 = vld [vmem:[#allocation53_spill] sm:$0xff] }
 0x313   :  { %6382 = vpow2.f32 %v1457_v41  ;;  %v9167_v28 = vpop.eup %6378  ;;  %v11185_v41 = vld [vmem:[#allocation50_spill] sm:$0xff] }
 0x314   :  { %6384 = vrcp.f32 %v3841_v15  ;;  %v1467_v39 = vmul.f32 1.442695, %v1377_v0  ;;  %v1352_v54 = vsub.f32 %v11185_v41, %v11184_v22  ;;  %v11187_v15 = vld [vmem:[#allocation106_spill] sm:$0xff]  ;;  %v11209_v22 = vld [vmem:[#allocation63_spill] sm:$0xff] }
 0x315   :  { %6386 = vpow2.f32 %v1463_v44  ;;  %v11189_v44 = vld [vmem:[#allocation49_spill] sm:$0xff] }
 0x316   :  { %2291 = vadd.xlane.f32.xlu0 %v8974_v57  ;;  %v11191_v0 = vsub.f32 %v11189_v44, %v11190_v55 }
 0x317   :  { %1860 = vperm.xlu1 %6205, %v8678_v9  }
 0x31a   :  { %2293 = vadd.xlane.f32.xlu0 %v8972_v14  ;;  %v11169_v14 = vld [vmem:[#allocation95_spill] sm:$0xff] }
 0x31b   :  { %2586 = vperm.xlu1 %6205, %v6369_v2   ;;  %v11170_v57 = vsub.f32 %v11168_v19, %v11169_v14  ;;  %v11180_v2 = vld [vmem:[#allocation102_spill] sm:$0xff] }
 0x31c   :  { %v11181_v26 = vsub.f32 %v11179_v4, %v11180_v2  ;;  %v2080_v14 = vld [vmem:[#allocation3 + $0xc8] sm:$0xff]  ;;  %v11204_v4 = vld [vmem:[#allocation60_spill] sm:$0xff] }
 0x31d   :  { %v1465_v32 = vmul.f32 1.442695, %v11170_v57  ;;  %v11205_v2 = vld [vmem:[#allocation58_spill] sm:$0xff] }
 0x31e   :  { %2295 = vadd.xlane.f32.xlu0 %v8980_v51  ;;  %v1379_v51 = vsub.f32 %v11171_v62, %v8227_v49  ;;  %v1473_v47 = vmul.f32 1.442695, %v11181_v26  ;;  %v2081_v62 = vld [vmem:[#allocation3 + $0xd0] sm:$0xff]  ;;  %v1357_v26 = vsub.f32 %v11205_v2, %v11204_v4 }
 0x31f   :  { %2596 = vperm.xlu1 %6205, %v6371_v16   ;;  %6388 = vpow2.f32 %v1465_v32  ;;  %v2141_v16 = vmul.f32 %v6377_v58, %v2077_v33 }
 0x320   :  { %6390 = vpow2.f32 %v1467_v39  ;;  %v1471_v49 = vmul.f32 1.442695, %v1379_v51  ;;  %v1417_v51 = vmul.f32 1.442695, %v1352_v54 }
 0x322   :  { %2299 = vadd.xlane.f32.xlu0 %v8987_v1 }
 0x323   :  { %2601 = vperm.xlu1 %6205, %v6373_v29   ;;  %v2078_v29 = vld [vmem:[#allocation3 + $0xb8] sm:$0xff] }
 0x326   :  { %2301 = vadd.xlane.f32.xlu0 %v8985_v50  ;;  %v6381_v50 = vpop.eup %6380 }
 0x327   :  { %2606 = vperm.xlu1 %6205, %v6375_v38   ;;  %v9179_v27 = vpop.eup %6382  ;;  %v11188_v38 = vsub.f32 %v11186_v35, %v11187_v15  ;;  %v1427_v15 = vmul.f32 1.442695, %v1357_v26  ;;  %v11225_v26 = vld [vmem:[#allocation72_spill] sm:$0xff] }
 0x328   :  { %v6385_v12 = vpop.eup %6384  ;;  %v2140_v25 = vmul.f32 %v9179_v27, %v2076_v43 }
 0x329   :  { %v9190_v3 = vpop.eup %6386  ;;  %v1477_v5 = vmul.f32 1.442695, %v11188_v38  ;;  %v11211_v38 = vld [vmem:[#allocation64_spill] sm:$0xff] }
 0x32a   :  { %2303 = vadd.xlane.f32.xlu0 %v8993_v42  ;;  %v11173_v42 = vld [vmem:[#allocation96_spill] sm:$0xff]  ;;  %v9203_v37 = vpop.eup %6388 }
 0x32b   :  { %v2216_v59 = vpop.xlane.xlu0 %2215  ;;  %2616 = vperm.xlu1 %6205, %v6377_v58   ;;  %v11175_v23 = vsub.f32 %v11173_v42, %v11174_v24  ;;  %v2143_v58 = vmul.f32 %v9190_v3, %v2079_v6  ;;  %v9205_v57 = vpop.eup %6390  ;;  %v11197_v42 = vld [vmem:[#allocation56_spill] sm:$0xff] }
 0x32c   :  { %v2327_v21 = vadd.f32 %v2216_v59, %v2135_v53  ;;  %v1415_v53 = vmul.f32 1.442695, %v11191_v0  ;;  %v2142_v59 = vmul.f32 %v6381_v50, %v2078_v29 }
 0x32d   :  { %v1469_v56 = vmul.f32 1.442695, %v11175_v23  ;;  %v2144_v23 = vmul.f32 %v9203_v37, %v2080_v14 }
 0x32e   :  { %2392 = vst.msk [vmem:[#allocation3 + $0x80] sm:$0xff] %vm11172_vm15, %v2327_v21  ;;  %2307 = vadd.xlane.f32.xlu0 %v9167_v28  ;;  %vm11227_vm15 = vmmov %vm10943_vm0 }
 0x32f   :  { %v2220_v1 = vpop.xlane.xlu0 %2219  ;;  %2621 = vperm.xlu1 %6205, %v6381_v50   ;;  %6392 = vpow2.f32 %v1469_v56  ;;  %v11198_v50 = vld [vmem:[#allocation54_spill] sm:$0xff] }
 0x330   :  { %v2329_v46 = vadd.f32 %v2220_v1, %v2137_v52  ;;  %6394 = vpow2.f32 %v1471_v49  ;;  %v11195_v1 = vld [vmem:[#allocation55_spill] sm:$0xff]  ;;  %v1355_v24 = vsub.f32 %v11198_v50, %v11197_v42  ;;  %v11219_v42 = vld [vmem:[#allocation66_spill] sm:$0xff] }
 0x331   :  { %6396 = vpow2.f32 %v1473_v47  ;;  %v11196_v10 = vsub.f32 %v11194_v13, %v11195_v1 }
 0x332   :  { %2394 = vst.msk [vmem:[#allocation3 + $0x90] sm:$0xff] %vm11178_vm8, %v2329_v46  ;;  %6398 = vpow2.f32 %v1475_v63  ;;  %vm11233_vm8 = vmmov %vm10943_vm0 }
 0x333   :  { %v2224_v48 = vpop.xlane.xlu1 %2223  ;;  %v2222_v31 = vpop.xlane.xlu0 %2221  ;;  %4039 = vperm.xlu1 %6205, %v6385_v12   ;;  %6400 = vpow2.f32 %v1477_v5  ;;  %v1419_v46 = vmul.f32 1.442695, %v11196_v10  ;;  %v2083_v12 = vld [vmem:[#allocation3 + $0xe0] sm:$0xff]  ;;  %v11212_v5 = vld [vmem:[#allocation62_spill] sm:$0xff] }
 0x334   :  { %v2331_v18 = vadd.f32 %v2224_v48, %v2139_v45  ;;  %v2330_v20 = vadd.f32 %v2222_v31, %v2138_v34  ;;  %6402 = vpow2.f32 %v1415_v53  ;;  %v2145_v45 = vmul.f32 %v9205_v57, %v2081_v62  ;;  %v11201_v48 = vld [vmem:[#allocation57_spill] sm:$0xff]  ;;  %v11202_v31 = vld [vmem:[#allocation59_spill] sm:$0xff] }
 0x335   :  { %v11203_v33 = vsub.f32 %v11201_v48, %v11202_v31  ;;  %v1359_v44 = vsub.f32 %v11212_v5, %v11211_v38  ;;  %v11215_v62 = vld [vmem:[#allocation65_spill] sm:$0xff]  ;;  %v2057_v31 = vld [vmem:[#allocation3 + $0x10] sm:$0xff] }
 0x336   :  { %2396 = vst.msk [vmem:[#allocation3 + $0xa0] sm:$0xff] %vm11182_vm6, %v2331_v18  ;;  %vm11234_vm6 = vmmov %vm10943_vm0 }
 0x337   :  { %2395 = vst.msk [vmem:[#allocation3 + $0x98] sm:$0xff] %vm11183_vm7, %v2330_v20  ;;  %v2228_v40 = vpop.xlane.xlu1 %2227  ;;  %v2226_v17 = vpop.xlane.xlu0 %2225  ;;  %v1421_v43 = vmul.f32 1.442695, %v11203_v33  ;;  %v1423_v20 = vmul.f32 1.442695, %v1355_v24  ;;  %v11222_v33 = vld [vmem:[#allocation69_spill] sm:$0xff]  ;;  %vm11240_vm7 = vmmov %vm10943_vm0 }
 0x338   :  { %v2333_v36 = vadd.f32 %v2228_v40, %v2141_v16  ;;  %v2332_v60 = vadd.f32 %v2226_v17, %v2140_v25  ;;  %v2084_v40 = vld [vmem:[#allocation3 + $0xe8] sm:$0xff]  ;;  %v1431_v10 = vmul.f32 1.442695, %v1359_v44 }
 0x339   :  { %v9215_v56 = vpop.eup %6392 }
 0x33a   :  { %2398 = vst.msk [vmem:[#allocation3 + $0xb0] sm:$0xff] %vm11192_vm2, %v2333_v36  ;;  %v9218_v30 = vpop.eup %6394  ;;  %v2146_v47 = vmul.f32 %v9215_v56, %v2082_v8  ;;  %v2085_v36 = vld [vmem:[#allocation3 + $0xf0] sm:$0xff]  ;;  %v2056_v8 = vld [vmem:[#allocation3 + $0x8] sm:$0xff]  ;;  %vm11241_vm2 = vmmov %vm10943_vm0 }
 0x33b   :  { %2397 = vst.msk [vmem:[#allocation3 + $0xa8] sm:$0xff] %vm11193_vm13, %v2332_v60  ;;  %v2232_v21 = vpop.xlane.xlu1 %2231  ;;  %v2230_v19 = vpop.xlane.xlu0 %2229  ;;  %v2147_v16 = vmul.f32 %v9218_v30, %v2083_v12  ;;  %v11208_v60 = vld [vmem:[#allocation61_spill] sm:$0xff]  ;;  %vm11247_vm13 = vmmov %vm10943_vm0 }
 0x33c   :  { %v2335_v32 = vadd.f32 %v2232_v21, %v2143_v58  ;;  %v2334_v39 = vadd.f32 %v2230_v19, %v2142_v59  ;;  %v9227_v63 = vpop.eup %6396  ;;  %v11210_v41 = vsub.f32 %v11208_v60, %v11209_v22  ;;  %v2086_v59 = vld [vmem:[#allocation3 + $0xf8] sm:$0xff] }
 0x33d   :  { %v9231_v17 = vpop.eup %6398  ;;  %v2148_v55 = vmul.f32 %v9227_v63, %v2084_v40 }
 0x33e   :  { %v3843_v52 = vld [vmem:[#allocation3 + $0x98] sm:$0xff]  ;;  %2400 = vst.msk [vmem:[#allocation3 + $0xc0] sm:$0xff] %vm11199_vm12, %v2335_v32  ;;  %v1425_v54 = vmul.f32 1.442695, %v11210_v41  ;;  %v9240_v0 = vpop.eup %6400  ;;  %v2149_v53 = vmul.f32 %v9231_v17, %v2085_v36  ;;  %v2055_v32 = vld [vmem:[#allocation3] sm:$0xff]  ;;  %vm11248_vm12 = vmmov %vm10943_vm0 }
 0x33f   :  { %2399 = vst.msk [vmem:[#allocation3 + $0xb8] sm:$0xff] %vm11200_vm14, %v2334_v39  ;;  %6404 = vrcp.f32 %v3843_v52  ;;  %v2234_v49 = vpop.xlane.xlu0 %2233  ;;  %v2236_v11 = vpop.xlane.xlu1 %2235  ;;  %v2150_v24 = vmul.f32 %v9240_v0, %v2086_v59  ;;  %v2058_v36 = vld [vmem:[#allocation3 + $0x18] sm:$0xff]  ;;  %vm11255_vm14 = vmmov %vm10943_vm0 }
 0x340   :  { %v2336_v34 = vadd.f32 %v2234_v49, %v2144_v23  ;;  %6406 = vpow2.f32 %v1417_v51  ;;  %v2337_v18 = vadd.f32 %v2236_v11, %v2145_v45  ;;  %v9244_v21 = vpop.eup %6402  ;;  %v11216_v51 = vld [vmem:[#allocation67_spill] sm:$0xff] }
 0x341   :  { %6408 = vpow2.f32 %v1419_v46  ;;  %v11217_v52 = vsub.f32 %v11215_v62, %v11216_v51  ;;  %v11218_v46 = vld [vmem:[#allocation68_spill] sm:$0xff]  ;;  %v2119_v45 = vmul.f32 %v9244_v21, %v2055_v32  ;;  %v2060_v62 = vld [vmem:[#allocation3 + $0x28] sm:$0xff] }
 0x342   :  { %2401 = vst.msk [vmem:[#allocation3 + $0xc8] sm:$0xff] %vm11206_vm4, %v2336_v34  ;;  %6410 = vpow2.f32 %v1421_v43  ;;  %v1361_v50 = vsub.f32 %v11219_v42, %v11218_v46  ;;  %v3845_v34 = vld [vmem:[#allocation3 + $0xa8] sm:$0xff]  ;;  %v11223_v43 = vld [vmem:[#allocation71_spill] sm:$0xff]  ;;  %vm11256_vm4 = vmmov %vm10943_vm0 }
 0x343   :  { %2402 = vst.msk [vmem:[#allocation3 + $0xd0] sm:$0xff] %vm11207_vm1, %v2337_v18  ;;  %v2238_v25 = vpop.xlane.xlu0 %2237  ;;  %v2240_v6 = vpop.xlane.xlu1 %2239  ;;  %6412 = vpow2.f32 %v1423_v20  ;;  %v1429_v13 = vmul.f32 1.442695, %v11217_v52  ;;  %v11224_v18 = vsub.f32 %v11222_v33, %v11223_v43  ;;  %v11236_v46 = vld [vmem:[#allocation79_spill] sm:$0xff]  ;;  %v2062_v33 = vld [vmem:[#allocation3 + $0x38] sm:$0xff]  ;;  %vm11264_vm1 = vmmov %vm10943_vm0 }
 0x344   :  { %v2338_v29 = vadd.f32 %v2238_v25, %v2146_v47  ;;  %v2339_v35 = vadd.f32 %v2240_v6, %v2147_v16  ;;  %6414 = vpow2.f32 %v1425_v54  ;;  %v1435_v2 = vmul.f32 1.442695, %v1361_v50  ;;  %v11226_v47 = vld [vmem:[#allocation70_spill] sm:$0xff] }
 0x345   :  { %6416 = vpow2.f32 %v1427_v15  ;;  %v1433_v20 = vmul.f32 1.442695, %v11224_v18  ;;  %v1363_v16 = vsub.f32 %v11226_v47, %v11225_v26  ;;  %v11228_v15 = vld [vmem:[#allocation73_spill] sm:$0xff]  ;;  %v11243_v47 = vld [vmem:[#allocation82_spill] sm:$0xff] }
 0x346   :  { %2403 = vst.msk [vmem:[#allocation3 + $0xd8] sm:$0xff] %vm11213_vm11, %v2338_v29  ;;  %6418 = vpow2.f32 %v1429_v13  ;;  %v3847_v22 = vld [vmem:[#allocation3 + $0xb8] sm:$0xff]  ;;  %vm11265_vm11 = vmmov %vm10943_vm0 }
 0x347   :  { %2404 = vst.msk [vmem:[#allocation3 + $0xe0] sm:$0xff] %vm11214_vm9, %v2339_v35  ;;  %v2242_v58 = vpop.xlane.xlu0 %2241  ;;  %v2244_v19 = vpop.xlane.xlu1 %2243  ;;  %6420 = vpow2.f32 %v1431_v10  ;;  %v2059_v35 = vld [vmem:[#allocation3 + $0x20] sm:$0xff]  ;;  %vm11271_vm9 = vmmov %vm10943_vm0 }
 0x348   :  { %v2340_v14 = vadd.f32 %v2242_v58, %v2148_v55  ;;  %v2341_v1 = vadd.f32 %v2244_v19, %v2149_v53  ;;  %6422 = vrcp.f32 %v3845_v34  ;;  %v1439_v55 = vmul.f32 1.442695, %v1363_v16  ;;  %v11231_v53 = vld [vmem:[#allocation76_spill] sm:$0xff]  ;;  %v11232_v58 = vld [vmem:[#allocation74_spill] sm:$0xff]  ;;  %v11235_v10 = vld [vmem:[#allocation77_spill] sm:$0xff] }
 0x349   :  { %v6405_v39 = vpop.eup %6404  ;;  %6424 = vpow2.f32 %v1433_v20  ;;  %v1365_v59 = vsub.f32 %v11232_v58, %v11231_v53  ;;  %v3849_v58 = vld [vmem:[#allocation3 + $0xc8] sm:$0xff] }
 0x34a   :  { %2405 = vst.msk [vmem:[#allocation3 + $0xe8] sm:$0xff] %vm11220_vm3, %v2340_v14  ;;  %4049 = vperm.xlu1 %6205, %v6405_v39   ;;  %v9253_v23 = vpop.eup %6406  ;;  %6426 = vpow2.f32 %v1435_v2  ;;  %v2063_v2 = vld [vmem:[#allocation3 + $0x40] sm:$0xff]  ;;  %vm11272_vm3 = vmmov %vm10943_vm0 }
 0x34b   :  { %2406 = vst.msk [vmem:[#allocation3 + $0xf0] sm:$0xff] %vm11221_vm5, %v2341_v1  ;;  %v2246_v49 = vpop.xlane.xlu0 %2245  ;;  %v9257_v11 = vpop.eup %6408  ;;  %v2120_v25 = vmul.f32 %v9253_v23, %v2056_v8  ;;  %6428 = vrcp.f32 %v3847_v22  ;;  %v2061_v1 = vld [vmem:[#allocation3 + $0x30] sm:$0xff]  ;;  %vm11280_vm5 = vmmov %vm10943_vm0 }
 0x34c   :  { %v2184_v12 = vpop.xlane.xlu1 %2183  ;;  %v2342_v48 = vadd.f32 %v2246_v49, %v2150_v24  ;;  %v9267_v40 = vpop.eup %6410  ;;  %v2121_v6 = vmul.f32 %v9257_v11, %v2057_v31  ;;  %v1443_v24 = vmul.f32 1.442695, %v1365_v59  ;;  %v11239_v49 = vld [vmem:[#allocation101_spill] sm:$0xff]  ;;  %v11245_v22 = vld [vmem:[#allocation107_spill] sm:$0xff] }
 0x34d   :  { %v2311_v4 = vadd.f32 %v2184_v12, %v2119_v45  ;;  %v9271_v60 = vpop.eup %6412  ;;  %v2122_v19 = vmul.f32 %v9267_v40, %v2058_v36  ;;  %v11238_v45 = vld [vmem:[#allocation103_spill] sm:$0xff] }
 0x34e   :  { %2407 = vst.msk [vmem:[#allocation3 + $0xf8] sm:$0xff] %vm10943_vm0, %v2342_v48  ;;  %2626 = vperm.xlu1 %6205, %v9190_v3   ;;  %v11229_v3 = vld [vmem:[#allocation75_spill] sm:$0xff]  ;;  %v9281_v14 = vpop.eup %6414  ;;  %v2123_v32 = vmul.f32 %v9271_v60, %v2059_v35  ;;  %v1383_v8 = vsub.f32 %v11239_v49, %v11238_v45 }
 0x34f   :  { %2376 = vst.msk [vmem:[#allocation3] sm:$0xff] %vm11227_vm15, %v2311_v4  ;;  %v2186_v29 = vpop.xlane.xlu0 %2185  ;;  %v11230_v38 = vsub.f32 %v11228_v15, %v11229_v3  ;;  %v9285_v51 = vpop.eup %6416  ;;  %v2124_v34 = vmul.f32 %v9281_v14, %v2060_v62  ;;  %v11250_v62 = vld [vmem:[#allocation108_spill] sm:$0xff]  ;;  %vm11287_vm15 = vmmov %vm10943_vm0 }
 0x350   :  { %v2188_v41 = vpop.xlane.xlu1 %2187  ;;  %v2312_v54 = vadd.f32 %v2186_v29, %v2120_v25  ;;  %v9295_v12 = vpop.eup %6418  ;;  %v2125_v48 = vmul.f32 %v9285_v51, %v2061_v1  ;;  %v1479_v36 = vmul.f32 1.442695, %v1383_v8 }
 0x351   :  { %v1437_v5 = vmul.f32 1.442695, %v11230_v38  ;;  %v2313_v44 = vadd.f32 %v2188_v41, %v2121_v6  ;;  %v9299_v43 = vpop.eup %6420  ;;  %v11246_v41 = vld [vmem:[#allocation105_spill] sm:$0xff]  ;;  %v2126_v15 = vmul.f32 %v9295_v12, %v2062_v33 }
 0x352   :  { %2377 = vst.msk [vmem:[#allocation3 + $0x8] sm:$0xff] %vm11233_vm8, %v2312_v54  ;;  %2636 = vperm.xlu1 %6205, %v9205_v57   ;;  %v11237_v57 = vsub.f32 %v11235_v10, %v11236_v46  ;;  %v6423_v26 = vpop.eup %6422  ;;  %v1385_v54 = vsub.f32 %v11246_v41, %v11245_v22  ;;  %v11262_v22 = vld [vmem:[#allocation115_spill] sm:$0xff]  ;;  %v11263_v41 = vld [vmem:[#allocation113_spill] sm:$0xff]  ;;  %vm11288_vm8 = vmmov %vm10943_vm0 }
 0x353   :  { %2378 = vst.msk [vmem:[#allocation3 + $0x10] sm:$0xff] %vm11234_vm6, %v2313_v44  ;;  %v2190_v39 = vpop.xlane.xlu0 %2189  ;;  %6430 = vpow2.f32 %v1437_v5  ;;  %v9314_v3 = vpop.eup %6424  ;;  %v2127_v5 = vmul.f32 %v9299_v43, %v2063_v2  ;;  %v2067_v2 = vld [vmem:[#allocation3 + $0x60] sm:$0xff]  ;;  %vm11300_vm6 = vmmov %vm10943_vm0 }
 0x354   :  { %v2192_v52 = vpop.xlane.xlu1 %2191  ;;  %v2314_v13 = vadd.f32 %v2190_v39, %v2122_v19  ;;  %v1441_v42 = vmul.f32 1.442695, %v11237_v57  ;;  %6432 = vpow2.f32 %v1439_v55  ;;  %v2064_v55 = vld [vmem:[#allocation3 + $0x48] sm:$0xff]  ;;  %v9320_v53 = vpop.eup %6426  ;;  %v1483_v46 = vmul.f32 1.442695, %v1385_v54  ;;  %v11253_v57 = vld [vmem:[#allocation111_spill] sm:$0xff] }
 0x355   :  { %v2315_v50 = vadd.f32 %v2192_v52, %v2123_v32  ;;  %v2065_v32 = vld [vmem:[#allocation3 + $0x50] sm:$0xff]  ;;  %v6429_v39 = vpop.eup %6428  ;;  %v11251_v52 = vld [vmem:[#allocation110_spill] sm:$0xff]  ;;  %v1389_v54 = vsub.f32 %v11263_v41, %v11262_v22 }
 0x356   :  { %2379 = vst.msk [vmem:[#allocation3 + $0x18] sm:$0xff] %vm11240_vm7, %v2314_v13  ;;  %2641 = vperm.xlu1 %6205, %v9215_v56   ;;  %6434 = vpow2.f32 %v1441_v42  ;;  %v11242_v56 = vld [vmem:[#allocation80_spill] sm:$0xff]  ;;  %v11252_v13 = vsub.f32 %v11250_v62, %v11251_v52  ;;  %v11254_v42 = vld [vmem:[#allocation109_spill] sm:$0xff]  ;;  %v2129_v49 = vmul.f32 %v9320_v53, %v2065_v32  ;;  %vm11302_vm7 = vmmov %vm10943_vm0 }
 0x357   :  { %2380 = vst.msk [vmem:[#allocation3 + $0x20] sm:$0xff] %vm11241_vm2, %v2315_v50  ;;  %v2194_v31 = vpop.xlane.xlu0 %2193  ;;  %v11244_v16 = vsub.f32 %v11242_v56, %v11243_v47  ;;  %6436 = vpow2.f32 %v1443_v24  ;;  %v1387_v50 = vsub.f32 %v11254_v42, %v11253_v57  ;;  %v2128_v24 = vmul.f32 %v9314_v3, %v2064_v55  ;;  %v11259_v56 = vld [vmem:[#allocation114_spill] sm:$0xff]  ;;  %v11266_v52 = vld [vmem:[#allocation116_spill] sm:$0xff]  ;;  %v11269_v42 = vld [vmem:[#allocation119_spill] sm:$0xff] }
 0x358   :  { %v2196_v18 = vpop.xlane.xlu1 %2195  ;;  %v2316_v20 = vadd.f32 %v2194_v31, %v2124_v34  ;;  %v9301_v4 = vpop.f32.mrb[0].mxu1  ;;  %v1481_v1 = vmul.f32 1.442695, %v11252_v13  ;;  %v2066_v34 = vld [vmem:[#allocation3 + $0x58] sm:$0xff]  ;;  %v11267_v13 = vld [vmem:[#allocation118_spill] sm:$0xff]  ;;  %vm11310_vm2 = vmmov %vm10943_vm0 }
 0x359   :  { %v1445_v25 = vmul.f32 1.442695, %v11244_v16  ;;  %v2317_v6 = vadd.f32 %v2196_v18, %v2125_v48  ;;  %v9306_v29 = vpop.f32.mrb[1].mxu1  ;;  %v3851_v31 = vld [vmem:[#allocation3 + $0xd8] sm:$0xff]  ;;  %v1491_v57 = vmul.f32 1.442695, %v1389_v54 }
 0x35a   :  { %2381 = vst.msk [vmem:[#allocation3 + $0x28] sm:$0xff] %vm11247_vm13, %v2316_v20  ;;  %4059 = vperm.xlu1 %6205, %v6423_v26   ;;  %v9311_v35 = vpop.f32.mrb[2].mxu1  ;;  %v11258_v26 = vld [vmem:[#allocation112_spill] sm:$0xff]  ;;  %vm11311_vm13 = vmmov %vm10943_vm0 }
 0x35b   :  { %2382 = vst.msk [vmem:[#allocation3 + $0x30] sm:$0xff] %vm11248_vm12, %v2317_v6  ;;  %v9317_v38 = vpop.f32.mrb[3].mxu1  ;;  %v2198_v44 = vpop.xlane.xlu0 %2197  ;;  %6438 = vpow2.f32 %v1445_v25  ;;  %v11260_v47 = vsub.f32 %v11258_v26, %v11259_v56  ;;  %vm11316_vm12 = vmmov %vm10943_vm0 }
 0x35c   :  { %11249 = vst [vmem:[#allocation5_spill] sm:$0xff] %v9317_v38  ;;  %v2200_v59 = vpop.xlane.xlu1 %2199  ;;  %v2318_v19 = vadd.f32 %v2198_v44, %v2126_v15  ;;  %6440 = vpow2.f32 %v1479_v36  ;;  %v1487_v36 = vmul.f32 1.442695, %v1387_v50  ;;  %v11270_v50 = vld [vmem:[#allocation117_spill] sm:$0xff] }
 0x35d   :  { %v2319_v10 = vadd.f32 %v2200_v59, %v2127_v5  ;;  %v9329_v45 = vpop.eup %6430  ;;  %6442 = vrcp.f32 %v3849_v58  ;;  %v1485_v16 = vmul.f32 1.442695, %v11260_v47  ;;  %v2087_v47 = vld [vmem:[#allocation3 + $0x100] sm:$0xff] }
 0x35e   :  { %2383 = vst.msk [vmem:[#allocation3 + $0x38] sm:$0xff] %vm11255_vm14, %v2318_v19  ;;  %4069 = vperm.xlu1 %6205, %v6429_v39   ;;  %v9333_v48 = vpop.eup %6432  ;;  %6444 = vpow2.f32 %v1481_v1  ;;  %v2130_v5 = vmul.f32 %v9329_v45, %v2066_v34  ;;  %v2068_v19 = vld [vmem:[#allocation3 + $0x68] sm:$0xff]  ;;  %v11268_v1 = vsub.f32 %v11266_v52, %v11267_v13  ;;  %vm11317_vm14 = vmmov %vm10943_vm0 }
 0x35f   :  { %2384 = vst.msk [vmem:[#allocation3 + $0x40] sm:$0xff] %vm11256_vm4, %v2319_v10  ;;  %v2202_v8 = vpop.xlane.xlu0 %2201  ;;  %6446 = vpow2.f32 %v1483_v46  ;;  %v2131_v58 = vmul.f32 %v9333_v48, %v2067_v2  ;;  %vm11328_vm4 = vmmov %vm10943_vm0 }
 0x360   :  { %v2204_v33 = vpop.xlane.xlu1 %2203  ;;  %v2320_v18 = vadd.f32 %v2202_v8, %v2128_v24  ;;  %v9335_v20 = vpop.f32.mrb[4].mxu1  ;;  %6448 = vrcp.f32 %v3851_v31  ;;  %v1489_v10 = vmul.f32 1.442695, %v11268_v1  ;;  %v1391_v24 = vsub.f32 %v11270_v50, %v11269_v42  ;;  %v2089_v50 = vld [vmem:[#allocation3 + $0x110] sm:$0xff] }
 0x361   :  { %11257 = vst [vmem:[#allocation9_spill] sm:$0xff] %v9335_v20  ;;  %v2321_v25 = vadd.f32 %v2204_v33, %v2129_v49  ;;  %v9340_v6 = vpop.f32.mrb[5].mxu1  ;;  %v9349_v44 = vpop.eup %6434  ;;  %6450 = vpow2.f32 %v1485_v16  ;;  %v2070_v33 = vld [vmem:[#allocation3 + $0x78] sm:$0xff]  ;;  %v11323_v20 = vld [vmem:[#allocation138_spill] sm:$0xff] }
 0x362   :  { %11261 = vst [vmem:[#allocation6_spill] sm:$0xff] %v9340_v6  ;;  %2385 = vst.msk [vmem:[#allocation3 + $0x48] sm:$0xff] %vm11264_vm1, %v2320_v18  ;;  %2651 = vperm.xlu1 %6205, %v9227_v63   ;;  %v9346_v15 = vpop.f32.mrb[6].mxu1  ;;  %v9355_v32 = vpop.eup %6436  ;;  %v2069_v63 = vld [vmem:[#allocation3 + $0x70] sm:$0xff]  ;;  %6452 = vpow2.f32 %v1487_v36  ;;  %v2132_v49 = vmul.f32 %v9349_v44, %v2068_v19 }
 0x363   :  { %2386 = vst.msk [vmem:[#allocation3 + $0x50] sm:$0xff] %vm11265_vm11, %v2321_v25  ;;  %v9352_v55 = vpop.f32.mrb[7].mxu1  ;;  %v2206_v59 = vpop.xlane.xlu0 %2205  ;;  %v2133_v34 = vmul.f32 %v9355_v32, %v2069_v63  ;;  %6454 = vpow2.f32 %v1489_v10  ;;  %v11275_v25 = vld [vmem:[#allocation122_spill] sm:$0xff]  ;;  %vm11329_vm1 = vmmov %vm10943_vm0 }
 0x364   :  { %v2208_v39 = vpop.xlane.xlu1 %2207  ;;  %v2322_v62 = vadd.f32 %v2206_v59, %v2130_v5  ;;  %6456 = vpow2.f32 %v1491_v57  ;;  %v1495_v5 = vmul.f32 1.442695, %v1391_v24  ;;  %v11279_v59 = vld [vmem:[#allocation121_spill] sm:$0xff]  ;;  %v2088_v10 = vld [vmem:[#allocation3 + $0x108] sm:$0xff]  ;;  %vm11335_vm11 = vmmov %vm10943_vm0 }
 0x365   :  { %v2323_v46 = vadd.f32 %v2208_v39, %v2131_v58  ;;  %v9365_v8 = vpop.eup %6438  ;;  %v11278_v58 = vld [vmem:[#allocation123_spill] sm:$0xff] }
 0x366   :  { %2387 = vst.msk [vmem:[#allocation3 + $0x58] sm:$0xff] %vm11271_vm9, %v2322_v62  ;;  %2661 = vperm.xlu1 %6205, %v9240_v0   ;;  %v9369_v18 = vpop.eup %6440  ;;  %v11274_v0 = vld [vmem:[#allocation120_spill] sm:$0xff]  ;;  %v1393_v19 = vsub.f32 %v11279_v59, %v11278_v58  ;;  %v2134_v62 = vmul.f32 %v9365_v8, %v2070_v33  ;;  %vm11337_vm9 = vmmov %vm10943_vm0 }
 0x367   :  { %2388 = vst.msk [vmem:[#allocation3 + $0x60] sm:$0xff] %vm11272_vm3, %v2323_v46  ;;  %v2210_v31 = vpop.xlane.xlu0 %2209  ;;  %v6443_v16 = vpop.eup %6442  ;;  %v11276_v36 = vsub.f32 %v11274_v0, %v11275_v25  ;;  %v2151_v13 = vmul.f32 %v9369_v18, %v2087_v47  ;;  %vm11339_vm3 = vmmov %vm10943_vm0 }
 0x368   :  { %v2212_v2 = vpop.xlane.xlu1 %2211  ;;  %v2324_v26 = vadd.f32 %v2210_v31, %v2132_v49  ;;  %v9371_v56 = vpop.f32.mrb[8].mxu1  ;;  %v11284_v49 = vld [vmem:[#allocation124_spill] sm:$0xff] }
 0x369   :  { %11273 = vst [vmem:[#allocation11_spill] sm:$0xff] %v9371_v56  ;;  %v1493_v22 = vmul.f32 1.442695, %v11276_v36  ;;  %v2325_v41 = vadd.f32 %v2212_v2, %v2133_v34  ;;  %v9376_v54 = vpop.f32.mrb[9].mxu1  ;;  %v9384_v63 = vpop.eup %6444  ;;  %v11285_v34 = vld [vmem:[#allocation126_spill] sm:$0xff]  ;;  %v2090_v36 = vld [vmem:[#allocation3 + $0x118] sm:$0xff] }
 0x36a   :  { %11277 = vst [vmem:[#allocation7_spill] sm:$0xff] %v9376_v54  ;;  %2389 = vst.msk [vmem:[#allocation3 + $0x68] sm:$0xff] %vm11280_vm5, %v2324_v26  ;;  %4079 = vperm.xlu1 %6205, %v6443_v16   ;;  %v9381_v39 = vpop.f32.mrb[10].mxu1  ;;  %v9390_v46 = vpop.eup %6446  ;;  %v11286_v31 = vsub.f32 %v11284_v49, %v11285_v34  ;;  %v1499_v26 = vmul.f32 1.442695, %v1393_v19  ;;  %v2152_v47 = vmul.f32 %v9384_v63, %v2088_v10  ;;  %v2091_v19 = vld [vmem:[#allocation3 + $0x120] sm:$0xff] }
 0x36b   :  { %11281 = vst [vmem:[#allocation8_spill] sm:$0xff] %v9381_v39  ;;  %11282 = vst [vmem:[#allocation14_spill] sm:$0xff] %v9384_v63  ;;  %v9387_v52 = vpop.f32.mrb[11].mxu1  ;;  %v2214_v1 = vpop.xlane.xlu0 %2213  ;;  %6458 = vpow2.f32 %v1493_v22  ;;  %v2153_v0 = vmul.f32 %v9390_v46, %v2089_v50  ;;  %v11293_v10 = vld [vmem:[#allocation128_spill] sm:$0xff]  ;;  %v11350_v63 = vld [vmem:[#allocation147_spill] sm:$0xff] }
 0x36c   :  { %2390 = vst.msk [vmem:[#allocation3 + $0x70] sm:$0xff] %vm10943_vm0, %v2325_v41  ;;  %11283 = vst [vmem:[#allocation10_spill] sm:$0xff] %v9387_v52  ;;  %v2248_v57 = vpop.xlane.xlu1 %2247  ;;  %v2326_v42 = vadd.f32 %v2214_v1, %v2134_v62  ;;  %v6449_v24 = vpop.eup %6448  ;;  %v1497_v33 = vmul.f32 1.442695, %v11286_v31  ;;  %6460 = vpow2.f32 %v1495_v5  ;;  %v3853_v41 = vld [vmem:[#allocation3 + $0xe8] sm:$0xff]  ;;  %v11291_v62 = vld [vmem:[#allocation127_spill] sm:$0xff] }
 0x36d   :  { %v2343_v2 = vadd.f32 %v2248_v57, %v2151_v13  ;;  %v9397_v16 = vpop.eup %6450  ;;  %v11292_v13 = vld [vmem:[#allocation125_spill] sm:$0xff]  ;;  %v11294_v57 = vld [vmem:[#allocation130_spill] sm:$0xff]  ;;  %v11297_v34 = vld [vmem:[#allocation132_spill] sm:$0xff] }
 0x36e   :  { %2391 = vst.msk [vmem:[#allocation3 + $0x78] sm:$0xff] %vm11287_vm15, %v2326_v42  ;;  %4089 = vperm.xlu1 %6205, %v6449_v24   ;;  %v9401_v22 = vpop.eup %6452  ;;  %6462 = vpow2.f32 %v1497_v33  ;;  %v1395_v1 = vsub.f32 %v11292_v13, %v11291_v62  ;;  %v11295_v42 = vsub.f32 %v11293_v10, %v11294_v57  ;;  %v11298_v31 = vld [vmem:[#allocation134_spill] sm:$0xff]  ;;  %v2093_v57 = vld [vmem:[#allocation3 + $0x130] sm:$0xff]  ;;  %vm11341_vm5 = vmmov %vm10943_vm0 }
 0x36f   :  { %2408 = vst.msk [vmem:[#allocation3 + $0x100] sm:$0xff] %vm11288_vm8, %v2343_v2  ;;  %v2250_v25 = vpop.xlane.xlu0 %2249  ;;  %11289 = vst [vmem:[#allocation16_spill] sm:$0xff] %v9401_v22  ;;  %6464 = vpow2.f32 %v1499_v26  ;;  %v11299_v2 = vsub.f32 %v11297_v34, %v11298_v31  ;;  %v2155_v26 = vmul.f32 %v9401_v22, %v2091_v19  ;;  %v2092_v62 = vld [vmem:[#allocation3 + $0x128] sm:$0xff]  ;;  %v11306_v34 = vld [vmem:[#allocation129_spill] sm:$0xff] }
 0x370   :  { %v2252_v58 = vpop.xlane.xlu1 %2251  ;;  %v2344_v59 = vadd.f32 %v2250_v25, %v2152_v47  ;;  %v9403_v5 = vpop.f32.mrb[12].mxu1  ;;  %v1501_v24 = vmul.f32 1.442695, %v11295_v42  ;;  %v2154_v47 = vmul.f32 %v9397_v16, %v2090_v36  ;;  %6466 = vrcp.f32 %v3853_v41  ;;  %v11305_v36 = vld [vmem:[#allocation131_spill] sm:$0xff]  ;;  %vm11347_vm15 = vmmov %vm10943_vm0 }
 0x371   :  { %11290 = vst [vmem:[#allocation12_spill] sm:$0xff] %v9403_v5  ;;  %v2345_v49 = vadd.f32 %v2252_v58, %v2153_v0  ;;  %v9410_v50 = vpop.f32.mrb[13].mxu1  ;;  %v1505_v61 = vmul.f32 1.442695, %v11299_v2  ;;  %v9420_v25 = vpop.eup %6454  ;;  %v1503_v42 = vmul.f32 1.442695, %v1395_v1  ;;  %v1397_v31 = vsub.f32 %v11306_v34, %v11305_v36  ;;  %vm11352_vm8 = vmmov %vm10943_vm0 }
 0x372   :  { %11296 = vst [vmem:[#allocation18_spill] sm:$0xff] %v9410_v50  ;;  %2409 = vst.msk [vmem:[#allocation3 + $0x108] sm:$0xff] %vm11300_vm6, %v2344_v59  ;;  %2506 = vperm.xlu1 %6205, %v9244_v21   ;;  %v9417_v33 = vpop.f32.mrb[14].mxu1  ;;  %v9426_v13 = vpop.eup %6456  ;;  %v3855_v59 = vld [vmem:[#allocation3 + $0xf8] sm:$0xff]  ;;  %6468 = vpow2.f32 %v1501_v24  ;;  %v11308_v2 = vld [vmem:[#allocation142_spill] sm:$0xff]  ;;  %v2156_v19 = vmul.f32 %v9420_v25, %v2092_v62 }
 0x373   :  { %11301 = vst [vmem:[#allocation13_spill] sm:$0xff] %v9417_v33  ;;  %2410 = vst.msk [vmem:[#allocation3 + $0x110] sm:$0xff] %vm11302_vm7, %v2345_v49  ;;  %v9423_v0 = vpop.f32.mrb[15].mxu1  ;;  %v2254_v58 = vpop.xlane.xlu0 %2253  ;;  %6470 = vpow2.f32 %v1505_v61  ;;  %v11307_v49 = vld [vmem:[#allocation140_spill] sm:$0xff]  ;;  %v2157_v1 = vmul.f32 %v9426_v13, %v2093_v57  ;;  %v11314_v36 = vld [vmem:[#allocation150_spill] sm:$0xff] }
 0x374   :  { %11303 = vst [vmem:[#allocation20_spill] sm:$0xff] %v9423_v0  ;;  %11304 = vst [vmem:[#allocation15_spill] sm:$0xff] %v9426_v13  ;;  %v2256_v10 = vpop.xlane.xlu1 %2255  ;;  %v2346_v21 = vadd.f32 %v2254_v58, %v2154_v47  ;;  %v11309_v5 = vsub.f32 %v11307_v49, %v11308_v2  ;;  %6472 = vrcp.f32 %v3855_v59  ;;  %v2094_v47 = vld [vmem:[#allocation3 + $0x138] sm:$0xff] }
 0x375   :  { %v2347_v41 = vadd.f32 %v2256_v10, %v2155_v26  ;;  %v9436_v52 = vpop.eup %6458  ;;  %v2095_v10 = vld [vmem:[#allocation3 + $0x140] sm:$0xff]  ;;  %6474 = vpow2.f32 %v1503_v42  ;;  %v11313_v59 = vld [vmem:[#allocation148_spill] sm:$0xff]  ;;  %vm11354_vm6 = vmmov %vm10943_vm0 }
 0x376   :  { %v1513_v50 = vmul.f32 1.442695, %v11309_v5  ;;  %2411 = vst.msk [vmem:[#allocation3 + $0x118] sm:$0xff] %vm11310_vm2, %v2346_v21  ;;  %2516 = vperm.xlu1 %6205, %v9257_v11   ;;  %v9440_v61 = vpop.eup %6460  ;;  %v1507_v11 = vmul.f32 1.442695, %v1397_v31  ;;  %v11315_v34 = vsub.f32 %v11313_v59, %v11314_v36  ;;  %v2158_v49 = vmul.f32 %v9436_v52, %v2094_v47  ;;  %v11320_v59 = vld [vmem:[#allocation135_spill] sm:$0xff]  ;;  %vm11357_vm7 = vmmov %vm10943_vm0 }
 0x377   :  { %2412 = vst.msk [vmem:[#allocation3 + $0x120] sm:$0xff] %vm11311_vm13, %v2347_v41  ;;  %v2258_v24 = vpop.xlane.xlu0 %2257  ;;  %11312 = vst [vmem:[#allocation22_spill] sm:$0xff] %v9440_v61  ;;  %v11321_v36 = vld [vmem:[#allocation133_spill] sm:$0xff] }
 0x378   :  { %v2260_v26 = vpop.xlane.xlu1 %2259  ;;  %v2348_v58 = vadd.f32 %v2258_v24, %v2156_v19  ;;  %v9442_v5 = vpop.f32.mrb[16].mxu1  ;;  %6476 = vpow2.f32 %v1513_v50  ;;  %v1521_v41 = vmul.f32 1.442695, %v11315_v34  ;;  %v2159_v50 = vmul.f32 %v9440_v61, %v2095_v10  ;;  %v2096_v19 = vld [vmem:[#allocation3 + $0x148] sm:$0xff]  ;;  %v11322_v34 = vld [vmem:[#allocation136_spill] sm:$0xff]  ;;  %vm11359_vm2 = vmmov %vm10943_vm0 }
 0x379   :  { %v2349_v21 = vadd.f32 %v2260_v26, %v2157_v1  ;;  %v9444_v62 = vpop.f32.mrb[17].mxu1  ;;  %v9454_v2 = vpop.eup %6462  ;;  %6478 = vpow2.f32 %v1507_v11  ;;  %v1399_v47 = vsub.f32 %v11321_v36, %v11320_v59  ;;  %v11324_v6 = vsub.f32 %v11322_v34, %v11323_v20  ;;  %v11326_v10 = vld [vmem:[#allocation158_spill] sm:$0xff]  ;;  %v2098_v20 = vld [vmem:[#allocation3 + $0x158] sm:$0xff]  ;;  %v11331_v36 = vld [vmem:[#allocation137_spill] sm:$0xff] }
 0x37a   :  { %2413 = vst.msk [vmem:[#allocation3 + $0x128] sm:$0xff] %vm11316_vm12, %v2348_v58  ;;  %2521 = vperm.xlu1 %6205, %v9267_v40   ;;  %v9451_v57 = vpop.f32.mrb[18].mxu1  ;;  %v9460_v1 = vpop.eup %6464  ;;  %v2097_v58 = vld [vmem:[#allocation3 + $0x150] sm:$0xff]  ;;  %6480 = vpow2.f32 %v1521_v41  ;;  %v3825_v41 = vld [vmem:[#allocation3 + $0x8] sm:$0xff]  ;;  %vm11365_vm13 = vmmov %vm10943_vm0 }
 0x37b   :  { %2414 = vst.msk [vmem:[#allocation3 + $0x130] sm:$0xff] %vm11317_vm14, %v2349_v21  ;;  %v9457_v42 = vpop.f32.mrb[19].mxu1  ;;  %v2262_v31 = vpop.xlane.xlu0 %2261  ;;  %11319 = vst [vmem:[#allocation24_spill] sm:$0xff] %v9460_v1  ;;  %v1509_v21 = vmul.f32 1.442695, %v11324_v6  ;;  %v2161_v11 = vmul.f32 %v9460_v1, %v2097_v58  ;;  %v11332_v58 = vld [vmem:[#allocation164_spill] sm:$0xff] }
 0x37c   :  { %11318 = vst [vmem:[#allocation17_spill] sm:$0xff] %v9457_v42  ;;  %v2264_v24 = vpop.xlane.xlu1 %2263  ;;  %v2350_v26 = vadd.f32 %v2262_v31, %v2158_v49  ;;  %v6467_v40 = vpop.eup %6466  ;;  %v11325_v42 = vld [vmem:[#allocation156_spill] sm:$0xff]  ;;  %v2160_v49 = vmul.f32 %v9454_v2, %v2096_v19  ;;  %v11330_v19 = vld [vmem:[#allocation139_spill] sm:$0xff]  ;;  %v11333_v1 = vld [vmem:[#allocation165_spill] sm:$0xff] }
 0x37d   :  { %v2351_v38 = vadd.f32 %v2264_v24, %v2159_v50  ;;  %v11327_v61 = vsub.f32 %v11325_v42, %v11326_v10  ;;  %v9472_v31 = vpop.eup %6468  ;;  %6482 = vpow2.f32 %v1509_v21  ;;  %v1401_v34 = vsub.f32 %v11331_v36, %v11330_v19  ;;  %v2104_v19 = vld [vmem:[#allocation3 + $0x188] sm:$0xff]  ;;  %vm11366_vm12 = vmmov %vm10943_vm0 }
 0x37e   :  { %2415 = vst.msk [vmem:[#allocation3 + $0x138] sm:$0xff] %vm11328_vm4, %v2350_v26  ;;  %4099 = vperm.xlu1 %6205, %v6467_v40   ;;  %v9476_v6 = vpop.eup %6470  ;;  %v1511_v40 = vmul.f32 1.442695, %v1399_v47  ;;  %v11334_v33 = vsub.f32 %v11332_v58, %v11333_v1  ;;  %vm11372_vm14 = vmmov %vm10943_vm0 }
 0x37f   :  { %v1529_v13 = vmul.f32 1.442695, %v11327_v61  ;;  %2416 = vst.msk [vmem:[#allocation3 + $0x140] sm:$0xff] %vm11329_vm1, %v2351_v38  ;;  %v2266_v59 = vpop.xlane.xlu0 %2265  ;;  %v2100_v61 = vld [vmem:[#allocation3 + $0x168] sm:$0xff]  ;;  %v6473_v26 = vpop.eup %6472  ;;  %v1515_v36 = vmul.f32 1.442695, %v1401_v34  ;;  %vm11375_vm4 = vmmov %vm10943_vm0 }
 0x380   :  { %v2268_v50 = vpop.xlane.xlu1 %2267  ;;  %v2352_v24 = vadd.f32 %v2266_v59, %v2160_v49  ;;  %v9478_v42 = vpop.f32.mrb[20].mxu1  ;;  %v1537_v22 = vmul.f32 1.442695, %v11334_v33  ;;  %v2162_v59 = vmul.f32 %v9472_v31, %v2098_v20  ;;  %v3827_v33 = vld [vmem:[#allocation3 + $0x18] sm:$0xff]  ;;  %vm11384_vm1 = vmmov %vm10943_vm0 }
 0x381   :  { %v2353_v10 = vadd.f32 %v2268_v50, %v2161_v11  ;;  %v9482_v38 = vpop.f32.mrb[21].mxu1  ;;  %6484 = vpow2.f32 %v1529_v13  ;;  %v9491_v47 = vpop.eup %6474  ;;  %v2164_v13 = vmul.f32 %v9476_v6, %v2100_v61  ;;  %v2099_v50 = vld [vmem:[#allocation3 + $0x160] sm:$0xff] }
 0x382   :  { %2417 = vst.msk [vmem:[#allocation3 + $0x148] sm:$0xff] %vm11335_vm11, %v2352_v24  ;;  %4109 = vperm.xlu1 %6205, %v6473_v26   ;;  %v9488_v49 = vpop.f32.mrb[22].mxu1  ;;  %11336 = vst [vmem:[#allocation19_spill] sm:$0xff] %v9491_v47  ;;  %6486 = vrcp.f32 %v3825_v41  ;;  %v9497_v1 = vpop.eup %6476  ;;  %v2163_v41 = vmul.f32 %v9491_v47, %v2099_v50  ;;  %v11345_v47 = vld [vmem:[#allocation146_spill] sm:$0xff] }
 0x383   :  { %2418 = vst.msk [vmem:[#allocation3 + $0x150] sm:$0xff] %vm11337_vm9, %v2353_v10  ;;  %v9494_v21 = vpop.f32.mrb[23].mxu1  ;;  %v2270_v11 = vpop.xlane.xlu0 %2269  ;;  %6488 = vpow2.f32 %v1511_v40  ;;  %v2168_v61 = vmul.f32 %v9497_v1, %v2104_v19  ;;  %vm11388_vm11 = vmmov %vm10943_vm0 }
 0x384   :  { %11338 = vst [vmem:[#allocation26_spill] sm:$0xff] %v9494_v21  ;;  %v2274_v24 = vpop.xlane.xlu1 %2273  ;;  %v2354_v26 = vadd.f32 %v2270_v11, %v2162_v59  ;;  %6490 = vpow2.f32 %v1537_v22  ;;  %v9502_v10 = vpop.eup %6478  ;;  %v2101_v59 = vld [vmem:[#allocation3 + $0x170] sm:$0xff]  ;;  %vm11389_vm9 = vmmov %vm10943_vm0 }
 0x385   :  { %v2356_v20 = vadd.f32 %v2274_v24, %v2164_v13  ;;  %11340 = vst [vmem:[#allocation21_spill] sm:$0xff] %v9502_v10  ;;  %6492 = vrcp.f32 %v3827_v33  ;;  %v9506_v11 = vpop.eup %6480  ;;  %v2108_v13 = vld [vmem:[#allocation3 + $0x1a8] sm:$0xff]  ;;  %v11343_v24 = vld [vmem:[#allocation141_spill] sm:$0xff] }
 0x386   :  { %2419 = vst.msk [vmem:[#allocation3 + $0x158] sm:$0xff] %vm11339_vm3, %v2354_v26  ;;  %2531 = vperm.xlu1 %6205, %v9281_v14   ;;  %6494 = vpow2.f32 %v1515_v36  ;;  %v11342_v14 = vld [vmem:[#allocation143_spill] sm:$0xff]  ;;  %v11344_v26 = vld [vmem:[#allocation144_spill] sm:$0xff]  ;;  %vm11390_vm3 = vmmov %vm10943_vm0 }
 0x387   :  { %2421 = vst.msk [vmem:[#allocation3 + $0x168] sm:$0xff] %vm11341_vm5, %v2356_v20  ;;  %v2272_v58 = vpop.xlane.xlu0 %2271  ;;  %v1403_v50 = vsub.f32 %v11343_v24, %v11342_v14  ;;  %v11346_v33 = vsub.f32 %v11344_v26, %v11345_v47  ;;  %v2172_v47 = vmul.f32 %v9506_v11, %v2108_v13  ;;  %v2112_v26 = vld [vmem:[#allocation3 + $0x1c8] sm:$0xff]  ;;  %vm11392_vm5 = vmmov %vm10943_vm0 }
 0x388   :  { %v2282_v40 = vpop.xlane.xlu1 %2281  ;;  %v2355_v34 = vadd.f32 %v2272_v58, %v2163_v41  ;;  %v9508_v22 = vpop.f32.mrb[24].mxu1  ;;  %v2165_v41 = vmul.f32 %v9502_v10, %v2101_v59  ;;  %v11351_v59 = vld [vmem:[#allocation145_spill] sm:$0xff] }
 0x389   :  { %v1517_v21 = vmul.f32 1.442695, %v11346_v33  ;;  %v2360_v20 = vadd.f32 %v2282_v40, %v2168_v61  ;;  %v9515_v0 = vpop.f32.mrb[25].mxu1  ;;  %v9522_v58 = vpop.eup %6482  ;;  %v2102_v61 = vld [vmem:[#allocation3 + $0x178] sm:$0xff]  ;;  %v1519_v33 = vmul.f32 1.442695, %v1403_v50  ;;  %v1405_v10 = vsub.f32 %v11351_v59, %v11350_v63 }
 0x38a   :  { %2420 = vst.msk [vmem:[#allocation3 + $0x160] sm:$0xff] %vm10943_vm0, %v2355_v34  ;;  %2541 = vperm.xlu1 %6205, %v9295_v12   ;;  %v9519_v19 = vpop.f32.mrb[26].mxu1  ;;  %v2116_v63 = vld [vmem:[#allocation3 + $0x1e8] sm:$0xff] }
 0x38b   :  { %2425 = vst.msk [vmem:[#allocation3 + $0x188] sm:$0xff] %vm11347_vm15, %v2360_v20  ;;  %v9525_v36 = vpop.f32.mrb[27].mxu1  ;;  %v2276_v14 = vpop.xlane.xlu0 %2275  ;;  %6496 = vpow2.f32 %v1517_v21  ;;  %v2166_v20 = vmul.f32 %v9522_v58, %v2102_v61  ;;  %vm11395_vm15 = vmmov %vm10943_vm0 }
 0x38c   :  { %11348 = vst [vmem:[#allocation28_spill] sm:$0xff] %v9525_v36  ;;  %v9528_v40 = vpop.eup %6484  ;;  %v2290_v24 = vpop.xlane.xlu1 %2289  ;;  %v2357_v34 = vadd.f32 %v2276_v14, %v2165_v41  ;;  %v2103_v14 = vld [vmem:[#allocation3 + $0x180] sm:$0xff]  ;;  %6498 = vpow2.f32 %v1519_v33 }
 0x38d   :  { %11349 = vst [vmem:[#allocation23_spill] sm:$0xff] %v9528_v40  ;;  %v6487_v12 = vpop.eup %6486  ;;  %v2364_v39 = vadd.f32 %v2290_v24, %v2172_v47  ;;  %v2176_v36 = vmul.f32 %v9528_v40, %v2112_v26  ;;  %v1523_v24 = vmul.f32 1.442695, %v1405_v10  ;;  %v2105_v10 = vld [vmem:[#allocation3 + $0x190] sm:$0xff]  ;;  %v11363_v40 = vld [vmem:[#allocation154_spill] sm:$0xff] }
 0x38e   :  { %2422 = vst.msk [vmem:[#allocation3 + $0x170] sm:$0xff] %vm11352_vm8, %v2357_v34  ;;  %3959 = vperm.xlu1 %6205, %v6487_v12   ;;  %v9534_v13 = vpop.eup %6488  ;;  %vm11396_vm8 = vmmov %vm10943_vm0 }
 0x38f   :  { %11353 = vst [vmem:[#allocation30_spill] sm:$0xff] %v9534_v13  ;;  %2429 = vst.msk [vmem:[#allocation3 + $0x1a8] sm:$0xff] %vm11354_vm6, %v2364_v39  ;;  %v2278_v41 = vpop.xlane.xlu0 %2277  ;;  %v9538_v9 = vpop.eup %6490  ;;  %v2167_v26 = vmul.f32 %v9534_v13, %v2103_v14  ;;  %6500 = vpow2.f32 %v1523_v24  ;;  %v2106_v24 = vld [vmem:[#allocation3 + $0x198] sm:$0xff] }
 0x390   :  { %v2298_v21 = vpop.xlane.xlu1 %2297  ;;  %v2358_v50 = vadd.f32 %v2278_v41, %v2166_v20  ;;  %v9540_v56 = vpop.f32.mrb[28].mxu1  ;;  %v2180_v20 = vmul.f32 %v9538_v9, %v2116_v63  ;;  %v11361_v41 = vld [vmem:[#allocation149_spill] sm:$0xff]  ;;  %vm11412_vm6 = vmmov %vm10943_vm0 }
 0x391   :  { %11355 = vst [vmem:[#allocation25_spill] sm:$0xff] %v9540_v56  ;;  %v6493_v47 = vpop.eup %6492  ;;  %v2368_v34 = vadd.f32 %v2298_v21, %v2176_v36  ;;  %v9542_v61 = vpop.f32.mrb[29].mxu1  ;;  %v11360_v36 = vld [vmem:[#allocation151_spill] sm:$0xff]  ;;  %v3829_v56 = vld [vmem:[#allocation3 + $0x28] sm:$0xff] }
 0x392   :  { %11356 = vst [vmem:[#allocation32_spill] sm:$0xff] %v9542_v61  ;;  %2423 = vst.msk [vmem:[#allocation3 + $0x178] sm:$0xff] %vm11357_vm7, %v2358_v50  ;;  %3969 = vperm.xlu1 %6205, %v6493_v47   ;;  %v9545_v39 = vpop.f32.mrb[30].mxu1  ;;  %v9548_v12 = vpop.eup %6494  ;;  %v1407_v21 = vsub.f32 %v11361_v41, %v11360_v36  ;;  %v11362_v61 = vld [vmem:[#allocation152_spill] sm:$0xff]  ;;  %6502 = vrcp.f32 %v3829_v56 }
 0x393   :  { %11358 = vst [vmem:[#allocation27_spill] sm:$0xff] %v9548_v12  ;;  %2433 = vst.msk [vmem:[#allocation3 + $0x1c8] sm:$0xff] %vm11359_vm2, %v2368_v34  ;;  %v9551_v59 = vpop.f32.mrb[31].mxu1  ;;  %v2280_v33 = vpop.xlane.xlu0 %2279  ;;  %v11364_v14 = vsub.f32 %v11362_v61, %v11363_v40  ;;  %v2169_v63 = vmul.f32 %v9548_v12, %v2105_v10  ;;  %v3831_v41 = vld [vmem:[#allocation3 + $0x38] sm:$0xff]  ;;  %v11370_v10 = vld [vmem:[#allocation166_spill] sm:$0xff] }
 0x394   :  { %v2306_v50 = vpop.xlane.xlu1 %2305  ;;  %v2359_v47 = vadd.f32 %v2280_v33, %v2167_v26  ;;  %v1527_v33 = vmul.f32 1.442695, %v1407_v21 }
 0x395   :  { %v1525_v13 = vmul.f32 1.442695, %v11364_v14  ;;  %v2372_v54 = vadd.f32 %v2306_v50, %v2180_v20  ;;  %v9562_v34 = vpop.eup %6496  ;;  %v11368_v50 = vld [vmem:[#allocation155_spill] sm:$0xff] }
 0x396   :  { %2424 = vst.msk [vmem:[#allocation3 + $0x180] sm:$0xff] %vm11365_vm13, %v2359_v47  ;;  %2546 = vperm.xlu1 %6205, %v9299_v43   ;;  %v11369_v43 = vld [vmem:[#allocation153_spill] sm:$0xff]  ;;  %v2170_v21 = vmul.f32 %v9562_v34, %v2106_v24 }
 0x397   :  { %2437 = vst.msk [vmem:[#allocation3 + $0x1e8] sm:$0xff] %vm11366_vm12, %v2372_v54  ;;  %v9565_v36 = vpop.f32.mrb[0].mxu0  ;;  %v2284_v26 = vpop.xlane.xlu0 %2283  ;;  %6504 = vpow2.f32 %v1525_v13  ;;  %v1409_v47 = vsub.f32 %v11369_v43, %v11368_v50  ;;  %v2456_v54 = vld [vmem:[#allocation4 + $0x80] sm:$0xff] }
 0x398   :  { %11367 = vst [vmem:[#allocation34_spill] sm:$0xff] %v9565_v36  ;;  %v1861_v40 = vpop.permute.xlu1 %1860  ;;  %v2361_v61 = vadd.f32 %v2284_v26, %v2169_v63  ;;  %v9567_v20 = vpop.f32.mrb[1].mxu0  ;;  %6506 = vrcp.f32 %v3831_v41  ;;  %v2107_v36 = vld [vmem:[#allocation3 + $0x1a0] sm:$0xff] }
 0x399   :  { %v1926_v14 = vsub.f32 %v11370_v10, %v1861_v40  ;;  %v9572_v12 = vpop.f32.mrb[2].mxu0  ;;  %v9579_v63 = vpop.eup %6498  ;;  %6508 = vpow2.f32 %v1527_v33  ;;  %v1531_v43 = vmul.f32 1.442695, %v1409_v47  ;;  %v2109_v33 = vld [vmem:[#allocation3 + $0x1b0] sm:$0xff] }
 0x39a   :  { %11371 = vst [vmem:[#allocation29_spill] sm:$0xff] %v9572_v12  ;;  %2426 = vst.msk [vmem:[#allocation3 + $0x190] sm:$0xff] %vm11372_vm14, %v2361_v61  ;;  %2556 = vperm.xlu1 %6205, %v9320_v53   ;;  %v9576_v56 = vpop.f32.mrb[3].mxu0  ;;  %v2458_v53 = vld [vmem:[#allocation4 + $0x90] sm:$0xff]  ;;  %v2171_v61 = vmul.f32 %v9579_v63, %v2107_v36  ;;  %v9584_v24 = vpop.eup %6500 }
 0x39b   :  { %11373 = vst [vmem:[#allocation36_spill] sm:$0xff] %v9576_v56  ;;  %11374 = vst [vmem:[#allocation31_spill] sm:$0xff] %v9579_v63  ;;  %v2053_v13 = vmul.f32 1.442695, %v1926_v14  ;;  %v2286_v26 = vpop.xlane.xlu0 %2285 }
 0x39c   :  { %v2587_v50 = vpop.permute.xlu1 %2586  ;;  %v2362_v40 = vadd.f32 %v2286_v26, %v2170_v21  ;;  %v11379_v26 = vld [vmem:[#allocation157_spill] sm:$0xff] }
 0x39d   :  { %6510 = vpow2.f32 %v2053_v13  ;;  %v2840_v10 = vmul.f32 %v2587_v50, %v2456_v54  ;;  %v6503_v54 = vpop.eup %6502  ;;  %v11378_v13 = vld [vmem:[#allocation159_spill] sm:$0xff]  ;;  %v11380_v50 = vld [vmem:[#allocation160_spill] sm:$0xff] }
 0x39e   :  { %2427 = vst.msk [vmem:[#allocation3 + $0x198] sm:$0xff] %vm11375_vm4, %v2362_v40  ;;  %2561 = vperm.xlu1 %6205, %v9329_v45   ;;  %6512 = vpow2.f32 %v1531_v43  ;;  %v1411_v45 = vsub.f32 %v11379_v26, %v11378_v13  ;;  %v11381_v40 = vld [vmem:[#allocation162_spill] sm:$0xff]  ;;  %v2173_v43 = vmul.f32 %v9584_v24, %v2109_v33 }
 0x39f   :  { %v3580_v41 = vadd.f32 %v9444_v62, %v2840_v10  ;;  %v9587_v14 = vpop.f32.mrb[4].mxu0  ;;  %v2288_v56 = vpop.xlane.xlu0 %2287  ;;  %v11382_v36 = vsub.f32 %v11380_v50, %v11381_v40  ;;  %v2110_v50 = vld [vmem:[#allocation3 + $0x1b8] sm:$0xff]  ;;  %v3833_v40 = vld [vmem:[#allocation3 + $0x48] sm:$0xff] }
 0x3a0   :  { %11376 = vst [vmem:[#allocation38_spill] sm:$0xff] %v9587_v14  ;;  %v2597_v12 = vpop.permute.xlu1 %2596  ;;  %v2363_v21 = vadd.f32 %v2288_v56, %v2171_v61  ;;  %v9589_v47 = vpop.f32.mrb[5].mxu0  ;;  %v2459_v61 = vld [vmem:[#allocation4 + $0x98] sm:$0xff] }
 0x3a1   :  { %11377 = vst [vmem:[#allocation33_spill] sm:$0xff] %v9589_v47  ;;  %v1533_v63 = vmul.f32 1.442695, %v11382_v36  ;;  %3645 = vst.msk [vmem:[#allocation4 + $0x80] sm:$0xff] %vm168_vm10, %v3580_v41  ;;  %v2842_v62 = vmul.f32 %v2597_v12, %v2458_v53  ;;  %v9597_v10 = vpop.f32.mrb[6].mxu0  ;;  %v9603_v14 = vpop.eup %6504  ;;  %v11386_v47 = vld [vmem:[#allocation163_spill] sm:$0xff] }
 0x3a2   :  { %11383 = vst [vmem:[#allocation40_spill] sm:$0xff] %v9597_v10  ;;  %2428 = vst.msk [vmem:[#allocation3 + $0x1a0] sm:$0xff] %vm11384_vm1, %v2363_v21  ;;  %3979 = vperm.xlu1 %6205, %v6503_v54   ;;  %v9600_v56 = vpop.f32.mrb[7].mxu0  ;;  %v6507_v12 = vpop.eup %6506  ;;  %v1535_v53 = vmul.f32 1.442695, %v1411_v45  ;;  %v11387_v21 = vld [vmem:[#allocation161_spill] sm:$0xff]  ;;  %v2174_v33 = vmul.f32 %v9603_v14, %v2110_v50 }
 0x3a3   :  { %11385 = vst [vmem:[#allocation35_spill] sm:$0xff] %v9600_v56  ;;  %v3582_v13 = vadd.f32 %v9442_v5, %v2842_v62  ;;  %v2292_v26 = vpop.xlane.xlu0 %2291  ;;  %6514 = vpow2.f32 %v1533_v63  ;;  %v1413_v54 = vsub.f32 %v11387_v21, %v11386_v47  ;;  %v9609_v56 = vpop.eup %6508  ;;  %v2460_v5 = vld [vmem:[#allocation4 + $0xa0] sm:$0xff]  ;;  %v3835_v47 = vld [vmem:[#allocation3 + $0x58] sm:$0xff] }
 0x3a4   :  { %v2602_v36 = vpop.permute.xlu1 %2601  ;;  %v2365_v41 = vadd.f32 %v2292_v26, %v2173_v43  ;;  %6516 = vrcp.f32 %v3833_v40  ;;  %v2111_v26 = vld [vmem:[#allocation3 + $0x1c0] sm:$0xff] }
 0x3a5   :  { %3647 = vst.msk [vmem:[#allocation4 + $0x90] sm:$0xff] %vm168_vm10, %v3582_v13  ;;  %v2843_v10 = vmul.f32 %v2602_v36, %v2459_v61  ;;  %6518 = vpow2.f32 %v1535_v53 }
 0x3a6   :  { %2430 = vst.msk [vmem:[#allocation3 + $0x1b0] sm:$0xff] %vm11388_vm11, %v2365_v41  ;;  %3989 = vperm.xlu1 %6205, %v6507_v12   ;;  %v1539_v41 = vmul.f32 1.442695, %v1413_v54  ;;  %v2175_v12 = vmul.f32 %v9609_v56, %v2111_v26  ;;  %6520 = vrcp.f32 %v3835_v47  ;;  %v2113_v54 = vld [vmem:[#allocation3 + $0x1d0] sm:$0xff] }
 0x3a7   :  { %v6511_v62 = vpop.eup %6510  ;;  %v3583_v43 = vadd.f32 %v9451_v57, %v2843_v10  ;;  %v9614_v45 = vpop.f32.mrb[8].mxu0  ;;  %v2462_v10 = vld [vmem:[#allocation4 + $0xb0] sm:$0xff] }
 0x3a8   :  { %v2294_v63 = vpop.xlane.xlu0 %2293  ;;  %v2607_v21 = vpop.permute.xlu1 %2606  ;;  %2309 = vadd.xlane.f32.xlu0 %v6511_v62  ;;  %v2919_v36 = vpack.c.bf16 %v6511_v62, %v9167_v28  ;;  %6522 = vpow2.f32 %v1539_v41 }
 0x3a9   :  { %v2366_v61 = vadd.f32 %v2294_v63, %v2174_v33  ;;  %v9616_v13 = vpop.f32.mrb[9].mxu0  ;;  %3648 = vst.msk [vmem:[#allocation4 + $0x98] sm:$0xff] %vm168_vm10, %v3583_v43  ;;  %v2844_v50 = vmul.f32 %v2607_v21, %v2460_v5  ;;  %v9627_v33 = vpop.eup %6512 }
 0x3aa   :  { %v9620_v40 = vpop.f32.mrb[10].mxu0  ;;  %6056 = vmatmul.mubr.bf16.gmra.mrb[44].mxu1 %v2919_v36  ;;  %2571 = vperm.xlu1 %6205, %v9349_v44   ;;  %v2463_v44 = vld [vmem:[#allocation4 + $0xb8] sm:$0xff]  ;;  %v2177_v63 = vmul.f32 %v9627_v33, %v2113_v54 }
 0x3ab   :  { %2431 = vst.msk [vmem:[#allocation3 + $0x1b8] sm:$0xff] %vm11389_vm9, %v2366_v61  ;;  %v9624_v57 = vpop.f32.mrb[11].mxu0  ;;  %v3584_v28 = vadd.f32 %v9482_v38, %v2844_v50  ;;  %v2114_v61 = vld [vmem:[#allocation3 + $0x1d8] sm:$0xff] }
 0x3ac   :  { %v2296_v53 = vpop.xlane.xlu0 %2295  ;;  %v2617_v5 = vpop.permute.xlu1 %2616 }
 0x3ad   :  { %v2367_v62 = vadd.f32 %v2296_v53, %v2175_v12  ;;  %3649 = vst.msk [vmem:[#allocation4 + $0xa0] sm:$0xff] %vm168_vm10, %v3584_v28  ;;  %v2846_v43 = vmul.f32 %v2617_v5, %v2462_v10  ;;  %v9634_v26 = vpop.eup %6514 }
 0x3ae   :  { %2581 = vperm.xlu1 %6205, %v9365_v8   ;;  %v6517_v10 = vpop.eup %6516 }
 0x3af   :  { %2432 = vst.msk [vmem:[#allocation3 + $0x1c0] sm:$0xff] %vm11390_vm3, %v2367_v62  ;;  %v3586_v47 = vadd.f32 %v9478_v42, %v2846_v43  ;;  %v9637_v38 = vpop.f32.mrb[12].mxu0  ;;  %v2178_v42 = vmul.f32 %v9634_v26, %v2114_v61  ;;  %v9648_v53 = vpop.eup %6518  ;;  %v2115_v62 = vld [vmem:[#allocation3 + $0x1e0] sm:$0xff] }
 0x3b0   :  { %11391 = vst [vmem:[#allocation42_spill] sm:$0xff] %v9637_v38  ;;  %v2300_v21 = vpop.xlane.xlu0 %2299  ;;  %v2622_v36 = vpop.permute.xlu1 %2621 }
 0x3b1   :  { %v2369_v41 = vadd.f32 %v2300_v21, %v2177_v63  ;;  %v9639_v50 = vpop.f32.mrb[13].mxu0  ;;  %3651 = vst.msk [vmem:[#allocation4 + $0xb0] sm:$0xff] %vm168_vm10, %v3586_v47  ;;  %v2847_v12 = vmul.f32 %v2622_v36, %v2463_v44  ;;  %v6521_v63 = vpop.eup %6520  ;;  %v2179_v44 = vmul.f32 %v9648_v53, %v2115_v62  ;;  %v3840_v21 = vld [vmem:[#allocation3 + $0x80] sm:$0xff]  ;;  %v3842_v62 = vld [vmem:[#allocation3 + $0x90] sm:$0xff] }
 0x3b2   :  { %v9642_v8 = vpop.f32.mrb[14].mxu0  ;;  %3999 = vperm.xlu1 %6205, %v6517_v10   ;;  %v9654_v47 = vpop.eup %6522  ;;  %v3837_v10 = vld [vmem:[#allocation3 + $0x68] sm:$0xff]  ;;  %6524 = vrcp.f32 %v3840_v21 }
 0x3b3   :  { %2434 = vst.msk [vmem:[#allocation3 + $0x1d0] sm:$0xff] %vm11392_vm5, %v2369_v41  ;;  %v9645_v28 = vpop.f32.mrb[15].mxu0  ;;  %v3587_v54 = vadd.f32 %v9488_v49, %v2847_v12  ;;  %v2117_v41 = vld [vmem:[#allocation3 + $0x1f0] sm:$0xff]  ;;  %6526 = vrcp.f32 %v3837_v10  ;;  %v3844_v10 = vld [vmem:[#allocation3 + $0xa0] sm:$0xff] }
 0x3b4   :  { %v2302_v5 = vpop.xlane.xlu0 %2301  ;;  %6528 = vrcp.f32 %v3842_v62  ;;  %v3857_v62 = vld [vmem:[#allocation3 + $0x108] sm:$0xff] }
 0x3b5   :  { %v2370_v43 = vadd.f32 %v2302_v5, %v2178_v42  ;;  %3652 = vst.msk [vmem:[#allocation4 + $0xb8] sm:$0xff] %vm168_vm10, %v3587_v54  ;;  %v2181_v5 = vmul.f32 %v9654_v47, %v2117_v41 }
 0x3b6   :  { %4009 = vperm.xlu1 %6205, %v6521_v63   ;;  %v3839_v63 = vld [vmem:[#allocation3 + $0x78] sm:$0xff] }
 0x3b7   :  { %2435 = vst.msk [vmem:[#allocation3 + $0x1d8] sm:$0xff] %vm10943_vm0, %v2370_v43  ;;  %v9656_v36 = vpop.f32.mrb[32].mxu1  ;;  %6530 = vrcp.f32 %v3839_v63 }
 0x3b8   :  { %11393 = vst [vmem:[#allocation37_spill] sm:$0xff] %v9656_v36  ;;  %v2304_v61 = vpop.xlane.xlu0 %2303  ;;  %v9658_v12 = vpop.f32.mrb[33].mxu1  ;;  %6532 = vrcp.f32 %v3844_v10  ;;  %v3859_v10 = vld [vmem:[#allocation3 + $0x118] sm:$0xff] }
 0x3b9   :  { %v2371_v49 = vadd.f32 %v2304_v61, %v2179_v44  ;;  %11394 = vst [vmem:[#allocation44_spill] sm:$0xff] %v9658_v12  ;;  %v9660_v42 = vpop.f32.mrb[34].mxu1 }
 0x3ba   :  { %2666 = vperm.xlu1 %6205, %v9369_v18   ;;  %v9664_v54 = vpop.f32.mrb[35].mxu1 }
 0x3bb   :  { %2436 = vst.msk [vmem:[#allocation3 + $0x1e0] sm:$0xff] %vm11395_vm15, %v2371_v49  ;;  %v9680_v49 = vpop.permute.xlu1 %4039 }
 0x3bc   :  { %v2308_v43 = vpop.xlane.xlu0 %2307  ;;  %v6525_v41 = vpop.eup %6524 }
 0x3bd   :  { %v2373_v36 = vadd.f32 %v2308_v43, %v2181_v5 }
 0x3be   :  { %2591 = vperm.xlu0 %6204, %v8791_v7   ;;  %2676 = vperm.xlu1 %6205, %v9390_v46   ;;  %v3846_v7 = vld [vmem:[#allocation3 + $0xb0] sm:$0xff] }
 0x3bf   :  { %2438 = vst.msk [vmem:[#allocation3 + $0x1f0] sm:$0xff] %vm11396_vm8, %v2373_v36  ;;  %v9670_v44 = vpop.f32.mrb[36].mxu1  ;;  %v6527_v36 = vpop.eup %6526  ;;  %6534 = vrcp.f32 %v3846_v7 }
 0x3c0   :  { %11397 = vst [vmem:[#allocation39_spill] sm:$0xff] %v9670_v44  ;;  %v9672_v18 = vpop.f32.mrb[37].mxu1  ;;  %v6529_v5 = vpop.eup %6528  ;;  %6536 = vrcp.f32 %v3857_v62 }
 0x3c1   :  { %11398 = vst [vmem:[#allocation46_spill] sm:$0xff] %v9672_v18  ;;  %v9674_v21 = vpop.f32.mrb[38].mxu1  ;;  %6538 = vrcp.f32 %v3859_v10  ;;  %v6238_v10 = vld [vmem:[%s10576_s5 + $0x8] sm:$0xff]  }
 0x3c2   :  { %2611 = vperm.xlu0 %6204, %v9179_v27   ;;  %2681 = vperm.xlu1 %6205, %v9397_v16   ;;  %v9678_v61 = vpop.f32.mrb[39].mxu1  ;;  %v6531_v27 = vpop.eup %6530 }
 0x3c3   :  { %v6533_v12 = vpop.eup %6532  ;;  %6059 = vmatprep.subr.bf16.mxu0 %v6238_v10 }
 0x3c4   :  { %6060 = vmatpush3.bf16.msra.mxu0 %v6238_v10 }
 0x3c6   :  { %4034 = vperm.xlu0 %6204, %v6525_v41   ;;  %4019 = vperm.xlu1 %6205, %v6527_v36   ;;  %v2464_v41 = vld [vmem:[#allocation4 + $0xc0] sm:$0xff] }
 0x3c7   :  { %v9682_v46 = vpop.f32.mrb[40].mxu1 }
 0x3c8   :  { %11399 = vst [vmem:[#allocation41_spill] sm:$0xff] %v9682_v46  ;;  %v9684_v43 = vpop.f32.mrb[41].mxu1  ;;  %v2466_v46 = vld [vmem:[#allocation4 + $0xd0] sm:$0xff] }
 0x3c9   :  { %11400 = vst [vmem:[#allocation48_spill] sm:$0xff] %v9684_v43  ;;  %v9686_v63 = vpop.permute.xlu1 %4049  ;;  %v9688_v16 = vpop.f32.mrb[42].mxu1 }
 0x3ca   :  { %4044 = vperm.xlu0 %6204, %v6529_v5   ;;  %4029 = vperm.xlu1 %6205, %v6531_v27   ;;  %v9690_v44 = vpop.f32.mrb[43].mxu1  ;;  %v2467_v5 = vld [vmem:[#allocation4 + $0xd8] sm:$0xff]  ;;  %v6535_v62 = vpop.eup %6534  ;;  %v3848_v27 = vld [vmem:[#allocation3 + $0xc0] sm:$0xff] }
 0x3cb   :  { %6540 = vrcp.f32 %v3848_v27 }
 0x3cd   :  { %v2627_v36 = vpop.permute.xlu1 %2626 }
 0x3ce   :  { %v2848_v18 = vmul.f32 %v2627_v36, %v2464_v41  ;;  %2631 = vperm.xlu0 %6204, %v9203_v37   ;;  %2691 = vperm.xlu1 %6205, %v9420_v25   ;;  %v6537_v37 = vpop.eup %6536 }
 0x3d0   :  { %v3588_v43 = vadd.f32 %v9515_v0, %v2848_v18  ;;  %v3850_v0 = vld [vmem:[#allocation3 + $0xd0] sm:$0xff]  ;;  %v3861_v18 = vld [vmem:[#allocation3 + $0x128] sm:$0xff] }
 0x3d1   :  { %v2637_v38 = vpop.permute.xlu1 %2636  ;;  %6542 = vrcp.f32 %v3850_v0 }
 0x3d2   :  { %3653 = vst.msk [vmem:[#allocation4 + $0xc0] sm:$0xff] %vm168_vm10, %v3588_v43  ;;  %v2850_v7 = vmul.f32 %v2637_v38, %v2466_v46  ;;  %4054 = vperm.xlu0 %6204, %v6533_v12   ;;  %2701 = vperm.xlu1 %6205, %v9436_v52   ;;  %v6539_v12 = vpop.eup %6538  ;;  %6544 = vrcp.f32 %v3861_v18  ;;  %v3863_v52 = vld [vmem:[#allocation3 + $0x138] sm:$0xff]  ;;  %v3852_v43 = vld [vmem:[#allocation3 + $0xe0] sm:$0xff] }
 0x3d3   :  { %6546 = vrcp.f32 %v3863_v52  ;;  %v2440_v52 = vld [vmem:[#allocation4] sm:$0xff] }
 0x3d4   :  { %v3590_v41 = vadd.f32 %v9508_v22, %v2850_v7  ;;  %6548 = vrcp.f32 %v3852_v43  ;;  %v3824_v43 = vld [vmem:[#allocation3] sm:$0xff] }
 0x3d5   :  { %v2642_v36 = vpop.permute.xlu1 %2641  ;;  %v6541_v7 = vpop.eup %6540 }
 0x3d6   :  { %3655 = vst.msk [vmem:[#allocation4 + $0xd0] sm:$0xff] %vm168_vm10, %v3590_v41  ;;  %v2851_v25 = vmul.f32 %v2642_v36, %v2467_v5  ;;  %4064 = vperm.xlu0 %6204, %v6535_v62   ;;  %4119 = vperm.xlu1 %6205, %v6537_v37  }
 0x3d8   :  { %v3591_v38 = vadd.f32 %v9519_v19, %v2851_v25  ;;  %v2469_v19 = vld [vmem:[#allocation4 + $0xe8] sm:$0xff] }
 0x3d9   :  { %v9700_v46 = vpop.permute.xlu1 %4059  ;;  %v3865_v25 = vld [vmem:[#allocation3 + $0x148] sm:$0xff] }
 0x3da   :  { %3656 = vst.msk [vmem:[#allocation4 + $0xd8] sm:$0xff] %vm168_vm10, %v3591_v38  ;;  %2646 = vperm.xlu0 %6204, %v9218_v30   ;;  %4129 = vperm.xlu1 %6205, %v6539_v12   ;;  %v2471_v30 = vld [vmem:[#allocation4 + $0xf8] sm:$0xff] }
 0x3db   :  { %v6543_v27 = vpop.eup %6542 }
 0x3dc   :  { %v6545_v41 = vpop.eup %6544 }
 0x3dd   :  { %v9704_v22 = vpop.permute.xlu1 %4069 }
 0x3de   :  { %2656 = vperm.xlu0 %6204, %v9231_v17   ;;  %2711 = vperm.xlu1 %6205, %v9454_v2   ;;  %v3854_v17 = vld [vmem:[#allocation3 + $0xf0] sm:$0xff] }
 0x3df   :  { %6550 = vrcp.f32 %v3854_v17  ;;  %v3869_v17 = vld [vmem:[#allocation3 + $0x168] sm:$0xff] }
 0x3e0   :  { %6552 = vrcp.f32 %v3865_v25 }
 0x3e1   :  { %v2652_v5 = vpop.permute.xlu1 %2651 }
 0x3e2   :  { %v2853_v62 = vmul.f32 %v2652_v5, %v2469_v19  ;;  %4074 = vperm.xlu0 %6204, %v6541_v7   ;;  %2721 = vperm.xlu1 %6205, %v9472_v31   ;;  %v6547_v31 = vpop.eup %6546  ;;  %v3826_v7 = vld [vmem:[#allocation3 + $0x10] sm:$0xff] }
 0x3e3   :  { %v6549_v38 = vpop.eup %6548 }
 0x3e4   :  { %v3593_v2 = vadd.f32 %v9551_v59, %v2853_v62  ;;  %v3867_v59 = vld [vmem:[#allocation3 + $0x158] sm:$0xff] }
 0x3e5   :  { %v2662_v37 = vpop.permute.xlu1 %2661  ;;  %6554 = vrcp.f32 %v3867_v59 }
 0x3e6   :  { %3658 = vst.msk [vmem:[#allocation4 + $0xe8] sm:$0xff] %vm168_vm10, %v3593_v2  ;;  %v2855_v36 = vmul.f32 %v2662_v37, %v2471_v30  ;;  %4084 = vperm.xlu0 %6204, %v6543_v27   ;;  %4139 = vperm.xlu1 %6205, %v6545_v41   ;;  %6556 = vrcp.f32 %v3824_v43 }
 0x3e7   :  { %6558 = vrcp.f32 %v3826_v7 }
 0x3e8   :  { %v3595_v0 = vadd.f32 %v9545_v39, %v2855_v36  ;;  %6560 = vrcp.f32 %v3869_v17  ;;  %v3871_v36 = vld [vmem:[#allocation3 + $0x178] sm:$0xff] }
 0x3e9   :  { %v9715_v18 = vpop.permute.xlu1 %4079  ;;  %v6551_v39 = vpop.eup %6550 }
 0x3ea   :  { %3660 = vst.msk [vmem:[#allocation4 + $0xf8] sm:$0xff] %vm168_vm10, %v3595_v0  ;;  %2511 = vperm.xlu0 %6204, %v9253_v23   ;;  %4149 = vperm.xlu1 %6205, %v6547_v31   ;;  %v2442_v23 = vld [vmem:[#allocation4 + $0x10] sm:$0xff]  ;;  %v6553_v62 = vpop.eup %6552  ;;  %v3873_v31 = vld [vmem:[#allocation3 + $0x188] sm:$0xff] }
 0x3ed   :  { %v9719_v12 = vpop.permute.xlu1 %4089 }
 0x3ee   :  { %4094 = vperm.xlu0 %6204, %v6549_v38   ;;  %2731 = vperm.xlu1 %6205, %v9476_v6   ;;  %v2443_v6 = vld [vmem:[#allocation4 + $0x18] sm:$0xff] }
 0x3ef   :  { %v6555_v41 = vpop.eup %6554  ;;  %v3875_v38 = vld [vmem:[#allocation3 + $0x198] sm:$0xff] }
 0x3f1   :  { %v2507_v19 = vpop.permute.xlu1 %2506 }
 0x3f2   :  { %v2824_v10 = vmul.f32 %v2507_v19, %v2440_v52  ;;  %4104 = vperm.xlu0 %6204, %v6551_v39   ;;  %2741 = vperm.xlu1 %6205, %v9522_v58  }
 0x3f4   :  { %v3564_v5 = vadd.f32 %v9306_v29, %v2824_v10  ;;  %v3828_v29 = vld [vmem:[#allocation3 + $0x20] sm:$0xff] }
 0x3f5   :  { %v2517_v30 = vpop.permute.xlu1 %2516  ;;  %6562 = vrcp.f32 %v3828_v29  ;;  %v2450_v29 = vld [vmem:[#allocation4 + $0x50] sm:$0xff] }
 0x3f6   :  { %3629 = vst.msk [vmem:[#allocation4] sm:$0xff] %vm168_vm10, %v3564_v5  ;;  %v2826_v27 = vmul.f32 %v2517_v30, %v2442_v23  ;;  %2526 = vperm.xlu0 %6204, %v9271_v60   ;;  %4159 = vperm.xlu1 %6205, %v6553_v62   ;;  %v6557_v60 = vpop.eup %6556  ;;  %6564 = vrcp.f32 %v3871_v36  ;;  %v3832_v62 = vld [vmem:[#allocation3 + $0x40] sm:$0xff] }
 0x3f7   :  { %v6559_v59 = vpop.eup %6558  ;;  %v3836_v36 = vld [vmem:[#allocation3 + $0x60] sm:$0xff] }
 0x3f8   :  { %v3566_v2 = vadd.f32 %v9301_v4, %v2826_v27  ;;  %v3830_v4 = vld [vmem:[#allocation3 + $0x30] sm:$0xff]  ;;  %v6561_v52 = vpop.eup %6560 }
 0x3f9   :  { %v2522_v58 = vpop.permute.xlu1 %2521  ;;  %6566 = vrcp.f32 %v3830_v4  ;;  %v9753_v4 = vld [vmem:[%s10576_s5] sm:$0xff]  }
 0x3fa   :  { %3631 = vst.msk [vmem:[#allocation4 + $0x10] sm:$0xff] %vm168_vm10, %v3566_v2  ;;  %v2827_v37 = vmul.f32 %v2522_v58, %v2443_v6  ;;  %2536 = vperm.xlu0 %6204, %v9285_v51   ;;  %4169 = vperm.xlu1 %6205, %v6555_v41   ;;  %6568 = vrcp.f32 %v3873_v31  ;;  %v2448_v41 = vld [vmem:[#allocation4 + $0x40] sm:$0xff] }
 0x3fb   :  { %6570 = vrcp.f32 %v3875_v38  ;;  %6077 = vmatprep.subr.bf16.mxu0 %v9753_v4  ;;  %v11402_v38 = vld [vmem:[#allocation11_spill] sm:$0xff] }
 0x3fc   :  { %v3567_v25 = vadd.f32 %v9311_v35, %v2827_v37  ;;  %v2445_v35 = vld [vmem:[#allocation4 + $0x28] sm:$0xff]  ;;  %6572 = vrcp.f32 %v3832_v62 }
 0x3fd   :  { %v9730_v0 = vpop.permute.xlu1 %4099 }
 0x3fe   :  { %3632 = vst.msk [vmem:[#allocation4 + $0x18] sm:$0xff] %vm168_vm10, %v3567_v25  ;;  %3954 = vperm.xlu0 %6204, %v6557_v60   ;;  %2751 = vperm.xlu1 %6205, %v9497_v1   ;;  %v2447_v1 = vld [vmem:[#allocation4 + $0x38] sm:$0xff]  ;;  %v11401_v25 = vld [vmem:[#allocation7_spill] sm:$0xff] }
 0x3ff   :  { %v6563_v19 = vpop.eup %6562 }
 0x400   :  { %v6565_v23 = vpop.eup %6564 }
 0x401   :  { %v9734_v51 = vpop.permute.xlu1 %4109 }
 0x402   :  { %3964 = vperm.xlu0 %6204, %v6559_v59   ;;  %2761 = vperm.xlu1 %6205, %v9562_v34  }
 0x403   :  { %v6567_v34 = vpop.eup %6566 }
 0x404   :  { %v6569_v27 = vpop.eup %6568 }
 0x405   :  { %v2532_v43 = vpop.permute.xlu1 %2531  ;;  %v6571_v17 = vpop.eup %6570 }
 0x406   :  { %v2829_v39 = vmul.f32 %v2532_v43, %v2445_v35  ;;  %2551 = vperm.xlu0 %6204, %v9314_v3   ;;  %4179 = vperm.xlu1 %6205, %v6561_v52   ;;  %v3834_v3 = vld [vmem:[#allocation3 + $0x50] sm:$0xff] }
 0x407   :  { %6574 = vrcp.f32 %v3834_v3  ;;  %v3838_v35 = vld [vmem:[#allocation3 + $0x70] sm:$0xff]  ;;  %v3883_v3 = vld [vmem:[#allocation3 + $0x1d8] sm:$0xff] }
 0x408   :  { %v3569_v10 = vadd.f32 %v9352_v55, %v2829_v39  ;;  %v3877_v55 = vld [vmem:[#allocation3 + $0x1a8] sm:$0xff] }
 0x409   :  { %v2542_v7 = vpop.permute.xlu1 %2541  ;;  %6576 = vrcp.f32 %v3877_v55 }
 0x40a   :  { %3634 = vst.msk [vmem:[#allocation4 + $0x28] sm:$0xff] %vm168_vm10, %v3569_v10  ;;  %v2831_v5 = vmul.f32 %v2542_v7, %v2447_v1  ;;  %3974 = vperm.xlu0 %6204, %v6563_v19   ;;  %4189 = vperm.xlu1 %6205, %v6565_v23   ;;  %v11403_v1 = vld [vmem:[#allocation168_spill] sm:$0xff]  ;;  %v11404_v19 = vld [vmem:[#allocation167_spill] sm:$0xff] }
 0x40b   :  { %v1414_v10 = vsub.f32 %v11404_v19, %v11403_v1  ;;  %v11405_v7 = vld [vmem:[#allocation8_spill] sm:$0xff] }
 0x40c   :  { %v3571_v30 = vadd.f32 %v9346_v15, %v2831_v5  ;;  %v3879_v15 = vld [vmem:[#allocation3 + $0x1b8] sm:$0xff] }
 0x40d   :  { %v9741_v6 = vpop.permute.xlu1 %3959  ;;  %6578 = vrcp.f32 %v3879_v15  ;;  %v2453_v15 = vld [vmem:[#allocation4 + $0x68] sm:$0xff]  ;;  %v2118_v19 = vld [vmem:[#allocation3 + $0x1f8] sm:$0xff] }
 0x40e   :  { %3636 = vst.msk [vmem:[#allocation4 + $0x38] sm:$0xff] %vm168_vm10, %v3571_v30  ;;  %3984 = vperm.xlu0 %6204, %v6567_v34   ;;  %4199 = vperm.xlu1 %6205, %v6569_v27   ;;  %6580 = vrcp.f32 %v3836_v36  ;;  %v1541_v30 = vmul.f32 1.442695, %v1414_v10  ;;  %v11406_v27 = vld [vmem:[#allocation14_spill] sm:$0xff]  ;;  %v11411_v10 = vld [vmem:[#allocation15_spill] sm:$0xff] }
 0x40f   :  { %6582 = vrcp.f32 %v3838_v35  ;;  %v11409_v35 = vld [vmem:[#allocation16_spill] sm:$0xff] }
 0x411   :  { %v9744_v2 = vpop.permute.xlu1 %3969 }
 0x412   :  { %2566 = vperm.xlu0 %6204, %v9333_v48   ;;  %4209 = vperm.xlu1 %6205, %v6571_v17   ;;  %v6573_v48 = vpop.eup %6572 }
 0x415   :  { %v2547_v58 = vpop.permute.xlu1 %2546 }
 0x416   :  { %v2832_v37 = vmul.f32 %v2547_v58, %v2448_v41  ;;  %2576 = vperm.xlu0 %6204, %v9355_v32   ;;  %2771 = vperm.xlu1 %6205, %v9506_v11   ;;  %v2451_v32 = vld [vmem:[#allocation4 + $0x58] sm:$0xff]  ;;  %v6575_v11 = vpop.eup %6574  ;;  %v11407_v41 = vld [vmem:[#allocation23_spill] sm:$0xff]  ;;  %v3856_v58 = vld [vmem:[#allocation3 + $0x100] sm:$0xff] }
 0x417   :  { %v6577_v43 = vpop.eup %6576 }
 0x418   :  { %v3572_v60 = vadd.f32 %v11401_v25, %v2832_v37  ;;  %v6579_v34 = vpop.eup %6578  ;;  %v2455_v25 = vld [vmem:[#allocation4 + $0x78] sm:$0xff] }
 0x419   :  { %v2557_v31 = vpop.permute.xlu1 %2556  ;;  %v6581_v55 = vpop.eup %6580 }
 0x41a   :  { %3637 = vst.msk [vmem:[#allocation4 + $0x40] sm:$0xff] %vm168_vm10, %v3572_v60  ;;  %v2834_v59 = vmul.f32 %v2557_v31, %v2450_v29  ;;  %3994 = vperm.xlu0 %6204, %v6573_v48   ;;  %2781 = vperm.xlu1 %6205, %v9603_v14   ;;  %v3881_v14 = vld [vmem:[#allocation3 + $0x1c8] sm:$0xff]  ;;  %v6583_v37 = vpop.eup %6582  ;;  %v3858_v60 = vld [vmem:[#allocation3 + $0x110] sm:$0xff]  ;;  %v11408_v48 = vld [vmem:[#allocation20_spill] sm:$0xff] }
 0x41b   :  { %6584 = vrcp.f32 %v3881_v14 }
 0x41c   :  { %v3574_v52 = vadd.f32 %v11402_v38, %v2834_v59  ;;  %6586 = vpow2.f32 %v1541_v30  ;;  %v2472_v30 = vld [vmem:[#allocation4 + $0x100] sm:$0xff] }
 0x41d   :  { %v2562_v39 = vpop.permute.xlu1 %2561  ;;  %6588 = vrcp.f32 %v3883_v3 }
 0x41e   :  { %3639 = vst.msk [vmem:[#allocation4 + $0x50] sm:$0xff] %vm168_vm10, %v3574_v52  ;;  %v2835_v23 = vmul.f32 %v2562_v39, %v2451_v32  ;;  %4004 = vperm.xlu0 %6204, %v6575_v11   ;;  %4219 = vperm.xlu1 %6205, %v6577_v43   ;;  %6590 = vrcp.f32 %v3856_v58  ;;  %v3885_v52 = vld [vmem:[#allocation3 + $0x1e8] sm:$0xff]  ;;  %v11410_v43 = vld [vmem:[#allocation13_spill] sm:$0xff] }
 0x41f   :  { %6592 = vrcp.f32 %v3858_v60  ;;  %v2457_v58 = vld [vmem:[#allocation4 + $0x88] sm:$0xff] }
 0x420   :  { %v3575_v5 = vadd.f32 %v11405_v7, %v2835_v23  ;;  %6594 = vrcp.f32 %v3885_v52 }
 0x421   :  { %v9763_v62 = vpop.permute.xlu1 %3979 }
 0x422   :  { %3640 = vst.msk [vmem:[#allocation4 + $0x58] sm:$0xff] %vm168_vm10, %v3575_v5  ;;  %2671 = vperm.xlu0 %6204, %v11406_v27   ;;  %4229 = vperm.xlu1 %6205, %v6579_v34   ;;  %v3860_v27 = vld [vmem:[#allocation3 + $0x120] sm:$0xff] }
 0x423   :  { %6596 = vrcp.f32 %v3860_v27  ;;  %v11418_v27 = vld [vmem:[#allocation26_spill] sm:$0xff] }
 0x425   :  { %v9767_v17 = vpop.permute.xlu1 %3989  ;;  %v6585_v59 = vpop.eup %6584 }
 0x426   :  { %4014 = vperm.xlu0 %6204, %v6581_v55   ;;  %2791 = vperm.xlu1 %6205, %v11407_v41   ;;  %v6587_v38 = vpop.eup %6586 }
 0x427   :  { %v6589_v1 = vpop.eup %6588  ;;  %v2182_v23 = vmul.f32 %v6587_v38, %v2118_v19 }
 0x428   :  { %v6591_v14 = vpop.eup %6590 }
 0x429   :  { %v2572_v29 = vpop.permute.xlu1 %2571  ;;  %v6593_v3 = vpop.eup %6592 }
 0x42a   :  { %v2837_v36 = vmul.f32 %v2572_v29, %v2453_v15  ;;  %4024 = vperm.xlu0 %6204, %v6583_v37   ;;  %2801 = vperm.xlu1 %6205, %v9634_v26   ;;  %v2474_v15 = vld [vmem:[#allocation4 + $0x110] sm:$0xff]  ;;  %v3779_v29 = vld [vmem:[#allocation4 + $0x98] sm:$0xff] }
 0x42b   :  { %v3862_v37 = vld [vmem:[#allocation3 + $0x130] sm:$0xff]  ;;  %v4291_v60 = vmul.f32 %v9686_v63, %v3779_v29  ;;  %v11414_v63 = vld [vmem:[#allocation34_spill] sm:$0xff] }
 0x42c   :  { %v3577_v31 = vadd.f32 %v11408_v48, %v2837_v36  ;;  %6598 = vrcp.f32 %v3862_v37  ;;  %v3776_v37 = vld [vmem:[#allocation4 + $0x80] sm:$0xff] }
 0x42d   :  { %v2582_v32 = vpop.permute.xlu1 %2581 }
 0x42e   :  { %3642 = vst.msk [vmem:[#allocation4 + $0x68] sm:$0xff] %vm168_vm10, %v3577_v31  ;;  %v2839_v11 = vmul.f32 %v2582_v32, %v2455_v25  ;;  %2686 = vperm.xlu0 %6204, %v11409_v35   ;;  %4239 = vperm.xlu1 %6205, %v6585_v59   ;;  %v6595_v25 = vpop.eup %6594  ;;  %v9788_v31 = vld [vmem:[%s10577_s4 + $0x1] ss:$0 sm:$0xff] }
 0x430   :  { %v3579_v39 = vadd.f32 %v11410_v43, %v2839_v11  ;;  %v11413_v11 = vld [vmem:[#allocation22_spill] sm:$0xff]  ;;  %v11415_v43 = vld [vmem:[#allocation17_spill] sm:$0xff] }
 0x431   :  { %v9775_v26 = vpop.permute.xlu1 %3999 }
 0x432   :  { %3644 = vst.msk [vmem:[#allocation4 + $0x78] sm:$0xff] %vm168_vm10, %v3579_v39  ;;  %2696 = vperm.xlu0 %6204, %v11411_v10   ;;  %4249 = vperm.xlu1 %6205, %v6589_v1   ;;  %v9795_v1 = vadd.f32 %v9788_v31, %v4291_v60  ;;  %v3864_v60 = vld [vmem:[#allocation3 + $0x140] sm:$0xff] }
 0x434   :  { %vm4447_vm7 = vcmp.gt.f32.partialorder %v9795_v1, 0.0 }
 0x435   :  { %v9779_v7 = vpop.permute.xlu1 %4009  ;;  %v2310_v5 = vpop.xlane.xlu0 %2309 }
 0x436   :  { %v2374_v34 = vadd.f32 %v2310_v5, %v2182_v23  ;;  %4114 = vperm.xlu0 %6204, %v6591_v14   ;;  %2811 = vperm.xlu1 %6205, %v9538_v9   ;;  %v11416_v5 = vld [vmem:[#allocation24_spill] sm:$0xff] }
 0x438   :  { %2439 = vst.msk [vmem:[#allocation3 + $0x1f8] sm:$0xff] %vm11412_vm6, %v2374_v34  ;;  %v11417_v34 = vld [vmem:[#allocation29_spill] sm:$0xff] }
 0x439   :  { %v2667_v55 = vpop.permute.xlu1 %2666 }
 0x43a   :  { %v2856_v41 = vmul.f32 %v2667_v55, %v2472_v30  ;;  %4124 = vperm.xlu0 %6204, %v6593_v3   ;;  %2821 = vperm.xlu1 %6205, %v6587_v38   ;;  %v2461_v38 = vld [vmem:[#allocation4 + $0xa8] sm:$0xff]  ;;  %v6597_v55 = vpop.eup %6596 }
 0x43c   :  { %v3596_v36 = vadd.f32 %v9567_v20, %v2856_v41  ;;  %v2475_v20 = vld [vmem:[#allocation4 + $0x118] sm:$0xff]  ;;  %v4511_v41 = vmin.f32 %v9795_v1, 0.0 }
 0x43d   :  { %v2677_v9 = vpop.permute.xlu1 %2676  ;;  %v2592_v48 = vpop.permute.xlu0 %2591 }
 0x43e   :  { %3661 = vst.msk [vmem:[#allocation4 + $0x100] sm:$0xff] %vm168_vm10, %v3596_v36  ;;  %v2858_v59 = vmul.f32 %v2677_v9, %v2474_v15  ;;  %v2841_v32 = vmul.f32 %v2592_v48, %v2457_v58  ;;  %2706 = vperm.xlu0 %6204, %v11413_v11   ;;  %4259 = vperm.xlu1 %6205, %v6595_v25   ;;  %v3783_v15 = vld [vmem:[#allocation4 + $0xb8] sm:$0xff]  ;;  %v6599_v48 = vpop.eup %6598 }
 0x43f   :  { %v3887_v35 = vld [vmem:[#allocation3 + $0x1f8] sm:$0xff]  ;;  %v4295_v36 = vmul.f32 %v9704_v22, %v3783_v15  ;;  %v11419_v15 = vld [vmem:[#allocation19_spill] sm:$0xff] }
 0x440   :  { %6600 = vrcp.f32 %v3887_v35  ;;  %v3598_v52 = vadd.f32 %v11414_v63, %v2858_v59  ;;  %v3581_v39 = vadd.f32 %v11415_v43, %v2841_v32  ;;  %v4594_v59 = vmul.f32 1.442695, %v4511_v41  ;;  %v3778_v63 = vld [vmem:[#allocation4 + $0x90] sm:$0xff]  ;;  %v2477_v43 = vld [vmem:[#allocation4 + $0x128] sm:$0xff] }
 0x441   :  { %v2682_v19 = vpop.permute.xlu1 %2681  ;;  %v2612_v10 = vpop.permute.xlu0 %2611  ;;  %6602 = vrcp.f32 %v3864_v60  ;;  %v11421_v60 = vld [vmem:[#allocation28_spill] sm:$0xff] }
 0x442   :  { %3663 = vst.msk [vmem:[#allocation4 + $0x110] sm:$0xff] %vm168_vm10, %v3598_v52  ;;  %3646 = vst.msk [vmem:[#allocation4 + $0x88] sm:$0xff] %vm168_vm10, %v3581_v39  ;;  %v2859_v23 = vmul.f32 %v2682_v19, %v2475_v20  ;;  %v2845_v14 = vmul.f32 %v2612_v10, %v2461_v38  ;;  %2716 = vperm.xlu0 %6204, %v11416_v5   ;;  %v9814_v38 = vadd.f32 %v9788_v31, %v4295_v36  ;;  %v2465_v39 = vld [vmem:[#allocation4 + $0xc8] sm:$0xff]  ;;  %v3866_v10 = vld [vmem:[#allocation3 + $0x150] sm:$0xff] }
 0x443   :  { %6604 = vpow2.f32 %v4594_v59  ;;  %v11420_v36 = vld [vmem:[#allocation35_spill] sm:$0xff] }
 0x444   :  { %v3599_v30 = vadd.f32 %v11417_v34, %v2859_v23  ;;  %v3585_v3 = vadd.f32 %v11418_v27, %v2845_v14  ;;  %6606 = vrcp.f32 %v3866_v10  ;;  %vm4451_vm1 = vcmp.gt.f32.partialorder %v9814_v38, 0.0 }
 0x445   :  { %v9803_v58 = vpop.permute.xlu1 %4019  ;;  %v4035_v29 = vpop.permute.xlu0 %4034 }
 0x446   :  { %3664 = vst.msk [vmem:[#allocation4 + $0x118] sm:$0xff] %vm168_vm10, %v3599_v30  ;;  %3650 = vst.msk [vmem:[#allocation4 + $0xa8] sm:$0xff] %vm168_vm10, %v3585_v3  ;;  %v4288_v25 = vmul.f32 %v4035_v29, %v3776_v37  ;;  %4134 = vperm.xlu0 %6204, %v6597_v55   ;;  %v4515_v3 = vmin.f32 %v9814_v38, 0.0  ;;  %v2479_v37 = vld [vmem:[#allocation4 + $0x138] sm:$0xff] }
 0x448   :  { %v9809_v9 = vadd.f32 %v9788_v31, %v4288_v25 }
 0x449   :  { %v9811_v32 = vpop.permute.xlu1 %4029  ;;  %v4045_v11 = vpop.permute.xlu0 %4044  ;;  %v3777_v35 = vld [vmem:[#allocation4 + $0x88] sm:$0xff] }
 0x44a   :  { %v6601_v20 = vpop.eup %6600  ;;  %v4508_v22 = vmin.f32 %v9809_v9, 0.0  ;;  %4144 = vperm.xlu0 %6204, %v6599_v48   ;;  %v4290_v52 = vmul.f32 %v4045_v11, %v3778_v63  ;;  %v4289_v19 = vmul.f32 %v9680_v49, %v3777_v35  ;;  %v3780_v11 = vld [vmem:[#allocation4 + $0xa0] sm:$0xff]  ;;  %v4602_v63 = vmul.f32 1.442695, %v4515_v3 }
 0x44b   :  { %4269 = vperm.xlu1 %6205, %v6601_v20   ;;  %vm4444_vm2 = vcmp.gt.f32.partialorder %v9809_v9, 0.0 }
 0x44c   :  { %v4588_v23 = vmul.f32 1.442695, %v4508_v22  ;;  %v9819_v14 = vadd.f32 %v9788_v31, %v4290_v52  ;;  %v9822_v30 = vadd.f32 %v9788_v31, %v4289_v19 }
 0x44d   :  { %v2692_v5 = vpop.permute.xlu1 %2691  ;;  %v2632_v34 = vpop.permute.xlu0 %2631  ;;  %v3781_v27 = vld [vmem:[#allocation4 + $0xa8] sm:$0xff] }
 0x44e   :  { %v2861_v55 = vmul.f32 %v2692_v5, %v2477_v43  ;;  %v2849_v41 = vmul.f32 %v2632_v34, %v2465_v39  ;;  %2726 = vperm.xlu0 %6204, %v11419_v15   ;;  %v4293_v49 = vmul.f32 %v9700_v46, %v3781_v27  ;;  %6608 = vpow2.f32 %v4588_v23  ;;  %v11422_v39 = vld [vmem:[#allocation21_spill] sm:$0xff]  ;;  %v11423_v23 = vld [vmem:[#allocation40_spill] sm:$0xff]  ;;  %v6603_v27 = vpop.eup %6602 }
 0x44f   :  { %v4510_v29 = vmin.f32 %v9819_v14, 0.0  ;;  %v4509_v20 = vmin.f32 %v9822_v30, 0.0  ;;  %vm4446_vm13 = vcmp.gt.f32.partialorder %v9819_v14, 0.0  ;;  %vm4445_vm12 = vcmp.gt.f32.partialorder %v9822_v30, 0.0 }
 0x450   :  { %v3601_v25 = vadd.f32 %v11420_v36, %v2861_v55  ;;  %v3589_v48 = vadd.f32 %v11421_v60, %v2849_v41  ;;  %v9832_v22 = vadd.f32 %v9788_v31, %v4293_v49  ;;  %v3782_v55 = vld [vmem:[#allocation4 + $0xb0] sm:$0xff]  ;;  %v3868_v49 = vld [vmem:[#allocation3 + $0x160] sm:$0xff]  ;;  %v6605_v36 = vpop.eup %6604 }
 0x451   :  { %v2702_v59 = vpop.permute.xlu1 %2701  ;;  %v4055_v35 = vpop.permute.xlu0 %4054  ;;  %v4592_v52 = vmul.f32 1.442695, %v4510_v29  ;;  %v4590_v19 = vmul.f32 1.442695, %v4509_v20 }
 0x452   :  { %3666 = vst.msk [vmem:[#allocation4 + $0x128] sm:$0xff] %vm168_vm10, %v3601_v25  ;;  %3654 = vst.msk [vmem:[#allocation4 + $0xc8] sm:$0xff] %vm168_vm10, %v3589_v48  ;;  %v2863_v46 = vmul.f32 %v2702_v59, %v2479_v37  ;;  %v4292_v43 = vmul.f32 %v4055_v35, %v3780_v11  ;;  %2736 = vperm.xlu0 %6204, %v11422_v39   ;;  %v4513_v10 = vmin.f32 %v9832_v22, 0.0  ;;  %v3870_v25 = vld [vmem:[#allocation3 + $0x170] sm:$0xff]  ;;  %v2468_v59 = vld [vmem:[#allocation4 + $0xe0] sm:$0xff]  ;;  %v6607_v11 = vpop.eup %6606  ;;  %vm4449_vm14 = vcmp.gt.f32.partialorder %v9832_v22, 0.0 }
 0x453   :  { %6610 = vpow2.f32 %v4592_v52  ;;  %v3872_v35 = vld [vmem:[#allocation3 + $0x180] sm:$0xff]  ;;  %v3787_v39 = vld [vmem:[#allocation4 + $0xd8] sm:$0xff] }
 0x454   :  { %v3603_v5 = vadd.f32 %v11423_v23, %v2863_v46  ;;  %v9840_v34 = vadd.f32 %v9788_v31, %v4292_v43  ;;  %6612 = vpow2.f32 %v4590_v19  ;;  %v4598_v15 = vmul.f32 1.442695, %v4513_v10 }
 0x455   :  { %v9842_v3 = vpop.permute.xlu1 %4119  ;;  %v4065_v41 = vpop.permute.xlu0 %4064  ;;  %6614 = vpow2.f32 %v4602_v63  ;;  %v5701_v43 = vadd.f32 -1.0, %v6605_v36  ;;  %v4299_v10 = vmul.f32 %v9719_v12, %v3787_v39 }
 0x456   :  { %3668 = vst.msk [vmem:[#allocation4 + $0x138] sm:$0xff] %vm168_vm10, %v3603_v5  ;;  %v4512_v37 = vmin.f32 %v9840_v34, 0.0  ;;  %v4294_v29 = vmul.f32 %v4065_v41, %v3782_v55  ;;  %4154 = vperm.xlu0 %6204, %v6603_v27   ;;  %6616 = vpow2.f32 %v4598_v15  ;;  %v2481_v5 = vld [vmem:[#allocation4 + $0x148] sm:$0xff]  ;;  %v2470_v27 = vld [vmem:[#allocation4 + $0xf0] sm:$0xff]  ;;  %vm4448_vm4 = vcmp.gt.f32.partialorder %v9840_v34, 0.0 }
 0x457   :  { %6618 = vrcp.f32 %v3868_v49  ;;  %v11424_v49 = vld [vmem:[#allocation32_spill] sm:$0xff]  ;;  %v4767_v12 = vsel %vm4447_vm7, %v9795_v1, %v5701_v43  ;;  %v11426_v43 = vld [vmem:[#allocation25_spill] sm:$0xff] }
 0x458   :  { %v4596_v60 = vmul.f32 1.442695, %v4512_v37  ;;  %v9847_v48 = vadd.f32 %v9788_v31, %v4294_v29  ;;  %v6609_v46 = vpop.eup %6608 }
 0x459   :  { %v9849_v20 = vpop.permute.xlu1 %4129  ;;  %v2647_v63 = vpop.permute.xlu0 %2646  ;;  %v3785_v52 = vld [vmem:[#allocation4 + $0xc8] sm:$0xff]  ;;  %v5698_v15 = vadd.f32 -1.0, %v6609_v46 }
 0x45a   :  { %6620 = vpow2.f32 %v4596_v60  ;;  %v4514_v19 = vmin.f32 %v9847_v48, 0.0  ;;  %4164 = vperm.xlu0 %6204, %v6607_v11   ;;  %v2852_v23 = vmul.f32 %v2647_v63, %v2468_v59  ;;  %v4297_v55 = vmul.f32 %v9715_v18, %v3785_v52  ;;  %v3789_v59 = vld [vmem:[#allocation4 + $0xe8] sm:$0xff] }
 0x45b   :  { %6622 = vrcp.f32 %v3870_v25  ;;  %v11425_v18 = vld [vmem:[#allocation30_spill] sm:$0xff]  ;;  %v9862_v52 = vadd.f32 %v9788_v31, %v4299_v10  ;;  %v4301_v46 = vmul.f32 %v9730_v0, %v3789_v59  ;;  %v4764_v10 = vsel %vm4444_vm2, %v9809_v9, %v5698_v15  ;;  %v11427_v59 = vld [vmem:[#allocation27_spill] sm:$0xff] }
 0x45c   :  { %6624 = vrcp.f32 %v3872_v35  ;;  %v4600_v41 = vmul.f32 1.442695, %v4514_v19  ;;  %v3592_v37 = vadd.f32 %v11424_v49, %v2852_v23  ;;  %v9857_v60 = vadd.f32 %v9788_v31, %v4297_v55  ;;  %v2483_v19 = vld [vmem:[#allocation4 + $0x158] sm:$0xff]  ;;  %v3784_v49 = vld [vmem:[#allocation4 + $0xc0] sm:$0xff] }
 0x45d   :  { %v2712_v29 = vpop.permute.xlu1 %2711  ;;  %v2657_v36 = vpop.permute.xlu0 %2656  ;;  %vm4450_vm11 = vcmp.gt.f32.partialorder %v9847_v48, 0.0  ;;  %vm4455_vm5 = vcmp.gt.f32.partialorder %v9862_v52, 0.0 }
 0x45e   :  { %v6611_v25 = vpop.eup %6610  ;;  %6626 = vpow2.f32 %v4600_v41  ;;  %v2865_v11 = vmul.f32 %v2712_v29, %v2481_v5  ;;  %v2854_v63 = vmul.f32 %v2657_v36, %v2470_v27  ;;  %2746 = vperm.xlu0 %6204, %v11425_v18   ;;  %3657 = vst.msk [vmem:[#allocation4 + $0xe0] sm:$0xff] %vm168_vm10, %v3592_v37  ;;  %v4517_v37 = vmin.f32 %v9857_v60, 0.0 }
 0x45f   :  { %v6613_v35 = vpop.eup %6612  ;;  %v5700_v39 = vadd.f32 -1.0, %v6611_v25  ;;  %vm4453_vm3 = vcmp.gt.f32.partialorder %v9857_v60, 0.0 }
 0x460   :  { %v6615_v23 = vpop.eup %6614  ;;  %v3605_v1 = vadd.f32 %v9624_v57, %v2865_v11  ;;  %v3594_v5 = vadd.f32 %v11426_v43, %v2854_v63  ;;  %v5699_v27 = vadd.f32 -1.0, %v6613_v35  ;;  %v4606_v18 = vmul.f32 1.442695, %v4517_v37 }
 0x461   :  { %v6617_v55 = vpop.eup %6616  ;;  %v4766_v41 = vsel %vm4446_vm13, %v9819_v14, %v5700_v39  ;;  %v2722_v0 = vpop.permute.xlu1 %2721  ;;  %v4519_v14 = vmin.f32 %v9862_v52, 0.0  ;;  %v3874_v39 = vld [vmem:[#allocation3 + $0x190] sm:$0xff]  ;;  %v5705_v43 = vadd.f32 -1.0, %v6615_v23 }
 0x462   :  { %v4075_v29 = vpop.permute.xlu0 %4074  ;;  %v4821_v36 = vpack.c.bf16 %v4767_v12, %v4766_v41  ;;  %3670 = vst.msk [vmem:[#allocation4 + $0x148] sm:$0xff] %vm168_vm10, %v3605_v1  ;;  %3659 = vst.msk [vmem:[#allocation4 + $0xf0] sm:$0xff] %vm168_vm10, %v3594_v5  ;;  %v2867_v57 = vmul.f32 %v2722_v0, %v2483_v19  ;;  %2756 = vperm.xlu0 %6204, %v11427_v59   ;;  %v4765_v9 = vsel %vm4445_vm12, %v9822_v30, %v5699_v27  ;;  %v6619_v15 = vpop.eup %6618  ;;  %v3791_v12 = vld [vmem:[#allocation4 + $0xf8] sm:$0xff]  ;;  %v9886_v19 = vld [vmem:[%s10576_s5 + $0x10] sm:$0xff]  }
 0x463   :  { %v4296_v25 = vmul.f32 %v4075_v29, %v3784_v49  ;;  %v4820_v11 = vpack.c.bf16 %v4765_v9, %v4764_v10  ;;  %v5703_v63 = vadd.f32 -1.0, %v6617_v55  ;;  %v9889_v27 = vadd.f32 %v9788_v31, %v4301_v46  ;;  %v2441_v9 = vld [vmem:[#allocation4 + $0x8] sm:$0xff] }
 0x464   :  { %v6621_v35 = vpop.eup %6620  ;;  %v3607_v1 = vadd.f32 %v9620_v40, %v2867_v57  ;;  %v4303_v55 = vmul.f32 %v9734_v51, %v3791_v12  ;;  %v3786_v40 = vld [vmem:[#allocation4 + $0xd0] sm:$0xff]  ;;  %6628 = vpow2.f32 %v4606_v18  ;;  %v4610_v51 = vmul.f32 1.442695, %v4519_v14 }
 0x465   :  { %v9881_v5 = vadd.f32 %v9788_v31, %v4296_v25  ;;  %v6623_v30 = vpop.eup %6622  ;;  %v5702_v10 = vadd.f32 -1.0, %v6621_v35  ;;  %6061 = vmatprep.mubr.msk.bf16.mxu0 %vm168_vm10, %v4820_v11  ;;  %v9893_v23 = vpop.permute.xlu1 %4139  ;;  %6630 = vrcp.f32 %v3874_v39  ;;  %v4769_v37 = vsel %vm4449_vm14, %v9832_v22, %v5703_v63  ;;  %v2485_v39 = vld [vmem:[#allocation4 + $0x168] sm:$0xff] }
 0x466   :  { %v4085_v41 = vpop.permute.xlu0 %4084  ;;  %v6625_v0 = vpop.eup %6624  ;;  %3672 = vst.msk [vmem:[#allocation4 + $0x158] sm:$0xff] %vm168_vm10, %v3607_v1  ;;  %6062 = vmatmul.mubr.msk.bf16.vlgmr.msra.gmra.mrb[16].mxu0 %vm168_vm10, %v4821_v36  ;;  %4174 = vperm.xlu0 %6204, %v6619_v15   ;;  %v4521_v36 = vmin.f32 %v9889_v27, 0.0  ;;  %v9910_v15 = vadd.f32 %v9788_v31, %v4303_v55  ;;  %v4771_v14 = vsel %vm4451_vm1, %v9814_v38, %v5705_v43  ;;  %vm4457_vm15 = vcmp.gt.f32.partialorder %v9889_v27, 0.0 }
 0x467   :  { %v4516_v49 = vmin.f32 %v9881_v5, 0.0  ;;  %v4298_v46 = vmul.f32 %v4085_v41, %v3786_v40  ;;  %v4768_v29 = vsel %vm4448_vm4, %v9840_v34, %v5702_v10  ;;  %6078 = vmatpush3.bf16.msra.mxu0 %v9753_v4  ;;  %v11428_v40 = vld [vmem:[#allocation5_spill] sm:$0xff]  ;;  %vm4452_vm9 = vcmp.gt.f32.partialorder %v9881_v5, 0.0 }
 0x468   :  { %v6627_v57 = vpop.eup %6626  ;;  %v4822_v11 = vpack.c.bf16 %v4769_v37, %v4768_v29  ;;  %6095 = vmatprep.subr.bf16.mxu0 %v9886_v19  ;;  %v4614_v1 = vmul.f32 1.442695, %v4521_v36  ;;  %v4523_v55 = vmin.f32 %v9910_v15, 0.0  ;;  %v3788_v41 = vld [vmem:[#allocation4 + $0xe0] sm:$0xff]  ;;  %vm4459_vm6 = vcmp.gt.f32.partialorder %v9910_v15, 0.0 }
 0x469   :  { %v4604_v25 = vmul.f32 1.442695, %v4516_v49  ;;  %v9904_v59 = vadd.f32 %v9788_v31, %v4298_v46  ;;  %v5704_v34 = vadd.f32 -1.0, %v6627_v57  ;;  %v9912_v22 = vpop.permute.xlu1 %4149  ;;  %v3876_v29 = vld [vmem:[#allocation3 + $0x1a0] sm:$0xff] }
 0x46a   :  { %v2512_v4 = vpop.permute.xlu0 %2511  ;;  %4184 = vperm.xlu0 %6204, %v6623_v30   ;;  %6065 = vmatprep.mubr.msk.bf16.mxu0 %vm168_vm10, %v4822_v11  ;;  %v4618_v11 = vmul.f32 1.442695, %v4523_v55 }
 0x46b   :  { %6632 = vpow2.f32 %v4604_v25  ;;  %v4770_v63 = vsel %vm4450_vm11, %v9847_v48, %v5704_v34  ;;  %v4518_v18 = vmin.f32 %v9904_v59, 0.0  ;;  %v2825_v35 = vmul.f32 %v2512_v4, %v2441_v9  ;;  %v2487_v48 = vld [vmem:[#allocation4 + $0x178] sm:$0xff]  ;;  %v3878_v9 = vld [vmem:[#allocation3 + $0x1b0] sm:$0xff] }
 0x46c   :  { %6634 = vpow2.f32 %v4610_v51  ;;  %v4823_v12 = vpack.c.bf16 %v4771_v14, %v4770_v63  ;;  %v3790_v34 = vld [vmem:[#allocation4 + $0xf0] sm:$0xff]  ;;  %vm4454_vm0 = vcmp.gt.f32.partialorder %v9904_v59, 0.0 }
 0x46d   :  { %v4608_v10 = vmul.f32 1.442695, %v4518_v18  ;;  %v3565_v38 = vadd.f32 %v11428_v40, %v2825_v35  ;;  %v2732_v43 = vpop.permute.xlu1 %2731 }
 0x46e   :  { %v4095_v49 = vpop.permute.xlu0 %4094  ;;  %v2869_v30 = vmul.f32 %v2732_v43, %v2485_v39  ;;  %4194 = vperm.xlu0 %6204, %v6625_v0   ;;  %6066 = vmatmul.mubr.msk.bf16.gmra.mrb[20].mxu0 %vm168_vm10, %v4823_v12  ;;  %v6629_v51 = vpop.eup %6628 }
 0x46f   :  { %v4300_v46 = vmul.f32 %v4095_v49, %v3788_v41  ;;  %6636 = vpow2.f32 %v4608_v10  ;;  %3630 = vst.msk [vmem:[#allocation4 + $0x8] sm:$0xff] %vm168_vm10, %v3565_v38  ;;  %v6631_v25 = vpop.eup %6630  ;;  %v5707_v18 = vadd.f32 -1.0, %v6629_v51  ;;  %v11429_v41 = vld [vmem:[#allocation31_spill] sm:$0xff] }
 0x470   :  { %v3609_v37 = vadd.f32 %v9645_v28, %v2869_v30  ;;  %6638 = vpow2.f32 %v4614_v1  ;;  %v2444_v1 = vld [vmem:[#allocation4 + $0x20] sm:$0xff] }
 0x471   :  { %v9925_v57 = vadd.f32 %v9788_v31, %v4300_v46  ;;  %v2742_v36 = vpop.permute.xlu1 %2741  ;;  %6640 = vrcp.f32 %v3876_v29  ;;  %v4773_v46 = vsel %vm4453_vm3, %v9857_v60, %v5707_v18  ;;  %v9946_v29 = vld [vmem:[%s10577_s4] ss:$0 sm:$0xff] }
 0x472   :  { %v4105_v0 = vpop.permute.xlu0 %4104  ;;  %3674 = vst.msk [vmem:[#allocation4 + $0x168] sm:$0xff] %vm168_vm10, %v3609_v37  ;;  %v2871_v14 = vmul.f32 %v2742_v36, %v2487_v48  ;;  %4204 = vperm.xlu0 %6204, %v6631_v25   ;;  %6642 = vrcp.f32 %v3878_v9  ;;  %v2446_v9 = vld [vmem:[#allocation4 + $0x30] sm:$0xff] }
 0x473   :  { %v4520_v4 = vmin.f32 %v9925_v57, 0.0  ;;  %v4302_v63 = vmul.f32 %v4105_v0, %v3790_v34  ;;  %6644 = vpow2.f32 %v4618_v11  ;;  %v11430_v34 = vld [vmem:[#allocation6_spill] sm:$0xff]  ;;  %vm4456_vm8 = vcmp.gt.f32.partialorder %v9925_v57, 0.0 }
 0x474   :  { %v3611_v39 = vadd.f32 %v9642_v8, %v2871_v14 }
 0x475   :  { %v6633_v28 = vpop.eup %6632  ;;  %v4612_v35 = vmul.f32 1.442695, %v4520_v4  ;;  %v9931_v12 = vadd.f32 %v9788_v31, %v4302_v63  ;;  %v9933_v40 = vpop.permute.xlu1 %4159  ;;  %v3763_v31 = vld [vmem:[#allocation4 + $0x18] sm:$0xff]  ;;  %v2489_v63 = vld [vmem:[#allocation4 + $0x188] sm:$0xff] }
 0x476   :  { %v6635_v55 = vpop.eup %6634  ;;  %v5706_v10 = vadd.f32 -1.0, %v6633_v28  ;;  %v2527_v38 = vpop.permute.xlu0 %2526  ;;  %3676 = vst.msk [vmem:[#allocation4 + $0x178] sm:$0xff] %vm168_vm10, %v3611_v39  ;;  %2766 = vperm.xlu0 %6204, %v11429_v41   ;;  %v3761_v8 = vld [vmem:[#allocation4 + $0x8] sm:$0xff]  ;;  %v4275_v37 = vmul.f32 %v9744_v2, %v3763_v31 }
 0x477   :  { %6646 = vpow2.f32 %v4612_v35  ;;  %v4522_v43 = vmin.f32 %v9931_v12, 0.0  ;;  %v2828_v30 = vmul.f32 %v2527_v38, %v2444_v1  ;;  %v4273_v48 = vmul.f32 %v9741_v6, %v3761_v8  ;;  %v11431_v1 = vld [vmem:[#allocation9_spill] sm:$0xff] }
 0x478   :  { %v4772_v49 = vsel %vm4452_vm9, %v9881_v5, %v5706_v10  ;;  %v5709_v51 = vadd.f32 -1.0, %v6635_v55  ;;  %v9962_v28 = vadd.f32 %v9946_v29, %v4275_v37  ;;  %v3880_v8 = vld [vmem:[#allocation3 + $0x1c0] sm:$0xff]  ;;  %vm4458_vm7 = vcmp.gt.f32.partialorder %v9931_v12, 0.0 }
 0x479   :  { %v4616_v25 = vmul.f32 1.442695, %v4522_v43  ;;  %v4824_v11 = vpack.c.bf16 %v4773_v46, %v4772_v49  ;;  %v6637_v36 = vpop.eup %6636  ;;  %v3568_v0 = vadd.f32 %v11430_v34, %v2828_v30  ;;  %v9950_v5 = vpop.permute.xlu1 %4169  ;;  %v9953_v60 = vadd.f32 %v9946_v29, %v4273_v48  ;;  %v3765_v49 = vld [vmem:[#allocation4 + $0x28] sm:$0xff] }
 0x47a   :  { %v2537_v4 = vpop.permute.xlu0 %2536  ;;  %v5708_v6 = vadd.f32 -1.0, %v6637_v36  ;;  %2776 = vperm.xlu0 %6204, %v9584_v24   ;;  %v6639_v14 = vpop.eup %6638  ;;  %v4775_v18 = vsel %vm4455_vm5, %v9862_v52, %v5709_v51  ;;  %v3760_v52 = vld [vmem:[#allocation4] sm:$0xff]  ;;  %v4277_v51 = vmul.f32 %v9763_v62, %v3765_v49  ;;  %v4495_v34 = vmin.f32 %v9962_v28, 0.0 }
 0x47b   :  { %6648 = vpow2.f32 %v4616_v25  ;;  %6069 = vmatprep.mubr.msk.bf16.mxu0 %vm168_vm10, %v4824_v11  ;;  %3633 = vst.msk [vmem:[#allocation4 + $0x20] sm:$0xff] %vm168_vm10, %v3568_v0  ;;  %v2830_v2 = vmul.f32 %v2537_v4, %v2446_v9  ;;  %v4493_v24 = vmin.f32 %v9953_v60, 0.0  ;;  %v6641_v39 = vpop.eup %6640  ;;  %v5711_v31 = vadd.f32 -1.0, %v6639_v14  ;;  %v2491_v9 = vld [vmem:[#allocation4 + $0x198] sm:$0xff] }
 0x47c   :  { %v4774_v35 = vsel %vm4454_vm0, %v9904_v59, %v5708_v6  ;;  %v6643_v41 = vpop.eup %6642  ;;  %6650 = vrcp.f32 %v3880_v8  ;;  %vm4429_vm13 = vcmp.gt.f32.partialorder %v9953_v60, 0.0  ;;  %vm4431_vm12 = vcmp.gt.f32.partialorder %v9962_v28, 0.0 }
 0x47d   :  { %v3570_v55 = vadd.f32 %v11431_v1, %v2830_v2  ;;  %v9967_v10 = vpop.f32.mrb[44].mxu1  ;;  %v2752_v38 = vpop.permute.xlu1 %2751  ;;  %v4825_v43 = vpack.c.bf16 %v4775_v18, %v4774_v35  ;;  %v4558_v11 = vmul.f32 1.442695, %v4493_v24  ;;  %v3882_v2 = vld [vmem:[#allocation3 + $0x1d0] sm:$0xff]  ;;  %v9988_v24 = vadd.f32 %v9946_v29, %v4277_v51 }
 0x47e   :  { %v2873_v30 = vmul.f32 %v2752_v38, %v2489_v63  ;;  %v3955_v46 = vpop.permute.xlu0 %3954  ;;  %v9969_v48 = vpop.f32.mrb[45].mxu1  ;;  %4214 = vperm.xlu0 %6204, %v6641_v39   ;;  %v4777_v63 = vsel %vm4457_vm15, %v9889_v27, %v5711_v31  ;;  %v2449_v31 = vld [vmem:[#allocation4 + $0x48] sm:$0xff] }
 0x47f   :  { %v6645_v59 = vpop.eup %6644  ;;  %3635 = vst.msk [vmem:[#allocation4 + $0x30] sm:$0xff] %vm168_vm10, %v3570_v55  ;;  %v4272_v37 = vmul.f32 %v3955_v46, %v3760_v52  ;;  %6070 = vmatmul.mubr.msk.bf16.gmra.mrb[24].mxu0 %vm168_vm10, %v4825_v43  ;;  %v9974_v25 = vpop.f32.mrb[46].mxu1  ;;  %v3762_v55 = vld [vmem:[#allocation4 + $0x10] sm:$0xff]  ;;  %6652 = vpow2.f32 %v4558_v11  ;;  %v4562_v43 = vmul.f32 1.442695, %v4495_v34  ;;  %vm4433_vm4 = vcmp.gt.f32.partialorder %v9988_v24, 0.0 }
 0x480   :  { %v3613_v0 = vadd.f32 %v9664_v54, %v2873_v30  ;;  %v9978_v4 = vpop.f32.mrb[47].mxu1  ;;  %v5713_v18 = vadd.f32 -1.0, %v6645_v59  ;;  %6654 = vrcp.f32 %v3882_v2 }
 0x481   :  { %v6647_v36 = vpop.eup %6646  ;;  %v9982_v6 = vadd.f32 %v9946_v29, %v4272_v37  ;;  %v2762_v14 = vpop.permute.xlu1 %2761  ;;  %v4497_v37 = vmin.f32 %v9988_v24, 0.0 }
 0x482   :  { %v5710_v62 = vadd.f32 -1.0, %v6647_v36  ;;  %3678 = vst.msk [vmem:[#allocation4 + $0x188] sm:$0xff] %vm168_vm10, %v3613_v0  ;;  %v2875_v35 = vmul.f32 %v2762_v14, %v2491_v9  ;;  %v3965_v54 = vpop.permute.xlu0 %3964  ;;  %4224 = vperm.xlu0 %6204, %v6643_v41   ;;  %v3767_v41 = vld [vmem:[#allocation4 + $0x38] sm:$0xff]  ;;  %v11432_v36 = vld [vmem:[#allocation10_spill] sm:$0xff]  ;;  %v3764_v14 = vld [vmem:[#allocation4 + $0x20] sm:$0xff] }
 0x483   :  { %v4492_v1 = vmin.f32 %v9982_v6, 0.0  ;;  %v4274_v8 = vmul.f32 %v3965_v54, %v3762_v55  ;;  %v4279_v59 = vmul.f32 %v9767_v17, %v3767_v41  ;;  %vm4428_vm2 = vcmp.gt.f32.partialorder %v9982_v6, 0.0 }
 0x484   :  { %v4776_v39 = vsel %vm4456_vm8, %v9925_v57, %v5710_v62  ;;  %v3615_v27 = vadd.f32 %v9660_v42, %v2875_v35  ;;  %v4779_v57 = vsel %vm4459_vm6, %v9910_v15, %v5713_v18 }
 0x485   :  { %v6649_v38 = vpop.eup %6648  ;;  %v4826_v49 = vpack.c.bf16 %v4777_v63, %v4776_v39  ;;  %v4556_v52 = vmul.f32 1.442695, %v4492_v1  ;;  %v9994_v46 = vpop.permute.xlu1 %4179  ;;  %v10001_v42 = vadd.f32 %v9946_v29, %v4274_v8  ;;  %v10012_v62 = vadd.f32 %v9946_v29, %v4279_v59 }
 0x486   :  { %v5712_v30 = vadd.f32 -1.0, %v6649_v38  ;;  %3680 = vst.msk [vmem:[#allocation4 + $0x198] sm:$0xff] %vm168_vm10, %v3615_v27  ;;  %v2552_v51 = vpop.permute.xlu0 %2551  ;;  %2786 = vperm.xlu0 %6204, %v9609_v56   ;;  %v4566_v63 = vmul.f32 1.442695, %v4497_v37  ;;  %v3766_v55 = vld [vmem:[#allocation4 + $0x30] sm:$0xff] }
 0x487   :  { %6073 = vmatprep.mubr.msk.bf16.mxu0 %vm168_vm10, %v4826_v49  ;;  %6656 = vpow2.f32 %v4556_v52  ;;  %v2833_v15 = vmul.f32 %v2552_v51, %v2449_v31  ;;  %v4494_v17 = vmin.f32 %v10001_v42, 0.0  ;;  %v4499_v1 = vmin.f32 %v10012_v62, 0.0  ;;  %v3886_v51 = vld [vmem:[#allocation3 + $0x1f0] sm:$0xff] }
 0x488   :  { %v4778_v9 = vsel %vm4458_vm7, %v9931_v12, %v5712_v30  ;;  %6658 = vpow2.f32 %v4562_v43  ;;  %v6651_v12 = vpop.eup %6650  ;;  %v3884_v43 = vld [vmem:[#allocation3 + $0x1e0] sm:$0xff]  ;;  %vm4430_vm14 = vcmp.gt.f32.partialorder %v10001_v42, 0.0  ;;  %vm4435_vm9 = vcmp.gt.f32.partialorder %v10012_v62, 0.0 }
 0x489   :  { %v4827_v11 = vpack.c.bf16 %v4779_v57, %v4778_v9  ;;  %v3573_v34 = vadd.f32 %v11432_v36, %v2833_v15  ;;  %v10009_v0 = vpop.permute.xlu1 %4189  ;;  %v4560_v56 = vmul.f32 1.442695, %v4494_v17  ;;  %v6653_v35 = vpop.eup %6652  ;;  %v2452_v57 = vld [vmem:[#allocation4 + $0x60] sm:$0xff]  ;;  %v4570_v37 = vmul.f32 1.442695, %v4499_v1  ;;  %v3771_v9 = vld [vmem:[#allocation4 + $0x58] sm:$0xff] }
 0x48a   :  { %v3975_v2 = vpop.permute.xlu0 %3974  ;;  %2796 = vperm.xlu0 %6204, %v9627_v33   ;;  %v6655_v33 = vpop.eup %6654  ;;  %v5683_v31 = vadd.f32 -1.0, %v6653_v35  ;;  %v4283_v36 = vmul.f32 %v9779_v7, %v3771_v9 }
 0x48b   :  { %6074 = vmatmul.mubr.msk.bf16.gmra.mrb[28].mxu0 %vm168_vm10, %v4827_v11  ;;  %3638 = vst.msk [vmem:[#allocation4 + $0x48] sm:$0xff] %vm168_vm10, %v3573_v34  ;;  %v4276_v18 = vmul.f32 %v3975_v2, %v3764_v14  ;;  %6660 = vpow2.f32 %v4560_v56  ;;  %v2493_v2 = vld [vmem:[#allocation4 + $0x1a8] sm:$0xff] }
 0x48c   :  { %6662 = vpow2.f32 %v4566_v63  ;;  %v4749_v63 = vsel %vm4429_vm13, %v9953_v60, %v5683_v31  ;;  %v2495_v60 = vld [vmem:[#allocation4 + $0x1b8] sm:$0xff]  ;;  %v10041_v31 = vadd.f32 %v9946_v29, %v4283_v36  ;;  %v3768_v36 = vld [vmem:[#allocation4 + $0x40] sm:$0xff] }
 0x48d   :  { %v10018_v54 = vadd.f32 %v9946_v29, %v4276_v18  ;;  %v10020_v39 = vpop.permute.xlu1 %4199  ;;  %6664 = vrcp.f32 %v3884_v43 }
 0x48e   :  { %v3985_v38 = vpop.permute.xlu0 %3984  ;;  %4234 = vperm.xlu0 %6204, %v6651_v12   ;;  %v2454_v12 = vld [vmem:[#allocation4 + $0x70] sm:$0xff]  ;;  %vm4439_vm15 = vcmp.gt.f32.partialorder %v10041_v31, 0.0 }
 0x48f   :  { %v4496_v27 = vmin.f32 %v10018_v54, 0.0  ;;  %v4278_v8 = vmul.f32 %v3985_v38, %v3766_v55  ;;  %vm4432_vm1 = vcmp.gt.f32.partialorder %v10018_v54, 0.0 }
 0x491   :  { %v6657_v49 = vpop.eup %6656  ;;  %v4564_v41 = vmul.f32 1.442695, %v4496_v27  ;;  %v10025_v30 = vadd.f32 %v9946_v29, %v4278_v8  ;;  %v10027_v52 = vpop.permute.xlu1 %4209 }
 0x492   :  { %v6659_v59 = vpop.eup %6658  ;;  %v5682_v15 = vadd.f32 -1.0, %v6657_v49  ;;  %v2567_v17 = vpop.permute.xlu0 %2566  ;;  %4244 = vperm.xlu0 %6204, %v6655_v33   ;;  %v3769_v11 = vld [vmem:[#allocation4 + $0x48] sm:$0xff] }
 0x493   :  { %6666 = vpow2.f32 %v4564_v41  ;;  %v4498_v56 = vmin.f32 %v10025_v30, 0.0  ;;  %v2836_v14 = vmul.f32 %v2567_v17, %v2452_v57  ;;  %v5685_v18 = vadd.f32 -1.0, %v6659_v59  ;;  %v11433_v33 = vld [vmem:[#allocation18_spill] sm:$0xff] }
 0x494   :  { %v4748_v34 = vsel %vm4428_vm2, %v9982_v6, %v5682_v15  ;;  %6668 = vrcp.f32 %v3886_v51  ;;  %v4281_v7 = vmul.f32 %v9775_v26, %v3769_v11  ;;  %v11434_v51 = vld [vmem:[#allocation12_spill] sm:$0xff]  ;;  %v3773_v15 = vld [vmem:[#allocation4 + $0x68] sm:$0xff]  ;;  %vm4434_vm11 = vcmp.gt.f32.partialorder %v10025_v30, 0.0 }
 0x495   :  { %v2772_v35 = vpop.permute.xlu1 %2771  ;;  %v4812_v1 = vpack.c.bf16 %v4749_v63, %v4748_v34  ;;  %v6661_v55 = vpop.eup %6660  ;;  %6670 = vpow2.f32 %v4570_v37  ;;  %v4568_v38 = vmul.f32 1.442695, %v4498_v56  ;;  %v3576_v43 = vadd.f32 %v11433_v33, %v2836_v14  ;;  %v10056_v56 = vld [vmem:[%s10576_s5 + $0x18] sm:$0xff]  }
 0x496   :  { %v2577_v27 = vpop.permute.xlu0 %2576  ;;  %2806 = vperm.xlu0 %6204, %v9648_v53   ;;  %v5684_v6 = vadd.f32 -1.0, %v6661_v55  ;;  %v2877_v8 = vmul.f32 %v2772_v35, %v2493_v2  ;;  %v10046_v26 = vadd.f32 %v9946_v29, %v4281_v7  ;;  %v6663_v53 = vpop.eup %6662  ;;  %v4751_v41 = vsel %vm4431_vm12, %v9962_v28, %v5685_v18  ;;  %v3775_v63 = vld [vmem:[#allocation4 + $0x78] sm:$0xff] }
 0x497   :  { %v2838_v49 = vmul.f32 %v2577_v27, %v2454_v12  ;;  %6079 = vmatprep.mubr.msk.bf16.mxu0 %vm168_vm10, %v4812_v1  ;;  %6672 = vpow2.f32 %v4568_v38  ;;  %3641 = vst.msk [vmem:[#allocation4 + $0x60] sm:$0xff] %vm168_vm10, %v3576_v43  ;;  %v4285_v28 = vmul.f32 %v9803_v58, %v3773_v15  ;;  %v6665_v14 = vpop.eup %6664  ;;  %v5687_v2 = vadd.f32 -1.0, %v6663_v53  ;;  %v3770_v38 = vld [vmem:[#allocation4 + $0x50] sm:$0xff] }
 0x498   :  { %v4750_v57 = vsel %vm4430_vm14, %v10001_v42, %v5684_v6  ;;  %v3617_v59 = vadd.f32 %v9678_v61, %v2877_v8  ;;  %v4501_v42 = vmin.f32 %v10046_v26, 0.0  ;;  %v4503_v12 = vmin.f32 %v10041_v31, 0.0 }
 0x499   :  { %v3578_v37 = vadd.f32 %v11434_v51, %v2838_v49  ;;  %v2782_v9 = vpop.permute.xlu1 %2781  ;;  %v4813_v17 = vpack.c.bf16 %v4751_v41, %v4750_v57  ;;  %v4287_v35 = vmul.f32 %v9811_v32, %v3775_v63  ;;  %v10076_v32 = vadd.f32 %v9946_v29, %v4285_v28 }
 0x49a   :  { %v2879_v11 = vmul.f32 %v2782_v9, %v2495_v60  ;;  %v3995_v34 = vpop.permute.xlu0 %3994  ;;  %2816 = vperm.xlu0 %6204, %v9654_v47   ;;  %3682 = vst.msk [vmem:[#allocation4 + $0x1a8] sm:$0xff] %vm168_vm10, %v3617_v59  ;;  %v4574_v7 = vmul.f32 1.442695, %v4501_v42  ;;  %v4753_v6 = vsel %vm4433_vm4, %v9988_v24, %v5687_v2  ;;  %v4578_v8 = vmul.f32 1.442695, %v4503_v12  ;;  %v2473_v59 = vld [vmem:[#allocation4 + $0x108] sm:$0xff] }
 0x49b   :  { %3643 = vst.msk [vmem:[#allocation4 + $0x70] sm:$0xff] %vm168_vm10, %v3578_v37  ;;  %v4280_v61 = vmul.f32 %v3995_v34, %v3768_v36  ;;  %6080 = vmatmul.mubr.msk.bf16.vlgmr.msra.gmra.mrb[16].mxu0 %vm168_vm10, %v4813_v17  ;;  %v10083_v60 = vadd.f32 %v9946_v29, %v4287_v35  ;;  %v4505_v24 = vmin.f32 %v10076_v32, 0.0  ;;  %vm4437_vm3 = vcmp.gt.f32.partialorder %v10046_v26, 0.0 }
 0x49c   :  { %v3619_v47 = vadd.f32 %v9674_v21, %v2879_v11  ;;  %6096 = vmatpush3.bf16.msra.mxu0 %v9886_v19  ;;  %6674 = vpow2.f32 %v4574_v7  ;;  %vm4441_vm8 = vcmp.gt.f32.partialorder %v10076_v32, 0.0 }
 0x49d   :  { %v6667_v18 = vpop.eup %6666  ;;  %v10067_v58 = vadd.f32 %v9946_v29, %v4280_v61  ;;  %v10069_v1 = vpop.permute.xlu1 %4219  ;;  %6113 = vmatprep.subr.bf16.mxu0 %v10056_v56  ;;  %v4507_v34 = vmin.f32 %v10083_v60, 0.0  ;;  %v4582_v35 = vmul.f32 1.442695, %v4505_v24  ;;  %vm4443_vm7 = vcmp.gt.f32.partialorder %v10083_v60, 0.0 }
 0x49e   :  { %v5686_v55 = vadd.f32 -1.0, %v6667_v18  ;;  %3684 = vst.msk [vmem:[#allocation4 + $0x1b8] sm:$0xff] %vm168_vm10, %v3619_v47  ;;  %v4005_v21 = vpop.permute.xlu0 %4004  ;;  %4254 = vperm.xlu0 %6204, %v6665_v14   ;;  %v6669_v33 = vpop.eup %6668  ;;  %v11435_v14 = vld [vmem:[#allocation36_spill] sm:$0xff]  ;;  %v3772_v63 = vld [vmem:[#allocation4 + $0x60] sm:$0xff] }
 0x49f   :  { %v4500_v43 = vmin.f32 %v10067_v58, 0.0  ;;  %v4282_v27 = vmul.f32 %v4005_v21, %v3770_v38  ;;  %v6671_v19 = vpop.eup %6670  ;;  %v4586_v21 = vmul.f32 1.442695, %v4507_v34  ;;  %vm4436_vm5 = vcmp.gt.f32.partialorder %v10067_v58, 0.0 }
 0x4a0   :  { %v4752_v49 = vsel %vm4432_vm1, %v10018_v54, %v5686_v55  ;;  %v5689_v15 = vadd.f32 -1.0, %v6671_v19  ;;  %v2497_v54 = vld [vmem:[#allocation4 + $0x1c8] sm:$0xff]  ;;  %v2499_v55 = vld [vmem:[#allocation4 + $0x1d8] sm:$0xff] }
 0x4a1   :  { %v4572_v53 = vmul.f32 1.442695, %v4500_v43  ;;  %v10086_v41 = vadd.f32 %v9946_v29, %v4282_v27  ;;  %v10088_v57 = vpop.permute.xlu1 %4229  ;;  %v4814_v51 = vpack.c.bf16 %v4753_v6, %v4752_v49  ;;  %v6673_v37 = vpop.eup %6672 }
 0x4a2   :  { %v2672_v9 = vpop.permute.xlu0 %2671  ;;  %4264 = vperm.xlu0 %6204, %v6669_v33   ;;  %v5688_v17 = vadd.f32 -1.0, %v6673_v37  ;;  %v4755_v18 = vsel %vm4435_vm9, %v10012_v62, %v5689_v15  ;;  %v3774_v19 = vld [vmem:[#allocation4 + $0x70] sm:$0xff] }
 0x4a3   :  { %6676 = vpow2.f32 %v4572_v53  ;;  %6083 = vmatprep.mubr.msk.bf16.mxu0 %vm168_vm10, %v4814_v51  ;;  %v4502_v11 = vmin.f32 %v10086_v41, 0.0  ;;  %v2857_v36 = vmul.f32 %v2672_v9, %v2473_v59  ;;  %v2476_v53 = vld [vmem:[#allocation4 + $0x120] sm:$0xff]  ;;  %vm4438_vm0 = vcmp.gt.f32.partialorder %v10086_v41, 0.0 }
 0x4a4   :  { %6678 = vpow2.f32 %v4578_v8  ;;  %v4754_v28 = vsel %vm4434_vm11, %v10025_v30, %v5688_v17 }
 0x4a5   :  { %v2792_v61 = vpop.permute.xlu1 %2791  ;;  %v4576_v42 = vmul.f32 1.442695, %v4502_v11  ;;  %v3597_v2 = vadd.f32 %v11435_v14, %v2857_v36  ;;  %v4815_v30 = vpack.c.bf16 %v4755_v18, %v4754_v28  ;;  %v3795_v11 = vld [vmem:[#allocation4 + $0x118] sm:$0xff] }
 0x4a6   :  { %v2881_v12 = vmul.f32 %v2792_v61, %v2497_v54  ;;  %v4015_v47 = vpop.permute.xlu0 %4014  ;;  %v6675_v27 = vpop.eup %6674  ;;  %v2478_v61 = vld [vmem:[#allocation4 + $0x130] sm:$0xff] }
 0x4a7   :  { %v4284_v7 = vmul.f32 %v4015_v47, %v3772_v63  ;;  %6680 = vpow2.f32 %v4576_v42  ;;  %3662 = vst.msk [vmem:[#allocation4 + $0x108] sm:$0xff] %vm168_vm10, %v3597_v2  ;;  %6084 = vmatmul.mubr.msk.bf16.gmra.mrb[20].mxu0 %vm168_vm10, %v4815_v30  ;;  %v5691_v59 = vadd.f32 -1.0, %v6675_v27  ;;  %v10124_v2 = vld [vmem:[%s10577_s4 + $0x2] ss:$0 sm:$0xff]  ;;  %v2501_v30 = vld [vmem:[#allocation4 + $0x1e8] sm:$0xff] }
 0x4a8   :  { %v3621_v38 = vadd.f32 %v9690_v44, %v2881_v12  ;;  %6682 = vpow2.f32 %v4582_v35  ;;  %v11436_v63 = vld [vmem:[#allocation33_spill] sm:$0xff] }
 0x4a9   :  { %v10102_v33 = vadd.f32 %v9946_v29, %v4284_v7  ;;  %v2802_v43 = vpop.permute.xlu1 %2801  ;;  %6684 = vpow2.f32 %v4586_v21  ;;  %v4757_v42 = vsel %vm4437_vm3, %v10046_v26, %v5691_v59 }
 0x4aa   :  { %3686 = vst.msk [vmem:[#allocation4 + $0x1c8] sm:$0xff] %vm168_vm10, %v3621_v38  ;;  %v2883_v62 = vmul.f32 %v2802_v43, %v2499_v55  ;;  %v4025_v6 = vpop.permute.xlu0 %4024 }
 0x4ab   :  { %v4504_v8 = vmin.f32 %v10102_v33, 0.0  ;;  %v4286_v49 = vmul.f32 %v4025_v6, %v3774_v19  ;;  %vm4440_vm6 = vcmp.gt.f32.partialorder %v10102_v33, 0.0 }
 0x4ac   :  { %v3623_v44 = vadd.f32 %v9688_v16, %v2883_v62  ;;  %v11437_v62 = vld [vmem:[#allocation38_spill] sm:$0xff] }
 0x4ad   :  { %v6677_v51 = vpop.eup %6676  ;;  %v4580_v37 = vmul.f32 1.442695, %v4504_v8  ;;  %v10109_v9 = vadd.f32 %v9946_v29, %v4286_v49  ;;  %v10111_v15 = vpop.permute.xlu1 %4239  ;;  %v4307_v29 = vmul.f32 %v9849_v20, %v3795_v11  ;;  %v3792_v49 = vld [vmem:[#allocation4 + $0x100] sm:$0xff]  ;;  %v2503_v11 = vld [vmem:[#allocation4 + $0x1f8] sm:$0xff] }
 0x4ae   :  { %v5690_v24 = vadd.f32 -1.0, %v6677_v51  ;;  %3688 = vst.msk [vmem:[#allocation4 + $0x1d8] sm:$0xff] %vm168_vm10, %v3623_v44  ;;  %v2687_v17 = vpop.permute.xlu0 %2686  ;;  %v6679_v54 = vpop.eup %6678  ;;  %v3793_v34 = vld [vmem:[#allocation4 + $0x108] sm:$0xff] }
 0x4af   :  { %6686 = vpow2.f32 %v4580_v37  ;;  %v4506_v16 = vmin.f32 %v10109_v9, 0.0  ;;  %v2860_v36 = vmul.f32 %v2687_v17, %v2476_v53  ;;  %v4305_v14 = vmul.f32 %v9842_v3, %v3793_v34 }
 0x4b0   :  { %v4756_v28 = vsel %vm4436_vm5, %v10067_v58, %v5690_v24  ;;  %v5693_v20 = vadd.f32 -1.0, %v6679_v54  ;;  %v10135_v38 = vadd.f32 %v10124_v2, %v4307_v29  ;;  %vm4442_vm2 = vcmp.gt.f32.partialorder %v10109_v9, 0.0 }
 0x4b1   :  { %v4584_v12 = vmul.f32 1.442695, %v4506_v16  ;;  %v3600_v47 = vadd.f32 %v11436_v63, %v2860_v36  ;;  %v10127_v18 = vpop.permute.xlu1 %4249  ;;  %v4816_v35 = vpack.c.bf16 %v4757_v42, %v4756_v28  ;;  %v6681_v7 = vpop.eup %6680  ;;  %v10130_v58 = vadd.f32 %v10124_v2, %v4305_v14 }
 0x4b2   :  { %v2697_v55 = vpop.permute.xlu0 %2696  ;;  %v5692_v26 = vadd.f32 -1.0, %v6681_v7  ;;  %v6683_v43 = vpop.eup %6682  ;;  %v4759_v8 = vsel %vm4439_vm15, %v10041_v31, %v5693_v20  ;;  %v4527_v54 = vmin.f32 %v10135_v38, 0.0  ;;  %v2480_v20 = vld [vmem:[#allocation4 + $0x140] sm:$0xff]  ;;  %vm4463_vm14 = vcmp.gt.f32.partialorder %v10135_v38, 0.0 }
 0x4b3   :  { %6688 = vpow2.f32 %v4584_v12  ;;  %3665 = vst.msk [vmem:[#allocation4 + $0x120] sm:$0xff] %vm168_vm10, %v3600_v47  ;;  %v2862_v3 = vmul.f32 %v2697_v55, %v2478_v61  ;;  %6087 = vmatprep.mubr.msk.bf16.mxu0 %vm168_vm10, %v4816_v35  ;;  %v4525_v21 = vmin.f32 %v10130_v58, 0.0  ;;  %v6685_v53 = vpop.eup %6684  ;;  %v5695_v17 = vadd.f32 -1.0, %v6683_v43  ;;  %v3794_v12 = vld [vmem:[#allocation4 + $0x110] sm:$0xff] }
 0x4b4   :  { %v4758_v27 = vsel %vm4438_vm0, %v10086_v41, %v5692_v26  ;;  %v3797_v41 = vld [vmem:[#allocation4 + $0x128] sm:$0xff]  ;;  %v5697_v29 = vadd.f32 -1.0, %v6685_v53  ;;  %v4626_v47 = vmul.f32 1.442695, %v4527_v54  ;;  %vm4461_vm12 = vcmp.gt.f32.partialorder %v10130_v58, 0.0 }
 0x4b5   :  { %v3602_v19 = vadd.f32 %v11437_v62, %v2862_v3  ;;  %v2812_v6 = vpop.permute.xlu1 %2811  ;;  %v4817_v37 = vpack.c.bf16 %v4759_v8, %v4758_v27  ;;  %v4622_v24 = vmul.f32 1.442695, %v4525_v21  ;;  %v4309_v28 = vmul.f32 %v9893_v23, %v3797_v41 }
 0x4b6   :  { %v4115_v44 = vpop.permute.xlu0 %4114  ;;  %v2885_v59 = vmul.f32 %v2812_v6, %v2501_v30  ;;  %v4761_v63 = vsel %vm4441_vm8, %v10076_v32, %v5695_v17  ;;  %v4763_v30 = vsel %vm4443_vm7, %v10083_v60, %v5697_v29  ;;  %v2482_v6 = vld [vmem:[#allocation4 + $0x150] sm:$0xff] }
 0x4b7   :  { %3667 = vst.msk [vmem:[#allocation4 + $0x130] sm:$0xff] %vm168_vm10, %v3602_v19  ;;  %v4304_v51 = vmul.f32 %v4115_v44, %v3792_v49  ;;  %6088 = vmatmul.mubr.msk.bf16.gmra.mrb[24].mxu0 %vm168_vm10, %v4817_v37  ;;  %6690 = vpow2.f32 %v4622_v24  ;;  %v10164_v32 = vadd.f32 %v10124_v2, %v4309_v28 }
 0x4b8   :  { %v3625_v36 = vadd.f32 %v9978_v4, %v2885_v59 }
 0x4b9   :  { %v6687_v16 = vpop.eup %6686  ;;  %v10147_v34 = vadd.f32 %v10124_v2, %v4304_v51  ;;  %v2822_v31 = vpop.permute.xlu1 %2821  ;;  %v4529_v59 = vmin.f32 %v10164_v32, 0.0  ;;  %vm4465_vm1 = vcmp.gt.f32.partialorder %v10164_v32, 0.0 }
 0x4ba   :  { %v5694_v61 = vadd.f32 -1.0, %v6687_v16  ;;  %v4125_v42 = vpop.permute.xlu0 %4124  ;;  %3690 = vst.msk [vmem:[#allocation4 + $0x1e8] sm:$0xff] %vm168_vm10, %v3625_v36  ;;  %v2887_v4 = vmul.f32 %v2822_v31, %v2503_v11  ;;  %v3796_v24 = vld [vmem:[#allocation4 + $0x120] sm:$0xff]  ;;  %v3801_v36 = vld [vmem:[#allocation4 + $0x148] sm:$0xff] }
 0x4bb   :  { %v4524_v14 = vmin.f32 %v10147_v34, 0.0  ;;  %v4306_v7 = vmul.f32 %v4125_v42, %v3794_v12  ;;  %v4313_v28 = vmul.f32 %v9933_v40, %v3801_v36  ;;  %vm4460_vm13 = vcmp.gt.f32.partialorder %v10147_v34, 0.0 }
 0x4bc   :  { %v4760_v35 = vsel %vm4440_vm6, %v10102_v33, %v5694_v61  ;;  %v3627_v26 = vadd.f32 %v9974_v25, %v2887_v4  ;;  %v3799_v33 = vld [vmem:[#allocation4 + $0x138] sm:$0xff] }
 0x4bd   :  { %v6689_v55 = vpop.eup %6688  ;;  %v4620_v23 = vmul.f32 1.442695, %v4524_v14  ;;  %v4818_v3 = vpack.c.bf16 %v4761_v63, %v4760_v35  ;;  %v10161_v43 = vadd.f32 %v10124_v2, %v4306_v7  ;;  %v4311_v25 = vmul.f32 %v9912_v22, %v3799_v33  ;;  %v2486_v33 = vld [vmem:[#allocation4 + $0x170] sm:$0xff] }
 0x4be   :  { %v5696_v21 = vadd.f32 -1.0, %v6689_v55  ;;  %v2707_v27 = vpop.permute.xlu0 %2706  ;;  %3692 = vst.msk [vmem:[#allocation4 + $0x1f8] sm:$0xff] %vm168_vm10, %v3627_v26  ;;  %v3798_v14 = vld [vmem:[#allocation4 + $0x130] sm:$0xff]  ;;  %v10192_v26 = vadd.f32 %v10124_v2, %v4313_v28 }
 0x4bf   :  { %6692 = vpow2.f32 %v4620_v23  ;;  %v2864_v62 = vmul.f32 %v2707_v27, %v2480_v20  ;;  %6091 = vmatprep.mubr.msk.bf16.mxu0 %vm168_vm10, %v4818_v3  ;;  %v4526_v19 = vmin.f32 %v10161_v43, 0.0  ;;  %v10177_v37 = vadd.f32 %v10124_v2, %v4311_v25  ;;  %v3803_v20 = vld [vmem:[#allocation4 + $0x158] sm:$0xff] }
 0x4c0   :  { %6694 = vpow2.f32 %v4626_v47  ;;  %v4762_v60 = vsel %vm4442_vm2, %v10109_v9, %v5696_v21  ;;  %v2484_v47 = vld [vmem:[#allocation4 + $0x160] sm:$0xff]  ;;  %v4315_v3 = vmul.f32 %v9950_v5, %v3803_v20  ;;  %vm4462_vm4 = vcmp.gt.f32.partialorder %v10161_v43, 0.0 }
 0x4c1   :  { %v3604_v8 = vadd.f32 %v9616_v13, %v2864_v62  ;;  %v4819_v49 = vpack.c.bf16 %v4763_v30, %v4762_v60  ;;  %v4624_v44 = vmul.f32 1.442695, %v4526_v19  ;;  %v6691_v22 = vpop.eup %6690  ;;  %v4630_v13 = vmul.f32 1.442695, %v4529_v59 }
 0x4c2   :  { %v2717_v53 = vpop.permute.xlu0 %2716  ;;  %v4531_v11 = vmin.f32 %v10177_v37, 0.0  ;;  %v5715_v16 = vadd.f32 -1.0, %v6691_v22  ;;  %v4533_v60 = vmin.f32 %v10192_v26, 0.0  ;;  %v10207_v19 = vadd.f32 %v10124_v2, %v4315_v3 }
 0x4c3   :  { %3669 = vst.msk [vmem:[#allocation4 + $0x140] sm:$0xff] %vm168_vm10, %v3604_v8  ;;  %v2866_v51 = vmul.f32 %v2717_v53, %v2482_v6  ;;  %6092 = vmatmul.mubr.msk.bf16.gmra.mrb[28].mxu0 %vm168_vm10, %v4819_v49  ;;  %6696 = vpow2.f32 %v4624_v44  ;;  %vm4467_vm9 = vcmp.gt.f32.partialorder %v10177_v37, 0.0  ;;  %vm4469_vm5 = vcmp.gt.f32.partialorder %v10192_v26, 0.0 }
 0x4c4   :  { %6698 = vpow2.f32 %v4630_v13  ;;  %v4634_v4 = vmul.f32 1.442695, %v4531_v11  ;;  %v4781_v35 = vsel %vm4461_vm12, %v10130_v58, %v5715_v16  ;;  %v3805_v16 = vld [vmem:[#allocation4 + $0x168] sm:$0xff]  ;;  %vm4471_vm15 = vcmp.gt.f32.partialorder %v10207_v19, 0.0 }
 0x4c5   :  { %v3606_v9 = vadd.f32 %v9614_v45, %v2866_v51 }
 0x4c6   :  { %v4135_v17 = vpop.permute.xlu0 %4134 }
 0x4c7   :  { %3671 = vst.msk [vmem:[#allocation4 + $0x150] sm:$0xff] %vm168_vm10, %v3606_v9  ;;  %v4308_v54 = vmul.f32 %v4135_v17, %v3796_v24 }
 0x4c9   :  { %v6693_v41 = vpop.eup %6692  ;;  %v10183_v31 = vadd.f32 %v10124_v2, %v4308_v54 }
 0x4ca   :  { %v6695_v29 = vpop.eup %6694  ;;  %v5714_v61 = vadd.f32 -1.0, %v6693_v41  ;;  %v4145_v42 = vpop.permute.xlu0 %4144  ;;  %v3800_v51 = vld [vmem:[#allocation4 + $0x140] sm:$0xff] }
 0x4cb   :  { %v4528_v45 = vmin.f32 %v10183_v31, 0.0  ;;  %v4310_v63 = vmul.f32 %v4145_v42, %v3798_v14  ;;  %v5717_v7 = vadd.f32 -1.0, %v6695_v29  ;;  %v4317_v29 = vmul.f32 %v9994_v46, %v3805_v16 }
 0x4cc   :  { %v4780_v12 = vsel %vm4460_vm13, %v10147_v34, %v5714_v61  ;;  %vm4464_vm11 = vcmp.gt.f32.partialorder %v10183_v31, 0.0 }
 0x4cd   :  { %v4628_v40 = vmul.f32 1.442695, %v4528_v45  ;;  %v4828_v55 = vpack.c.bf16 %v4781_v35, %v4780_v12  ;;  %v6697_v23 = vpop.eup %6696  ;;  %v10196_v30 = vadd.f32 %v10124_v2, %v4310_v63  ;;  %v4783_v62 = vsel %vm4463_vm14, %v10135_v38, %v5717_v7  ;;  %v11438_v38 = vld [vmem:[#allocation42_spill] sm:$0xff] }
 0x4ce   :  { %v2727_v21 = vpop.permute.xlu0 %2726  ;;  %v5716_v27 = vadd.f32 -1.0, %v6697_v23  ;;  %v6699_v53 = vpop.eup %6698  ;;  %v3802_v41 = vld [vmem:[#allocation4 + $0x150] sm:$0xff] }
 0x4cf   :  { %6700 = vpow2.f32 %v4628_v40  ;;  %v2868_v34 = vmul.f32 %v2727_v21, %v2484_v47  ;;  %6097 = vmatprep.mubr.msk.bf16.mxu0 %vm168_vm10, %v4828_v55  ;;  %v4530_v58 = vmin.f32 %v10196_v30, 0.0  ;;  %v5719_v24 = vadd.f32 -1.0, %v6699_v53  ;;  %v2488_v47 = vld [vmem:[#allocation4 + $0x180] sm:$0xff]  ;;  %v2490_v23 = vld [vmem:[#allocation4 + $0x190] sm:$0xff]  ;;  %v3809_v21 = vld [vmem:[#allocation4 + $0x188] sm:$0xff] }
 0x4d0   :  { %6702 = vpow2.f32 %v4634_v4  ;;  %v4782_v5 = vsel %vm4462_vm4, %v10161_v43, %v5716_v27  ;;  %v4535_v43 = vmin.f32 %v10207_v19, 0.0  ;;  %v3807_v4 = vld [vmem:[#allocation4 + $0x178] sm:$0xff]  ;;  %v10229_v40 = vadd.f32 %v10124_v2, %v4317_v29 }
 0x4d1   :  { %v3608_v25 = vadd.f32 %v9639_v50, %v2868_v34  ;;  %v4829_v6 = vpack.c.bf16 %v4783_v62, %v4782_v5  ;;  %v4632_v8 = vmul.f32 1.442695, %v4530_v58  ;;  %v4638_v50 = vmul.f32 1.442695, %v4533_v60 }
 0x4d2   :  { %v2737_v49 = vpop.permute.xlu0 %2736  ;;  %v4642_v11 = vmul.f32 1.442695, %v4535_v43  ;;  %v4785_v42 = vsel %vm4465_vm1, %v10164_v32, %v5719_v24  ;;  %v4319_v46 = vmul.f32 %v10009_v0, %v3807_v4  ;;  %vm4466_vm3 = vcmp.gt.f32.partialorder %v10196_v30, 0.0 }
 0x4d3   :  { %3673 = vst.msk [vmem:[#allocation4 + $0x160] sm:$0xff] %vm168_vm10, %v3608_v25  ;;  %v2870_v44 = vmul.f32 %v2737_v49, %v2486_v33  ;;  %6704 = vpow2.f32 %v4632_v8  ;;  %6098 = vmatmul.mubr.msk.bf16.vlgmr.msra.gmra.mrb[16].mxu0 %vm168_vm10, %v4829_v6  ;;  %v4321_v58 = vmul.f32 %v10020_v39, %v3809_v21  ;;  %v11439_v33 = vld [vmem:[#allocation44_spill] sm:$0xff]  ;;  %v4537_v60 = vmin.f32 %v10229_v40, 0.0  ;;  %v10246_v6 = vld [vmem:[%s10577_s4 + $0x3] ss:$0 sm:$0xff] }
 0x4d4   :  { %6114 = vmatpush3.bf16.msra.mxu0 %v10056_v56  ;;  %6706 = vpow2.f32 %v4638_v50  ;;  %v10238_v34 = vadd.f32 %v10124_v2, %v4319_v46  ;;  %v3811_v8 = vld [vmem:[#allocation4 + $0x198] sm:$0xff]  ;;  %v11440_v39 = vld [vmem:[#allocation37_spill] sm:$0xff]  ;;  %vm4473_vm6 = vcmp.gt.f32.partialorder %v10229_v40, 0.0 }
 0x4d5   :  { %v3610_v59 = vadd.f32 %v11438_v38, %v2870_v44  ;;  %6708 = vpow2.f32 %v4642_v11  ;;  %v10253_v53 = vadd.f32 %v10246_v6, %v4321_v58  ;;  %v4323_v38 = vmul.f32 %v10027_v52, %v3811_v8 }
 0x4d6   :  { %v4155_v22 = vpop.permute.xlu0 %4154  ;;  %v4539_v44 = vmin.f32 %v10238_v34, 0.0  ;;  %v4646_v43 = vmul.f32 1.442695, %v4537_v60  ;;  %vm4475_vm2 = vcmp.gt.f32.partialorder %v10238_v34, 0.0 }
 0x4d7   :  { %3675 = vst.msk [vmem:[#allocation4 + $0x170] sm:$0xff] %vm168_vm10, %v3610_v59  ;;  %v4312_v9 = vmul.f32 %v4155_v22, %v3800_v51  ;;  %v4541_v11 = vmin.f32 %v10253_v53, 0.0  ;;  %v10263_v16 = vadd.f32 %v10246_v6, %v4323_v38  ;;  %vm4477_vm12 = vcmp.gt.f32.partialorder %v10253_v53, 0.0 }
 0x4d9   :  { %v6701_v17 = vpop.eup %6700  ;;  %v10216_v13 = vadd.f32 %v10124_v2, %v4312_v9  ;;  %vm4479_vm4 = vcmp.gt.f32.partialorder %v10263_v16, 0.0 }
 0x4da   :  { %v6703_v54 = vpop.eup %6702  ;;  %v5718_v56 = vadd.f32 -1.0, %v6701_v17  ;;  %v4165_v36 = vpop.permute.xlu0 %4164  ;;  %v3804_v59 = vld [vmem:[#allocation4 + $0x160] sm:$0xff] }
 0x4db   :  { %v4532_v28 = vmin.f32 %v10216_v13, 0.0  ;;  %v4314_v61 = vmul.f32 %v4165_v36, %v3802_v41  ;;  %v5721_v14 = vadd.f32 -1.0, %v6703_v54  ;;  %v4650_v54 = vmul.f32 1.442695, %v4539_v44  ;;  %v2494_v44 = vld [vmem:[#allocation4 + $0x1b0] sm:$0xff] }
 0x4dc   :  { %v4784_v45 = vsel %vm4464_vm11, %v10183_v31, %v5718_v56  ;;  %vm4468_vm0 = vcmp.gt.f32.partialorder %v10216_v13, 0.0 }
 0x4dd   :  { %v4636_v12 = vmul.f32 1.442695, %v4532_v28  ;;  %v10225_v63 = vadd.f32 %v10124_v2, %v4314_v61  ;;  %v4830_v35 = vpack.c.bf16 %v4785_v42, %v4784_v45  ;;  %v6705_v7 = vpop.eup %6704  ;;  %v4787_v3 = vsel %vm4467_vm9, %v10177_v37, %v5721_v14 }
 0x4de   :  { %v2747_v20 = vpop.permute.xlu0 %2746  ;;  %v5720_v55 = vadd.f32 -1.0, %v6705_v7  ;;  %v3806_v56 = vld [vmem:[#allocation4 + $0x170] sm:$0xff] }
 0x4df   :  { %6710 = vpow2.f32 %v4636_v12  ;;  %v4534_v32 = vmin.f32 %v10225_v63, 0.0  ;;  %6101 = vmatprep.mubr.msk.bf16.mxu0 %vm168_vm10, %v4830_v35  ;;  %v2872_v31 = vmul.f32 %v2747_v20, %v2488_v47  ;;  %v4654_v47 = vmul.f32 1.442695, %v4541_v11 }
 0x4e0   :  { %v4786_v0 = vsel %vm4466_vm3, %v10196_v30, %v5720_v55  ;;  %v6707_v30 = vpop.eup %6706  ;;  %v4543_v35 = vmin.f32 %v10263_v16, 0.0  ;;  %vm4470_vm8 = vcmp.gt.f32.partialorder %v10225_v63, 0.0 }
 0x4e1   :  { %v4640_v27 = vmul.f32 1.442695, %v4534_v32  ;;  %v3612_v62 = vadd.f32 %v11439_v33, %v2872_v31  ;;  %v4831_v25 = vpack.c.bf16 %v4787_v3, %v4786_v0  ;;  %v6709_v22 = vpop.eup %6708  ;;  %v5723_v9 = vadd.f32 -1.0, %v6707_v30 }
 0x4e2   :  { %v2757_v5 = vpop.permute.xlu0 %2756  ;;  %v5725_v61 = vadd.f32 -1.0, %v6709_v22  ;;  %v4658_v3 = vmul.f32 1.442695, %v4543_v35 }
 0x4e3   :  { %6712 = vpow2.f32 %v4640_v27  ;;  %v2874_v37 = vmul.f32 %v2757_v5, %v2490_v23  ;;  %3677 = vst.msk [vmem:[#allocation4 + $0x180] sm:$0xff] %vm168_vm10, %v3612_v62  ;;  %6102 = vmatmul.mubr.msk.bf16.gmra.mrb[20].mxu0 %vm168_vm10, %v4831_v25  ;;  %v4789_v28 = vsel %vm4469_vm5, %v10192_v26, %v5723_v9  ;;  %v3813_v27 = vld [vmem:[#allocation4 + $0x1a8] sm:$0xff]  ;;  %v2492_v62 = vld [vmem:[#allocation4 + $0x1a0] sm:$0xff] }
 0x4e4   :  { %6714 = vpow2.f32 %v4646_v43  ;;  %v4791_v55 = vsel %vm4471_vm15, %v10207_v19, %v5725_v61  ;;  %v4325_v25 = vmul.f32 %v10069_v1, %v3813_v27 }
 0x4e5   :  { %v3614_v49 = vadd.f32 %v11440_v39, %v2874_v37  ;;  %6716 = vpow2.f32 %v4650_v54  ;;  %v3815_v37 = vld [vmem:[#allocation4 + $0x1b8] sm:$0xff] }
 0x4e6   :  { %v4175_v50 = vpop.permute.xlu0 %4174  ;;  %v4327_v22 = vmul.f32 %v10088_v57, %v3815_v37 }
 0x4e7   :  { %3679 = vst.msk [vmem:[#allocation4 + $0x190] sm:$0xff] %vm168_vm10, %v3614_v49  ;;  %v4316_v51 = vmul.f32 %v4175_v50, %v3804_v59  ;;  %v11441_v50 = vld [vmem:[#allocation46_spill] sm:$0xff] }
 0x4e8   :  { %v10302_v61 = vadd.f32 %v10246_v6, %v4327_v22  ;;  %v11444_v22 = vld [vmem:[#allocation41_spill] sm:$0xff] }
 0x4e9   :  { %v6711_v24 = vpop.eup %6710  ;;  %v10259_v17 = vadd.f32 %v10124_v2, %v4316_v51  ;;  %v10291_v51 = vadd.f32 %v10246_v6, %v4325_v25 }
 0x4ea   :  { %v5722_v52 = vadd.f32 -1.0, %v6711_v24  ;;  %v4185_v41 = vpop.permute.xlu0 %4184  ;;  %v3808_v46 = vld [vmem:[#allocation4 + $0x180] sm:$0xff]  ;;  %vm4483_vm3 = vcmp.gt.f32.partialorder %v10302_v61, 0.0 }
 0x4eb   :  { %v4536_v36 = vmin.f32 %v10259_v17, 0.0  ;;  %v4318_v29 = vmul.f32 %v4185_v41, %v3806_v56  ;;  %vm4472_vm7 = vcmp.gt.f32.partialorder %v10259_v17, 0.0  ;;  %vm4481_vm11 = vcmp.gt.f32.partialorder %v10291_v51, 0.0 }
 0x4ec   :  { %v4788_v42 = vsel %vm4468_vm0, %v10216_v13, %v5722_v52 }
 0x4ed   :  { %v6713_v45 = vpop.eup %6712  ;;  %v4644_v14 = vmul.f32 1.442695, %v4536_v36  ;;  %v10271_v4 = vadd.f32 %v10124_v2, %v4318_v29  ;;  %v4832_v12 = vpack.c.bf16 %v4789_v28, %v4788_v42  ;;  %v11442_v36 = vld [vmem:[#allocation39_spill] sm:$0xff]  ;;  %v4545_v28 = vmin.f32 %v10291_v51, 0.0 }
 0x4ee   :  { %v5724_v7 = vadd.f32 -1.0, %v6713_v45  ;;  %v4195_v20 = vpop.permute.xlu0 %4194  ;;  %v3810_v21 = vld [vmem:[#allocation4 + $0x190] sm:$0xff]  ;;  %v6715_v19 = vpop.eup %6714 }
 0x4ef   :  { %6718 = vpow2.f32 %v4644_v14  ;;  %v4538_v26 = vmin.f32 %v10271_v4, 0.0  ;;  %v4320_v13 = vmul.f32 %v4195_v20, %v3808_v46  ;;  %6105 = vmatprep.mubr.msk.bf16.mxu0 %vm168_vm10, %v4832_v12  ;;  %v6717_v39 = vpop.eup %6716  ;;  %v5727_v49 = vadd.f32 -1.0, %v6715_v19 }
 0x4f0   :  { %v4790_v2 = vsel %vm4470_vm8, %v10225_v63, %v5724_v7  ;;  %6720 = vpow2.f32 %v4654_v47  ;;  %v5729_v52 = vadd.f32 -1.0, %v6717_v39  ;;  %vm4474_vm13 = vcmp.gt.f32.partialorder %v10271_v4, 0.0 }
 0x4f1   :  { %v4648_v32 = vmul.f32 1.442695, %v4538_v26  ;;  %v10280_v31 = vadd.f32 %v10246_v6, %v4320_v13  ;;  %v4833_v23 = vpack.c.bf16 %v4791_v55, %v4790_v2  ;;  %v4793_v11 = vsel %vm4473_vm6, %v10229_v40, %v5727_v49  ;;  %v3817_v55 = vld [vmem:[#allocation4 + $0x1c8] sm:$0xff]  ;;  %v11443_v49 = vld [vmem:[#allocation48_spill] sm:$0xff] }
 0x4f2   :  { %v4205_v0 = vpop.permute.xlu0 %4204  ;;  %v4662_v7 = vmul.f32 1.442695, %v4545_v28  ;;  %v4547_v46 = vmin.f32 %v10302_v61, 0.0 }
 0x4f3   :  { %6722 = vpow2.f32 %v4648_v32  ;;  %v4540_v58 = vmin.f32 %v10280_v31, 0.0  ;;  %v4322_v33 = vmul.f32 %v4205_v0, %v3810_v21  ;;  %6106 = vmatmul.mubr.msk.bf16.gmra.mrb[24].mxu0 %vm168_vm10, %v4833_v23  ;;  %vm4476_vm14 = vcmp.gt.f32.partialorder %v10280_v31, 0.0  ;;  %v2496_v23 = vld [vmem:[#allocation4 + $0x1c0] sm:$0xff] }
 0x4f4   :  { %6724 = vpow2.f32 %v4658_v3  ;;  %v4666_v27 = vmul.f32 1.442695, %v4547_v46 }
 0x4f5   :  { %v4652_v5 = vmul.f32 1.442695, %v4540_v58  ;;  %v10285_v63 = vadd.f32 %v10246_v6, %v4322_v33  ;;  %v4329_v58 = vmul.f32 %v10111_v15, %v3817_v55 }
 0x4f6   :  { %v2767_v60 = vpop.permute.xlu0 %2766 }
 0x4f7   :  { %6726 = vpow2.f32 %v4652_v5  ;;  %v4542_v30 = vmin.f32 %v10285_v63, 0.0  ;;  %v2876_v8 = vmul.f32 %v2767_v60, %v2492_v62  ;;  %v3819_v5 = vld [vmem:[#allocation4 + $0x1d8] sm:$0xff]  ;;  %vm4478_vm1 = vcmp.gt.f32.partialorder %v10285_v63, 0.0 }
 0x4f9   :  { %v6719_v38 = vpop.eup %6718  ;;  %v4656_v59 = vmul.f32 1.442695, %v4542_v30  ;;  %v3616_v43 = vadd.f32 %v11441_v50, %v2876_v8  ;;  %v2498_v30 = vld [vmem:[#allocation4 + $0x1d0] sm:$0xff] }
 0x4fa   :  { %v5726_v9 = vadd.f32 -1.0, %v6719_v38  ;;  %v2777_v1 = vpop.permute.xlu0 %2776  ;;  %v6721_v54 = vpop.eup %6720  ;;  %v10331_v38 = vadd.f32 %v10246_v6, %v4329_v58 }
 0x4fb   :  { %6728 = vpow2.f32 %v4656_v59  ;;  %3681 = vst.msk [vmem:[#allocation4 + $0x1a0] sm:$0xff] %vm168_vm10, %v3616_v43  ;;  %v2878_v24 = vmul.f32 %v2777_v1, %v2494_v44  ;;  %v5731_v14 = vadd.f32 -1.0, %v6721_v54  ;;  %v4331_v59 = vmul.f32 %v10127_v18, %v3819_v5 }
 0x4fc   :  { %v4792_v56 = vsel %vm4472_vm7, %v10259_v17, %v5726_v9  ;;  %v4795_v17 = vsel %vm4475_vm2, %v10238_v34, %v5729_v52  ;;  %6730 = vpow2.f32 %v4662_v7  ;;  %v4549_v1 = vmin.f32 %v10331_v38, 0.0 }
 0x4fd   :  { %v6723_v41 = vpop.eup %6722  ;;  %v3618_v29 = vadd.f32 %v11442_v36, %v2878_v24  ;;  %v4834_v57 = vpack.c.bf16 %v4793_v11, %v4792_v56  ;;  %v4797_v34 = vsel %vm4477_vm12, %v10253_v53, %v5731_v14  ;;  %6732 = vpow2.f32 %v4666_v27  ;;  %v3821_v36 = vld [vmem:[#allocation4 + $0x1e8] sm:$0xff] }
 0x4fe   :  { %v5728_v42 = vadd.f32 -1.0, %v6723_v41  ;;  %v4215_v45 = vpop.permute.xlu0 %4214  ;;  %v6725_v40 = vpop.eup %6724  ;;  %v10340_v24 = vadd.f32 %v10246_v6, %v4331_v59  ;;  %v4670_v11 = vmul.f32 1.442695, %v4549_v1  ;;  %vm4485_vm0 = vcmp.gt.f32.partialorder %v10331_v38, 0.0 }
 0x4ff   :  { %3683 = vst.msk [vmem:[#allocation4 + $0x1b0] sm:$0xff] %vm168_vm10, %v3618_v29  ;;  %6109 = vmatprep.mubr.msk.bf16.mxu0 %vm168_vm10, %v4834_v57  ;;  %v5733_v32 = vadd.f32 -1.0, %v6725_v40  ;;  %v4260_v29 = vpop.permute.xlu1 %4259 }
 0x500   :  { %v4794_v12 = vsel %vm4474_vm13, %v10271_v4, %v5728_v42  ;;  %v4551_v52 = vmin.f32 %v10340_v24, 0.0  ;;  %vm4487_vm8 = vcmp.gt.f32.partialorder %v10340_v24, 0.0 }
 0x501   :  { %v6727_v47 = vpop.eup %6726  ;;  %v4835_v35 = vpack.c.bf16 %v4795_v17, %v4794_v12  ;;  %v4799_v60 = vsel %vm4479_vm4, %v10263_v16, %v5733_v32  ;;  %v4333_v12 = vmul.f32 %v4260_v29, %v3821_v36  ;;  %v2502_v32 = vld [vmem:[#allocation4 + $0x1f0] sm:$0xff]  ;;  %vm5459_vm4 = vcmask 125952  }
 0x502   :  { %v5730_v20 = vadd.f32 -1.0, %v6727_v47  ;;  %v3812_v26 = vld [vmem:[#allocation4 + $0x1a0] sm:$0xff]  ;;  %v4225_v13 = vpop.permute.xlu0 %4224  ;;  %v4674_v14 = vmul.f32 1.442695, %v4551_v52 }
 0x503   :  { %v4324_v2 = vmul.f32 %v4215_v45, %v3812_v26  ;;  %6110 = vmatmul.mubr.msk.bf16.gmra.mrb[28].mxu0 %vm168_vm10, %v4835_v35  ;;  %v2500_v45 = vld [vmem:[#allocation4 + $0x1e0] sm:$0xff]  ;;  %v4270_v46 = vpop.permute.xlu1 %4269 }
 0x504   :  { %v4796_v4 = vsel %vm4476_vm14, %v10280_v31, %v5730_v20  ;;  %vm6758_vm14 = vmmov 0  }
 0x505   :  { %v6729_v3 = vpop.eup %6728  ;;  %v10318_v21 = vadd.f32 %v10246_v6, %v4324_v2  ;;  %v4836_v0 = vpack.c.bf16 %v4797_v34, %v4796_v4 }
 0x506   :  { %v5732_v33 = vadd.f32 -1.0, %v6729_v3  ;;  %v3814_v62 = vld [vmem:[#allocation4 + $0x1b0] sm:$0xff]  ;;  %v2787_v19 = vpop.permute.xlu0 %2786  ;;  %v6731_v18 = vpop.eup %6730 }
 0x507   :  { %v4544_v53 = vmin.f32 %v10318_v21, 0.0  ;;  %v4326_v31 = vmul.f32 %v4225_v13, %v3814_v62  ;;  %v2880_v25 = vmul.f32 %v2787_v19, %v2496_v23  ;;  %6115 = vmatprep.mubr.msk.bf16.mxu0 %vm168_vm10, %v4836_v0  ;;  %v6733_v28 = vpop.eup %6732  ;;  %v5735_v42 = vadd.f32 -1.0, %v6731_v18  ;;  %v3823_v23 = vld [vmem:[#allocation4 + $0x1f8] sm:$0xff] }
 0x508   :  { %v4798_v37 = vsel %vm4478_vm1, %v10285_v63, %v5732_v33  ;;  %vm4480_vm9 = vcmp.gt.f32.partialorder %v10318_v21, 0.0  ;;  %v5737_v2 = vadd.f32 -1.0, %v6733_v28  ;;  %v10356_v33 = vadd.f32 %v10246_v6, %v4333_v12 }
 0x509   :  { %v4837_v8 = vpack.c.bf16 %v4799_v60, %v4798_v37  ;;  %v4660_v39 = vmul.f32 1.442695, %v4544_v53  ;;  %v10327_v15 = vadd.f32 %v10246_v6, %v4326_v31  ;;  %v3620_v44 = vadd.f32 %v11443_v49, %v2880_v25 }
 0x50a   :  { %v2797_v50 = vpop.permute.xlu0 %2796  ;;  %v4801_v55 = vsel %vm4481_vm11, %v10291_v51, %v5735_v42  ;;  %v4335_v62 = vmul.f32 %v4270_v46, %v3823_v23  ;;  %vm4489_vm7 = vcmp.gt.f32.partialorder %v10356_v33, 0.0  ;;  %vm11446_vm1 = vcmask 7168  }
 0x50b   :  { %6734 = vpow2.f32 %v4660_v39  ;;  %v4546_v16 = vmin.f32 %v10327_v15, 0.0  ;;  %3685 = vst.msk [vmem:[#allocation4 + $0x1c0] sm:$0xff] %vm168_vm10, %v3620_v44  ;;  %v2882_v63 = vmul.f32 %v2797_v50, %v2498_v30  ;;  %6116 = vmatmul.mubr.msk.bf16.vlgmr.msra.gmra.mrb[16].mxu0 %vm168_vm10, %v4837_v8  ;;  %vm4482_vm5 = vcmp.gt.f32.partialorder %v10327_v15, 0.0  ;;  %vm11447_vm11 = vmmov %vm11446_vm1 }
 0x50c   :  { %v4427_v37 = vadd.f32 %v10246_v6, %v4335_v62  ;;  %v4553_v30 = vmin.f32 %v10356_v33, 0.0 }
 0x50d   :  { %v4664_v43 = vmul.f32 1.442695, %v4546_v16  ;;  %v3622_v9 = vadd.f32 %v11444_v22, %v2882_v63 }
 0x50e   :  { %v4235_v54 = vpop.permute.xlu0 %4234  ;;  %v4555_v49 = vmin.f32 %v4427_v37, 0.0  ;;  %vm4491_vm13 = vcmp.gt.f32.partialorder %v4427_v37, 0.0 }
 0x50f   :  { %6736 = vpow2.f32 %v4664_v43  ;;  %3687 = vst.msk [vmem:[#allocation4 + $0x1d0] sm:$0xff] %vm168_vm10, %v3622_v9 }
 0x510   :  { %6738 = vpow2.f32 %v4670_v11  ;;  %v4682_v63 = vmul.f32 1.442695, %v4555_v49 }
 0x511   :  { %6740 = vpow2.f32 %v4674_v14 }
 0x512   :  { %v3816_v56 = vld [vmem:[#allocation4 + $0x1c0] sm:$0xff]  ;;  %v4245_v41 = vpop.permute.xlu0 %4244 }
 0x513   :  { %v4328_v57 = vmul.f32 %v4235_v54, %v3816_v56 }
 0x515   :  { %v6735_v40 = vpop.eup %6734  ;;  %v10346_v17 = vadd.f32 %v10246_v6, %v4328_v57 }
 0x516   :  { %v5734_v47 = vadd.f32 -1.0, %v6735_v40  ;;  %v3818_v35 = vld [vmem:[#allocation4 + $0x1d0] sm:$0xff]  ;;  %v2807_v7 = vpop.permute.xlu0 %2806 }
 0x517   :  { %v4548_v20 = vmin.f32 %v10346_v17, 0.0  ;;  %v4330_v26 = vmul.f32 %v4245_v41, %v3818_v35  ;;  %v2884_v13 = vmul.f32 %v2807_v7, %v2500_v45  ;;  %vm4484_vm15 = vcmp.gt.f32.partialorder %v10346_v17, 0.0 }
 0x518   :  { %v4800_v34 = vsel %vm4480_vm9, %v10318_v21, %v5734_v47  ;;  %vm11448_vm9 = vmmov %vm11446_vm1 }
 0x519   :  { %v6737_v4 = vpop.eup %6736  ;;  %v4668_v3 = vmul.f32 1.442695, %v4548_v20  ;;  %v4422_v0 = vadd.f32 %v10246_v6, %v4330_v26  ;;  %v3624_v27 = vadd.f32 %v9969_v48, %v2884_v13  ;;  %v4838_v58 = vpack.c.bf16 %v4801_v55, %v4800_v34 }
 0x51a   :  { %v5736_v51 = vadd.f32 -1.0, %v6737_v4  ;;  %v2817_v19 = vpop.permute.xlu0 %2816  ;;  %v4803_v48 = vsel %vm4483_vm3, %v10302_v61, %v5737_v2  ;;  %v6739_v8 = vpop.eup %6738  ;;  %v4678_v61 = vmul.f32 1.442695, %v4553_v30  ;;  %v11445_v34 = vmov 0.0   ;;  %vm11450_vm3 = vmmov %vm11446_vm1 }
 0x51b   :  { %6742 = vpow2.f32 %v4668_v3  ;;  %v4550_v21 = vmin.f32 %v4422_v0, 0.0  ;;  %3689 = vst.msk [vmem:[#allocation4 + $0x1e0] sm:$0xff] %vm168_vm10, %v3624_v27  ;;  %v2886_v5 = vmul.f32 %v2817_v19, %v2502_v32  ;;  %6119 = vmatprep.mubr.msk.bf16.mxu0 %vm168_vm10, %v4838_v58  ;;  %v5739_v50 = vadd.f32 -1.0, %v6739_v8  ;;  %6147 = vmatprep.mubr.msk.bf16.mxu1 %vm6758_vm14, %v11445_v34  ;;  %v10388_v32 = vld [vmem:[%s10578_s6] ss:$0 sm:$0xff] }
 0x51c   :  { %v4802_v53 = vsel %vm4482_vm5, %v10327_v15, %v5736_v51  ;;  %v6741_v15 = vpop.eup %6740  ;;  %vm4486_vm6 = vcmp.gt.f32.partialorder %v4422_v0, 0.0  ;;  %vm11451_vm5 = vmmov %vm11446_vm1 }
 0x51d   :  { %v4672_v31 = vmul.f32 1.442695, %v4550_v21  ;;  %v3626_v25 = vadd.f32 %v9967_v10, %v2886_v5  ;;  %v4839_v60 = vpack.c.bf16 %v4803_v48, %v4802_v53  ;;  %v4805_v18 = vsel %vm4485_vm0, %v10331_v38, %v5739_v50  ;;  %vm11452_vm0 = vmmov %vm11446_vm1 }
 0x51e   :  { %v4255_v39 = vpop.permute.xlu0 %4254  ;;  %v5741_v11 = vadd.f32 -1.0, %v6741_v15  ;;  %vm11460_vm14 = vmmov %vm11452_vm0 }
 0x51f   :  { %6744 = vpow2.f32 %v4672_v31  ;;  %3691 = vst.msk [vmem:[#allocation4 + $0x1f0] sm:$0xff] %vm168_vm10, %v3626_v25  ;;  %6120 = vmatmul.mubr.msk.bf16.gmra.mrb[20].mxu0 %vm168_vm10, %v4839_v60 }
 0x520   :  { %6746 = vpow2.f32 %v4678_v61  ;;  %v4807_v42 = vsel %vm4487_vm8, %v10340_v24, %v5741_v11  ;;  %vm11454_vm8 = vmmov %vm11452_vm0 }
 0x521   :  { %6748 = vpow2.f32 %v4682_v63 }
 0x522   :  { %v3820_v44 = vld [vmem:[#allocation4 + $0x1e0] sm:$0xff]  ;;  %v4265_v9 = vpop.permute.xlu0 %4264 }
 0x523   :  { %v4332_v59 = vmul.f32 %v4255_v39, %v3820_v44 }
 0x525   :  { %v6743_v16 = vpop.eup %6742  ;;  %v4424_v10 = vadd.f32 %v10246_v6, %v4332_v59 }
 0x526   :  { %v5738_v43 = vadd.f32 -1.0, %v6743_v16  ;;  %v3822_v22 = vld [vmem:[#allocation4 + $0x1f0] sm:$0xff] }
 0x527   :  { %v4552_v1 = vmin.f32 %v4424_v10, 0.0  ;;  %v4334_v54 = vmul.f32 %v4265_v9, %v3822_v22  ;;  %vm4488_vm2 = vcmp.gt.f32.partialorder %v4424_v10, 0.0 }
 0x528   :  { %v4804_v52 = vsel %vm4484_vm15, %v10346_v17, %v5738_v43  ;;  %vm11453_vm15 = vmmov %vm11452_vm0 }
 0x529   :  { %v6745_v56 = vpop.eup %6744  ;;  %v4676_v41 = vmul.f32 1.442695, %v4552_v1  ;;  %v4426_v36 = vadd.f32 %v10246_v6, %v4334_v54  ;;  %v4840_v29 = vpack.c.bf16 %v4805_v18, %v4804_v52 }
 0x52a   :  { %v5740_v57 = vadd.f32 -1.0, %v6745_v56  ;;  %v6747_v17 = vpop.eup %6746 }
 0x52b   :  { %6750 = vpow2.f32 %v4676_v41  ;;  %v4554_v28 = vmin.f32 %v4426_v36, 0.0  ;;  %6123 = vmatprep.mubr.msk.bf16.mxu0 %vm168_vm10, %v4840_v29  ;;  %v6749_v6 = vpop.eup %6748  ;;  %v5743_v14 = vadd.f32 -1.0, %v6747_v17  ;;  %vm4490_vm12 = vcmp.gt.f32.partialorder %v4426_v36, 0.0 }
 0x52c   :  { %v4806_v38 = vsel %vm4486_vm6, %v4422_v0, %v5740_v57  ;;  %v5745_v7 = vadd.f32 -1.0, %v6749_v6  ;;  %vm11455_vm6 = vmmov %vm11452_vm0 }
 0x52d   :  { %v4680_v45 = vmul.f32 1.442695, %v4554_v28  ;;  %v4841_v40 = vpack.c.bf16 %v4807_v42, %v4806_v38  ;;  %v4809_v35 = vsel %vm4489_vm7, %v10356_v33, %v5743_v14  ;;  %vm11456_vm7 = vmmov %vm11452_vm0 }
 0x52e   :  { %v4811_v13 = vsel %vm4491_vm13, %v4427_v37, %v5745_v7  ;;  %vm11458_vm13 = vmmov %vm11452_vm0 }
 0x52f   :  { %6752 = vpow2.f32 %v4680_v45  ;;  %6124 = vmatmul.mubr.msk.bf16.gmra.mrb[24].mxu0 %vm168_vm10, %v4841_v40 }
 0x535   :  { %v6751_v12 = vpop.eup %6750 }
 0x536   :  { %v5742_v47 = vadd.f32 -1.0, %v6751_v12 }
 0x538   :  { %v4808_v46 = vsel %vm4488_vm2, %v4424_v10, %v5742_v47  ;;  %vm11457_vm2 = vmmov %vm11452_vm0 }
 0x539   :  { %v6753_v20 = vpop.eup %6752  ;;  %v4842_v24 = vpack.c.bf16 %v4809_v35, %v4808_v46 }
 0x53a   :  { %v5744_v26 = vadd.f32 -1.0, %v6753_v20 }
 0x53b   :  { %6127 = vmatprep.mubr.msk.bf16.mxu0 %vm168_vm10, %v4842_v24 }
 0x53c   :  { %v4810_v55 = vsel %vm4490_vm12, %v4426_v36, %v5744_v26  ;;  %vm11459_vm12 = vmmov %vm11452_vm0 }
 0x53d   :  { %v4843_v2 = vpack.c.bf16 %v4811_v13, %v4810_v55 }
 0x53f   :  { %6128 = vmatmul.mubr.msk.bf16.gmra.mrb[28].mxu0 %vm168_vm10, %v4843_v2 }
 0x5de   :  { %v6117_v4 = vpop.f32.mrb[16].mxu0 }
 0x5df   :  { %v5808_v23 = vpack.c.bf16 %v6117_v4, %v6117_v4  ;;  %v5316_v3 = vpop.f32.mrb[17].mxu0  ;;  %v5485_v33 = vmul.f32 %v6117_v4, %v10388_v32 }
 0x5e0   :  { %v5806_v0 = vpack.c.bf16 %v5316_v3, %v5316_v3  ;;  %v5483_v27 = vmul.f32 %v10388_v32, %v5316_v3  ;;  %v6118_v58 = vpop.f32.mrb[18].mxu0 }
 0x5e1   :  { %5462 = vst.msk [vmem:[%s10579_s8 + $0x8] sm:$0xf] %vm5459_vm4, %v5808_v23  ;;  %v5396_v62 = vpack.c.bf16 %v6118_v58, %v6117_v4  ;;  %v5809_v51 = vpack.c.bf16 %v6118_v58, %v6118_v58  ;;  %v5319_v19 = vpop.f32.mrb[19].mxu0  ;;  %v5486_v60 = vmul.f32 %v6118_v58, %v10388_v32  ;;  %v5505_v37 = vsel %vm168_vm10, %v5485_v33, 0.0 }
 0x5e2   :  { %5460 = vst.msk [vmem:[%s10579_s8] sm:$0xf] %vm5459_vm4, %v5806_v0  ;;  %v5395_v21 = vpack.c.bf16 %v5319_v19, %v5316_v3  ;;  %v5807_v5 = vpack.c.bf16 %v5319_v19, %v5319_v19  ;;  %v5484_v48 = vmul.f32 %v10388_v32, %v5319_v19  ;;  %v5499_v53 = vsel %vm168_vm10, %v5483_v27, 0.0 }
 0x5e3   :  { %5463 = vst.msk [vmem:[%s10579_s8 + $0xc] sm:$0xf] %vm5459_vm4, %v5809_v51  ;;  %5500 = vadd.xlane.f32.xlu0 %v5499_v53  ;;  %v5508_v30 = vsel %vm168_vm10, %v5486_v60, 0.0  ;;  %v5572_v8 = vsel %vm168_vm10, %v5396_v62, 0 }
 0x5e4   :  { %5461 = vst.msk [vmem:[%s10579_s8 + $0x4] sm:$0xf] %vm5459_vm4, %v5807_v5  ;;  %v5502_v31 = vsel %vm168_vm10, %v5484_v48, 0.0  ;;  %v5569_v25 = vsel %vm168_vm10, %v5395_v21, 0 }
 0x5e5   :  { %5503 = vadd.xlane.f32.xlu1 %v5502_v31  ;;  %6132 = vmatpush3.bf16.xpose.msra.mxu1 %v5569_v25 }
 0x5e6   :  { %6133 = vmatprep.subr.bf16.mxu1 %v11445_v34 }
 0x5e7   :  { %5506 = vadd.xlane.f32.xlu0 %v5505_v37  ;;  %v5563_v37 = vld [vmem:[%s10580_s7] sm:$0x1] }
 0x5eb   :  { %5509 = vadd.xlane.f32.xlu0 %v5508_v30  ;;  %v5564_v30 = vpack.c.bf16 %v5563_v37, %v5563_v37 }
 0x5ed   :  { %6134 = vmatpush3.bf16.xpose.msra.mxu1 %v5572_v8 }
 0x5ee   :  { %6135 = vmatprep.subr.bf16.mxu1 %v11445_v34 }
 0x5f2   :  { %v6121_v39 = vpop.f32.mrb[20].mxu0 }
 0x5f3   :  { %v5812_v49 = vpack.c.bf16 %v6121_v39, %v6121_v39  ;;  %v5332_v44 = vpop.f32.mrb[21].mxu0  ;;  %v5489_v50 = vmul.f32 %v6121_v39, %v10388_v32 }
 0x5f4   :  { %v5810_v61 = vpack.c.bf16 %v5332_v44, %v5332_v44  ;;  %v5487_v59 = vmul.f32 %v10388_v32, %v5332_v44  ;;  %v6122_v15 = vpop.f32.mrb[22].mxu0 }
 0x5f5   :  { %5466 = vst.msk [vmem:[%s10579_s8 + $0x18] sm:$0xf] %vm5459_vm4, %v5812_v49  ;;  %v5398_v16 = vpack.c.bf16 %v6122_v15, %v6121_v39  ;;  %v5813_v10 = vpack.c.bf16 %v6122_v15, %v6122_v15  ;;  %v5335_v63 = vpop.f32.mrb[23].mxu0  ;;  %v5490_v54 = vmul.f32 %v6122_v15, %v10388_v32  ;;  %v5517_v52 = vsel %vm168_vm10, %v5489_v50, 0.0 }
 0x5f6   :  { %5464 = vst.msk [vmem:[%s10579_s8 + $0x10] sm:$0xf] %vm5459_vm4, %v5810_v61  ;;  %v5397_v43 = vpack.c.bf16 %v5335_v63, %v5332_v44  ;;  %v5811_v22 = vpack.c.bf16 %v5335_v63, %v5335_v63  ;;  %v5488_v9 = vmul.f32 %v10388_v32, %v5335_v63  ;;  %v5511_v1 = vsel %vm168_vm10, %v5487_v59, 0.0 }
 0x5f7   :  { %5467 = vst.msk [vmem:[%s10579_s8 + $0x1c] sm:$0xf] %vm5459_vm4, %v5813_v10  ;;  %5512 = vadd.xlane.f32.xlu1 %v5511_v1  ;;  %v5520_v56 = vsel %vm168_vm10, %v5490_v54, 0.0  ;;  %v5578_v41 = vsel %vm168_vm10, %v5398_v16, 0 }
 0x5f8   :  { %5465 = vst.msk [vmem:[%s10579_s8 + $0x14] sm:$0xf] %vm5459_vm4, %v5811_v22  ;;  %v5514_v18 = vsel %vm168_vm10, %v5488_v9, 0.0  ;;  %v5575_v11 = vsel %vm168_vm10, %v5397_v43, 0 }
 0x5f9   :  { %5515 = vadd.xlane.f32.xlu0 %v5514_v18  ;;  %6136 = vmatpush3.bf16.xpose.msra.mxu1 %v5575_v11 }
 0x5fa   :  { %6137 = vmatprep.subr.bf16.mxu1 %v11445_v34 }
 0x5fb   :  { %5518 = vadd.xlane.f32.xlu1 %v5517_v52 }
 0x5fd   :  { %5521 = vadd.xlane.f32.xlu0 %v5520_v56 }
 0x601   :  { %6138 = vmatpush3.bf16.xpose.msra.mxu1 %v5578_v41 }
 0x602   :  { %v6125_v36 = vpop.f32.mrb[24].mxu0  ;;  %6139 = vmatprep.subr.bf16.mxu1 %v11445_v34 }
 0x603   :  { %v5816_v29 = vpack.c.bf16 %v6125_v36, %v6125_v36  ;;  %v5348_v57 = vpop.f32.mrb[25].mxu0  ;;  %v5493_v45 = vmul.f32 %v6125_v36, %v10388_v32 }
 0x604   :  { %v5814_v28 = vpack.c.bf16 %v5348_v57, %v5348_v57  ;;  %v5491_v42 = vmul.f32 %v10388_v32, %v5348_v57  ;;  %v6126_v38 = vpop.f32.mrb[26].mxu0 }
 0x605   :  { %5470 = vst.msk [vmem:[%s10579_s8 + $0x28] sm:$0xf] %vm5459_vm4, %v5816_v29  ;;  %v5400_v40 = vpack.c.bf16 %v6126_v38, %v6125_v36  ;;  %v5817_v17 = vpack.c.bf16 %v6126_v38, %v6126_v38  ;;  %v5351_v6 = vpop.f32.mrb[27].mxu0  ;;  %v5494_v7 = vmul.f32 %v6126_v38, %v10388_v32  ;;  %v5529_v24 = vsel %vm168_vm10, %v5493_v45, 0.0 }
 0x606   :  { %5468 = vst.msk [vmem:[%s10579_s8 + $0x20] sm:$0xf] %vm5459_vm4, %v5814_v28  ;;  %v5399_v14 = vpack.c.bf16 %v5351_v6, %v5348_v57  ;;  %v5815_v12 = vpack.c.bf16 %v5351_v6, %v5351_v6  ;;  %v5492_v47 = vmul.f32 %v10388_v32, %v5351_v6  ;;  %v5523_v35 = vsel %vm168_vm10, %v5491_v42, 0.0 }
 0x607   :  { %5471 = vst.msk [vmem:[%s10579_s8 + $0x2c] sm:$0xf] %vm5459_vm4, %v5817_v17  ;;  %5524 = vadd.xlane.f32.xlu1 %v5523_v35  ;;  %v5532_v26 = vsel %vm168_vm10, %v5494_v7, 0.0  ;;  %v5584_v13 = vsel %vm168_vm10, %v5400_v40, 0 }
 0x608   :  { %5469 = vst.msk [vmem:[%s10579_s8 + $0x24] sm:$0xf] %vm5459_vm4, %v5815_v12  ;;  %v5526_v46 = vsel %vm168_vm10, %v5492_v47, 0.0  ;;  %v5581_v20 = vsel %vm168_vm10, %v5399_v14, 0 }
 0x609   :  { %5527 = vadd.xlane.f32.xlu0 %v5526_v46  ;;  %6140 = vmatpush3.bf16.xpose.msra.mxu1 %v5581_v20 }
 0x60a   :  { %6141 = vmatprep.subr.bf16.mxu1 %v11445_v34 }
 0x60b   :  { %5530 = vadd.xlane.f32.xlu1 %v5529_v24 }
 0x60d   :  { %5533 = vadd.xlane.f32.xlu0 %v5532_v26 }
 0x611   :  { %6142 = vmatpush3.bf16.xpose.msra.mxu1 %v5584_v13 }
 0x612   :  { %v6129_v55 = vpop.f32.mrb[28].mxu0  ;;  %6143 = vmatprep.subr.bf16.mxu1 %v11445_v34 }
 0x613   :  { %v5820_v2 = vpack.c.bf16 %v6129_v55, %v6129_v55  ;;  %v5364_v4 = vpop.f32.mrb[29].mxu0  ;;  %v5497_v27 = vmul.f32 %v6129_v55, %v10388_v32 }
 0x614   :  { %v5818_v23 = vpack.c.bf16 %v5364_v4, %v5364_v4  ;;  %v5495_v3 = vmul.f32 %v10388_v32, %v5364_v4  ;;  %v6130_v0 = vpop.f32.mrb[30].mxu0 }
 0x615   :  { %5474 = vst.msk [vmem:[%s10579_s8 + $0x38] sm:$0xf] %vm5459_vm4, %v5820_v2  ;;  %v5402_v58 = vpack.c.bf16 %v6130_v0, %v6129_v55  ;;  %v5821_v33 = vpack.c.bf16 %v6130_v0, %v6130_v0  ;;  %v5367_v62 = vpop.f32.mrb[31].mxu0  ;;  %v5498_v48 = vmul.f32 %v6130_v0, %v10388_v32  ;;  %v5541_v25 = vsel %vm168_vm10, %v5497_v27, 0.0 }
 0x616   :  { %5472 = vst.msk [vmem:[%s10579_s8 + $0x30] sm:$0xf] %vm5459_vm4, %v5818_v23  ;;  %v5401_v51 = vpack.c.bf16 %v5367_v62, %v5364_v4  ;;  %v5819_v19 = vpack.c.bf16 %v5367_v62, %v5367_v62  ;;  %v5496_v21 = vmul.f32 %v10388_v32, %v5367_v62  ;;  %v5535_v5 = vsel %vm168_vm10, %v5495_v3, 0.0 }
 0x617   :  { %5475 = vst.msk [vmem:[%s10579_s8 + $0x3c] sm:$0xf] %vm5459_vm4, %v5821_v33  ;;  %5536 = vadd.xlane.f32.xlu1 %v5535_v5  ;;  %v5544_v60 = vsel %vm168_vm10, %v5498_v48, 0.0  ;;  %v5590_v32 = vsel %vm168_vm10, %v5402_v58, 0 }
 0x618   :  { %5473 = vst.msk [vmem:[%s10579_s8 + $0x34] sm:$0xf] %vm5459_vm4, %v5819_v19  ;;  %v5538_v53 = vsel %vm168_vm10, %v5496_v21, 0.0  ;;  %v5587_v31 = vsel %vm168_vm10, %v5401_v51, 0  ;;  %vm11461_vm4 = vmmov %vm11452_vm0 }
 0x619   :  { %5539 = vadd.xlane.f32.xlu0 %v5538_v53  ;;  %6144 = vmatpush3.bf16.xpose.msra.mxu1 %v5587_v31 }
 0x61a   :  { %6145 = vmatprep.subr.bf16.mxu1 %v11445_v34 }
 0x61b   :  { %5542 = vadd.xlane.f32.xlu1 %v5541_v25 }
 0x61d   :  { %5545 = vadd.xlane.f32.xlu0 %v5544_v60 }
 0x621   :  { %6146 = vmatpush3.bf16.xpose.msra.mxu1 %v5590_v32 }
 0x628   :  { %6148 = vmatmul.mubr.msk.bf16.vlgmr.msra.gmra.mrb[48].mxu1 %vm168_vm10, %v5564_v30  ;;  %vm11449_vm10 = vmmov %vm11446_vm1 }
 0x670   :  { %v5501_v8 = vpop.xlane.xlu0 %5500 }
 0x671   :  { %5547 = vst.msk [vmem:[%s10581_s9] sm:$0xff] %vm11446_vm1, %v5501_v8 }
 0x672   :  { %v5504_v34 = vpop.xlane.xlu1 %5503 }
 0x673   :  { %5548 = vst.msk [vmem:[%s10581_s9 + $0x8] sm:$0xff] %vm11447_vm11, %v5504_v34 }
 0x674   :  { %v5507_v39 = vpop.xlane.xlu0 %5506 }
 0x675   :  { %5549 = vst.msk [vmem:[%s10581_s9 + $0x10] sm:$0xff] %vm11448_vm9, %v5507_v39 }
 0x678   :  { %v5510_v49 = vpop.xlane.xlu0 %5509 }
 0x679   :  { %5550 = vst.msk [vmem:[%s10581_s9 + $0x18] sm:$0xff] %vm11449_vm10, %v5510_v49 }
 0x684   :  { %v5513_v44 = vpop.xlane.xlu1 %5512 }
 0x685   :  { %5551 = vst.msk [vmem:[%s10581_s9 + $0x20] sm:$0xff] %vm11450_vm3, %v5513_v44 }
 0x686   :  { %v5516_v61 = vpop.xlane.xlu0 %5515 }
 0x687   :  { %5552 = vst.msk [vmem:[%s10581_s9 + $0x28] sm:$0xff] %vm11451_vm5, %v5516_v61 }
 0x688   :  { %v5519_v59 = vpop.xlane.xlu1 %5518 }
 0x689   :  { %5553 = vst.msk [vmem:[%s10581_s9 + $0x30] sm:$0xff] %vm11452_vm0, %v5519_v59 }
 0x68a   :  { %v5522_v15 = vpop.xlane.xlu0 %5521 }
 0x68b   :  { %5554 = vst.msk [vmem:[%s10581_s9 + $0x38] sm:$0xff] %vm11453_vm15, %v5522_v15 }
 0x694   :  { %v5525_v50 = vpop.xlane.xlu1 %5524 }
 0x695   :  { %5555 = vst.msk [vmem:[%s10581_s9 + $0x40] sm:$0xff] %vm11454_vm8, %v5525_v50 }
 0x696   :  { %v5528_v16 = vpop.xlane.xlu0 %5527 }
 0x697   :  { %5556 = vst.msk [vmem:[%s10581_s9 + $0x48] sm:$0xff] %vm11455_vm6, %v5528_v16 }
 0x698   :  { %v5531_v10 = vpop.xlane.xlu1 %5530 }
 0x699   :  { %5557 = vst.msk [vmem:[%s10581_s9 + $0x50] sm:$0xff] %vm11456_vm7, %v5531_v10 }
 0x69a   :  { %v5534_v63 = vpop.xlane.xlu0 %5533 }
 0x69b   :  { %5558 = vst.msk [vmem:[%s10581_s9 + $0x58] sm:$0xff] %vm11457_vm2, %v5534_v63 }
 0x6a4   :  { %v5537_v43 = vpop.xlane.xlu1 %5536 }
 0x6a5   :  { %5559 = vst.msk [vmem:[%s10581_s9 + $0x60] sm:$0xff] %vm11458_vm13, %v5537_v43 }
 0x6a6   :  { %v5540_v22 = vpop.xlane.xlu0 %5539 }
 0x6a7   :  { %5560 = vst.msk [vmem:[%s10581_s9 + $0x68] sm:$0xff] %vm11459_vm12, %v5540_v22 }
 0x6a8   :  { %v5543_v9 = vpop.xlane.xlu1 %5542 }
 0x6a9   :  { %5561 = vst.msk [vmem:[%s10581_s9 + $0x70] sm:$0xff] %vm11460_vm14, %v5543_v9 }
 0x6aa   :  { %v5546_v1 = vpop.xlane.xlu0 %5545 }
 0x6ab   :  { %5562 = vst.msk [vmem:[%s10581_s9 + $0x78] sm:$0xff] %vm11461_vm4, %v5546_v1 }
 0x6fb   :  { %v5626_v54 = vpop.f32.mrb[48].mxu1 }
 0x6fc   :  { %5632 = vst [vmem:[%s10582_s10] sm:$0x1] %v5626_v54  ;;  %v6149_v18 = vpop.f32.mrb[49].mxu1 }
 0x6fd   :  { %v5629_v11 = vpop.f32.mrb[50].mxu1 }
 0x6fe   :  { %v6150_v52 = vpop.f32.mrb[51].mxu1 }

</bundles_post_ra>
